<compile_context>
chip_gen: v5e
topology: v5e:2x2
jax: 0.10.0
libtpu: 0.0.40
codegen_flags: <defaults>
</compile_context>

<pallas_src>
import jax
import jax.numpy as jnp
from jax.experimental import pallas as pl
from jax.experimental.pallas import tpu as pltpu

N_BANDS = 128                    # exp.n_bands  (8 * 128 = 1024 conv input channels)
WINDOW = 512                     # exp.kernel_size
HOP = 256
EMBED_IN = WINDOW // 2 + 1       # 257 rfft bins
EMBED_OUT = 8
HIDDEN_IN = EMBED_OUT * N_BANDS  # 1024
K_FOLDED = N_BANDS * EMBED_IN    # 32896 contraction length of the folded layer
SAMPLERATE = 22050.0


# ----------------------------------------------------------------------------
# Pallas kernel: one M-tile of the folded (Linear + 1x1 Conv1d) layer.
#   x_ref : (tile_m, K)  bf16   (K = n_bands * 257, full contraction in-block)
#   w_ref : (K, C)       bf16   (grid-invariant; fetched once)
#   b_ref : (1, C)       f32
#   o_ref : (tile_m, C)  f32
# ----------------------------------------------------------------------------
def _folded_matmul_bias_kernel(x_ref, w_ref, b_ref, o_ref):
    acc = jnp.dot(x_ref[...], w_ref[...], preferred_element_type=jnp.float32)
    o_ref[...] = (acc + b_ref[...]).astype(o_ref.dtype)


def folded_matmul_bias(x, w, b):
    """y = x @ w + b  with x:(M,K) bf16, w:(K,C) bf16, b:(1,C) f32 -> (M,C) f32.

    Tiled only over M; the full K lives in one block so every grid step is a
    single large contiguous DMA.  No host-side padding: a ragged last M block
    relies on Pallas masked stores.
    """
    M, K = x.shape
    K2, C = w.shape
    assert K == K2 and b.shape == (1, C)

    tile_m = min(128, M)              # full-M block for small M (always legal),
    grid_m = pl.cdiv(M, tile_m)       # ragged last block masked otherwise.

    return pl.pallas_call(
        _folded_matmul_bias_kernel,
        out_shape=jax.ShapeDtypeStruct((M, C), jnp.float32),
        grid_spec=pltpu.PrefetchScalarGridSpec(
            num_scalar_prefetch=0,
            grid=(grid_m,),
            in_specs=[
                pl.BlockSpec((tile_m, K), lambda i: (i, 0)),   # streamed activations
                pl.BlockSpec((K, C), lambda i: (0, 0)),        # folded weight (invariant)
                pl.BlockSpec((1, C), lambda i: (0, 0)),        # folded bias row
            ],
            out_specs=pl.BlockSpec((tile_m, C), lambda i: (i, 0)),
        ),
        compiler_params=pltpu.CompilerParams(
            dimension_semantics=("parallel",),                 # shard M across TCs (v7x)
            vmem_limit_bytes=32 * 1024 * 1024,                 # covers v5e's 16 MiB default,
        ),                                                     # <= v7x 64 MiB physical
    )(x, w, b)


# ----------------------------------------------------------------------------
# Stand-in for exp.perceptual_feature (zounds Morlet filterbank + per-band STFT)
# ----------------------------------------------------------------------------
def make_filterbank(n_bands, ksize, sr):
    n = jnp.arange(ksize, dtype=jnp.float32) - ksize / 2.0
    freqs = jnp.geomspace(20.0, 0.9 * sr / 2.0, n_bands).astype(jnp.float32) / sr
    sigma = 3.0 / freqs
    env = jnp.exp(-0.5 * (n[None, :] / sigma[:, None]) ** 2)
    car = jnp.cos(2.0 * jnp.pi * freqs[:, None] * n[None, :])
    filt = env * car
    filt = filt / jnp.linalg.norm(filt, axis=-1, keepdims=True)
    return filt.astype(jnp.float32)


def perceptual_feature(audio, fb):
    # TODO(synk): exact zounds AIM/PIF (Morlet filterbank + scattering-style
    # per-band spectrogram) is external to the module; this is a deterministic
    # Gabor-filterbank + windowed rFFT-magnitude stand-in with matching shapes.
    # The filterbank conv, framing, window and rFFT stay in XLA (no clean Pallas
    # FFT); this is the dominant HBM traffic at real sizes.
    B, _, N = audio.shape
    banded = jax.lax.conv_general_dilated(
        audio, fb[:, None, :], window_strides=(1,), padding="SAME",
        dimension_numbers=("NCH", "OIH", "NCH"))               # (B, n_bands, N)
    T = 1 + (N - WINDOW) // HOP
    if N % HOP == 0 and WINDOW == 2 * HOP:
        # 50% overlap: frame t = concat(segment t, segment t+1); avoids the gather.
        segs = banded.reshape(B, N_BANDS, N // HOP, HOP)
        framed = jnp.concatenate([segs[:, :, :T, :], segs[:, :, 1:T + 1, :]], axis=-1)
    else:
        idx = jnp.arange(T)[:, None] * HOP + jnp.arange(WINDOW)[None, :]
        framed = banded[:, :, idx]                             # (B, n_bands, T, WINDOW)
    win = 0.5 - 0.5 * jnp.cos(2.0 * jnp.pi * jnp.arange(WINDOW) / WINDOW)
    spec = jnp.abs(jnp.fft.rfft(framed * win, axis=-1)) / WINDOW
    return spec.astype(jnp.float32)                            # (B, n_bands, T, 257)


# ----------------------------------------------------------------------------
# Module parameters + forward
# ----------------------------------------------------------------------------
def init_params(key, channels, weight_init=0.1):
    k1, k2, k3, k4 = jax.random.split(key, 4)
    return {
        "we": weight_init * jax.random.normal(k1, (EMBED_OUT, EMBED_IN), jnp.float32),
        "be": weight_init * jax.random.normal(k2, (EMBED_OUT,), jnp.float32),
        "wh": weight_init * jax.random.normal(k3, (channels, HIDDEN_IN), jnp.float32),
        "bh": weight_init * jax.random.normal(k4, (channels,), jnp.float32),
        "fb": make_filterbank(N_BANDS, WINDOW, SAMPLERATE),
    }


def fold_weights(params):
    """Fold Linear(257->8) followed by 1x1 Conv1d(1024->C) into one (n,f) contraction.

    Respects the (band*8 + e) column ordering the PyTorch permute/reshape produces.
    """
    wh_r = params["wh"].reshape(-1, N_BANDS, EMBED_OUT)                  # (C, 128, 8)
    wc = jnp.einsum("one,ef->onf", wh_r, params["we"])                   # (C, 128, 257)
    w2d = jnp.transpose(wc, (1, 2, 0)).reshape(K_FOLDED, -1)             # (K, C), K=(n,f)
    bias = params["bh"] + jnp.einsum("one,e->o", wh_r, params["be"])     # (C,)
    return w2d, bias


def audio_analysis_forward(audio, params):
    B = audio.shape[0]
    feat = perceptual_feature(audio, params["fb"])                       # (B, 128, T, 257)
    T = feat.shape[2]

    w2d, bias = fold_weights(params)                                     # tiny, in XLA

    # Rows = (b, t), cols = (band, freq) to match the folded weight ordering.
    # bf16 streaming halves HBM traffic; accumulation/bias/output stay f32.
    x2d = jnp.transpose(feat, (0, 2, 1, 3)).reshape(B * T, K_FOLDED)
    y = folded_matmul_bias(
        x2d.astype(jnp.bfloat16),
        w2d.astype(jnp.bfloat16),
        bias.reshape(1, -1).astype(jnp.float32))                         # (B*T, C) f32

    # Tiny (B*T*C) transpose to the Conv1d NCW output layout.
    return jnp.transpose(y.reshape(B, T, -1), (0, 2, 1))                 # (B, C, T)


def reference_forward(audio, params):
    # Pure-JAX, unfused, f32 reference mirroring the PyTorch forward.
    B = audio.shape[0]
    feat = perceptual_feature(audio, params["fb"])
    emb = jnp.einsum("bntf,ef->bnte", feat, params["we"]) + params["be"]
    x = jnp.transpose(emb, (0, 1, 3, 2)).reshape(B, HIDDEN_IN, -1)       # c = n*8 + e
    out = jnp.einsum("oc,bct->bot", params["wh"], x) + params["bh"][None, :, None]
    return out


if __name__ == "__main__":
    key = jax.random.PRNGKey(0)
    B, N_SAMPLES, CHANNELS = 2, 2048, 32        # small stand-in for n_samples=2**15
    k_audio, k_params = jax.random.split(key)
    audio = jax.random.normal(k_audio, (B, 1, N_SAMPLES), jnp.float32)
    params = init_params(k_params, CHANNELS)

    fwd = jax.jit(audio_analysis_forward)
    out = jax.block_until_ready(fwd(audio, params))

    T = 1 + (N_SAMPLES - WINDOW) // HOP
    assert out.shape == (B, CHANNELS, T), out.shape

    ref = reference_forward(audio, params)
    # Tolerances account for the intentional bf16 streaming of activations/weights.
    max_err = float(jnp.max(jnp.abs(out - ref)))
    assert jnp.allclose(out, ref, rtol=3e-2, atol=5e-3), max_err

    print("KERNEL_OK")
</pallas_src>

<mosaic_0001>
module attributes {stable_mosaic.version = 11 : i64} {
  func.func @_folded_matmul_bias_kernel(%arg0: i32, %arg1: memref<14x32896xbf16, #tpu.memory_space<vmem>>, %arg2: memref<32896x32xbf16, #tpu.memory_space<vmem>>, %arg3: memref<1x32xf32, #tpu.memory_space<vmem>>, %arg4: memref<14x32xf32, #tpu.memory_space<vmem>>) attributes {dimension_semantics = [#tpu.dimension_semantics<parallel>], iteration_bounds = array<i64: 1>, scalar_prefetch = 0 : i64, scratch_operands = 0 : i64, tpu.core_type = #tpu.core_type<tc>, window_params = [{transform_indices = @transform_0, window_bounds = array<i64: 14, 32896>}, {pipeline_mode = #tpu.pipeline_mode<synchronous>, transform_indices = @transform_1, window_bounds = array<i64: 32896, 32>}, {pipeline_mode = #tpu.pipeline_mode<synchronous>, transform_indices = @transform_2, window_bounds = array<i64: 1, 32>}, {transform_indices = @transform_3, window_bounds = array<i64: 14, 32>}]} {
    %c0 = arith.constant 0 : index
    %c0_0 = arith.constant 0 : index
    %0 = vector.load %arg1[%c0, %c0_0] : memref<14x32896xbf16, #tpu.memory_space<vmem>>, vector<14x32896xbf16>
    %c0_1 = arith.constant 0 : index
    %c0_2 = arith.constant 0 : index
    %1 = vector.load %arg2[%c0_1, %c0_2] : memref<32896x32xbf16, #tpu.memory_space<vmem>>, vector<32896x32xbf16>
    %cst = arith.constant dense<0.000000e+00> : vector<14x32xf32>
    %2 = tpu.matmul %0, %1, %cst {dimension_numbers = #tpu.dot_dimension_numbers<[1], [0], [0], [1], [0, 0, 1, 1], [], []>} : vector<14x32896xbf16>, vector<32896x32xbf16>, vector<14x32xf32> -> vector<14x32xf32>
    %c0_3 = arith.constant 0 : index
    %c0_4 = arith.constant 0 : index
    %3 = vector.load %arg3[%c0_3, %c0_4] : memref<1x32xf32, #tpu.memory_space<vmem>>, vector<1x32xf32>
    %4 = vector.broadcast %3 : vector<1x32xf32> to vector<14x32xf32>
    %5 = arith.addf %2, %4 : vector<14x32xf32>
    %c0_5 = arith.constant 0 : index
    %c0_6 = arith.constant 0 : index
    %6 = vector.load %arg4[%c0_5, %c0_6] : memref<14x32xf32, #tpu.memory_space<vmem>>, vector<14x32xf32>
    tpu.vector_store %arg4[%c0_5, %c0_6], %5 {strides = array<i32>} : memref<14x32xf32, #tpu.memory_space<vmem>>, vector<14x32xf32>,
    return
  }
  func.func @transform_0(%arg0: i32) -> (i32, i32) {
    %c0_i32 = arith.constant 0 : i32
    %c0_i32_0 = arith.constant 0 : i32
    return %arg0, %c0_i32 : i32, i32
  }
  func.func @transform_1(%arg0: i32) -> (i32, i32) {
    %c0_i32 = arith.constant 0 : i32
    %c0_i32_0 = arith.constant 0 : i32
    %c0_i32_1 = arith.constant 0 : i32
    return %c0_i32, %c0_i32_0 : i32, i32
  }
  func.func @transform_2(%arg0: i32) -> (i32, i32) {
    %c0_i32 = arith.constant 0 : i32
    %c0_i32_0 = arith.constant 0 : i32
    %c0_i32_1 = arith.constant 0 : i32
    return %c0_i32, %c0_i32_0 : i32, i32
  }
  func.func @transform_3(%arg0: i32) -> (i32, i32) {
    %c0_i32 = arith.constant 0 : i32
    %c0_i32_0 = arith.constant 0 : i32
    return %arg0, %c0_i32 : i32, i32
  }
}

</mosaic_0001>

<bundles_post_ra>
// kernel: audio_analysis_forward.1
= control target key start
LH: loop header
LB: loop body
LE: loop exit
PB: predicated region body
PF: predicated region fallthrough
CT: control target
= control target key end

     0   :  { %vm21608_vm0 = vcmask 261120   ;;  %vm21610_vm1 = vcmask 259072   ;;  %s41723_s1 = inlined_call_operand.vmem [shape: bf16[32896,32], index: 1, kind: input, shape index: {}]   ;;  %s41724_s0 = inlined_call_operand.vmem [shape: bf16[14,32896], index: 0, kind: input, shape index: {}]   ;;  %s41725_s2 = inlined_call_operand.vmem [shape: f32[1,32], index: 2, kind: input, shape index: {}]   ;;  %s41726_s3 = inlined_call_operand.vmem [shape: f32[14,32], index: 3, kind: output, shape index: {}]  }
   0x1   :  { %v31132_v0 = vld [vmem:[%s41723_s1 + $0x38] sm:$0xff]  ;;  %v31131_v4 = vld [vmem:[%s41723_s1 + $0x30] sm:$0xff]  ;;  %v31130_v8 = vld [vmem:[%s41723_s1 + $0x28] sm:$0xff] }
   0x2   :  { %v31148_v1 = vld [vmem:[%s41723_s1 + $0xb8] sm:$0xff]  ;;  %18010 = vmatpush.bf16.msra.mxu0 %v31132_v0  ;;  %v31147_v5 = vld [vmem:[%s41723_s1 + $0xb0] sm:$0xff]  ;;  %v31146_v9 = vld [vmem:[%s41723_s1 + $0xa8] sm:$0xff] }
   0x3   :  { %v31140_v2 = vld [vmem:[%s41723_s1 + $0x78] sm:$0xff]  ;;  %18038 = vmatpush.bf16.msra.mxu2 %v31148_v1  ;;  %v31139_v6 = vld [vmem:[%s41723_s1 + $0x70] sm:$0xff]  ;;  %v31138_v10 = vld [vmem:[%s41723_s1 + $0x68] sm:$0xff] }
   0x4   :  { %v31156_v3 = vld [vmem:[%s41723_s1 + $0xf8] sm:$0xff]  ;;  %18024 = vmatpush.bf16.msra.mxu1 %v31140_v2  ;;  %v31155_v7 = vld [vmem:[%s41723_s1 + $0xf0] sm:$0xff]  ;;  %v31154_v11 = vld [vmem:[%s41723_s1 + $0xe8] sm:$0xff] }
   0x5   :  { %18052 = vmatpush.bf16.msra.mxu3 %v31156_v3  ;;  %v31129_v12 = vld [vmem:[%s41723_s1 + $0x20] sm:$0xff]  ;;  %v31128_v16 = vld [vmem:[%s41723_s1 + $0x18] sm:$0xff]  ;;  %v31127_v20 = vld [vmem:[%s41723_s1 + $0x10] sm:$0xff] }
   0x6   :  { %18011 = vmatpush.bf16.msra.mxu0 %v31131_v4  ;;  %v31145_v13 = vld [vmem:[%s41723_s1 + $0xa0] sm:$0xff]  ;;  %v31144_v17 = vld [vmem:[%s41723_s1 + $0x98] sm:$0xff]  ;;  %v31143_v21 = vld [vmem:[%s41723_s1 + $0x90] sm:$0xff] }
   0x7   :  { %18039 = vmatpush.bf16.msra.mxu2 %v31147_v5  ;;  %v31137_v14 = vld [vmem:[%s41723_s1 + $0x60] sm:$0xff]  ;;  %v31136_v18 = vld [vmem:[%s41723_s1 + $0x58] sm:$0xff]  ;;  %v31135_v22 = vld [vmem:[%s41723_s1 + $0x50] sm:$0xff] }
   0x8   :  { %18025 = vmatpush.bf16.msra.mxu1 %v31139_v6  ;;  %v31153_v15 = vld [vmem:[%s41723_s1 + $0xe0] sm:$0xff]  ;;  %v31152_v19 = vld [vmem:[%s41723_s1 + $0xd8] sm:$0xff]  ;;  %v31151_v23 = vld [vmem:[%s41723_s1 + $0xd0] sm:$0xff] }
   0x9   :  { %18053 = vmatpush.bf16.msra.mxu3 %v31155_v7  ;;  %v31126_v24 = vld [vmem:[%s41723_s1 + $0x8] sm:$0xff]  ;;  %v31125_v28 = vld [vmem:[%s41723_s1] sm:$0xff]  ;;  %v31164_v30 = vld [vmem:[%s41723_s1 + $0x138] sm:$0xff] }
   0xa   :  { %18012 = vmatpush.bf16.msra.mxu0 %v31130_v8  ;;  %v31142_v25 = vld [vmem:[%s41723_s1 + $0x88] sm:$0xff]  ;;  %v31141_v29 = vld [vmem:[%s41723_s1 + $0x80] sm:$0xff]  ;;  %v31180_v31 = vld [vmem:[%s41723_s1 + $0x1b8] sm:$0xff] }
   0xb   :  { %18040 = vmatpush.bf16.msra.mxu2 %v31146_v9  ;;  %v31134_v26 = vld [vmem:[%s41723_s1 + $0x48] sm:$0xff]  ;;  %v31133_v32 = vld [vmem:[%s41723_s1 + $0x40] sm:$0xff]  ;;  %v31172_v38 = vld [vmem:[%s41723_s1 + $0x178] sm:$0xff] }
   0xc   :  { %18026 = vmatpush.bf16.msra.mxu1 %v31138_v10  ;;  %v31150_v27 = vld [vmem:[%s41723_s1 + $0xc8] sm:$0xff]  ;;  %v31149_v33 = vld [vmem:[%s41723_s1 + $0xc0] sm:$0xff]  ;;  %v31188_v39 = vld [vmem:[%s41723_s1 + $0x1f8] sm:$0xff] }
   0xd   :  { %18054 = vmatpush.bf16.msra.mxu3 %v31154_v11  ;;  %v21618_v34 = vld [vmem:[%s41724_s0] sm:$0xf]  ;;  %v30996_v35 = vld [vmem:[%s41724_s0 + $0x400] sm:$0x70]  ;;  %v21626_v36 = vld [vmem:[%s41724_s0 + $0x8] sm:$0xf] }
   0xe   :  { %18013 = vmatpush.bf16.msra.mxu0 %v31129_v12  ;;  %v30997_v37 = vld [vmem:[%s41724_s0 + $0x408] sm:$0x70]  ;;  %v30868_v40 = vld [vmem:[%s41724_s0 + $0x4] sm:$0xf]  ;;  %v21620_v41 = vld [vmem:[%s41724_s0 + $0x404] sm:$0x70]  ;;  %v21619_v44 = vor.u32 %v30996_v35, %v21618_v34 }
   0xf   :  { %18041 = vmatpush.bf16.msra.mxu2 %v31145_v13  ;;  %v30869_v42 = vld [vmem:[%s41724_s0 + $0xc] sm:$0xf]  ;;  %v21628_v43 = vld [vmem:[%s41724_s0 + $0x40c] sm:$0x70]  ;;  %v21627_v45 = vor.u32 %v30997_v37, %v21626_v36  ;;  %v21623_v48 = vor.u32 %v30868_v40, %v21620_v41  ;;  %v31161_v56 = vld [vmem:[%s41723_s1 + $0x120] sm:$0xff] }
  0x10   :  { %18027 = vmatpush.bf16.msra.mxu1 %v31137_v14  ;;  %v31163_v46 = vld [vmem:[%s41723_s1 + $0x130] sm:$0xff]  ;;  %v21631_v49 = vor.u32 %v30869_v42, %v21628_v43  ;;  %v31162_v52 = vld [vmem:[%s41723_s1 + $0x128] sm:$0xff]  ;;  %v31177_v57 = vld [vmem:[%s41723_s1 + $0x1a0] sm:$0xff] }
  0x11   :  { %18055 = vmatpush.bf16.msra.mxu3 %v31153_v15  ;;  %v31179_v47 = vld [vmem:[%s41723_s1 + $0x1b0] sm:$0xff]  ;;  %v31178_v53 = vld [vmem:[%s41723_s1 + $0x1a8] sm:$0xff]  ;;  %v31169_v58 = vld [vmem:[%s41723_s1 + $0x160] sm:$0xff] }
  0x12   :  { %18014 = vmatpush.bf16.msra.mxu0 %v31128_v16  ;;  %v31171_v50 = vld [vmem:[%s41723_s1 + $0x170] sm:$0xff]  ;;  %v31170_v54 = vld [vmem:[%s41723_s1 + $0x168] sm:$0xff]  ;;  %v31185_v59 = vld [vmem:[%s41723_s1 + $0x1e0] sm:$0xff] }
  0x13   :  { %18042 = vmatpush.bf16.msra.mxu2 %v31144_v17  ;;  %v31187_v51 = vld [vmem:[%s41723_s1 + $0x1f0] sm:$0xff]  ;;  %v31186_v55 = vld [vmem:[%s41723_s1 + $0x1e8] sm:$0xff]  ;;  %v31160_v60 = vld [vmem:[%s41723_s1 + $0x118] sm:$0xff] }
  0x14   :  { %18028 = vmatpush.bf16.msra.mxu1 %v31136_v18  ;;  %v31176_v61 = vld [vmem:[%s41723_s1 + $0x198] sm:$0xff]  ;;  %v31159_v0 = vld [vmem:[%s41723_s1 + $0x110] sm:$0xff]  ;;  %v31158_v4 = vld [vmem:[%s41723_s1 + $0x108] sm:$0xff] }
  0x15   :  { %18056 = vmatpush.bf16.msra.mxu3 %v31152_v19  ;;  %v31168_v62 = vld [vmem:[%s41723_s1 + $0x158] sm:$0xff]  ;;  %v31175_v1 = vld [vmem:[%s41723_s1 + $0x190] sm:$0xff]  ;;  %v31174_v5 = vld [vmem:[%s41723_s1 + $0x188] sm:$0xff] }
  0x16   :  { %18015 = vmatpush.bf16.msra.mxu0 %v31127_v20  ;;  %v31184_v63 = vld [vmem:[%s41723_s1 + $0x1d8] sm:$0xff]  ;;  %v31167_v2 = vld [vmem:[%s41723_s1 + $0x150] sm:$0xff]  ;;  %v31166_v6 = vld [vmem:[%s41723_s1 + $0x148] sm:$0xff] }
  0x17   :  { %18043 = vmatpush.bf16.msra.mxu2 %v31143_v21  ;;  %v31183_v3 = vld [vmem:[%s41723_s1 + $0x1d0] sm:$0xff]  ;;  %v31182_v7 = vld [vmem:[%s41723_s1 + $0x1c8] sm:$0xff]  ;;  %v31157_v8 = vld [vmem:[%s41723_s1 + $0x100] sm:$0xff] }
  0x18   :  { %18029 = vmatpush.bf16.msra.mxu1 %v31135_v22  ;;  %v31173_v9 = vld [vmem:[%s41723_s1 + $0x180] sm:$0xff]  ;;  %v31196_v10 = vld [vmem:[%s41723_s1 + $0x238] sm:$0xff]  ;;  %v21634_v12 = vld [vmem:[%s41724_s0 + $0x10] sm:$0xf] }
  0x19   :  { %18057 = vmatpush.bf16.msra.mxu3 %v31151_v23  ;;  %v31212_v11 = vld [vmem:[%s41723_s1 + $0x2b8] sm:$0xff]  ;;  %v30998_v13 = vld [vmem:[%s41724_s0 + $0x410] sm:$0x70]  ;;  %v31165_v16 = vld [vmem:[%s41723_s1 + $0x140] sm:$0xff] }
  0x1a   :  { %18016 = vmatpush.bf16.msra.mxu0 %v31126_v24  ;;  %v21642_v14 = vld [vmem:[%s41724_s0 + $0x18] sm:$0xf]  ;;  %v30999_v15 = vld [vmem:[%s41724_s0 + $0x418] sm:$0x70]  ;;  %v31181_v17 = vld [vmem:[%s41723_s1 + $0x1c0] sm:$0xff]  ;;  %v21635_v22 = vor.u32 %v30998_v13, %v21634_v12 }
  0x1b   :  { %18044 = vmatpush.bf16.msra.mxu2 %v31142_v25  ;;  %v30870_v18 = vld [vmem:[%s41724_s0 + $0x14] sm:$0xf]  ;;  %v21636_v19 = vld [vmem:[%s41724_s0 + $0x414] sm:$0x70]  ;;  %v30871_v20 = vld [vmem:[%s41724_s0 + $0x1c] sm:$0xf]  ;;  %v21643_v23 = vor.u32 %v30999_v15, %v21642_v14 }
  0x1c   :  { %18030 = vmatpush.bf16.msra.mxu1 %v31134_v26  ;;  %v21644_v21 = vld [vmem:[%s41724_s0 + $0x41c] sm:$0x70]  ;;  %v31204_v24 = vld [vmem:[%s41723_s1 + $0x278] sm:$0xff]  ;;  %v21639_v26 = vor.u32 %v30870_v18, %v21636_v19  ;;  %v31202_v34 = vld [vmem:[%s41723_s1 + $0x268] sm:$0xff] }
  0x1d   :  { %18058 = vmatpush.bf16.msra.mxu3 %v31150_v27  ;;  %v31220_v25 = vld [vmem:[%s41723_s1 + $0x2f8] sm:$0xff]  ;;  %v21647_v27 = vor.u32 %v30871_v20, %v21644_v21  ;;  %v31218_v35 = vld [vmem:[%s41723_s1 + $0x2e8] sm:$0xff]  ;;  %v31193_v36 = vld [vmem:[%s41723_s1 + $0x220] sm:$0xff] }
  0x1e   :  { %18017 = vmatpush.bf16.msra.mxu0 %v31125_v28  ;;  %v31195_v28 = vld [vmem:[%s41723_s1 + $0x230] sm:$0xff]  ;;  %v31209_v37 = vld [vmem:[%s41723_s1 + $0x2a0] sm:$0xff]  ;;  %v31192_v40 = vld [vmem:[%s41723_s1 + $0x218] sm:$0xff] }
  0x1f   :  { %18045 = vmatpush.bf16.msra.mxu2 %v31141_v29  ;;  %v31211_v29 = vld [vmem:[%s41723_s1 + $0x2b0] sm:$0xff]  ;;  %v31208_v41 = vld [vmem:[%s41723_s1 + $0x298] sm:$0xff]  ;;  %v31226_v12 = vld [vmem:[%s41723_s1 + $0x328] sm:$0xff] }
  0x20   :  { %18031 = vmatpush.bf16.msra.mxu1 %v31133_v32  ;;  %v31194_v32 = vld [vmem:[%s41723_s1 + $0x228] sm:$0xff]  ;;  %v31200_v42 = vld [vmem:[%s41723_s1 + $0x258] sm:$0xff]  ;;  %v31233_v18 = vld [vmem:[%s41723_s1 + $0x360] sm:$0xff] }
  0x21   :  { %18059 = vmatpush.bf16.msra.mxu3 %v31149_v33  ;;  %18018 = vmatmul.bf16.vlgmr.msra.gmra.mxu0 %v21619_v44  ;;  %v31210_v33 = vld [vmem:[%s41723_s1 + $0x2a8] sm:$0xff]  ;;  %v31216_v43 = vld [vmem:[%s41723_s1 + $0x2d8] sm:$0xff]  ;;  %v31191_v44 = vld [vmem:[%s41723_s1 + $0x210] sm:$0xff] }
  0x22   :  { %18066 = vmatpush.bf16.msrb.mxu0 %v31164_v30  ;;  %18046 = vmatmul.bf16.vlgmr.msra.gmra.mxu2 %v21627_v45  ;;  %v31203_v30 = vld [vmem:[%s41723_s1 + $0x270] sm:$0xff]  ;;  %v31242_v13 = vld [vmem:[%s41723_s1 + $0x3a8] sm:$0xff]  ;;  %v31249_v19 = vld [vmem:[%s41723_s1 + $0x3e0] sm:$0xff] }
  0x23   :  { %18094 = vmatpush.bf16.msrb.mxu2 %v31180_v31  ;;  %18032 = vmatmul.bf16.vlgmr.msra.gmra.mxu1 %v21623_v48  ;;  %v31219_v31 = vld [vmem:[%s41723_s1 + $0x2f0] sm:$0xff]  ;;  %v31190_v48 = vld [vmem:[%s41723_s1 + $0x208] sm:$0xff]  ;;  %v31224_v20 = vld [vmem:[%s41723_s1 + $0x318] sm:$0xff] }
  0x24   :  { %18080 = vmatpush.bf16.msrb.mxu1 %v31172_v38  ;;  %18060 = vmatmul.bf16.vlgmr.msra.gmra.mxu3 %v21631_v49  ;;  %v31201_v38 = vld [vmem:[%s41723_s1 + $0x260] sm:$0xff]  ;;  %v31207_v45 = vld [vmem:[%s41723_s1 + $0x290] sm:$0xff]  ;;  %v31206_v49 = vld [vmem:[%s41723_s1 + $0x288] sm:$0xff] }
  0x25   :  { %18108 = vmatpush.bf16.msrb.mxu3 %v31188_v39  ;;  %v31217_v39 = vld [vmem:[%s41723_s1 + $0x2e0] sm:$0xff]  ;;  %v31234_v14 = vld [vmem:[%s41723_s1 + $0x368] sm:$0xff]  ;;  %v31240_v21 = vld [vmem:[%s41723_s1 + $0x398] sm:$0xff] }
  0x26   :  { %18067 = vmatpush.bf16.msrb.mxu0 %v31163_v46  ;;  %v31199_v46 = vld [vmem:[%s41723_s1 + $0x250] sm:$0xff]  ;;  %v31250_v15 = vld [vmem:[%s41723_s1 + $0x3e8] sm:$0xff] }
  0x27   :  { %18095 = vmatpush.bf16.msrb.mxu2 %v31179_v47  ;;  %v31215_v47 = vld [vmem:[%s41723_s1 + $0x2d0] sm:$0xff] }
  0x28   :  { %18081 = vmatpush.bf16.msrb.mxu1 %v31171_v50  ;;  %v31198_v50 = vld [vmem:[%s41723_s1 + $0x248] sm:$0xff] }
  0x29   :  { %18109 = vmatpush.bf16.msrb.mxu3 %v31187_v51  ;;  %v31214_v51 = vld [vmem:[%s41723_s1 + $0x2c8] sm:$0xff] }
  0x2a   :  { %18068 = vmatpush.bf16.msrb.mxu0 %v31162_v52  ;;  %v31189_v52 = vld [vmem:[%s41723_s1 + $0x200] sm:$0xff] }
  0x2b   :  { %18096 = vmatpush.bf16.msrb.mxu2 %v31178_v53  ;;  %v31205_v53 = vld [vmem:[%s41723_s1 + $0x280] sm:$0xff] }
  0x2c   :  { %18082 = vmatpush.bf16.msrb.mxu1 %v31170_v54  ;;  %v31228_v54 = vld [vmem:[%s41723_s1 + $0x338] sm:$0xff] }
  0x2d   :  { %18110 = vmatpush.bf16.msrb.mxu3 %v31186_v55  ;;  %v31244_v55 = vld [vmem:[%s41723_s1 + $0x3b8] sm:$0xff] }
  0x2e   :  { %18069 = vmatpush.bf16.msrb.mxu0 %v31161_v56  ;;  %v21650_v56 = vld [vmem:[%s41724_s0 + $0x20] sm:$0xf] }
  0x2f   :  { %18097 = vmatpush.bf16.msrb.mxu2 %v31177_v57  ;;  %v31000_v57 = vld [vmem:[%s41724_s0 + $0x420] sm:$0x70] }
  0x30   :  { %18083 = vmatpush.bf16.msrb.mxu1 %v31169_v58  ;;  %v21658_v58 = vld [vmem:[%s41724_s0 + $0x28] sm:$0xf] }
  0x31   :  { %18111 = vmatpush.bf16.msrb.mxu3 %v31185_v59  ;;  %v31001_v59 = vld [vmem:[%s41724_s0 + $0x428] sm:$0x70] }
  0x32   :  { %18070 = vmatpush.bf16.msrb.mxu0 %v31160_v60  ;;  %v31197_v60 = vld [vmem:[%s41723_s1 + $0x240] sm:$0xff] }
  0x33   :  { %18098 = vmatpush.bf16.msrb.mxu2 %v31176_v61  ;;  %v31213_v61 = vld [vmem:[%s41723_s1 + $0x2c0] sm:$0xff] }
  0x34   :  { %18084 = vmatpush.bf16.msrb.mxu1 %v31168_v62  ;;  %v30872_v62 = vld [vmem:[%s41724_s0 + $0x24] sm:$0xf] }
  0x35   :  { %18112 = vmatpush.bf16.msrb.mxu3 %v31184_v63  ;;  %v21652_v63 = vld [vmem:[%s41724_s0 + $0x424] sm:$0x70] }
  0x36   :  { %18071 = vmatpush.bf16.msrb.mxu0 %v31159_v0  ;;  %v30873_v0 = vld [vmem:[%s41724_s0 + $0x2c] sm:$0xf] }
  0x37   :  { %18099 = vmatpush.bf16.msrb.mxu2 %v31175_v1  ;;  %v21660_v1 = vld [vmem:[%s41724_s0 + $0x42c] sm:$0x70] }
  0x38   :  { %18085 = vmatpush.bf16.msrb.mxu1 %v31167_v2  ;;  %v21651_v2 = vor.u32 %v31000_v57, %v21650_v56  ;;  %v31258_v56 = vld [vmem:[%s41723_s1 + $0x428] sm:$0xff] }
  0x39   :  { %18113 = vmatpush.bf16.msrb.mxu3 %v31183_v3  ;;  %v21659_v3 = vor.u32 %v31001_v59, %v21658_v58  ;;  %v31274_v57 = vld [vmem:[%s41723_s1 + $0x4a8] sm:$0xff] }
  0x3a   :  { %18072 = vmatpush.bf16.msrb.mxu0 %v31158_v4  ;;  %v31236_v4 = vld [vmem:[%s41723_s1 + $0x378] sm:$0xff]  ;;  %v31266_v58 = vld [vmem:[%s41723_s1 + $0x468] sm:$0xff] }
  0x3b   :  { %18100 = vmatpush.bf16.msrb.mxu2 %v31174_v5  ;;  %v31252_v5 = vld [vmem:[%s41723_s1 + $0x3f8] sm:$0xff]  ;;  %v31282_v59 = vld [vmem:[%s41723_s1 + $0x4e8] sm:$0xff] }
  0x3c   :  { %18086 = vmatpush.bf16.msrb.mxu1 %v31166_v6  ;;  %v21655_v6 = vor.u32 %v30872_v62, %v21652_v63  ;;  %v31265_v62 = vld [vmem:[%s41723_s1 + $0x460] sm:$0xff] }
  0x3d   :  { %18114 = vmatpush.bf16.msrb.mxu3 %v31182_v7  ;;  %v21663_v7 = vor.u32 %v30873_v0, %v21660_v1  ;;  %v31281_v63 = vld [vmem:[%s41723_s1 + $0x4e0] sm:$0xff]  ;;  %v31256_v0 = vld [vmem:[%s41723_s1 + $0x418] sm:$0xff] }
  0x3e   :  { %18073 = vmatpush.bf16.msrb.mxu0 %v31157_v8  ;;  %v31227_v8 = vld [vmem:[%s41723_s1 + $0x330] sm:$0xff]  ;;  %v31272_v1 = vld [vmem:[%s41723_s1 + $0x498] sm:$0xff] }
  0x3f   :  { %18101 = vmatpush.bf16.msrb.mxu2 %v31173_v9  ;;  %v31243_v9 = vld [vmem:[%s41723_s1 + $0x3b0] sm:$0xff] }
  0x40   :  { %18087 = vmatpush.bf16.msrb.mxu1 %v31165_v16  ;;  %v31225_v16 = vld [vmem:[%s41723_s1 + $0x320] sm:$0xff] }
  0x41   :  { %18115 = vmatpush.bf16.msrb.mxu3 %v31181_v17  ;;  %18074 = vmatmul.bf16.vlgmr.msrb.gmra.mxu0 %v21635_v22  ;;  %v31241_v17 = vld [vmem:[%s41723_s1 + $0x3a0] sm:$0xff]  ;;  %v31232_v22 = vld [vmem:[%s41723_s1 + $0x358] sm:$0xff] }
  0x42   :  { %18122 = vmatpush.bf16.msra.mxu0 %v31196_v10  ;;  %18102 = vmatmul.bf16.vlgmr.msrb.gmra.mxu2 %v21643_v23  ;;  %v31235_v10 = vld [vmem:[%s41723_s1 + $0x370] sm:$0xff]  ;;  %v31248_v23 = vld [vmem:[%s41723_s1 + $0x3d8] sm:$0xff] }
  0x43   :  { %18150 = vmatpush.bf16.msra.mxu2 %v31212_v11  ;;  %18088 = vmatmul.bf16.vlgmr.msrb.gmra.mxu1 %v21639_v26  ;;  %v31251_v11 = vld [vmem:[%s41723_s1 + $0x3f0] sm:$0xff] }
  0x44   :  { %18136 = vmatpush.bf16.msra.mxu1 %v31204_v24  ;;  %18116 = vmatmul.bf16.vlgmr.msrb.gmra.mxu3 %v21647_v27  ;;  %v31223_v24 = vld [vmem:[%s41723_s1 + $0x310] sm:$0xff] }
  0x45   :  { %18164 = vmatpush.bf16.msra.mxu3 %v31220_v25  ;;  %v31239_v25 = vld [vmem:[%s41723_s1 + $0x390] sm:$0xff] }
  0x46   :  { %18123 = vmatpush.bf16.msra.mxu0 %v31195_v28  ;;  %v31231_v26 = vld [vmem:[%s41723_s1 + $0x350] sm:$0xff]  ;;  %v31222_v28 = vld [vmem:[%s41723_s1 + $0x308] sm:$0xff] }
  0x47   :  { %18151 = vmatpush.bf16.msra.mxu2 %v31211_v29  ;;  %v31247_v27 = vld [vmem:[%s41723_s1 + $0x3d0] sm:$0xff]  ;;  %v31238_v29 = vld [vmem:[%s41723_s1 + $0x388] sm:$0xff] }
  0x48   :  { %18137 = vmatpush.bf16.msra.mxu1 %v31203_v30  ;;  %v31230_v30 = vld [vmem:[%s41723_s1 + $0x348] sm:$0xff] }
  0x49   :  { %18165 = vmatpush.bf16.msra.mxu3 %v31219_v31  ;;  %v31246_v31 = vld [vmem:[%s41723_s1 + $0x3c8] sm:$0xff] }
  0x4a   :  { %18124 = vmatpush.bf16.msra.mxu0 %v31194_v32  ;;  %v31221_v32 = vld [vmem:[%s41723_s1 + $0x300] sm:$0xff] }
  0x4b   :  { %18152 = vmatpush.bf16.msra.mxu2 %v31210_v33  ;;  %v31237_v33 = vld [vmem:[%s41723_s1 + $0x380] sm:$0xff] }
  0x4c   :  { %18138 = vmatpush.bf16.msra.mxu1 %v31202_v34  ;;  %v31260_v34 = vld [vmem:[%s41723_s1 + $0x438] sm:$0xff] }
  0x4d   :  { %18166 = vmatpush.bf16.msra.mxu3 %v31218_v35  ;;  %v31276_v35 = vld [vmem:[%s41723_s1 + $0x4b8] sm:$0xff] }
  0x4e   :  { %18125 = vmatpush.bf16.msra.mxu0 %v31193_v36  ;;  %v21666_v36 = vld [vmem:[%s41724_s0 + $0x30] sm:$0xf] }
  0x4f   :  { %18153 = vmatpush.bf16.msra.mxu2 %v31209_v37  ;;  %v31002_v37 = vld [vmem:[%s41724_s0 + $0x430] sm:$0x70] }
  0x50   :  { %18139 = vmatpush.bf16.msra.mxu1 %v31201_v38  ;;  %v21674_v38 = vld [vmem:[%s41724_s0 + $0x38] sm:$0xf] }
  0x51   :  { %18167 = vmatpush.bf16.msra.mxu3 %v31217_v39  ;;  %v31003_v39 = vld [vmem:[%s41724_s0 + $0x438] sm:$0x70] }
  0x52   :  { %18126 = vmatpush.bf16.msra.mxu0 %v31192_v40  ;;  %v31229_v40 = vld [vmem:[%s41723_s1 + $0x340] sm:$0xff] }
  0x53   :  { %18154 = vmatpush.bf16.msra.mxu2 %v31208_v41  ;;  %v31245_v41 = vld [vmem:[%s41723_s1 + $0x3c0] sm:$0xff] }
  0x54   :  { %18140 = vmatpush.bf16.msra.mxu1 %v31200_v42  ;;  %v30874_v42 = vld [vmem:[%s41724_s0 + $0x34] sm:$0xf] }
  0x55   :  { %18168 = vmatpush.bf16.msra.mxu3 %v31216_v43  ;;  %v21668_v43 = vld [vmem:[%s41724_s0 + $0x434] sm:$0x70] }
  0x56   :  { %18127 = vmatpush.bf16.msra.mxu0 %v31191_v44  ;;  %v30875_v44 = vld [vmem:[%s41724_s0 + $0x3c] sm:$0xf] }
  0x57   :  { %18155 = vmatpush.bf16.msra.mxu2 %v31207_v45  ;;  %v21676_v45 = vld [vmem:[%s41724_s0 + $0x43c] sm:$0x70] }
  0x58   :  { %18141 = vmatpush.bf16.msra.mxu1 %v31199_v46  ;;  %v21667_v46 = vor.u32 %v31002_v37, %v21666_v36  ;;  %v31290_v36 = vld [vmem:[%s41723_s1 + $0x528] sm:$0xff] }
  0x59   :  { %18169 = vmatpush.bf16.msra.mxu3 %v31215_v47  ;;  %v21675_v47 = vor.u32 %v31003_v39, %v21674_v38  ;;  %v31306_v37 = vld [vmem:[%s41723_s1 + $0x5a8] sm:$0xff]  ;;  %v33181_v38 = vld [vmem:[%s41725_s2] ss:$0 sm:$0xff] }
  0x5a   :  { %18128 = vmatpush.bf16.msra.mxu0 %v31190_v48  ;;  %v31268_v48 = vld [vmem:[%s41723_s1 + $0x478] sm:$0xff]  ;;  %v31298_v39 = vld [vmem:[%s41723_s1 + $0x568] sm:$0xff] }
  0x5b   :  { %18156 = vmatpush.bf16.msra.mxu2 %v31206_v49  ;;  %v31284_v49 = vld [vmem:[%s41723_s1 + $0x4f8] sm:$0xff] }
  0x5c   :  { %18142 = vmatpush.bf16.msra.mxu1 %v31198_v50  ;;  %v21671_v50 = vor.u32 %v30874_v42, %v21668_v43  ;;  %v31305_v42 = vld [vmem:[%s41723_s1 + $0x5a0] sm:$0xff] }
  0x5d   :  { %18170 = vmatpush.bf16.msra.mxu3 %v31214_v51  ;;  %v21679_v51 = vor.u32 %v30875_v44, %v21676_v45  ;;  %v31297_v45 = vld [vmem:[%s41723_s1 + $0x560] sm:$0xff] }
  0x5e   :  { %18129 = vmatpush.bf16.msra.mxu0 %v31189_v52  ;;  %v31259_v52 = vld [vmem:[%s41723_s1 + $0x430] sm:$0xff] }
  0x5f   :  { %18157 = vmatpush.bf16.msra.mxu2 %v31205_v53  ;;  %v31275_v53 = vld [vmem:[%s41723_s1 + $0x4b0] sm:$0xff] }
  0x60   :  { %18143 = vmatpush.bf16.msra.mxu1 %v31197_v60  ;;  %v31257_v60 = vld [vmem:[%s41723_s1 + $0x420] sm:$0xff] }
  0x61   :  { %18171 = vmatpush.bf16.msra.mxu3 %v31213_v61  ;;  %18130 = vmatmul.bf16.vlgmr.msra.gmra.mxu0 %v21651_v2  ;;  %v31273_v61 = vld [vmem:[%s41723_s1 + $0x4a0] sm:$0xff]  ;;  %v31264_v2 = vld [vmem:[%s41723_s1 + $0x458] sm:$0xff] }
  0x62   :  { %18178 = vmatpush.bf16.msrb.mxu0 %v31228_v54  ;;  %18158 = vmatmul.bf16.vlgmr.msra.gmra.mxu2 %v21659_v3  ;;  %v31267_v54 = vld [vmem:[%s41723_s1 + $0x470] sm:$0xff]  ;;  %v31280_v3 = vld [vmem:[%s41723_s1 + $0x4d8] sm:$0xff] }
  0x63   :  { %18206 = vmatpush.bf16.msrb.mxu2 %v31244_v55  ;;  %18144 = vmatmul.bf16.vlgmr.msra.gmra.mxu1 %v21655_v6  ;;  %v31283_v55 = vld [vmem:[%s41723_s1 + $0x4f0] sm:$0xff] }
  0x64   :  { %18192 = vmatpush.bf16.msrb.mxu1 %v31236_v4  ;;  %18172 = vmatmul.bf16.vlgmr.msra.gmra.mxu3 %v21663_v7  ;;  %v31255_v4 = vld [vmem:[%s41723_s1 + $0x410] sm:$0xff] }
  0x65   :  { %18220 = vmatpush.bf16.msrb.mxu3 %v31252_v5  ;;  %v31271_v5 = vld [vmem:[%s41723_s1 + $0x490] sm:$0xff] }
  0x66   :  { %18179 = vmatpush.bf16.msrb.mxu0 %v31227_v8  ;;  %v31263_v6 = vld [vmem:[%s41723_s1 + $0x450] sm:$0xff]  ;;  %v31254_v8 = vld [vmem:[%s41723_s1 + $0x408] sm:$0xff] }
  0x67   :  { %18207 = vmatpush.bf16.msrb.mxu2 %v31243_v9  ;;  %v31279_v7 = vld [vmem:[%s41723_s1 + $0x4d0] sm:$0xff]  ;;  %v31270_v9 = vld [vmem:[%s41723_s1 + $0x488] sm:$0xff] }
  0x68   :  { %18193 = vmatpush.bf16.msrb.mxu1 %v31235_v10  ;;  %v31262_v10 = vld [vmem:[%s41723_s1 + $0x448] sm:$0xff] }
  0x69   :  { %18221 = vmatpush.bf16.msrb.mxu3 %v31251_v11  ;;  %v31278_v11 = vld [vmem:[%s41723_s1 + $0x4c8] sm:$0xff] }
  0x6a   :  { %18180 = vmatpush.bf16.msrb.mxu0 %v31226_v12  ;;  %v31253_v12 = vld [vmem:[%s41723_s1 + $0x400] sm:$0xff] }
  0x6b   :  { %18208 = vmatpush.bf16.msrb.mxu2 %v31242_v13  ;;  %v31269_v13 = vld [vmem:[%s41723_s1 + $0x480] sm:$0xff] }
  0x6c   :  { %18194 = vmatpush.bf16.msrb.mxu1 %v31234_v14  ;;  %v31292_v14 = vld [vmem:[%s41723_s1 + $0x538] sm:$0xff] }
  0x6d   :  { %18222 = vmatpush.bf16.msrb.mxu3 %v31250_v15  ;;  %v31308_v15 = vld [vmem:[%s41723_s1 + $0x5b8] sm:$0xff] }
  0x6e   :  { %18181 = vmatpush.bf16.msrb.mxu0 %v31225_v16  ;;  %v21682_v16 = vld [vmem:[%s41724_s0 + $0x40] sm:$0xf] }
  0x6f   :  { %18209 = vmatpush.bf16.msrb.mxu2 %v31241_v17  ;;  %v31004_v17 = vld [vmem:[%s41724_s0 + $0x440] sm:$0x70] }
  0x70   :  { %18195 = vmatpush.bf16.msrb.mxu1 %v31233_v18  ;;  %v21690_v18 = vld [vmem:[%s41724_s0 + $0x48] sm:$0xf] }
  0x71   :  { %18223 = vmatpush.bf16.msrb.mxu3 %v31249_v19  ;;  %v31005_v19 = vld [vmem:[%s41724_s0 + $0x448] sm:$0x70] }
  0x72   :  { %18182 = vmatpush.bf16.msrb.mxu0 %v31224_v20  ;;  %v31261_v20 = vld [vmem:[%s41723_s1 + $0x440] sm:$0xff] }
  0x73   :  { %18210 = vmatpush.bf16.msrb.mxu2 %v31240_v21  ;;  %v31277_v21 = vld [vmem:[%s41723_s1 + $0x4c0] sm:$0xff] }
  0x74   :  { %18196 = vmatpush.bf16.msrb.mxu1 %v31232_v22  ;;  %v30876_v22 = vld [vmem:[%s41724_s0 + $0x44] sm:$0xf] }
  0x75   :  { %18224 = vmatpush.bf16.msrb.mxu3 %v31248_v23  ;;  %v21684_v23 = vld [vmem:[%s41724_s0 + $0x444] sm:$0x70] }
  0x76   :  { %18183 = vmatpush.bf16.msrb.mxu0 %v31223_v24  ;;  %v30877_v24 = vld [vmem:[%s41724_s0 + $0x4c] sm:$0xf] }
  0x77   :  { %18211 = vmatpush.bf16.msrb.mxu2 %v31239_v25  ;;  %v21692_v25 = vld [vmem:[%s41724_s0 + $0x44c] sm:$0x70] }
  0x78   :  { %18197 = vmatpush.bf16.msrb.mxu1 %v31231_v26  ;;  %v21683_v26 = vor.u32 %v31004_v17, %v21682_v16 }
  0x79   :  { %18225 = vmatpush.bf16.msrb.mxu3 %v31247_v27  ;;  %v21691_v27 = vor.u32 %v31005_v19, %v21690_v18  ;;  %v31332_v18 = vld [vmem:[%s41723_s1 + $0x678] sm:$0xff] }
  0x7a   :  { %18184 = vmatpush.bf16.msrb.mxu0 %v31222_v28  ;;  %v31300_v28 = vld [vmem:[%s41723_s1 + $0x578] sm:$0xff] }
  0x7b   :  { %18212 = vmatpush.bf16.msrb.mxu2 %v31238_v29  ;;  %v31316_v29 = vld [vmem:[%s41723_s1 + $0x5f8] sm:$0xff] }
  0x7c   :  { %18198 = vmatpush.bf16.msrb.mxu1 %v31230_v30  ;;  %v21687_v30 = vor.u32 %v30876_v22, %v21684_v23  ;;  %v31348_v19 = vld [vmem:[%s41723_s1 + $0x6f8] sm:$0xff]  ;;  %v31323_v23 = vld [vmem:[%s41723_s1 + $0x630] sm:$0xff] }
  0x7d   :  { %18226 = vmatpush.bf16.msrb.mxu3 %v31246_v31  ;;  %v21695_v31 = vor.u32 %v30877_v24, %v21692_v25  ;;  %v31339_v24 = vld [vmem:[%s41723_s1 + $0x6b0] sm:$0xff] }
  0x7e   :  { %18185 = vmatpush.bf16.msrb.mxu0 %v31221_v32  ;;  %v31291_v32 = vld [vmem:[%s41723_s1 + $0x530] sm:$0xff] }
  0x7f   :  { %18213 = vmatpush.bf16.msrb.mxu2 %v31237_v33  ;;  %v31307_v33 = vld [vmem:[%s41723_s1 + $0x5b0] sm:$0xff] }
  0x80   :  { %18199 = vmatpush.bf16.msrb.mxu1 %v31229_v40  ;;  %v31314_v40 = vld [vmem:[%s41723_s1 + $0x5e8] sm:$0xff]  ;;  %v31331_v25 = vld [vmem:[%s41723_s1 + $0x670] sm:$0xff] }
  0x81   :  { %18227 = vmatpush.bf16.msrb.mxu3 %v31245_v41  ;;  %18186 = vmatmul.bf16.vlgmr.msrb.gmra.mxu0 %v21667_v46  ;;  %v31289_v41 = vld [vmem:[%s41723_s1 + $0x520] sm:$0xff] }
  0x82   :  { %18234 = vmatpush.bf16.msra.mxu0 %v31260_v34  ;;  %18214 = vmatmul.bf16.vlgmr.msrb.gmra.mxu2 %v21675_v47  ;;  %v31299_v34 = vld [vmem:[%s41723_s1 + $0x570] sm:$0xff]  ;;  %v31313_v46 = vld [vmem:[%s41723_s1 + $0x5e0] sm:$0xff] }
  0x83   :  { %18262 = vmatpush.bf16.msra.mxu2 %v31276_v35  ;;  %18200 = vmatmul.bf16.vlgmr.msrb.gmra.mxu1 %v21671_v50  ;;  %v31315_v35 = vld [vmem:[%s41723_s1 + $0x5f0] sm:$0xff]  ;;  %v31304_v50 = vld [vmem:[%s41723_s1 + $0x598] sm:$0xff] }
  0x84   :  { %18248 = vmatpush.bf16.msra.mxu1 %v31268_v48  ;;  %18228 = vmatmul.bf16.vlgmr.msrb.gmra.mxu3 %v21679_v51  ;;  %v31296_v51 = vld [vmem:[%s41723_s1 + $0x558] sm:$0xff] }
  0x85   :  { %18276 = vmatpush.bf16.msra.mxu3 %v31284_v49  ;;  %v31288_v49 = vld [vmem:[%s41723_s1 + $0x518] sm:$0xff] }
  0x86   :  { %18235 = vmatpush.bf16.msra.mxu0 %v31259_v52  ;;  %v31312_v52 = vld [vmem:[%s41723_s1 + $0x5d8] sm:$0xff] }
  0x87   :  { %18263 = vmatpush.bf16.msra.mxu2 %v31275_v53 }
  0x88   :  { %18249 = vmatpush.bf16.msra.mxu1 %v31267_v54 }
  0x89   :  { %18277 = vmatpush.bf16.msra.mxu3 %v31283_v55  ;;  %v31287_v55 = vld [vmem:[%s41723_s1 + $0x510] sm:$0xff] }
  0x8a   :  { %18236 = vmatpush.bf16.msra.mxu0 %v31258_v56  ;;  %v31303_v56 = vld [vmem:[%s41723_s1 + $0x590] sm:$0xff] }
  0x8b   :  { %18264 = vmatpush.bf16.msra.mxu2 %v31274_v57 }
  0x8c   :  { %18250 = vmatpush.bf16.msra.mxu1 %v31266_v58 }
  0x8d   :  { %18278 = vmatpush.bf16.msra.mxu3 %v31282_v59  ;;  %v31295_v59 = vld [vmem:[%s41723_s1 + $0x550] sm:$0xff] }
  0x8e   :  { %18237 = vmatpush.bf16.msra.mxu0 %v31257_v60  ;;  %v31311_v60 = vld [vmem:[%s41723_s1 + $0x5d0] sm:$0xff] }
  0x8f   :  { %18265 = vmatpush.bf16.msra.mxu2 %v31273_v61  ;;  %v31286_v61 = vld [vmem:[%s41723_s1 + $0x508] sm:$0xff] }
  0x90   :  { %18251 = vmatpush.bf16.msra.mxu1 %v31265_v62  ;;  %v31302_v62 = vld [vmem:[%s41723_s1 + $0x588] sm:$0xff] }
  0x91   :  { %18279 = vmatpush.bf16.msra.mxu3 %v31281_v63  ;;  %v31294_v63 = vld [vmem:[%s41723_s1 + $0x548] sm:$0xff] }
  0x92   :  { %18238 = vmatpush.bf16.msra.mxu0 %v31256_v0  ;;  %v31310_v0 = vld [vmem:[%s41723_s1 + $0x5c8] sm:$0xff] }
  0x93   :  { %18266 = vmatpush.bf16.msra.mxu2 %v31272_v1  ;;  %v31285_v1 = vld [vmem:[%s41723_s1 + $0x500] sm:$0xff] }
  0x94   :  { %18252 = vmatpush.bf16.msra.mxu1 %v31264_v2  ;;  %v31301_v2 = vld [vmem:[%s41723_s1 + $0x580] sm:$0xff] }
  0x95   :  { %18280 = vmatpush.bf16.msra.mxu3 %v31280_v3  ;;  %v31324_v3 = vld [vmem:[%s41723_s1 + $0x638] sm:$0xff] }
  0x96   :  { %18239 = vmatpush.bf16.msra.mxu0 %v31255_v4  ;;  %v31340_v4 = vld [vmem:[%s41723_s1 + $0x6b8] sm:$0xff] }
  0x97   :  { %18267 = vmatpush.bf16.msra.mxu2 %v31271_v5  ;;  %v21698_v5 = vld [vmem:[%s41724_s0 + $0x50] sm:$0xf] }
  0x98   :  { %18253 = vmatpush.bf16.msra.mxu1 %v31263_v6  ;;  %v31006_v6 = vld [vmem:[%s41724_s0 + $0x450] sm:$0x70] }
  0x99   :  { %18281 = vmatpush.bf16.msra.mxu3 %v31279_v7  ;;  %v21706_v7 = vld [vmem:[%s41724_s0 + $0x58] sm:$0xf]  ;;  %v21699_v16 = vor.u32 %v31006_v6, %v21698_v5  ;;  %v30881_v5 = vld [vmem:[%s41724_s0 + $0x6c] sm:$0xf]  ;;  %v21724_v6 = vld [vmem:[%s41724_s0 + $0x46c] sm:$0x70] }
  0x9a   :  { %18240 = vmatpush.bf16.msra.mxu0 %v31254_v8  ;;  %v31007_v8 = vld [vmem:[%s41724_s0 + $0x458] sm:$0x70] }
  0x9b   :  { %18268 = vmatpush.bf16.msra.mxu2 %v31270_v9  ;;  %v31293_v9 = vld [vmem:[%s41723_s1 + $0x540] sm:$0xff]  ;;  %v21707_v17 = vor.u32 %v31007_v8, %v21706_v7 }
  0x9c   :  { %18254 = vmatpush.bf16.msra.mxu1 %v31262_v10  ;;  %v31309_v10 = vld [vmem:[%s41723_s1 + $0x5c0] sm:$0xff] }
  0x9d   :  { %18282 = vmatpush.bf16.msra.mxu3 %v31278_v11  ;;  %v30878_v11 = vld [vmem:[%s41724_s0 + $0x54] sm:$0xf] }
  0x9e   :  { %18241 = vmatpush.bf16.msra.mxu0 %v31253_v12  ;;  %v18019_v43 = vpop.f32.mrf.mxu0 }
  0x9f   :  { %18269 = vmatpush.bf16.msra.mxu2 %v31269_v13  ;;  %v18020_v44 = vadd.f32 %v33181_v38, %v18019_v43  ;;  %v21700_v13 = vld [vmem:[%s41724_s0 + $0x454] sm:$0x70] }
  0xa0   :  { %18255 = vmatpush.bf16.msra.mxu1 %v31261_v20  ;;  %v18033_v47 = vpop.f32.mrf.mxu1 }
  0xa1   :  { %18283 = vmatpush.bf16.msra.mxu3 %v31277_v21  ;;  %18242 = vmatmul.bf16.vlgmr.msra.gmra.mxu0 %v21683_v26  ;;  %v18034_v48 = vadd.f32 %v18033_v47, %v18020_v44  ;;  %v21703_v21 = vor.u32 %v30878_v11, %v21700_v13  ;;  %v31347_v26 = vld [vmem:[%s41723_s1 + $0x6f0] sm:$0xff]  ;;  %v31380_v11 = vld [vmem:[%s41723_s1 + $0x7f8] sm:$0xff] }
  0xa2   :  { %18290 = vmatpush.bf16.msrb.mxu0 %v31292_v14  ;;  %18270 = vmatmul.bf16.vlgmr.msra.gmra.mxu2 %v21691_v27  ;;  %v30879_v14 = vld [vmem:[%s41724_s0 + $0x5c] sm:$0xf] }
  0xa3   :  { %18318 = vmatpush.bf16.msrb.mxu2 %v31308_v15  ;;  %18256 = vmatmul.bf16.vlgmr.msra.gmra.mxu1 %v21687_v30  ;;  %v21708_v15 = vld [vmem:[%s41724_s0 + $0x45c] sm:$0x70] }
  0xa4   :  { %18304 = vmatpush.bf16.msrb.mxu1 %v31300_v28  ;;  %18284 = vmatmul.bf16.vlgmr.msra.gmra.mxu3 %v21695_v31  ;;  %v21711_v22 = vor.u32 %v30879_v14, %v21708_v15  ;;  %v31322_v28 = vld [vmem:[%s41723_s1 + $0x628] sm:$0xff]  ;;  %v21727_v14 = vor.u32 %v30881_v5, %v21724_v6  ;;  %v31396_v6 = vld [vmem:[%s41723_s1 + $0x878] sm:$0xff] }
  0xa5   :  { %18332 = vmatpush.bf16.msrb.mxu3 %v31316_v29  ;;  %v18047_v53 = vpop.f32.mrf.mxu2  ;;  %v31338_v29 = vld [vmem:[%s41723_s1 + $0x6a8] sm:$0xff] }
  0xa6   :  { %18291 = vmatpush.bf16.msrb.mxu0 %v31291_v32  ;;  %v18048_v54 = vadd.f32 %v18047_v53, %v18034_v48  ;;  %v33925_v12 = vpop.f32.mrf.mxu0  ;;  %v31330_v31 = vld [vmem:[%s41723_s1 + $0x668] sm:$0xff] }
  0xa7   :  { %18319 = vmatpush.bf16.msrb.mxu2 %v31307_v33  ;;  %v18061_v57 = vpop.f32.mrf.mxu3  ;;  %v31346_v32 = vld [vmem:[%s41723_s1 + $0x6e8] sm:$0xff] }
  0xa8   :  { %18305 = vmatpush.bf16.msrb.mxu1 %v31299_v34  ;;  %v33872_v58 = vadd.f32 %v18061_v57, %v18048_v54  ;;  %v33942_v20 = vpop.f32.mrf.mxu1  ;;  %v31318_v53 = vld [vmem:[%s41723_s1 + $0x608] sm:$0xff]  ;;  %v31317_v57 = vld [vmem:[%s41723_s1 + $0x600] sm:$0xff] }
  0xa9   :  { %18333 = vmatpush.bf16.msrb.mxu3 %v31315_v35  ;;  %v31321_v35 = vld [vmem:[%s41723_s1 + $0x620] sm:$0xff]  ;;  %v31334_v54 = vld [vmem:[%s41723_s1 + $0x688] sm:$0xff] }
  0xaa   :  { %18292 = vmatpush.bf16.msrb.mxu0 %v31290_v36  ;;  %v31337_v36 = vld [vmem:[%s41723_s1 + $0x6a0] sm:$0xff] }
  0xab   :  { %18320 = vmatpush.bf16.msrb.mxu2 %v31306_v37 }
  0xac   :  { %18306 = vmatpush.bf16.msrb.mxu1 %v31298_v39  ;;  %v31329_v39 = vld [vmem:[%s41723_s1 + $0x660] sm:$0xff] }
  0xad   :  { %18334 = vmatpush.bf16.msrb.mxu3 %v31314_v40  ;;  %v33956_v27 = vpop.f32.mrf.mxu2  ;;  %v31345_v40 = vld [vmem:[%s41723_s1 + $0x6e0] sm:$0xff] }
  0xae   :  { %18293 = vmatpush.bf16.msrb.mxu0 %v31289_v41  ;;  %v31320_v41 = vld [vmem:[%s41723_s1 + $0x618] sm:$0xff] }
  0xaf   :  { %18321 = vmatpush.bf16.msrb.mxu2 %v31305_v42  ;;  %v33964_v30 = vpop.f32.mrf.mxu3  ;;  %v31336_v42 = vld [vmem:[%s41723_s1 + $0x698] sm:$0xff] }
  0xb0   :  { %18307 = vmatpush.bf16.msrb.mxu1 %v31297_v45  ;;  %v31328_v45 = vld [vmem:[%s41723_s1 + $0x658] sm:$0xff] }
  0xb1   :  { %18335 = vmatpush.bf16.msrb.mxu3 %v31313_v46  ;;  %v31344_v46 = vld [vmem:[%s41723_s1 + $0x6d8] sm:$0xff] }
  0xb2   :  { %18294 = vmatpush.bf16.msrb.mxu0 %v31288_v49  ;;  %v31319_v49 = vld [vmem:[%s41723_s1 + $0x610] sm:$0xff] }
  0xb3   :  { %18322 = vmatpush.bf16.msrb.mxu2 %v31304_v50  ;;  %v31335_v50 = vld [vmem:[%s41723_s1 + $0x690] sm:$0xff] }
  0xb4   :  { %18308 = vmatpush.bf16.msrb.mxu1 %v31296_v51  ;;  %v31327_v51 = vld [vmem:[%s41723_s1 + $0x650] sm:$0xff] }
  0xb5   :  { %18336 = vmatpush.bf16.msrb.mxu3 %v31312_v52  ;;  %v31343_v52 = vld [vmem:[%s41723_s1 + $0x6d0] sm:$0xff] }
  0xb6   :  { %18295 = vmatpush.bf16.msrb.mxu0 %v31287_v55  ;;  %v31326_v55 = vld [vmem:[%s41723_s1 + $0x648] sm:$0xff] }
  0xb7   :  { %18323 = vmatpush.bf16.msrb.mxu2 %v31303_v56  ;;  %v31342_v56 = vld [vmem:[%s41723_s1 + $0x6c8] sm:$0xff] }
  0xb8   :  { %18309 = vmatpush.bf16.msrb.mxu1 %v31295_v59  ;;  %v31356_v59 = vld [vmem:[%s41723_s1 + $0x738] sm:$0xff] }
  0xb9   :  { %18337 = vmatpush.bf16.msrb.mxu3 %v31311_v60  ;;  %v31372_v60 = vld [vmem:[%s41723_s1 + $0x7b8] sm:$0xff] }
  0xba   :  { %18296 = vmatpush.bf16.msrb.mxu0 %v31286_v61  ;;  %v21714_v61 = vld [vmem:[%s41724_s0 + $0x60] sm:$0xf] }
  0xbb   :  { %18324 = vmatpush.bf16.msrb.mxu2 %v31302_v62  ;;  %v31008_v62 = vld [vmem:[%s41724_s0 + $0x460] sm:$0x70] }
  0xbc   :  { %18310 = vmatpush.bf16.msrb.mxu1 %v31294_v63  ;;  %v21722_v63 = vld [vmem:[%s41724_s0 + $0x68] sm:$0xf]  ;;  %v21715_v7 = vor.u32 %v31008_v62, %v21714_v61  ;;  %v31357_v61 = vld [vmem:[%s41723_s1 + $0x740] sm:$0xff] }
  0xbd   :  { %18338 = vmatpush.bf16.msrb.mxu3 %v31310_v0  ;;  %v31009_v0 = vld [vmem:[%s41724_s0 + $0x468] sm:$0x70]  ;;  %v31373_v62 = vld [vmem:[%s41723_s1 + $0x7c0] sm:$0xff] }
  0xbe   :  { %18297 = vmatpush.bf16.msrb.mxu0 %v31285_v1  ;;  %v18075_v33 = vpop.f32.mrf.mxu0  ;;  %v31325_v1 = vld [vmem:[%s41723_s1 + $0x640] sm:$0xff]  ;;  %v21723_v8 = vor.u32 %v31009_v0, %v21722_v63  ;;  %v30882_v63 = vld [vmem:[%s41724_s0 + $0x74] sm:$0xf]  ;;  %v21732_v0 = vld [vmem:[%s41724_s0 + $0x474] sm:$0x70] }
  0xbf   :  { %18325 = vmatpush.bf16.msrb.mxu2 %v31301_v2  ;;  %v18076_v34 = vadd.f32 %v18075_v33, %v33872_v58  ;;  %v31333_v58 = vld [vmem:[%s41723_s1 + $0x680] sm:$0xff] }
  0xc0   :  { %18311 = vmatpush.bf16.msrb.mxu1 %v31293_v9  ;;  %v18089_v37 = vpop.f32.mrf.mxu1  ;;  %v31341_v2 = vld [vmem:[%s41723_s1 + $0x6c0] sm:$0xff] }
  0xc1   :  { %18339 = vmatpush.bf16.msrb.mxu3 %v31309_v10  ;;  %18298 = vmatmul.bf16.vlgmr.msrb.gmra.mxu0 %v21699_v16  ;;  %v18090_v38 = vadd.f32 %v18089_v37, %v18076_v34  ;;  %v31364_v10 = vld [vmem:[%s41723_s1 + $0x778] sm:$0xff]  ;;  %v31355_v16 = vld [vmem:[%s41723_s1 + $0x730] sm:$0xff] }
  0xc2   :  { %18346 = vmatpush.bf16.msra.mxu0 %v31324_v3  ;;  %18326 = vmatmul.bf16.vlgmr.msrb.gmra.mxu2 %v21707_v17  ;;  %v30880_v3 = vld [vmem:[%s41724_s0 + $0x64] sm:$0xf]  ;;  %v31371_v17 = vld [vmem:[%s41723_s1 + $0x7b0] sm:$0xff]  ;;  %v31352_v37 = vld [vmem:[%s41723_s1 + $0x718] sm:$0xff] }
  0xc3   :  { %18374 = vmatpush.bf16.msra.mxu2 %v31340_v4  ;;  %18312 = vmatmul.bf16.vlgmr.msrb.gmra.mxu1 %v21703_v21  ;;  %v21716_v4 = vld [vmem:[%s41724_s0 + $0x464] sm:$0x70] }
  0xc4   :  { %18360 = vmatpush.bf16.msra.mxu1 %v31332_v18  ;;  %18340 = vmatmul.bf16.vlgmr.msrb.gmra.mxu3 %v21711_v22  ;;  %v21719_v13 = vor.u32 %v30880_v3, %v21716_v4  ;;  %v31363_v18 = vld [vmem:[%s41723_s1 + $0x770] sm:$0xff]  ;;  %v31354_v22 = vld [vmem:[%s41723_s1 + $0x728] sm:$0xff] }
  0xc5   :  { %18388 = vmatpush.bf16.msra.mxu3 %v31348_v19  ;;  %v18103_v43 = vpop.f32.mrf.mxu2  ;;  %v31379_v19 = vld [vmem:[%s41723_s1 + $0x7f0] sm:$0xff] }
  0xc6   :  { %18347 = vmatpush.bf16.msra.mxu0 %v31323_v23  ;;  %v18104_v44 = vadd.f32 %v18103_v43, %v18090_v38  ;;  %v34065_v9 = vpop.f32.mrf.mxu0  ;;  %v31370_v23 = vld [vmem:[%s41723_s1 + $0x7a8] sm:$0xff]  ;;  %v31368_v38 = vld [vmem:[%s41723_s1 + $0x798] sm:$0xff] }
  0xc7   :  { %18375 = vmatpush.bf16.msra.mxu2 %v31339_v24  ;;  %v18117_v47 = vpop.f32.mrf.mxu3 }
  0xc8   :  { %18361 = vmatpush.bf16.msra.mxu1 %v31331_v25  ;;  %v33997_v48 = vadd.f32 %v18117_v47, %v18104_v44  ;;  %v34073_v15 = vpop.f32.mrf.mxu1  ;;  %v31362_v25 = vld [vmem:[%s41723_s1 + $0x768] sm:$0xff]  ;;  %v31359_v47 = vld [vmem:[%s41723_s1 + $0x750] sm:$0xff] }
  0xc9   :  { %18389 = vmatpush.bf16.msra.mxu3 %v31347_v26  ;;  %v31378_v26 = vld [vmem:[%s41723_s1 + $0x7e8] sm:$0xff] }
  0xca   :  { %18348 = vmatpush.bf16.msra.mxu0 %v31322_v28 }
  0xcb   :  { %18376 = vmatpush.bf16.msra.mxu2 %v31338_v29 }
  0xcc   :  { %18362 = vmatpush.bf16.msra.mxu1 %v31330_v31  ;;  %v31353_v31 = vld [vmem:[%s41723_s1 + $0x720] sm:$0xff] }
  0xcd   :  { %18390 = vmatpush.bf16.msra.mxu3 %v31346_v32  ;;  %v34087_v21 = vpop.f32.mrf.mxu2  ;;  %v31369_v32 = vld [vmem:[%s41723_s1 + $0x7a0] sm:$0xff] }
  0xce   :  { %18349 = vmatpush.bf16.msra.mxu0 %v31321_v35  ;;  %v31361_v35 = vld [vmem:[%s41723_s1 + $0x760] sm:$0xff] }
  0xcf   :  { %18377 = vmatpush.bf16.msra.mxu2 %v31337_v36  ;;  %v34095_v24 = vpop.f32.mrf.mxu3  ;;  %v31377_v36 = vld [vmem:[%s41723_s1 + $0x7e0] sm:$0xff] }
  0xd0   :  { %18363 = vmatpush.bf16.msra.mxu1 %v31329_v39 }
  0xd1   :  { %18391 = vmatpush.bf16.msra.mxu3 %v31345_v40 }
  0xd2   :  { %18350 = vmatpush.bf16.msra.mxu0 %v31320_v41  ;;  %v31360_v41 = vld [vmem:[%s41723_s1 + $0x758] sm:$0xff] }
  0xd3   :  { %18378 = vmatpush.bf16.msra.mxu2 %v31336_v42  ;;  %v31376_v42 = vld [vmem:[%s41723_s1 + $0x7d8] sm:$0xff] }
  0xd4   :  { %18364 = vmatpush.bf16.msra.mxu1 %v31328_v45  ;;  %v31351_v45 = vld [vmem:[%s41723_s1 + $0x710] sm:$0xff] }
  0xd5   :  { %18392 = vmatpush.bf16.msra.mxu3 %v31344_v46  ;;  %v31367_v46 = vld [vmem:[%s41723_s1 + $0x790] sm:$0xff] }
  0xd6   :  { %18351 = vmatpush.bf16.msra.mxu0 %v31319_v49  ;;  %v31350_v49 = vld [vmem:[%s41723_s1 + $0x708] sm:$0xff] }
  0xd7   :  { %18379 = vmatpush.bf16.msra.mxu2 %v31335_v50  ;;  %v31366_v50 = vld [vmem:[%s41723_s1 + $0x788] sm:$0xff] }
  0xd8   :  { %18365 = vmatpush.bf16.msra.mxu1 %v31327_v51  ;;  %v31358_v51 = vld [vmem:[%s41723_s1 + $0x748] sm:$0xff] }
  0xd9   :  { %18393 = vmatpush.bf16.msra.mxu3 %v31343_v52  ;;  %v31374_v52 = vld [vmem:[%s41723_s1 + $0x7c8] sm:$0xff] }
  0xda   :  { %18352 = vmatpush.bf16.msra.mxu0 %v31318_v53  ;;  %v31349_v53 = vld [vmem:[%s41723_s1 + $0x700] sm:$0xff] }
  0xdb   :  { %18380 = vmatpush.bf16.msra.mxu2 %v31334_v54  ;;  %v31365_v54 = vld [vmem:[%s41723_s1 + $0x780] sm:$0xff] }
  0xdc   :  { %18366 = vmatpush.bf16.msra.mxu1 %v31326_v55  ;;  %v31388_v55 = vld [vmem:[%s41723_s1 + $0x838] sm:$0xff] }
  0xdd   :  { %18394 = vmatpush.bf16.msra.mxu3 %v31342_v56  ;;  %v31404_v56 = vld [vmem:[%s41723_s1 + $0x8b8] sm:$0xff] }
  0xde   :  { %18353 = vmatpush.bf16.msra.mxu0 %v31317_v57  ;;  %v18131_v28 = vpop.f32.mrf.mxu0  ;;  %v21730_v57 = vld [vmem:[%s41724_s0 + $0x70] sm:$0xf] }
  0xdf   :  { %18381 = vmatpush.bf16.msra.mxu2 %v31333_v58  ;;  %v18132_v29 = vadd.f32 %v18131_v28, %v33997_v48  ;;  %v31375_v48 = vld [vmem:[%s41723_s1 + $0x7d0] sm:$0xff] }
  0xe0   :  { %18367 = vmatpush.bf16.msra.mxu1 %v31325_v1  ;;  %v18145_v33 = vpop.f32.mrf.mxu1  ;;  %v31010_v58 = vld [vmem:[%s41724_s0 + $0x470] sm:$0x70]  ;;  %v30883_v1 = vld [vmem:[%s41724_s0 + $0x7c] sm:$0xf] }
  0xe1   :  { %18395 = vmatpush.bf16.msra.mxu3 %v31341_v2  ;;  %18354 = vmatmul.bf16.vlgmr.msra.gmra.mxu0 %v21715_v7  ;;  %v18146_v34 = vadd.f32 %v18145_v33, %v18132_v29  ;;  %v21740_v2 = vld [vmem:[%s41724_s0 + $0x47c] sm:$0x70]  ;;  %v21731_v3 = vor.u32 %v31010_v58, %v21730_v57  ;;  %v31412_v7 = vld [vmem:[%s41723_s1 + $0x8f8] sm:$0xff]  ;;  %v31012_v58 = vld [vmem:[%s41724_s0 + $0x480] sm:$0x70] }
  0xe2   :  { %18402 = vmatpush.bf16.msrb.mxu0 %v31356_v59  ;;  %18382 = vmatmul.bf16.vlgmr.msra.gmra.mxu2 %v21723_v8  ;;  %v21738_v59 = vld [vmem:[%s41724_s0 + $0x78] sm:$0xf]  ;;  %v21735_v8 = vor.u32 %v30882_v63, %v21732_v0  ;;  %v21746_v57 = vld [vmem:[%s41724_s0 + $0x80] sm:$0xf]  ;;  %v30884_v63 = vld [vmem:[%s41724_s0 + $0x84] sm:$0xf] }
  0xe3   :  { %18430 = vmatpush.bf16.msrb.mxu2 %v31372_v60  ;;  %18368 = vmatmul.bf16.vlgmr.msra.gmra.mxu1 %v21719_v13  ;;  %v31011_v60 = vld [vmem:[%s41724_s0 + $0x478] sm:$0x70]  ;;  %v31387_v13 = vld [vmem:[%s41723_s1 + $0x830] sm:$0xff]  ;;  %v21748_v0 = vld [vmem:[%s41724_s0 + $0x484] sm:$0x70] }
  0xe4   :  { %18416 = vmatpush.bf16.msrb.mxu1 %v31364_v10  ;;  %18396 = vmatmul.bf16.vlgmr.msra.gmra.mxu3 %v21727_v14  ;;  %v21739_v4 = vor.u32 %v31011_v60, %v21738_v59  ;;  %v21743_v10 = vor.u32 %v30883_v1, %v21740_v2  ;;  %v31403_v14 = vld [vmem:[%s41723_s1 + $0x8b0] sm:$0xff]  ;;  %v21754_v59 = vld [vmem:[%s41724_s0 + $0x88] sm:$0xf]  ;;  %v31013_v60 = vld [vmem:[%s41724_s0 + $0x488] sm:$0x70] }
  0xe5   :  { %18444 = vmatpush.bf16.msrb.mxu3 %v31380_v11  ;;  %v18159_v39 = vpop.f32.mrf.mxu2  ;;  %v30885_v1 = vld [vmem:[%s41724_s0 + $0x8c] sm:$0xf]  ;;  %v21756_v2 = vld [vmem:[%s41724_s0 + $0x48c] sm:$0x70] }
  0xe6   :  { %18403 = vmatpush.bf16.msrb.mxu0 %v31355_v16  ;;  %v18160_v40 = vadd.f32 %v18159_v39, %v18146_v34  ;;  %v34196_v5 = vpop.f32.mrf.mxu0  ;;  %v31395_v16 = vld [vmem:[%s41723_s1 + $0x870] sm:$0xff] }
  0xe7   :  { %18431 = vmatpush.bf16.msrb.mxu2 %v31371_v17  ;;  %v18173_v43 = vpop.f32.mrf.mxu3  ;;  %v31411_v17 = vld [vmem:[%s41723_s1 + $0x8f0] sm:$0xff] }
  0xe8   :  { %18417 = vmatpush.bf16.msrb.mxu1 %v31363_v18  ;;  %v34128_v44 = vadd.f32 %v18173_v43, %v18160_v40  ;;  %v34204_v11 = vpop.f32.mrf.mxu1 }
  0xe9   :  { %18445 = vmatpush.bf16.msrb.mxu3 %v31379_v19  ;;  %v31386_v19 = vld [vmem:[%s41723_s1 + $0x828] sm:$0xff] }
  0xea   :  { %18404 = vmatpush.bf16.msrb.mxu0 %v31354_v22  ;;  %v31402_v22 = vld [vmem:[%s41723_s1 + $0x8a8] sm:$0xff] }
  0xeb   :  { %18432 = vmatpush.bf16.msrb.mxu2 %v31370_v23 }
  0xec   :  { %18418 = vmatpush.bf16.msrb.mxu1 %v31362_v25  ;;  %v31394_v25 = vld [vmem:[%s41723_s1 + $0x868] sm:$0xff] }
  0xed   :  { %18446 = vmatpush.bf16.msrb.mxu3 %v31378_v26  ;;  %v34218_v18 = vpop.f32.mrf.mxu2  ;;  %v31410_v26 = vld [vmem:[%s41723_s1 + $0x8e8] sm:$0xff] }
  0xee   :  { %18405 = vmatpush.bf16.msrb.mxu0 %v31353_v31  ;;  %v31385_v31 = vld [vmem:[%s41723_s1 + $0x820] sm:$0xff] }
  0xef   :  { %18433 = vmatpush.bf16.msrb.mxu2 %v31369_v32  ;;  %v34226_v23 = vpop.f32.mrf.mxu3  ;;  %v31401_v32 = vld [vmem:[%s41723_s1 + $0x8a0] sm:$0xff] }
  0xf0   :  { %18419 = vmatpush.bf16.msrb.mxu1 %v31361_v35  ;;  %v31393_v35 = vld [vmem:[%s41723_s1 + $0x860] sm:$0xff] }
  0xf1   :  { %18447 = vmatpush.bf16.msrb.mxu3 %v31377_v36  ;;  %v31409_v36 = vld [vmem:[%s41723_s1 + $0x8e0] sm:$0xff] }
  0xf2   :  { %18406 = vmatpush.bf16.msrb.mxu0 %v31352_v37  ;;  %v31384_v37 = vld [vmem:[%s41723_s1 + $0x818] sm:$0xff] }
  0xf3   :  { %18434 = vmatpush.bf16.msrb.mxu2 %v31368_v38  ;;  %v31400_v38 = vld [vmem:[%s41723_s1 + $0x898] sm:$0xff] }
  0xf4   :  { %18420 = vmatpush.bf16.msrb.mxu1 %v31360_v41  ;;  %v31392_v41 = vld [vmem:[%s41723_s1 + $0x858] sm:$0xff] }
  0xf5   :  { %18448 = vmatpush.bf16.msrb.mxu3 %v31376_v42  ;;  %v31408_v42 = vld [vmem:[%s41723_s1 + $0x8d8] sm:$0xff] }
  0xf6   :  { %18407 = vmatpush.bf16.msrb.mxu0 %v31351_v45  ;;  %v31383_v45 = vld [vmem:[%s41723_s1 + $0x810] sm:$0xff] }
  0xf7   :  { %18435 = vmatpush.bf16.msrb.mxu2 %v31367_v46  ;;  %v31399_v46 = vld [vmem:[%s41723_s1 + $0x890] sm:$0xff] }
  0xf8   :  { %18421 = vmatpush.bf16.msrb.mxu1 %v31359_v47  ;;  %v31391_v47 = vld [vmem:[%s41723_s1 + $0x850] sm:$0xff] }
  0xf9   :  { %18449 = vmatpush.bf16.msrb.mxu3 %v31375_v48  ;;  %v31407_v48 = vld [vmem:[%s41723_s1 + $0x8d0] sm:$0xff] }
  0xfa   :  { %18408 = vmatpush.bf16.msrb.mxu0 %v31350_v49  ;;  %v31382_v49 = vld [vmem:[%s41723_s1 + $0x808] sm:$0xff] }
  0xfb   :  { %18436 = vmatpush.bf16.msrb.mxu2 %v31366_v50  ;;  %v31398_v50 = vld [vmem:[%s41723_s1 + $0x888] sm:$0xff] }
  0xfc   :  { %18422 = vmatpush.bf16.msrb.mxu1 %v31358_v51  ;;  %v31390_v51 = vld [vmem:[%s41723_s1 + $0x848] sm:$0xff] }
  0xfd   :  { %18450 = vmatpush.bf16.msrb.mxu3 %v31374_v52  ;;  %v31406_v52 = vld [vmem:[%s41723_s1 + $0x8c8] sm:$0xff] }
  0xfe   :  { %18409 = vmatpush.bf16.msrb.mxu0 %v31349_v53  ;;  %v18187_v28 = vpop.f32.mrf.mxu0  ;;  %v31381_v53 = vld [vmem:[%s41723_s1 + $0x800] sm:$0xff] }
  0xff   :  { %18437 = vmatpush.bf16.msrb.mxu2 %v31365_v54  ;;  %v18188_v29 = vadd.f32 %v18187_v28, %v34128_v44  ;;  %v31397_v54 = vld [vmem:[%s41723_s1 + $0x880] sm:$0xff]  ;;  %v31434_v28 = vld [vmem:[%s41723_s1 + $0x9a8] sm:$0xff] }
 0x100   :  { %18423 = vmatpush.bf16.msrb.mxu1 %v31357_v61  ;;  %v18201_v33 = vpop.f32.mrf.mxu1  ;;  %v31389_v61 = vld [vmem:[%s41723_s1 + $0x840] sm:$0xff] }
 0x101   :  { %18451 = vmatpush.bf16.msrb.mxu3 %v31373_v62  ;;  %18410 = vmatmul.bf16.vlgmr.msrb.gmra.mxu0 %v21731_v3  ;;  %v18202_v34 = vadd.f32 %v18201_v33, %v18188_v29  ;;  %v31405_v62 = vld [vmem:[%s41723_s1 + $0x8c0] sm:$0xff]  ;;  %v21747_v3 = vor.u32 %v31012_v58, %v21746_v57 }
 0x102   :  { %18458 = vmatpush.bf16.msra.mxu0 %v31388_v55  ;;  %18438 = vmatmul.bf16.vlgmr.msrb.gmra.mxu2 %v21739_v4  ;;  %v31420_v55 = vld [vmem:[%s41723_s1 + $0x938] sm:$0xff]  ;;  %v21755_v4 = vor.u32 %v31013_v60, %v21754_v59  ;;  %v31413_v57 = vld [vmem:[%s41723_s1 + $0x900] sm:$0xff] }
 0x103   :  { %18486 = vmatpush.bf16.msra.mxu2 %v31404_v56  ;;  %18424 = vmatmul.bf16.vlgmr.msrb.gmra.mxu1 %v21735_v8  ;;  %v31436_v56 = vld [vmem:[%s41723_s1 + $0x9b8] sm:$0xff]  ;;  %v31429_v58 = vld [vmem:[%s41723_s1 + $0x980] sm:$0xff] }
 0x104   :  { %18472 = vmatpush.bf16.msra.mxu1 %v31396_v6  ;;  %18452 = vmatmul.bf16.vlgmr.msrb.gmra.mxu3 %v21743_v10  ;;  %v31444_v8 = vld [vmem:[%s41723_s1 + $0x9f8] sm:$0xff]  ;;  %v21751_v10 = vor.u32 %v30884_v63, %v21748_v0 }
 0x105   :  { %18500 = vmatpush.bf16.msra.mxu3 %v31412_v7  ;;  %v18215_v39 = vpop.f32.mrf.mxu2  ;;  %v31428_v7 = vld [vmem:[%s41723_s1 + $0x978] sm:$0xff] }
 0x106   :  { %18459 = vmatpush.bf16.msra.mxu0 %v31387_v13  ;;  %v18216_v40 = vadd.f32 %v18215_v39, %v18202_v34  ;;  %v34327_v6 = vpop.f32.mrf.mxu0  ;;  %v21759_v13 = vor.u32 %v30885_v1, %v21756_v2  ;;  %v31425_v39 = vld [vmem:[%s41723_s1 + $0x960] sm:$0xff]  ;;  %v31452_v59 = vld [vmem:[%s41723_s1 + $0xa38] sm:$0xff] }
 0x107   :  { %18487 = vmatpush.bf16.msra.mxu2 %v31403_v14  ;;  %v18229_v43 = vpop.f32.mrf.mxu3  ;;  %v31468_v60 = vld [vmem:[%s41723_s1 + $0xab8] sm:$0xff]  ;;  %v31421_v1 = vld [vmem:[%s41723_s1 + $0x940] sm:$0xff] }
 0x108   :  { %18473 = vmatpush.bf16.msra.mxu1 %v31395_v16  ;;  %v34259_v44 = vadd.f32 %v18229_v43, %v18216_v40  ;;  %v34335_v14 = vpop.f32.mrf.mxu1  ;;  %v31419_v16 = vld [vmem:[%s41723_s1 + $0x930] sm:$0xff]  ;;  %v31441_v40 = vld [vmem:[%s41723_s1 + $0x9e0] sm:$0xff]  ;;  %v21770_v63 = vld [vmem:[%s41724_s0 + $0x98] sm:$0xf] }
 0x109   :  { %18501 = vmatpush.bf16.msra.mxu3 %v31411_v17  ;;  %v31435_v17 = vld [vmem:[%s41723_s1 + $0x9b0] sm:$0xff]  ;;  %v31015_v0 = vld [vmem:[%s41724_s0 + $0x498] sm:$0x70]  ;;  %v31437_v2 = vld [vmem:[%s41723_s1 + $0x9c0] sm:$0xff] }
 0x10a   :  { %18460 = vmatpush.bf16.msra.mxu0 %v31386_v19  ;;  %v31427_v19 = vld [vmem:[%s41723_s1 + $0x970] sm:$0xff] }
 0x10b   :  { %18488 = vmatpush.bf16.msra.mxu2 %v31402_v22  ;;  %v31443_v22 = vld [vmem:[%s41723_s1 + $0x9f0] sm:$0xff] }
 0x10c   :  { %18474 = vmatpush.bf16.msra.mxu1 %v31394_v25 }
 0x10d   :  { %18502 = vmatpush.bf16.msra.mxu3 %v31410_v26  ;;  %v34349_v25 = vpop.f32.mrf.mxu2  ;;  %v31418_v26 = vld [vmem:[%s41723_s1 + $0x928] sm:$0xff] }
 0x10e   :  { %18461 = vmatpush.bf16.msra.mxu0 %v31385_v31  ;;  %v31426_v31 = vld [vmem:[%s41723_s1 + $0x968] sm:$0xff] }
 0x10f   :  { %18489 = vmatpush.bf16.msra.mxu2 %v31401_v32  ;;  %v34357_v29 = vpop.f32.mrf.mxu3  ;;  %v31442_v32 = vld [vmem:[%s41723_s1 + $0x9e8] sm:$0xff] }
 0x110   :  { %18475 = vmatpush.bf16.msra.mxu1 %v31393_v35  ;;  %v31417_v35 = vld [vmem:[%s41723_s1 + $0x920] sm:$0xff] }
 0x111   :  { %18503 = vmatpush.bf16.msra.mxu3 %v31409_v36  ;;  %v31433_v36 = vld [vmem:[%s41723_s1 + $0x9a0] sm:$0xff] }
 0x112   :  { %18462 = vmatpush.bf16.msra.mxu0 %v31384_v37 }
 0x113   :  { %18490 = vmatpush.bf16.msra.mxu2 %v31400_v38 }
 0x114   :  { %18476 = vmatpush.bf16.msra.mxu1 %v31392_v41  ;;  %v31416_v41 = vld [vmem:[%s41723_s1 + $0x918] sm:$0xff] }
 0x115   :  { %18504 = vmatpush.bf16.msra.mxu3 %v31408_v42  ;;  %v31432_v42 = vld [vmem:[%s41723_s1 + $0x998] sm:$0xff] }
 0x116   :  { %18463 = vmatpush.bf16.msra.mxu0 %v31383_v45  ;;  %v31424_v45 = vld [vmem:[%s41723_s1 + $0x958] sm:$0xff] }
 0x117   :  { %18491 = vmatpush.bf16.msra.mxu2 %v31399_v46  ;;  %v31440_v46 = vld [vmem:[%s41723_s1 + $0x9d8] sm:$0xff] }
 0x118   :  { %18477 = vmatpush.bf16.msra.mxu1 %v31391_v47 }
 0x119   :  { %18505 = vmatpush.bf16.msra.mxu3 %v31407_v48 }
 0x11a   :  { %18464 = vmatpush.bf16.msra.mxu0 %v31382_v49  ;;  %v31415_v49 = vld [vmem:[%s41723_s1 + $0x910] sm:$0xff] }
 0x11b   :  { %18492 = vmatpush.bf16.msra.mxu2 %v31398_v50  ;;  %v31431_v50 = vld [vmem:[%s41723_s1 + $0x990] sm:$0xff] }
 0x11c   :  { %18478 = vmatpush.bf16.msra.mxu1 %v31390_v51  ;;  %v31423_v51 = vld [vmem:[%s41723_s1 + $0x950] sm:$0xff] }
 0x11d   :  { %18506 = vmatpush.bf16.msra.mxu3 %v31406_v52  ;;  %v31439_v52 = vld [vmem:[%s41723_s1 + $0x9d0] sm:$0xff] }
 0x11e   :  { %18465 = vmatpush.bf16.msra.mxu0 %v31381_v53  ;;  %v18243_v33 = vpop.f32.mrf.mxu0  ;;  %v31414_v53 = vld [vmem:[%s41723_s1 + $0x908] sm:$0xff] }
 0x11f   :  { %18493 = vmatpush.bf16.msra.mxu2 %v31397_v54  ;;  %v18244_v34 = vadd.f32 %v18243_v33, %v34259_v44  ;;  %v31430_v54 = vld [vmem:[%s41723_s1 + $0x988] sm:$0xff]  ;;  %v31459_v33 = vld [vmem:[%s41723_s1 + $0xa70] sm:$0xff] }
 0x120   :  { %18479 = vmatpush.bf16.msra.mxu1 %v31389_v61  ;;  %v18257_v37 = vpop.f32.mrf.mxu1  ;;  %v21762_v61 = vld [vmem:[%s41724_s0 + $0x90] sm:$0xf] }
 0x121   :  { %18507 = vmatpush.bf16.msra.mxu3 %v31405_v62  ;;  %18466 = vmatmul.bf16.vlgmr.msra.gmra.mxu0 %v21747_v3  ;;  %v18258_v38 = vadd.f32 %v18257_v37, %v18244_v34  ;;  %v31014_v62 = vld [vmem:[%s41724_s0 + $0x490] sm:$0x70]  ;;  %v31466_v37 = vld [vmem:[%s41723_s1 + $0xaa8] sm:$0xff] }
 0x122   :  { %18514 = vmatpush.bf16.msrb.mxu0 %v31420_v55  ;;  %18494 = vmatmul.bf16.vlgmr.msra.gmra.mxu2 %v21755_v4  ;;  %v31422_v55 = vld [vmem:[%s41723_s1 + $0x948] sm:$0xff]  ;;  %v30886_v3 = vld [vmem:[%s41724_s0 + $0x94] sm:$0xf]  ;;  %v21764_v4 = vld [vmem:[%s41724_s0 + $0x494] sm:$0x70] }
 0x123   :  { %18542 = vmatpush.bf16.msrb.mxu2 %v31436_v56  ;;  %18480 = vmatmul.bf16.vlgmr.msra.gmra.mxu1 %v21751_v10  ;;  %v31438_v56 = vld [vmem:[%s41723_s1 + $0x9c8] sm:$0xff]  ;;  %v21763_v10 = vor.u32 %v31014_v62, %v21762_v61  ;;  %v31475_v34 = vld [vmem:[%s41723_s1 + $0xaf0] sm:$0xff] }
 0x124   :  { %18528 = vmatpush.bf16.msrb.mxu1 %v31428_v7  ;;  %18508 = vmatmul.bf16.vlgmr.msra.gmra.mxu3 %v21759_v13  ;;  %v30887_v7 = vld [vmem:[%s41724_s0 + $0x9c] sm:$0xf]  ;;  %v21771_v13 = vor.u32 %v31015_v0, %v21770_v63  ;;  %v31446_v61 = vld [vmem:[%s41723_s1 + $0xa08] sm:$0xff] }
 0x125   :  { %18556 = vmatpush.bf16.msrb.mxu3 %v31444_v8  ;;  %v18271_v43 = vpop.f32.mrf.mxu2  ;;  %v21772_v8 = vld [vmem:[%s41724_s0 + $0x49c] sm:$0x70]  ;;  %v31462_v62 = vld [vmem:[%s41723_s1 + $0xa88] sm:$0xff] }
 0x126   :  { %18515 = vmatpush.bf16.msrb.mxu0 %v31419_v16  ;;  %v18272_v44 = vadd.f32 %v18271_v43, %v18258_v38  ;;  %v34458_v16 = vpop.f32.mrf.mxu0  ;;  %v31449_v43 = vld [vmem:[%s41723_s1 + $0xa20] sm:$0xff]  ;;  %v31454_v63 = vld [vmem:[%s41723_s1 + $0xa48] sm:$0xff] }
 0x127   :  { %18543 = vmatpush.bf16.msrb.mxu2 %v31435_v17  ;;  %v18285_v47 = vpop.f32.mrf.mxu3  ;;  %v31460_v17 = vld [vmem:[%s41723_s1 + $0xa78] sm:$0xff]  ;;  %v31470_v0 = vld [vmem:[%s41723_s1 + $0xac8] sm:$0xff] }
 0x128   :  { %18529 = vmatpush.bf16.msrb.mxu1 %v31427_v19  ;;  %v34390_v48 = vadd.f32 %v18285_v47, %v18272_v44  ;;  %v31476_v19 = vld [vmem:[%s41723_s1 + $0xaf8] sm:$0xff]  ;;  %v31465_v44 = vld [vmem:[%s41723_s1 + $0xaa0] sm:$0xff] }
 0x129   :  { %18557 = vmatpush.bf16.msrb.mxu3 %v31443_v22  ;;  %v21767_v22 = vor.u32 %v30886_v3, %v21764_v4  ;;  %v31457_v47 = vld [vmem:[%s41723_s1 + $0xa60] sm:$0xff]  ;;  %v31484_v3 = vld [vmem:[%s41723_s1 + $0xb38] sm:$0xff] }
 0x12a   :  { %18516 = vmatpush.bf16.msrb.mxu0 %v31418_v26  ;;  %v21775_v26 = vor.u32 %v30887_v7, %v21772_v8  ;;  %v31500_v4 = vld [vmem:[%s41723_s1 + $0xbb8] sm:$0xff]  ;;  %v21778_v7 = vld [vmem:[%s41724_s0 + $0xa0] sm:$0xf]  ;;  %v31016_v8 = vld [vmem:[%s41724_s0 + $0x4a0] sm:$0x70] }
 0x12b   :  { %18544 = vmatpush.bf16.msrb.mxu2 %v31434_v28  ;;  %v34466_v28 = vpop.f32.mrf.mxu1 }
 0x12c   :  { %18530 = vmatpush.bf16.msrb.mxu1 %v31426_v31  ;;  %v31451_v31 = vld [vmem:[%s41723_s1 + $0xa30] sm:$0xff] }
 0x12d   :  { %18558 = vmatpush.bf16.msrb.mxu3 %v31442_v32  ;;  %v31467_v32 = vld [vmem:[%s41723_s1 + $0xab0] sm:$0xff] }
 0x12e   :  { %18517 = vmatpush.bf16.msrb.mxu0 %v31417_v35  ;;  %v34480_v35 = vpop.f32.mrf.mxu2 }
 0x12f   :  { %18545 = vmatpush.bf16.msrb.mxu2 %v31433_v36  ;;  %v31450_v36 = vld [vmem:[%s41723_s1 + $0xa28] sm:$0xff]  ;;  %v34488_v38 = vpop.f32.mrf.mxu3 }
 0x130   :  { %18531 = vmatpush.bf16.msrb.mxu1 %v31425_v39  ;;  %v31458_v39 = vld [vmem:[%s41723_s1 + $0xa68] sm:$0xff] }
 0x131   :  { %18559 = vmatpush.bf16.msrb.mxu3 %v31441_v40  ;;  %v31474_v40 = vld [vmem:[%s41723_s1 + $0xae8] sm:$0xff] }
 0x132   :  { %18518 = vmatpush.bf16.msrb.mxu0 %v31416_v41 }
 0x133   :  { %18546 = vmatpush.bf16.msrb.mxu2 %v31432_v42 }
 0x134   :  { %18532 = vmatpush.bf16.msrb.mxu1 %v31424_v45 }
 0x135   :  { %18560 = vmatpush.bf16.msrb.mxu3 %v31440_v46 }
 0x136   :  { %18519 = vmatpush.bf16.msrb.mxu0 %v31415_v49  ;;  %v31448_v49 = vld [vmem:[%s41723_s1 + $0xa18] sm:$0xff] }
 0x137   :  { %18547 = vmatpush.bf16.msrb.mxu2 %v31431_v50  ;;  %v31464_v50 = vld [vmem:[%s41723_s1 + $0xa98] sm:$0xff] }
 0x138   :  { %18533 = vmatpush.bf16.msrb.mxu1 %v31423_v51 }
 0x139   :  { %18561 = vmatpush.bf16.msrb.mxu3 %v31439_v52 }
 0x13a   :  { %18520 = vmatpush.bf16.msrb.mxu0 %v31414_v53  ;;  %v31456_v53 = vld [vmem:[%s41723_s1 + $0xa58] sm:$0xff] }
 0x13b   :  { %18548 = vmatpush.bf16.msrb.mxu2 %v31430_v54  ;;  %v31472_v54 = vld [vmem:[%s41723_s1 + $0xad8] sm:$0xff] }
 0x13c   :  { %18534 = vmatpush.bf16.msrb.mxu1 %v31422_v55 }
 0x13d   :  { %18562 = vmatpush.bf16.msrb.mxu3 %v31438_v56 }
 0x13e   :  { %18521 = vmatpush.bf16.msrb.mxu0 %v31413_v57  ;;  %v18299_v41 = vpop.f32.mrf.mxu0  ;;  %v31447_v57 = vld [vmem:[%s41723_s1 + $0xa10] sm:$0xff] }
 0x13f   :  { %18549 = vmatpush.bf16.msrb.mxu2 %v31429_v58  ;;  %v18300_v42 = vadd.f32 %v18299_v41, %v34390_v48  ;;  %v31473_v48 = vld [vmem:[%s41723_s1 + $0xae0] sm:$0xff]  ;;  %v31463_v58 = vld [vmem:[%s41723_s1 + $0xa90] sm:$0xff] }
 0x140   :  { %18535 = vmatpush.bf16.msrb.mxu1 %v31421_v1  ;;  %v18313_v45 = vpop.f32.mrf.mxu1  ;;  %v31445_v1 = vld [vmem:[%s41723_s1 + $0xa00] sm:$0xff] }
 0x141   :  { %18563 = vmatpush.bf16.msrb.mxu3 %v31437_v2  ;;  %18522 = vmatmul.bf16.vlgmr.msrb.gmra.mxu0 %v21763_v10  ;;  %v18314_v46 = vadd.f32 %v18313_v45, %v18300_v42  ;;  %v31461_v2 = vld [vmem:[%s41723_s1 + $0xa80] sm:$0xff]  ;;  %v21786_v10 = vld [vmem:[%s41724_s0 + $0xa8] sm:$0xf]  ;;  %v31491_v45 = vld [vmem:[%s41723_s1 + $0xb70] sm:$0xff] }
 0x142   :  { %18570 = vmatpush.bf16.msra.mxu0 %v31452_v59  ;;  %18550 = vmatmul.bf16.vlgmr.msrb.gmra.mxu2 %v21771_v13  ;;  %v31455_v59 = vld [vmem:[%s41723_s1 + $0xa50] sm:$0xff]  ;;  %v31017_v13 = vld [vmem:[%s41724_s0 + $0x4a8] sm:$0x70] }
 0x143   :  { %18598 = vmatpush.bf16.msra.mxu2 %v31468_v60  ;;  %18536 = vmatmul.bf16.vlgmr.msrb.gmra.mxu1 %v21767_v22  ;;  %v31471_v60 = vld [vmem:[%s41723_s1 + $0xad0] sm:$0xff]  ;;  %v30888_v22 = vld [vmem:[%s41724_s0 + $0xa4] sm:$0xf] }
 0x144   :  { %18584 = vmatpush.bf16.msra.mxu1 %v31460_v17  ;;  %18564 = vmatmul.bf16.vlgmr.msrb.gmra.mxu3 %v21775_v26  ;;  %v31453_v17 = vld [vmem:[%s41723_s1 + $0xa40] sm:$0xff]  ;;  %v21780_v26 = vld [vmem:[%s41724_s0 + $0x4a4] sm:$0x70] }
 0x145   :  { %18612 = vmatpush.bf16.msra.mxu3 %v31476_v19  ;;  %v18327_v51 = vpop.f32.mrf.mxu2  ;;  %v31469_v19 = vld [vmem:[%s41723_s1 + $0xac0] sm:$0xff] }
 0x146   :  { %18571 = vmatpush.bf16.msra.mxu0 %v31451_v31  ;;  %v18328_v52 = vadd.f32 %v18327_v51, %v18314_v46  ;;  %v30889_v31 = vld [vmem:[%s41724_s0 + $0xac] sm:$0xf]  ;;  %v31507_v46 = vld [vmem:[%s41723_s1 + $0xbf0] sm:$0xff] }
 0x147   :  { %18599 = vmatpush.bf16.msra.mxu2 %v31467_v32  ;;  %v18341_v55 = vpop.f32.mrf.mxu3  ;;  %v21788_v32 = vld [vmem:[%s41724_s0 + $0x4ac] sm:$0x70]  ;;  %v31490_v51 = vld [vmem:[%s41723_s1 + $0xb68] sm:$0xff] }
 0x148   :  { %18585 = vmatpush.bf16.msra.mxu1 %v31459_v33  ;;  %v34521_v56 = vadd.f32 %v18341_v55, %v18328_v52  ;;  %v21779_v33 = vor.u32 %v31016_v8, %v21778_v7  ;;  %v21791_v41 = vor.u32 %v30889_v31, %v21788_v32  ;;  %v34597_v42 = vpop.f32.mrf.mxu1  ;;  %v31506_v52 = vld [vmem:[%s41723_s1 + $0xbe8] sm:$0xff]  ;;  %v31481_v55 = vld [vmem:[%s41723_s1 + $0xb20] sm:$0xff]  ;;  %v31479_v7 = vld [vmem:[%s41723_s1 + $0xb10] sm:$0xff] }
 0x149   :  { %18613 = vmatpush.bf16.msra.mxu3 %v31475_v34  ;;  %v21787_v34 = vor.u32 %v31017_v13, %v21786_v10  ;;  %v31495_v8 = vld [vmem:[%s41723_s1 + $0xb90] sm:$0xff]  ;;  %v31477_v31 = vld [vmem:[%s41723_s1 + $0xb00] sm:$0xff] }
 0x14a   :  { %18572 = vmatpush.bf16.msra.mxu0 %v31450_v36  ;;  %v34589_v36 = vpop.f32.mrf.mxu0  ;;  %v31487_v10 = vld [vmem:[%s41723_s1 + $0xb50] sm:$0xff]  ;;  %v31493_v32 = vld [vmem:[%s41723_s1 + $0xb80] sm:$0xff] }
 0x14b   :  { %18600 = vmatpush.bf16.msra.mxu2 %v31466_v37  ;;  %v31492_v37 = vld [vmem:[%s41723_s1 + $0xb78] sm:$0xff]  ;;  %v31503_v13 = vld [vmem:[%s41723_s1 + $0xbd0] sm:$0xff] }
 0x14c   :  { %18586 = vmatpush.bf16.msra.mxu1 %v31458_v39  ;;  %v31508_v39 = vld [vmem:[%s41723_s1 + $0xbf8] sm:$0xff] }
 0x14d   :  { %18614 = vmatpush.bf16.msra.mxu3 %v31474_v40  ;;  %v21783_v40 = vor.u32 %v30888_v22, %v21780_v26  ;;  %v31486_v22 = vld [vmem:[%s41723_s1 + $0xb48] sm:$0xff] }
 0x14e   :  { %18573 = vmatpush.bf16.msra.mxu0 %v31449_v43  ;;  %v31483_v43 = vld [vmem:[%s41723_s1 + $0xb30] sm:$0xff]  ;;  %v31502_v26 = vld [vmem:[%s41723_s1 + $0xbc8] sm:$0xff] }
 0x14f   :  { %18601 = vmatpush.bf16.msra.mxu2 %v31465_v44  ;;  %v31499_v44 = vld [vmem:[%s41723_s1 + $0xbb0] sm:$0xff] }
 0x150   :  { %18587 = vmatpush.bf16.msra.mxu1 %v31457_v47  ;;  %v34611_v47 = vpop.f32.mrf.mxu2 }
 0x151   :  { %18615 = vmatpush.bf16.msra.mxu3 %v31473_v48  ;;  %v31482_v48 = vld [vmem:[%s41723_s1 + $0xb28] sm:$0xff] }
 0x152   :  { %18574 = vmatpush.bf16.msra.mxu0 %v31448_v49  ;;  %v31498_v49 = vld [vmem:[%s41723_s1 + $0xba8] sm:$0xff] }
 0x153   :  { %18602 = vmatpush.bf16.msra.mxu2 %v31464_v50  ;;  %v34619_v50 = vpop.f32.mrf.mxu3 }
 0x154   :  { %18588 = vmatpush.bf16.msra.mxu1 %v31456_v53 }
 0x155   :  { %18616 = vmatpush.bf16.msra.mxu3 %v31472_v54 }
 0x156   :  { %18575 = vmatpush.bf16.msra.mxu0 %v31447_v57  ;;  %v31497_v57 = vld [vmem:[%s41723_s1 + $0xba0] sm:$0xff] }
 0x157   :  { %18603 = vmatpush.bf16.msra.mxu2 %v31463_v58 }
 0x158   :  { %18589 = vmatpush.bf16.msra.mxu1 %v31455_v59 }
 0x159   :  { %18617 = vmatpush.bf16.msra.mxu3 %v31471_v60  ;;  %v31489_v60 = vld [vmem:[%s41723_s1 + $0xb60] sm:$0xff] }
 0x15a   :  { %18576 = vmatpush.bf16.msra.mxu0 %v31446_v61  ;;  %v31480_v61 = vld [vmem:[%s41723_s1 + $0xb18] sm:$0xff] }
 0x15b   :  { %18604 = vmatpush.bf16.msra.mxu2 %v31462_v62  ;;  %v31496_v62 = vld [vmem:[%s41723_s1 + $0xb98] sm:$0xff] }
 0x15c   :  { %18590 = vmatpush.bf16.msra.mxu1 %v31454_v63 }
 0x15d   :  { %18618 = vmatpush.bf16.msra.mxu3 %v31470_v0 }
 0x15e   :  { %18577 = vmatpush.bf16.msra.mxu0 %v31445_v1  ;;  %v18355_v53 = vpop.f32.mrf.mxu0  ;;  %v31488_v1 = vld [vmem:[%s41723_s1 + $0xb58] sm:$0xff] }
 0x15f   :  { %18605 = vmatpush.bf16.msra.mxu2 %v31461_v2  ;;  %v18356_v54 = vadd.f32 %v18355_v53, %v34521_v56  ;;  %v31505_v56 = vld [vmem:[%s41723_s1 + $0xbe0] sm:$0xff]  ;;  %v31504_v2 = vld [vmem:[%s41723_s1 + $0xbd8] sm:$0xff] }
 0x160   :  { %18591 = vmatpush.bf16.msra.mxu1 %v31453_v17  ;;  %v18369_v58 = vpop.f32.mrf.mxu1  ;;  %v31478_v17 = vld [vmem:[%s41723_s1 + $0xb08] sm:$0xff] }
 0x161   :  { %18619 = vmatpush.bf16.msra.mxu3 %v31469_v19  ;;  %18578 = vmatmul.bf16.vlgmr.msra.gmra.mxu0 %v21779_v33  ;;  %v18370_v59 = vadd.f32 %v18369_v58, %v18356_v54  ;;  %v31494_v19 = vld [vmem:[%s41723_s1 + $0xb88] sm:$0xff]  ;;  %v31516_v33 = vld [vmem:[%s41723_s1 + $0xc38] sm:$0xff] }
 0x162   :  { %18626 = vmatpush.bf16.msrb.mxu0 %v31484_v3  ;;  %18606 = vmatmul.bf16.vlgmr.msra.gmra.mxu2 %v21787_v34  ;;  %v31532_v34 = vld [vmem:[%s41723_s1 + $0xcb8] sm:$0xff] }
 0x163   :  { %18654 = vmatpush.bf16.msrb.mxu2 %v31500_v4  ;;  %18592 = vmatmul.bf16.vlgmr.msra.gmra.mxu1 %v21783_v40  ;;  %v21802_v40 = vld [vmem:[%s41724_s0 + $0xb8] sm:$0xf] }
 0x164   :  { %18640 = vmatpush.bf16.msrb.mxu1 %v31492_v37  ;;  %18620 = vmatmul.bf16.vlgmr.msra.gmra.mxu3 %v21791_v41  ;;  %v21794_v37 = vld [vmem:[%s41724_s0 + $0xb0] sm:$0xf]  ;;  %v31019_v41 = vld [vmem:[%s41724_s0 + $0x4b8] sm:$0x70] }
 0x165   :  { %18668 = vmatpush.bf16.msrb.mxu3 %v31508_v39  ;;  %v18383_v63 = vpop.f32.mrf.mxu2  ;;  %v31018_v39 = vld [vmem:[%s41724_s0 + $0x4b0] sm:$0x70]  ;;  %v31524_v54 = vld [vmem:[%s41723_s1 + $0xc78] sm:$0xff] }
 0x166   :  { %18627 = vmatpush.bf16.msrb.mxu0 %v31483_v43  ;;  %v18384_v0 = vadd.f32 %v18383_v63, %v18370_v59  ;;  %v31485_v43 = vld [vmem:[%s41723_s1 + $0xb40] sm:$0xff]  ;;  %v34720_v53 = vpop.f32.mrf.mxu0 }
 0x167   :  { %18655 = vmatpush.bf16.msrb.mxu2 %v31499_v44  ;;  %v18397_v3 = vpop.f32.mrf.mxu3  ;;  %v31501_v44 = vld [vmem:[%s41723_s1 + $0xbc0] sm:$0xff] }
 0x168   :  { %18641 = vmatpush.bf16.msrb.mxu1 %v31491_v45  ;;  %v34652_v4 = vadd.f32 %v18397_v3, %v18384_v0  ;;  %v30890_v45 = vld [vmem:[%s41724_s0 + $0xb4] sm:$0xf]  ;;  %v34728_v59 = vpop.f32.mrf.mxu1  ;;  %v31514_v0 = vld [vmem:[%s41723_s1 + $0xc28] sm:$0xff] }
 0x169   :  { %18669 = vmatpush.bf16.msrb.mxu3 %v31507_v46  ;;  %v21796_v46 = vld [vmem:[%s41724_s0 + $0x4b4] sm:$0x70]  ;;  %v31522_v3 = vld [vmem:[%s41723_s1 + $0xc68] sm:$0xff] }
 0x16a   :  { %18628 = vmatpush.bf16.msrb.mxu0 %v31482_v48  ;;  %v30891_v48 = vld [vmem:[%s41724_s0 + $0xbc] sm:$0xf] }
 0x16b   :  { %18656 = vmatpush.bf16.msrb.mxu2 %v31498_v49  ;;  %v21804_v49 = vld [vmem:[%s41724_s0 + $0x4bc] sm:$0x70] }
 0x16c   :  { %18642 = vmatpush.bf16.msrb.mxu1 %v31490_v51  ;;  %v21795_v51 = vor.u32 %v31018_v39, %v21794_v37  ;;  %v21807_v58 = vor.u32 %v30891_v48, %v21804_v49  ;;  %v31520_v37 = vld [vmem:[%s41723_s1 + $0xc58] sm:$0xff]  ;;  %v31510_v48 = vld [vmem:[%s41723_s1 + $0xc08] sm:$0xff] }
 0x16d   :  { %18670 = vmatpush.bf16.msrb.mxu3 %v31506_v52  ;;  %v21803_v52 = vor.u32 %v31019_v41, %v21802_v40  ;;  %v34742_v63 = vpop.f32.mrf.mxu2  ;;  %v31536_v39 = vld [vmem:[%s41723_s1 + $0xcd8] sm:$0xff]  ;;  %v31526_v49 = vld [vmem:[%s41723_s1 + $0xc88] sm:$0xff] }
 0x16e   :  { %18629 = vmatpush.bf16.msrb.mxu0 %v31481_v55  ;;  %v31540_v55 = vld [vmem:[%s41723_s1 + $0xcf8] sm:$0xff] }
 0x16f   :  { %18657 = vmatpush.bf16.msrb.mxu2 %v31497_v57  ;;  %v21799_v57 = vor.u32 %v30890_v45, %v21796_v46  ;;  %v31519_v45 = vld [vmem:[%s41723_s1 + $0xc50] sm:$0xff] }
 0x170   :  { %18643 = vmatpush.bf16.msrb.mxu1 %v31489_v60  ;;  %v31515_v60 = vld [vmem:[%s41723_s1 + $0xc30] sm:$0xff] }
 0x171   :  { %18671 = vmatpush.bf16.msrb.mxu3 %v31505_v56  ;;  %v31531_v56 = vld [vmem:[%s41723_s1 + $0xcb0] sm:$0xff] }
 0x172   :  { %18630 = vmatpush.bf16.msrb.mxu0 %v31480_v61  ;;  %v31523_v61 = vld [vmem:[%s41723_s1 + $0xc70] sm:$0xff] }
 0x173   :  { %18658 = vmatpush.bf16.msrb.mxu2 %v31496_v62  ;;  %v31539_v62 = vld [vmem:[%s41723_s1 + $0xcf0] sm:$0xff] }
 0x174   :  { %18644 = vmatpush.bf16.msrb.mxu1 %v31488_v1  ;;  %v31530_v1 = vld [vmem:[%s41723_s1 + $0xca8] sm:$0xff]  ;;  %v31535_v46 = vld [vmem:[%s41723_s1 + $0xcd0] sm:$0xff] }
 0x175   :  { %18672 = vmatpush.bf16.msrb.mxu3 %v31504_v2  ;;  %v34750_v2 = vpop.f32.mrf.mxu3 }
 0x176   :  { %18631 = vmatpush.bf16.msrb.mxu0 %v31479_v7  ;;  %v31538_v7 = vld [vmem:[%s41723_s1 + $0xce8] sm:$0xff] }
 0x177   :  { %18659 = vmatpush.bf16.msrb.mxu2 %v31495_v8 }
 0x178   :  { %18645 = vmatpush.bf16.msrb.mxu1 %v31487_v10 }
 0x179   :  { %18673 = vmatpush.bf16.msrb.mxu3 %v31503_v13  ;;  %v31513_v13 = vld [vmem:[%s41723_s1 + $0xc20] sm:$0xff] }
 0x17a   :  { %18632 = vmatpush.bf16.msrb.mxu0 %v31478_v17  ;;  %v31529_v17 = vld [vmem:[%s41723_s1 + $0xca0] sm:$0xff] }
 0x17b   :  { %18660 = vmatpush.bf16.msrb.mxu2 %v31494_v19 }
 0x17c   :  { %18646 = vmatpush.bf16.msrb.mxu1 %v31486_v22 }
 0x17d   :  { %18674 = vmatpush.bf16.msrb.mxu3 %v31502_v26  ;;  %v31521_v26 = vld [vmem:[%s41723_s1 + $0xc60] sm:$0xff] }
 0x17e   :  { %18633 = vmatpush.bf16.msrb.mxu0 %v31477_v31  ;;  %v18411_v8 = vpop.f32.mrf.mxu0  ;;  %v31512_v31 = vld [vmem:[%s41723_s1 + $0xc18] sm:$0xff] }
 0x17f   :  { %18661 = vmatpush.bf16.msrb.mxu2 %v31493_v32  ;;  %v18412_v10 = vadd.f32 %v18411_v8, %v34652_v4  ;;  %v31537_v4 = vld [vmem:[%s41723_s1 + $0xce0] sm:$0xff]  ;;  %v31528_v32 = vld [vmem:[%s41723_s1 + $0xc98] sm:$0xff]  ;;  %v30893_v8 = vld [vmem:[%s41724_s0 + $0xcc] sm:$0xf] }
 0x180   :  { %18647 = vmatpush.bf16.msrb.mxu1 %v31485_v43  ;;  %v18425_v19 = vpop.f32.mrf.mxu1  ;;  %v31511_v43 = vld [vmem:[%s41723_s1 + $0xc10] sm:$0xff] }
 0x181   :  { %18675 = vmatpush.bf16.msrb.mxu3 %v31501_v44  ;;  %18634 = vmatmul.bf16.vlgmr.msrb.gmra.mxu0 %v21795_v51  ;;  %v18426_v22 = vadd.f32 %v18425_v19, %v18412_v10  ;;  %v31527_v44 = vld [vmem:[%s41723_s1 + $0xc90] sm:$0xff]  ;;  %v31518_v51 = vld [vmem:[%s41723_s1 + $0xc48] sm:$0xff] }
 0x182   :  { %18682 = vmatpush.bf16.msra.mxu0 %v31516_v33  ;;  %18662 = vmatmul.bf16.vlgmr.msrb.gmra.mxu2 %v21803_v52  ;;  %v31534_v52 = vld [vmem:[%s41723_s1 + $0xcc8] sm:$0xff]  ;;  %v21820_v10 = vld [vmem:[%s41724_s0 + $0x4cc] sm:$0x70] }
 0x183   :  { %18710 = vmatpush.bf16.msra.mxu2 %v31532_v34  ;;  %18648 = vmatmul.bf16.vlgmr.msrb.gmra.mxu1 %v21799_v57  ;;  %v31548_v57 = vld [vmem:[%s41723_s1 + $0xd38] sm:$0xff] }
 0x184   :  { %18696 = vmatpush.bf16.msra.mxu1 %v31524_v54  ;;  %18676 = vmatmul.bf16.vlgmr.msrb.gmra.mxu3 %v21807_v58  ;;  %v31509_v54 = vld [vmem:[%s41723_s1 + $0xc00] sm:$0xff]  ;;  %v31564_v58 = vld [vmem:[%s41723_s1 + $0xdb8] sm:$0xff] }
 0x185   :  { %18724 = vmatpush.bf16.msra.mxu3 %v31540_v55  ;;  %v18439_v33 = vpop.f32.mrf.mxu2  ;;  %v31525_v55 = vld [vmem:[%s41723_s1 + $0xc80] sm:$0xff] }
 0x186   :  { %18683 = vmatpush.bf16.msra.mxu0 %v31515_v60  ;;  %v18440_v34 = vadd.f32 %v18439_v33, %v18426_v22  ;;  %v21810_v60 = vld [vmem:[%s41724_s0 + $0xc0] sm:$0xf]  ;;  %v34851_v19 = vpop.f32.mrf.mxu0  ;;  %v31556_v22 = vld [vmem:[%s41723_s1 + $0xd78] sm:$0xff]  ;;  %v31547_v33 = vld [vmem:[%s41723_s1 + $0xd30] sm:$0xff] }
 0x187   :  { %18711 = vmatpush.bf16.msra.mxu2 %v31531_v56  ;;  %v18453_v40 = vpop.f32.mrf.mxu3  ;;  %v31020_v56 = vld [vmem:[%s41724_s0 + $0x4c0] sm:$0x70] }
 0x188   :  { %18697 = vmatpush.bf16.msra.mxu1 %v31523_v61  ;;  %v34783_v41 = vadd.f32 %v18453_v40, %v18440_v34  ;;  %v21818_v61 = vld [vmem:[%s41724_s0 + $0xc8] sm:$0xf]  ;;  %v31563_v34 = vld [vmem:[%s41723_s1 + $0xdb0] sm:$0xff] }
 0x189   :  { %18725 = vmatpush.bf16.msra.mxu3 %v31539_v62  ;;  %v31021_v62 = vld [vmem:[%s41724_s0 + $0x4c8] sm:$0x70] }
 0x18a   :  { %18684 = vmatpush.bf16.msra.mxu0 %v31514_v0  ;;  %v31517_v0 = vld [vmem:[%s41723_s1 + $0xc40] sm:$0xff] }
 0x18b   :  { %18712 = vmatpush.bf16.msra.mxu2 %v31530_v1  ;;  %v31533_v1 = vld [vmem:[%s41723_s1 + $0xcc0] sm:$0xff] }
 0x18c   :  { %18698 = vmatpush.bf16.msra.mxu1 %v31522_v3  ;;  %v30892_v3 = vld [vmem:[%s41724_s0 + $0xc4] sm:$0xf] }
 0x18d   :  { %18726 = vmatpush.bf16.msra.mxu3 %v31538_v7  ;;  %v21812_v7 = vld [vmem:[%s41724_s0 + $0x4c4] sm:$0x70]  ;;  %v34873_v40 = vpop.f32.mrf.mxu2 }
 0x18e   :  { %18685 = vmatpush.bf16.msra.mxu0 %v31513_v13  ;;  %v21811_v13 = vor.u32 %v31020_v56, %v21810_v60  ;;  %v31544_v60 = vld [vmem:[%s41723_s1 + $0xd18] sm:$0xff] }
 0x18f   :  { %18713 = vmatpush.bf16.msra.mxu2 %v31529_v17  ;;  %v21819_v17 = vor.u32 %v31021_v62, %v21818_v61  ;;  %v31560_v56 = vld [vmem:[%s41723_s1 + $0xd98] sm:$0xff] }
 0x190   :  { %18699 = vmatpush.bf16.msra.mxu1 %v31521_v26  ;;  %v31572_v26 = vld [vmem:[%s41723_s1 + $0xdf8] sm:$0xff] }
 0x191   :  { %18727 = vmatpush.bf16.msra.mxu3 %v31537_v4  ;;  %v21815_v4 = vor.u32 %v30892_v3, %v21812_v7 }
 0x192   :  { %18686 = vmatpush.bf16.msra.mxu0 %v31512_v31  ;;  %v21823_v31 = vor.u32 %v30893_v8, %v21820_v10  ;;  %v31543_v8 = vld [vmem:[%s41723_s1 + $0xd10] sm:$0xff] }
 0x193   :  { %18714 = vmatpush.bf16.msra.mxu2 %v31528_v32  ;;  %v34859_v32 = vpop.f32.mrf.mxu1  ;;  %v31559_v10 = vld [vmem:[%s41723_s1 + $0xd90] sm:$0xff] }
 0x194   :  { %18700 = vmatpush.bf16.msra.mxu1 %v31520_v37  ;;  %v31555_v37 = vld [vmem:[%s41723_s1 + $0xd70] sm:$0xff] }
 0x195   :  { %18728 = vmatpush.bf16.msra.mxu3 %v31536_v39  ;;  %v31571_v39 = vld [vmem:[%s41723_s1 + $0xdf0] sm:$0xff] }
 0x196   :  { %18687 = vmatpush.bf16.msra.mxu0 %v31511_v43  ;;  %v31546_v43 = vld [vmem:[%s41723_s1 + $0xd28] sm:$0xff] }
 0x197   :  { %18715 = vmatpush.bf16.msra.mxu2 %v31527_v44  ;;  %v31562_v44 = vld [vmem:[%s41723_s1 + $0xda8] sm:$0xff] }
 0x198   :  { %18701 = vmatpush.bf16.msra.mxu1 %v31519_v45  ;;  %v34881_v45 = vpop.f32.mrf.mxu3 }
 0x199   :  { %18729 = vmatpush.bf16.msra.mxu3 %v31535_v46  ;;  %v31554_v46 = vld [vmem:[%s41723_s1 + $0xd68] sm:$0xff] }
 0x19a   :  { %18688 = vmatpush.bf16.msra.mxu0 %v31510_v48  ;;  %v31570_v48 = vld [vmem:[%s41723_s1 + $0xde8] sm:$0xff] }
 0x19b   :  { %18716 = vmatpush.bf16.msra.mxu2 %v31526_v49 }
 0x19c   :  { %18702 = vmatpush.bf16.msra.mxu1 %v31518_v51 }
 0x19d   :  { %18730 = vmatpush.bf16.msra.mxu3 %v31534_v52  ;;  %v31545_v52 = vld [vmem:[%s41723_s1 + $0xd20] sm:$0xff] }
 0x19e   :  { %18689 = vmatpush.bf16.msra.mxu0 %v31509_v54  ;;  %v18467_v49 = vpop.f32.mrf.mxu0  ;;  %v31561_v54 = vld [vmem:[%s41723_s1 + $0xda0] sm:$0xff] }
 0x19f   :  { %18717 = vmatpush.bf16.msra.mxu2 %v31525_v55  ;;  %v18468_v51 = vadd.f32 %v18467_v49, %v34783_v41  ;;  %v31569_v41 = vld [vmem:[%s41723_s1 + $0xde0] sm:$0xff] }
 0x1a0   :  { %18703 = vmatpush.bf16.msra.mxu1 %v31517_v0  ;;  %v18481_v55 = vpop.f32.mrf.mxu1  ;;  %v31552_v0 = vld [vmem:[%s41723_s1 + $0xd58] sm:$0xff]  ;;  %v31549_v49 = vld [vmem:[%s41723_s1 + $0xd40] sm:$0xff] }
 0x1a1   :  { %18731 = vmatpush.bf16.msra.mxu3 %v31533_v1  ;;  %18690 = vmatmul.bf16.vlgmr.msra.gmra.mxu0 %v21811_v13  ;;  %v31568_v1 = vld [vmem:[%s41723_s1 + $0xdd8] sm:$0xff]  ;;  %v31551_v13 = vld [vmem:[%s41723_s1 + $0xd50] sm:$0xff] }
 0x1a2   :  { %18738 = vmatpush.bf16.msrb.mxu0 %v31548_v57  ;;  %18718 = vmatmul.bf16.vlgmr.msra.gmra.mxu2 %v21819_v17  ;;  %v18482_v57 = vadd.f32 %v18481_v55, %v18468_v51  ;;  %v31567_v17 = vld [vmem:[%s41723_s1 + $0xdd0] sm:$0xff]  ;;  %v31565_v51 = vld [vmem:[%s41723_s1 + $0xdc0] sm:$0xff]  ;;  %v30895_v55 = vld [vmem:[%s41724_s0 + $0xdc] sm:$0xf] }
 0x1a3   :  { %18766 = vmatpush.bf16.msrb.mxu2 %v31564_v58  ;;  %18704 = vmatmul.bf16.vlgmr.msra.gmra.mxu1 %v21815_v4  ;;  %v31553_v58 = vld [vmem:[%s41723_s1 + $0xd60] sm:$0xff]  ;;  %v31550_v4 = vld [vmem:[%s41723_s1 + $0xd48] sm:$0xff] }
 0x1a4   :  { %18752 = vmatpush.bf16.msrb.mxu1 %v31556_v22  ;;  %18732 = vmatmul.bf16.vlgmr.msra.gmra.mxu3 %v21823_v31  ;;  %v31542_v22 = vld [vmem:[%s41723_s1 + $0xd08] sm:$0xff] }
 0x1a5   :  { %18780 = vmatpush.bf16.msrb.mxu3 %v31572_v26  ;;  %v18495_v61 = vpop.f32.mrf.mxu2  ;;  %v31558_v26 = vld [vmem:[%s41723_s1 + $0xd88] sm:$0xff] }
 0x1a6   :  { %18739 = vmatpush.bf16.msrb.mxu0 %v31547_v33  ;;  %v18496_v62 = vadd.f32 %v18495_v61, %v18482_v57  ;;  %v31566_v31 = vld [vmem:[%s41723_s1 + $0xdc8] sm:$0xff]  ;;  %v31541_v33 = vld [vmem:[%s41723_s1 + $0xd00] sm:$0xff]  ;;  %v31604_v61 = vld [vmem:[%s41723_s1 + $0xef8] sm:$0xff] }
 0x1a7   :  { %18767 = vmatpush.bf16.msrb.mxu2 %v31563_v34  ;;  %v18509_v3 = vpop.f32.mrf.mxu3  ;;  %v31557_v34 = vld [vmem:[%s41723_s1 + $0xd80] sm:$0xff] }
 0x1a8   :  { %18753 = vmatpush.bf16.msrb.mxu1 %v31555_v37  ;;  %v34914_v7 = vadd.f32 %v18509_v3, %v18496_v62  ;;  %v31580_v37 = vld [vmem:[%s41723_s1 + $0xe38] sm:$0xff]  ;;  %v21836_v57 = vld [vmem:[%s41724_s0 + $0x4dc] sm:$0x70]  ;;  %v31579_v3 = vld [vmem:[%s41723_s1 + $0xe30] sm:$0xff] }
 0x1a9   :  { %18781 = vmatpush.bf16.msrb.mxu3 %v31571_v39  ;;  %v31596_v39 = vld [vmem:[%s41723_s1 + $0xeb8] sm:$0xff] }
 0x1aa   :  { %18740 = vmatpush.bf16.msrb.mxu0 %v31546_v43  ;;  %v21826_v43 = vld [vmem:[%s41724_s0 + $0xd0] sm:$0xf] }
 0x1ab   :  { %18768 = vmatpush.bf16.msrb.mxu2 %v31562_v44  ;;  %v31022_v44 = vld [vmem:[%s41724_s0 + $0x4d0] sm:$0x70] }
 0x1ac   :  { %18754 = vmatpush.bf16.msrb.mxu1 %v31554_v46  ;;  %v21834_v46 = vld [vmem:[%s41724_s0 + $0xd8] sm:$0xf] }
 0x1ad   :  { %18782 = vmatpush.bf16.msrb.mxu3 %v31570_v48  ;;  %v31023_v48 = vld [vmem:[%s41724_s0 + $0x4d8] sm:$0x70] }
 0x1ae   :  { %18741 = vmatpush.bf16.msrb.mxu0 %v31545_v52  ;;  %v30894_v52 = vld [vmem:[%s41724_s0 + $0xd4] sm:$0xf] }
 0x1af   :  { %18769 = vmatpush.bf16.msrb.mxu2 %v31561_v54  ;;  %v21828_v54 = vld [vmem:[%s41724_s0 + $0x4d4] sm:$0x70] }
 0x1b0   :  { %18755 = vmatpush.bf16.msrb.mxu1 %v31553_v58  ;;  %v21827_v58 = vor.u32 %v31022_v44, %v21826_v43  ;;  %v21831_v62 = vor.u32 %v30894_v52, %v21828_v54  ;;  %v31593_v43 = vld [vmem:[%s41723_s1 + $0xea0] sm:$0xff] }
 0x1b1   :  { %18783 = vmatpush.bf16.msrb.mxu3 %v31569_v41  ;;  %v21835_v41 = vor.u32 %v31023_v48, %v21834_v46  ;;  %v31585_v48 = vld [vmem:[%s41723_s1 + $0xe60] sm:$0xff] }
 0x1b2   :  { %18742 = vmatpush.bf16.msrb.mxu0 %v31544_v60  ;;  %v34982_v60 = vpop.f32.mrf.mxu0 }
 0x1b3   :  { %18770 = vmatpush.bf16.msrb.mxu2 %v31560_v56  ;;  %v31588_v56 = vld [vmem:[%s41723_s1 + $0xe78] sm:$0xff] }
 0x1b4   :  { %18756 = vmatpush.bf16.msrb.mxu1 %v31552_v0  ;;  %v21839_v0 = vor.u32 %v30895_v55, %v21836_v57  ;;  %v31584_v55 = vld [vmem:[%s41723_s1 + $0xe58] sm:$0xff] }
 0x1b5   :  { %18784 = vmatpush.bf16.msrb.mxu3 %v31568_v1  ;;  %v34990_v1 = vpop.f32.mrf.mxu1  ;;  %v31600_v57 = vld [vmem:[%s41723_s1 + $0xed8] sm:$0xff] }
 0x1b6   :  { %18743 = vmatpush.bf16.msrb.mxu0 %v31543_v8  ;;  %v31595_v8 = vld [vmem:[%s41723_s1 + $0xeb0] sm:$0xff] }
 0x1b7   :  { %18771 = vmatpush.bf16.msrb.mxu2 %v31559_v10  ;;  %v31587_v10 = vld [vmem:[%s41723_s1 + $0xe70] sm:$0xff] }
 0x1b8   :  { %18757 = vmatpush.bf16.msrb.mxu1 %v31551_v13  ;;  %v31603_v13 = vld [vmem:[%s41723_s1 + $0xef0] sm:$0xff] }
 0x1b9   :  { %18785 = vmatpush.bf16.msrb.mxu3 %v31567_v17  ;;  %v35004_v17 = vpop.f32.mrf.mxu2 }
 0x1ba   :  { %18744 = vmatpush.bf16.msrb.mxu0 %v31542_v22  ;;  %v31578_v22 = vld [vmem:[%s41723_s1 + $0xe28] sm:$0xff] }
 0x1bb   :  { %18772 = vmatpush.bf16.msrb.mxu2 %v31558_v26  ;;  %v31594_v26 = vld [vmem:[%s41723_s1 + $0xea8] sm:$0xff] }
 0x1bc   :  { %18758 = vmatpush.bf16.msrb.mxu1 %v31550_v4  ;;  %v35012_v4 = vpop.f32.mrf.mxu3 }
 0x1bd   :  { %18786 = vmatpush.bf16.msrb.mxu3 %v31566_v31  ;;  %v31586_v31 = vld [vmem:[%s41723_s1 + $0xe68] sm:$0xff] }
 0x1be   :  { %18745 = vmatpush.bf16.msrb.mxu0 %v31541_v33  ;;  %v31602_v33 = vld [vmem:[%s41723_s1 + $0xee8] sm:$0xff] }
 0x1bf   :  { %18773 = vmatpush.bf16.msrb.mxu2 %v31557_v34  ;;  %v18523_v34 = vpop.f32.mrf.mxu0 }
 0x1c0   :  { %18759 = vmatpush.bf16.msrb.mxu1 %v31549_v49  ;;  %v18537_v44 = vpop.f32.mrf.mxu1  ;;  %v31576_v49 = vld [vmem:[%s41723_s1 + $0xe18] sm:$0xff] }
 0x1c1   :  { %18787 = vmatpush.bf16.msrb.mxu3 %v31565_v51  ;;  %18746 = vmatmul.bf16.vlgmr.msrb.gmra.mxu0 %v21827_v58  ;;  %v31592_v51 = vld [vmem:[%s41723_s1 + $0xe98] sm:$0xff] }
 0x1c2   :  { %18794 = vmatpush.bf16.msra.mxu0 %v31580_v37  ;;  %18774 = vmatmul.bf16.vlgmr.msrb.gmra.mxu2 %v21835_v41  ;;  %v18524_v37 = vadd.f32 %v18523_v34, %v34914_v7  ;;  %v31601_v7 = vld [vmem:[%s41723_s1 + $0xee0] sm:$0xff] }
 0x1c3   :  { %18822 = vmatpush.bf16.msra.mxu2 %v31596_v39  ;;  %18760 = vmatmul.bf16.vlgmr.msrb.gmra.mxu1 %v21831_v62  ;;  %v31577_v39 = vld [vmem:[%s41723_s1 + $0xe20] sm:$0xff]  ;;  %v31583_v62 = vld [vmem:[%s41723_s1 + $0xe50] sm:$0xff] }
 0x1c4   :  { %18808 = vmatpush.bf16.msra.mxu1 %v31588_v56  ;;  %18788 = vmatmul.bf16.vlgmr.msrb.gmra.mxu3 %v21839_v0  ;;  %v18538_v46 = vadd.f32 %v18537_v44, %v18524_v37  ;;  %v31575_v56 = vld [vmem:[%s41723_s1 + $0xe10] sm:$0xff]  ;;  %v21842_v34 = vld [vmem:[%s41724_s0 + $0xe0] sm:$0xf]  ;;  %v31024_v37 = vld [vmem:[%s41724_s0 + $0x4e0] sm:$0x70] }
 0x1c5   :  { %18836 = vmatpush.bf16.msra.mxu3 %v31604_v61  ;;  %v18551_v52 = vpop.f32.mrf.mxu2  ;;  %v31591_v61 = vld [vmem:[%s41723_s1 + $0xe90] sm:$0xff]  ;;  %v31581_v44 = vld [vmem:[%s41723_s1 + $0xe40] sm:$0xff] }
 0x1c6   :  { %18795 = vmatpush.bf16.msra.mxu0 %v31579_v3  ;;  %v18552_v54 = vadd.f32 %v18551_v52, %v18538_v46  ;;  %v31599_v0 = vld [vmem:[%s41723_s1 + $0xed0] sm:$0xff]  ;;  %v31574_v3 = vld [vmem:[%s41723_s1 + $0xe08] sm:$0xff]  ;;  %v31597_v46 = vld [vmem:[%s41723_s1 + $0xec0] sm:$0xff]  ;;  %v21843_v52 = vor.u32 %v31024_v37, %v21842_v34 }
 0x1c7   :  { %18823 = vmatpush.bf16.msra.mxu2 %v31595_v8  ;;  %v18565_v58 = vpop.f32.mrf.mxu3  ;;  %v31590_v8 = vld [vmem:[%s41723_s1 + $0xe88] sm:$0xff] }
 0x1c8   :  { %18809 = vmatpush.bf16.msra.mxu1 %v31587_v10  ;;  %v35045_v41 = vadd.f32 %v18565_v58, %v18552_v54  ;;  %v31582_v10 = vld [vmem:[%s41723_s1 + $0xe48] sm:$0xff]  ;;  %v31636_v58 = vld [vmem:[%s41723_s1 + $0xff8] sm:$0xff] }
 0x1c9   :  { %18837 = vmatpush.bf16.msra.mxu3 %v31603_v13  ;;  %v31598_v13 = vld [vmem:[%s41723_s1 + $0xec8] sm:$0xff] }
 0x1ca   :  { %18796 = vmatpush.bf16.msra.mxu0 %v31578_v22  ;;  %v31573_v22 = vld [vmem:[%s41723_s1 + $0xe00] sm:$0xff]  ;;  %v31634_v34 = vld [vmem:[%s41723_s1 + $0xfe8] sm:$0xff] }
 0x1cb   :  { %18824 = vmatpush.bf16.msra.mxu2 %v31594_v26  ;;  %v31589_v26 = vld [vmem:[%s41723_s1 + $0xe80] sm:$0xff] }
 0x1cc   :  { %18810 = vmatpush.bf16.msra.mxu1 %v31586_v31  ;;  %v31612_v31 = vld [vmem:[%s41723_s1 + $0xf38] sm:$0xff] }
 0x1cd   :  { %18838 = vmatpush.bf16.msra.mxu3 %v31602_v33  ;;  %v31628_v33 = vld [vmem:[%s41723_s1 + $0xfb8] sm:$0xff] }
 0x1ce   :  { %18797 = vmatpush.bf16.msra.mxu0 %v31577_v39  ;;  %v21850_v39 = vld [vmem:[%s41724_s0 + $0xe8] sm:$0xf] }
 0x1cf   :  { %18825 = vmatpush.bf16.msra.mxu2 %v31593_v43  ;;  %v31025_v43 = vld [vmem:[%s41724_s0 + $0x4e8] sm:$0x70] }
 0x1d0   :  { %18811 = vmatpush.bf16.msra.mxu1 %v31585_v48  ;;  %v30896_v48 = vld [vmem:[%s41724_s0 + $0xe4] sm:$0xf]  ;;  %v21851_v54 = vor.u32 %v31025_v43, %v21850_v39 }
 0x1d1   :  { %18839 = vmatpush.bf16.msra.mxu3 %v31601_v7  ;;  %v21844_v7 = vld [vmem:[%s41724_s0 + $0x4e4] sm:$0x70]  ;;  %v31609_v43 = vld [vmem:[%s41723_s1 + $0xf20] sm:$0xff] }
 0x1d2   :  { %18798 = vmatpush.bf16.msra.mxu0 %v31576_v49  ;;  %v30897_v49 = vld [vmem:[%s41724_s0 + $0xec] sm:$0xf] }
 0x1d3   :  { %18826 = vmatpush.bf16.msra.mxu2 %v31592_v51  ;;  %v21852_v51 = vld [vmem:[%s41724_s0 + $0x4ec] sm:$0x70] }
 0x1d4   :  { %18812 = vmatpush.bf16.msra.mxu1 %v31584_v55  ;;  %v35113_v55 = vpop.f32.mrf.mxu0 }
 0x1d5   :  { %18840 = vmatpush.bf16.msra.mxu3 %v31600_v57  ;;  %v31620_v57 = vld [vmem:[%s41723_s1 + $0xf78] sm:$0xff] }
 0x1d6   :  { %18799 = vmatpush.bf16.msra.mxu0 %v31575_v56  ;;  %v21847_v56 = vor.u32 %v30896_v48, %v21844_v7  ;;  %v31617_v7 = vld [vmem:[%s41723_s1 + $0xf60] sm:$0xff] }
 0x1d7   :  { %18827 = vmatpush.bf16.msra.mxu2 %v31591_v61  ;;  %v21855_v61 = vor.u32 %v30897_v49, %v21852_v51  ;;  %v31608_v49 = vld [vmem:[%s41723_s1 + $0xf18] sm:$0xff] }
 0x1d8   :  { %18813 = vmatpush.bf16.msra.mxu1 %v31583_v62  ;;  %v35121_v62 = vpop.f32.mrf.mxu1  ;;  %v31624_v51 = vld [vmem:[%s41723_s1 + $0xf98] sm:$0xff] }
 0x1d9   :  { %18841 = vmatpush.bf16.msra.mxu3 %v31599_v0  ;;  %v31611_v0 = vld [vmem:[%s41723_s1 + $0xf30] sm:$0xff] }
 0x1da   :  { %18800 = vmatpush.bf16.msra.mxu0 %v31574_v3  ;;  %v31627_v3 = vld [vmem:[%s41723_s1 + $0xfb0] sm:$0xff] }
 0x1db   :  { %18828 = vmatpush.bf16.msra.mxu2 %v31590_v8  ;;  %v31619_v8 = vld [vmem:[%s41723_s1 + $0xf70] sm:$0xff] }
 0x1dc   :  { %18814 = vmatpush.bf16.msra.mxu1 %v31582_v10  ;;  %v31635_v10 = vld [vmem:[%s41723_s1 + $0xff0] sm:$0xff] }
 0x1dd   :  { %18842 = vmatpush.bf16.msra.mxu3 %v31598_v13  ;;  %v35135_v13 = vpop.f32.mrf.mxu2 }
 0x1de   :  { %18801 = vmatpush.bf16.msra.mxu0 %v31573_v22  ;;  %v31610_v22 = vld [vmem:[%s41723_s1 + $0xf28] sm:$0xff]  ;;  %v18579_v37 = vpop.f32.mrf.mxu0 }
 0x1df   :  { %18829 = vmatpush.bf16.msra.mxu2 %v31589_v26  ;;  %v31626_v26 = vld [vmem:[%s41723_s1 + $0xfa8] sm:$0xff]  ;;  %v18580_v39 = vadd.f32 %v18579_v37, %v35045_v41  ;;  %v31633_v41 = vld [vmem:[%s41723_s1 + $0xfe0] sm:$0xff] }
 0x1e0   :  { %18815 = vmatpush.bf16.msra.mxu1 %v31581_v44  ;;  %v31625_v44 = vld [vmem:[%s41723_s1 + $0xfa0] sm:$0xff] }
 0x1e1   :  { %18843 = vmatpush.bf16.msra.mxu3 %v31597_v46  ;;  %18802 = vmatmul.bf16.vlgmr.msra.gmra.mxu0 %v21843_v52  ;;  %v18593_v46 = vpop.f32.mrf.mxu1  ;;  %v31605_v37 = vld [vmem:[%s41723_s1 + $0xf00] sm:$0xff] }
 0x1e2   :  { %18850 = vmatpush.bf16.msrb.mxu0 %v31612_v31  ;;  %18830 = vmatmul.bf16.vlgmr.msra.gmra.mxu2 %v21851_v54  ;;  %v35143_v31 = vpop.f32.mrf.mxu3  ;;  %v18594_v48 = vadd.f32 %v18593_v46, %v18580_v39  ;;  %v31621_v39 = vld [vmem:[%s41723_s1 + $0xf80] sm:$0xff]  ;;  %v21858_v46 = vld [vmem:[%s41724_s0 + $0xf0] sm:$0xf] }
 0x1e3   :  { %18878 = vmatpush.bf16.msrb.mxu2 %v31628_v33  ;;  %18816 = vmatmul.bf16.vlgmr.msra.gmra.mxu1 %v21847_v56  ;;  %v31618_v33 = vld [vmem:[%s41723_s1 + $0xf68] sm:$0xff] }
 0x1e4   :  { %18864 = vmatpush.bf16.msrb.mxu1 %v31620_v57  ;;  %18844 = vmatmul.bf16.vlgmr.msra.gmra.mxu3 %v21855_v61  ;;  %v31616_v57 = vld [vmem:[%s41723_s1 + $0xf58] sm:$0xff] }
 0x1e5   :  { %18892 = vmatpush.bf16.msrb.mxu3 %v31636_v58  ;;  %v18607_v52 = vpop.f32.mrf.mxu2  ;;  %v31632_v58 = vld [vmem:[%s41723_s1 + $0xfd8] sm:$0xff] }
 0x1e6   :  { %18851 = vmatpush.bf16.msrb.mxu0 %v31611_v0  ;;  %v18608_v54 = vadd.f32 %v18607_v52, %v18594_v48  ;;  %v31607_v0 = vld [vmem:[%s41723_s1 + $0xf10] sm:$0xff] }
 0x1e7   :  { %18879 = vmatpush.bf16.msrb.mxu2 %v31627_v3  ;;  %v31623_v3 = vld [vmem:[%s41723_s1 + $0xf90] sm:$0xff] }
 0x1e8   :  { %18865 = vmatpush.bf16.msrb.mxu1 %v31619_v8  ;;  %v31615_v8 = vld [vmem:[%s41723_s1 + $0xf50] sm:$0xff] }
 0x1e9   :  { %18893 = vmatpush.bf16.msrb.mxu3 %v31635_v10  ;;  %v31631_v10 = vld [vmem:[%s41723_s1 + $0xfd0] sm:$0xff] }
 0x1ea   :  { %18852 = vmatpush.bf16.msrb.mxu0 %v31610_v22  ;;  %v18621_v56 = vpop.f32.mrf.mxu3  ;;  %v31606_v22 = vld [vmem:[%s41723_s1 + $0xf08] sm:$0xff]  ;;  %v31026_v48 = vld [vmem:[%s41724_s0 + $0x4f0] sm:$0x70] }
 0x1eb   :  { %18880 = vmatpush.bf16.msrb.mxu2 %v31626_v26  ;;  %v35176_v61 = vadd.f32 %v18621_v56, %v18608_v54  ;;  %v31622_v26 = vld [vmem:[%s41723_s1 + $0xf88] sm:$0xff]  ;;  %v30898_v52 = vld [vmem:[%s41724_s0 + $0xf4] sm:$0xf]  ;;  %v21860_v54 = vld [vmem:[%s41724_s0 + $0x4f4] sm:$0x70]  ;;  %v21859_v56 = vor.u32 %v31026_v48, %v21858_v46 }
 0x1ec   :  { %18866 = vmatpush.bf16.msrb.mxu1 %v31618_v33  ;;  %v31614_v33 = vld [vmem:[%s41723_s1 + $0xf48] sm:$0xff] }
 0x1ed   :  { %18894 = vmatpush.bf16.msrb.mxu3 %v31634_v34  ;;  %v31630_v34 = vld [vmem:[%s41723_s1 + $0xfc8] sm:$0xff] }
 0x1ee   :  { %18853 = vmatpush.bf16.msrb.mxu0 %v31609_v43  ;;  %v31644_v43 = vld [vmem:[%s41723_s1 + $0x1038] sm:$0xff]  ;;  %v31642_v46 = vld [vmem:[%s41723_s1 + $0x1028] sm:$0xff] }
 0x1ef   :  { %18881 = vmatpush.bf16.msrb.mxu2 %v31625_v44  ;;  %v31660_v44 = vld [vmem:[%s41723_s1 + $0x10b8] sm:$0xff]  ;;  %v31658_v48 = vld [vmem:[%s41723_s1 + $0x10a8] sm:$0xff] }
 0x1f0   :  { %18867 = vmatpush.bf16.msrb.mxu1 %v31617_v7  ;;  %v21866_v7 = vld [vmem:[%s41724_s0 + $0xf8] sm:$0xf] }
 0x1f1   :  { %18895 = vmatpush.bf16.msrb.mxu3 %v31633_v41  ;;  %v31027_v41 = vld [vmem:[%s41724_s0 + $0x4f8] sm:$0x70] }
 0x1f2   :  { %18854 = vmatpush.bf16.msrb.mxu0 %v31608_v49  ;;  %v31613_v49 = vld [vmem:[%s41723_s1 + $0xf40] sm:$0xff] }
 0x1f3   :  { %18882 = vmatpush.bf16.msrb.mxu2 %v31624_v51  ;;  %v31629_v51 = vld [vmem:[%s41723_s1 + $0xfc0] sm:$0xff] }
 0x1f4   :  { %18868 = vmatpush.bf16.msrb.mxu1 %v31616_v57  ;;  %v30899_v57 = vld [vmem:[%s41724_s0 + $0xfc] sm:$0xf] }
 0x1f5   :  { %18896 = vmatpush.bf16.msrb.mxu3 %v31632_v58  ;;  %v21868_v58 = vld [vmem:[%s41724_s0 + $0x4fc] sm:$0x70] }
 0x1f6   :  { %18855 = vmatpush.bf16.msrb.mxu0 %v31607_v0  ;;  %v21867_v0 = vor.u32 %v31027_v41, %v21866_v7  ;;  %v35274_v7 = vpop.f32.mrf.mxu3  ;;  %v31650_v41 = vld [vmem:[%s41723_s1 + $0x1068] sm:$0xff] }
 0x1f7   :  { %18883 = vmatpush.bf16.msrb.mxu2 %v31623_v3  ;;  %v35244_v3 = vpop.f32.mrf.mxu0  ;;  %41729 = vst [vmem:[#allocation4_spill] sm:$0xff] %v35274_v7 }
 0x1f8   :  { %18869 = vmatpush.bf16.msrb.mxu1 %v31615_v8  ;;  %v31652_v8 = vld [vmem:[%s41723_s1 + $0x1078] sm:$0xff] }
 0x1f9   :  { %18897 = vmatpush.bf16.msrb.mxu3 %v31631_v10  ;;  %v31668_v10 = vld [vmem:[%s41723_s1 + $0x10f8] sm:$0xff] }
 0x1fa   :  { %18856 = vmatpush.bf16.msrb.mxu0 %v31606_v22  ;;  %v21863_v22 = vor.u32 %v30898_v52, %v21860_v54  ;;  %v31641_v54 = vld [vmem:[%s41723_s1 + $0x1020] sm:$0xff] }
 0x1fb   :  { %18884 = vmatpush.bf16.msrb.mxu2 %v31622_v26  ;;  %v21871_v26 = vor.u32 %v30899_v57, %v21868_v58  ;;  %v31657_v57 = vld [vmem:[%s41723_s1 + $0x10a0] sm:$0xff] }
 0x1fc   :  { %18870 = vmatpush.bf16.msrb.mxu1 %v31614_v33  ;;  %v35252_v33 = vpop.f32.mrf.mxu1 }
 0x1fd   :  { %18898 = vmatpush.bf16.msrb.mxu3 %v31630_v34  ;;  %41727 = vst [vmem:[#allocation2_spill] sm:$0xff] %v35252_v33  ;;  %v31643_v34 = vld [vmem:[%s41723_s1 + $0x1030] sm:$0xff] }
 0x1fe   :  { %18857 = vmatpush.bf16.msrb.mxu0 %v31605_v37  ;;  %v31659_v37 = vld [vmem:[%s41723_s1 + $0x10b0] sm:$0xff] }
 0x1ff   :  { %18885 = vmatpush.bf16.msrb.mxu2 %v31621_v39  ;;  %v31651_v39 = vld [vmem:[%s41723_s1 + $0x1070] sm:$0xff] }
 0x200   :  { %18871 = vmatpush.bf16.msrb.mxu1 %v31613_v49  ;;  %v31666_v49 = vld [vmem:[%s41723_s1 + $0x10e8] sm:$0xff] }
 0x201   :  { %18899 = vmatpush.bf16.msrb.mxu3 %v31629_v51  ;;  %18858 = vmatmul.bf16.vlgmr.msrb.gmra.mxu0 %v21859_v56  ;;  %v18635_v51 = vpop.f32.mrf.mxu0 }
 0x202   :  { %18906 = vmatpush.bf16.msra.mxu0 %v31644_v43  ;;  %18886 = vmatmul.bf16.vlgmr.msrb.gmra.mxu2 %v21867_v0  ;;  %v31667_v43 = vld [vmem:[%s41723_s1 + $0x10f0] sm:$0xff]  ;;  %v18636_v52 = vadd.f32 %v18635_v51, %v35176_v61  ;;  %v31649_v0 = vld [vmem:[%s41723_s1 + $0x1060] sm:$0xff]  ;;  %v31638_v51 = vld [vmem:[%s41723_s1 + $0x1008] sm:$0xff] }
 0x203   :  { %18934 = vmatpush.bf16.msra.mxu2 %v31660_v44  ;;  %18872 = vmatmul.bf16.vlgmr.msrb.gmra.mxu1 %v21863_v22  ;;  %v35266_v44 = vpop.f32.mrf.mxu2  ;;  %v31665_v61 = vld [vmem:[%s41723_s1 + $0x10e0] sm:$0xff] }
 0x204   :  { %18920 = vmatpush.bf16.msra.mxu1 %v31652_v8  ;;  %18900 = vmatmul.bf16.vlgmr.msrb.gmra.mxu3 %v21871_v26  ;;  %41728 = vst [vmem:[#allocation3_spill] sm:$0xff] %v35266_v44  ;;  %v18649_v58 = vpop.f32.mrf.mxu1  ;;  %v31640_v8 = vld [vmem:[%s41723_s1 + $0x1018] sm:$0xff] }
 0x205   :  { %18948 = vmatpush.bf16.msra.mxu3 %v31668_v10  ;;  %v18650_v56 = vadd.f32 %v18649_v58, %v18636_v52  ;;  %v31656_v10 = vld [vmem:[%s41723_s1 + $0x1098] sm:$0xff]  ;;  %v31654_v52 = vld [vmem:[%s41723_s1 + $0x1088] sm:$0xff]  ;;  %v31637_v58 = vld [vmem:[%s41723_s1 + $0x1000] sm:$0xff] }
 0x206   :  { %18907 = vmatpush.bf16.msra.mxu0 %v31643_v34  ;;  %v31648_v34 = vld [vmem:[%s41723_s1 + $0x1058] sm:$0xff] }
 0x207   :  { %18935 = vmatpush.bf16.msra.mxu2 %v31659_v37  ;;  %v31664_v37 = vld [vmem:[%s41723_s1 + $0x10d8] sm:$0xff] }
 0x208   :  { %18921 = vmatpush.bf16.msra.mxu1 %v31651_v39  ;;  %v18677_v39 = vpop.f32.mrf.mxu3 }
 0x209   :  { %18949 = vmatpush.bf16.msra.mxu3 %v31667_v43 }
 0x20a   :  { %18908 = vmatpush.bf16.msra.mxu0 %v31642_v46  ;;  %v31639_v46 = vld [vmem:[%s41723_s1 + $0x1010] sm:$0xff] }
 0x20b   :  { %18936 = vmatpush.bf16.msra.mxu2 %v31658_v48  ;;  %v18663_v22 = vpop.f32.mrf.mxu2  ;;  %v31655_v48 = vld [vmem:[%s41723_s1 + $0x1090] sm:$0xff] }
 0x20c   :  { %18922 = vmatpush.bf16.msra.mxu1 %v31650_v41  ;;  %v18664_v26 = vadd.f32 %v18663_v22, %v18650_v56  ;;  %v31647_v41 = vld [vmem:[%s41723_s1 + $0x1050] sm:$0xff]  ;;  %v31653_v56 = vld [vmem:[%s41723_s1 + $0x1080] sm:$0xff]  ;;  %v21882_v22 = vld [vmem:[%s41724_s0 + $0x108] sm:$0xf]  ;;  %v35383_v33 = vpop.f32.mrf.mxu1 }
 0x20d   :  { %18950 = vmatpush.bf16.msra.mxu3 %v31666_v49  ;;  %v31663_v49 = vld [vmem:[%s41723_s1 + $0x10d0] sm:$0xff]  ;;  %41731 = vst [vmem:[#allocation6_spill] sm:$0xff] %v35383_v33 }
 0x20e   :  { %18909 = vmatpush.bf16.msra.mxu0 %v31641_v54  ;;  %v35307_v43 = vadd.f32 %v18677_v39, %v18664_v26  ;;  %v31646_v54 = vld [vmem:[%s41723_s1 + $0x1048] sm:$0xff]  ;;  %v30900_v39 = vld [vmem:[%s41724_s0 + $0x104] sm:$0xf] }
 0x20f   :  { %18937 = vmatpush.bf16.msra.mxu2 %v31657_v57  ;;  %v31662_v57 = vld [vmem:[%s41723_s1 + $0x10c8] sm:$0xff] }
 0x210   :  { %18923 = vmatpush.bf16.msra.mxu1 %v31649_v0  ;;  %v31676_v0 = vld [vmem:[%s41723_s1 + $0x1138] sm:$0xff]  ;;  %v31029_v26 = vld [vmem:[%s41724_s0 + $0x508] sm:$0x70] }
 0x211   :  { %18951 = vmatpush.bf16.msra.mxu3 %v31665_v61  ;;  %v31692_v61 = vld [vmem:[%s41723_s1 + $0x11b8] sm:$0xff] }
 0x212   :  { %18910 = vmatpush.bf16.msra.mxu0 %v31640_v8  ;;  %v21874_v8 = vld [vmem:[%s41724_s0 + $0x100] sm:$0xf] }
 0x213   :  { %18938 = vmatpush.bf16.msra.mxu2 %v31656_v10  ;;  %v31028_v10 = vld [vmem:[%s41724_s0 + $0x500] sm:$0x70] }
 0x214   :  { %18924 = vmatpush.bf16.msra.mxu1 %v31648_v34  ;;  %v31645_v34 = vld [vmem:[%s41723_s1 + $0x1040] sm:$0xff] }
 0x215   :  { %18952 = vmatpush.bf16.msra.mxu3 %v31664_v37  ;;  %v31661_v37 = vld [vmem:[%s41723_s1 + $0x10c0] sm:$0xff] }
 0x216   :  { %18911 = vmatpush.bf16.msra.mxu0 %v31639_v46  ;;  %v21876_v46 = vld [vmem:[%s41724_s0 + $0x504] sm:$0x70] }
 0x217   :  { %18939 = vmatpush.bf16.msra.mxu2 %v31655_v48  ;;  %v30901_v48 = vld [vmem:[%s41724_s0 + $0x10c] sm:$0xf]  ;;  %v21879_v7 = vor.u32 %v30900_v39, %v21876_v46  ;;  %v31673_v39 = vld [vmem:[%s41723_s1 + $0x1120] sm:$0xff] }
 0x218   :  { %18925 = vmatpush.bf16.msra.mxu1 %v31647_v41  ;;  %v21884_v41 = vld [vmem:[%s41724_s0 + $0x50c] sm:$0x70]  ;;  %v31689_v46 = vld [vmem:[%s41723_s1 + $0x11a0] sm:$0xff] }
 0x219   :  { %18953 = vmatpush.bf16.msra.mxu3 %v31663_v49  ;;  %v21875_v49 = vor.u32 %v31028_v10, %v21874_v8  ;;  %v21887_v44 = vor.u32 %v30901_v48, %v21884_v41  ;;  %v35397_v8 = vpop.f32.mrf.mxu2  ;;  %v31674_v10 = vld [vmem:[%s41723_s1 + $0x1128] sm:$0xff] }
 0x21a   :  { %18912 = vmatpush.bf16.msra.mxu0 %v31638_v51  ;;  %v21883_v51 = vor.u32 %v31029_v26, %v21882_v22  ;;  %41732 = vst [vmem:[#allocation7_spill] sm:$0xff] %v35397_v8  ;;  %v31690_v22 = vld [vmem:[%s41723_s1 + $0x11a8] sm:$0xff]  ;;  %v35405_v26 = vpop.f32.mrf.mxu3 }
 0x21b   :  { %18940 = vmatpush.bf16.msra.mxu2 %v31654_v52  ;;  %v35375_v52 = vpop.f32.mrf.mxu0  ;;  %41733 = vst [vmem:[#allocation8_spill] sm:$0xff] %v35405_v26 }
 0x21c   :  { %18926 = vmatpush.bf16.msra.mxu1 %v31646_v54  ;;  %41730 = vst [vmem:[#allocation5_spill] sm:$0xff] %v35375_v52  ;;  %v31684_v54 = vld [vmem:[%s41723_s1 + $0x1178] sm:$0xff] }
 0x21d   :  { %18954 = vmatpush.bf16.msra.mxu3 %v31662_v57  ;;  %v31700_v57 = vld [vmem:[%s41723_s1 + $0x11f8] sm:$0xff] }
 0x21e   :  { %18913 = vmatpush.bf16.msra.mxu0 %v31637_v58  ;;  %v31675_v58 = vld [vmem:[%s41723_s1 + $0x1130] sm:$0xff] }
 0x21f   :  { %18941 = vmatpush.bf16.msra.mxu2 %v31653_v56  ;;  %v31691_v56 = vld [vmem:[%s41723_s1 + $0x11b0] sm:$0xff] }
 0x220   :  { %18927 = vmatpush.bf16.msra.mxu1 %v31645_v34  ;;  %v18705_v48 = vpop.f32.mrf.mxu1 }
 0x221   :  { %18955 = vmatpush.bf16.msra.mxu3 %v31661_v37  ;;  %18914 = vmatmul.bf16.vlgmr.msra.gmra.mxu0 %v21875_v49  ;;  %v31681_v49 = vld [vmem:[%s41723_s1 + $0x1160] sm:$0xff] }
 0x222   :  { %18962 = vmatpush.bf16.msrb.mxu0 %v31676_v0  ;;  %18942 = vmatmul.bf16.vlgmr.msra.gmra.mxu2 %v21883_v51  ;;  %v31683_v0 = vld [vmem:[%s41723_s1 + $0x1170] sm:$0xff]  ;;  %v31672_v51 = vld [vmem:[%s41723_s1 + $0x1118] sm:$0xff] }
 0x223   :  { %18990 = vmatpush.bf16.msrb.mxu2 %v31692_v61  ;;  %v31699_v61 = vld [vmem:[%s41723_s1 + $0x11f0] sm:$0xff]  ;;  %18928 = vmatmul.bf16.vlgmr.msra.gmra.mxu1 %v21879_v7  ;;  %v31698_v7 = vld [vmem:[%s41723_s1 + $0x11e8] sm:$0xff]  ;;  %v18691_v34 = vpop.f32.mrf.mxu0 }
 0x224   :  { %18976 = vmatpush.bf16.msrb.mxu1 %v31684_v54  ;;  %18956 = vmatmul.bf16.vlgmr.msra.gmra.mxu3 %v21887_v44  ;;  %v31682_v44 = vld [vmem:[%s41723_s1 + $0x1168] sm:$0xff]  ;;  %v18692_v37 = vadd.f32 %v18691_v34, %v35307_v43  ;;  %v31697_v43 = vld [vmem:[%s41723_s1 + $0x11e0] sm:$0xff]  ;;  %v31688_v54 = vld [vmem:[%s41723_s1 + $0x1198] sm:$0xff] }
 0x225   :  { %19004 = vmatpush.bf16.msrb.mxu3 %v31700_v57  ;;  %v18719_v57 = vpop.f32.mrf.mxu2  ;;  %v31695_v34 = vld [vmem:[%s41723_s1 + $0x11d0] sm:$0xff] }
 0x226   :  { %18963 = vmatpush.bf16.msrb.mxu0 %v31675_v58  ;;  %v18706_v41 = vadd.f32 %v18705_v48, %v18692_v37  ;;  %v31670_v37 = vld [vmem:[%s41723_s1 + $0x1108] sm:$0xff] }
 0x227   :  { %18991 = vmatpush.bf16.msrb.mxu2 %v31691_v56  ;;  %v31680_v56 = vld [vmem:[%s41723_s1 + $0x1158] sm:$0xff]  ;;  %v31694_v48 = vld [vmem:[%s41723_s1 + $0x11c8] sm:$0xff] }
 0x228   :  { %18977 = vmatpush.bf16.msrb.mxu1 %v31683_v0  ;;  %v18720_v58 = vadd.f32 %v18719_v57, %v18706_v41  ;;  %v31696_v0 = vld [vmem:[%s41723_s1 + $0x11d8] sm:$0xff]  ;;  %v31669_v41 = vld [vmem:[%s41723_s1 + $0x1100] sm:$0xff]  ;;  %v31030_v57 = vld [vmem:[%s41724_s0 + $0x510] sm:$0x70]  ;;  %v35514_v52 = vpop.f32.mrf.mxu1 }
 0x229   :  { %19005 = vmatpush.bf16.msrb.mxu3 %v31699_v61  ;;  %v18733_v61 = vpop.f32.mrf.mxu3  ;;  %41735 = vst [vmem:[#allocation10_spill] sm:$0xff] %v35514_v52 }
 0x22a   :  { %18964 = vmatpush.bf16.msrb.mxu0 %v31674_v10  ;;  %v35438_v10 = vadd.f32 %v18733_v61, %v18720_v58  ;;  %v21898_v58 = vld [vmem:[%s41724_s0 + $0x118] sm:$0xf]  ;;  %v31693_v61 = vld [vmem:[%s41723_s1 + $0x11c0] sm:$0xff] }
 0x22b   :  { %18992 = vmatpush.bf16.msrb.mxu2 %v31690_v22  ;;  %v31671_v22 = vld [vmem:[%s41723_s1 + $0x1110] sm:$0xff]  ;;  %v35506_v26 = vpop.f32.mrf.mxu0 }
 0x22c   :  { %18978 = vmatpush.bf16.msrb.mxu1 %v31682_v44  ;;  %v31687_v44 = vld [vmem:[%s41723_s1 + $0x1190] sm:$0xff]  ;;  %41734 = vst [vmem:[#allocation9_spill] sm:$0xff] %v35506_v26 }
 0x22d   :  { %19006 = vmatpush.bf16.msrb.mxu3 %v31698_v7  ;;  %v31679_v7 = vld [vmem:[%s41723_s1 + $0x1150] sm:$0xff] }
 0x22e   :  { %18965 = vmatpush.bf16.msrb.mxu0 %v31673_v39  ;;  %v31686_v39 = vld [vmem:[%s41723_s1 + $0x1188] sm:$0xff] }
 0x22f   :  { %18993 = vmatpush.bf16.msrb.mxu2 %v31689_v46  ;;  %v31678_v46 = vld [vmem:[%s41723_s1 + $0x1148] sm:$0xff] }
 0x230   :  { %18979 = vmatpush.bf16.msrb.mxu1 %v31681_v49  ;;  %v31685_v49 = vld [vmem:[%s41723_s1 + $0x1180] sm:$0xff] }
 0x231   :  { %19007 = vmatpush.bf16.msrb.mxu3 %v31697_v43  ;;  %v31708_v43 = vld [vmem:[%s41723_s1 + $0x1238] sm:$0xff] }
 0x232   :  { %18966 = vmatpush.bf16.msrb.mxu0 %v31672_v51  ;;  %v31724_v51 = vld [vmem:[%s41723_s1 + $0x12b8] sm:$0xff] }
 0x233   :  { %18994 = vmatpush.bf16.msrb.mxu2 %v31688_v54  ;;  %v21890_v54 = vld [vmem:[%s41724_s0 + $0x110] sm:$0xf] }
 0x234   :  { %18980 = vmatpush.bf16.msrb.mxu1 %v31680_v56  ;;  %v31031_v56 = vld [vmem:[%s41724_s0 + $0x518] sm:$0x70] }
 0x235   :  { %19008 = vmatpush.bf16.msrb.mxu3 %v31696_v0  ;;  %v31677_v0 = vld [vmem:[%s41723_s1 + $0x1140] sm:$0xff] }
 0x236   :  { %18967 = vmatpush.bf16.msrb.mxu0 %v31671_v22  ;;  %v30902_v22 = vld [vmem:[%s41724_s0 + $0x114] sm:$0xf] }
 0x237   :  { %18995 = vmatpush.bf16.msrb.mxu2 %v31687_v44  ;;  %v21892_v44 = vld [vmem:[%s41724_s0 + $0x514] sm:$0x70] }
 0x238   :  { %18981 = vmatpush.bf16.msrb.mxu1 %v31679_v7  ;;  %v30903_v7 = vld [vmem:[%s41724_s0 + $0x11c] sm:$0xf]  ;;  %v21895_v8 = vor.u32 %v30902_v22, %v21892_v44  ;;  %v31705_v22 = vld [vmem:[%s41723_s1 + $0x1220] sm:$0xff] }
 0x239   :  { %19009 = vmatpush.bf16.msrb.mxu3 %v31695_v34  ;;  %v21900_v34 = vld [vmem:[%s41724_s0 + $0x51c] sm:$0x70] }
 0x23a   :  { %18968 = vmatpush.bf16.msrb.mxu0 %v31670_v37  ;;  %v21891_v37 = vor.u32 %v31030_v57, %v21890_v54  ;;  %v21903_v33 = vor.u32 %v30903_v7, %v21900_v34  ;;  %v35528_v54 = vpop.f32.mrf.mxu2  ;;  %v31706_v57 = vld [vmem:[%s41723_s1 + $0x1228] sm:$0xff]  ;;  %v31721_v44 = vld [vmem:[%s41723_s1 + $0x12a0] sm:$0xff] }
 0x23b   :  { %18996 = vmatpush.bf16.msrb.mxu2 %v31686_v39  ;;  %v21899_v39 = vor.u32 %v31031_v56, %v21898_v58  ;;  %41736 = vst [vmem:[#allocation11_spill] sm:$0xff] %v35528_v54  ;;  %v31722_v58 = vld [vmem:[%s41723_s1 + $0x12a8] sm:$0xff]  ;;  %v35536_v56 = vpop.f32.mrf.mxu3 }
 0x23c   :  { %18982 = vmatpush.bf16.msrb.mxu1 %v31678_v46  ;;  %v31716_v46 = vld [vmem:[%s41723_s1 + $0x1278] sm:$0xff]  ;;  %41737 = vst [vmem:[#allocation12_spill] sm:$0xff] %v35536_v56 }
 0x23d   :  { %19010 = vmatpush.bf16.msrb.mxu3 %v31694_v48  ;;  %v31732_v48 = vld [vmem:[%s41723_s1 + $0x12f8] sm:$0xff] }
 0x23e   :  { %18969 = vmatpush.bf16.msrb.mxu0 %v31669_v41  ;;  %v31707_v41 = vld [vmem:[%s41723_s1 + $0x1230] sm:$0xff] }
 0x23f   :  { %18997 = vmatpush.bf16.msrb.mxu2 %v31685_v49  ;;  %v31723_v49 = vld [vmem:[%s41723_s1 + $0x12b0] sm:$0xff] }
 0x240   :  { %18983 = vmatpush.bf16.msrb.mxu1 %v31677_v0  ;;  %v18747_v0 = vpop.f32.mrf.mxu0  ;;  %v18761_v7 = vpop.f32.mrf.mxu1 }
 0x241   :  { %19011 = vmatpush.bf16.msrb.mxu3 %v31693_v61  ;;  %18970 = vmatmul.bf16.vlgmr.msrb.gmra.mxu0 %v21891_v37  ;;  %v18748_v61 = vadd.f32 %v18747_v0, %v35438_v10  ;;  %v31713_v37 = vld [vmem:[%s41723_s1 + $0x1260] sm:$0xff]  ;;  %v31727_v0 = vld [vmem:[%s41723_s1 + $0x12d0] sm:$0xff] }
 0x242   :  { %19018 = vmatpush.bf16.msra.mxu0 %v31708_v43  ;;  %18998 = vmatmul.bf16.vlgmr.msrb.gmra.mxu2 %v21899_v39  ;;  %v31715_v43 = vld [vmem:[%s41723_s1 + $0x1270] sm:$0xff]  ;;  %v31729_v10 = vld [vmem:[%s41723_s1 + $0x12e0] sm:$0xff]  ;;  %v31704_v39 = vld [vmem:[%s41723_s1 + $0x1218] sm:$0xff] }
 0x243   :  { %19046 = vmatpush.bf16.msra.mxu2 %v31724_v51  ;;  %v31731_v51 = vld [vmem:[%s41723_s1 + $0x12f0] sm:$0xff]  ;;  %18984 = vmatmul.bf16.vlgmr.msrb.gmra.mxu1 %v21895_v8  ;;  %v31730_v8 = vld [vmem:[%s41723_s1 + $0x12e8] sm:$0xff]  ;;  %v18762_v34 = vadd.f32 %v18761_v7, %v18748_v61 }
 0x244   :  { %19032 = vmatpush.bf16.msra.mxu1 %v31716_v46  ;;  %19012 = vmatmul.bf16.vlgmr.msrb.gmra.mxu3 %v21903_v33  ;;  %v31714_v33 = vld [vmem:[%s41723_s1 + $0x1268] sm:$0xff]  ;;  %v31720_v46 = vld [vmem:[%s41723_s1 + $0x1298] sm:$0xff] }
 0x245   :  { %19060 = vmatpush.bf16.msra.mxu3 %v31732_v48  ;;  %v18775_v48 = vpop.f32.mrf.mxu2  ;;  %v31702_v61 = vld [vmem:[%s41723_s1 + $0x1208] sm:$0xff] }
 0x246   :  { %19019 = vmatpush.bf16.msra.mxu0 %v31707_v41  ;;  %v18776_v41 = vadd.f32 %v18775_v48, %v18762_v34  ;;  %v31726_v7 = vld [vmem:[%s41723_s1 + $0x12c8] sm:$0xff]  ;;  %v31701_v34 = vld [vmem:[%s41723_s1 + $0x1200] sm:$0xff] }
 0x247   :  { %19047 = vmatpush.bf16.msra.mxu2 %v31723_v49  ;;  %v31712_v49 = vld [vmem:[%s41723_s1 + $0x1258] sm:$0xff]  ;;  %v31032_v48 = vld [vmem:[%s41724_s0 + $0x520] sm:$0x70] }
 0x248   :  { %19033 = vmatpush.bf16.msra.mxu1 %v31715_v43  ;;  %v31728_v43 = vld [vmem:[%s41723_s1 + $0x12d8] sm:$0xff]  ;;  %v35637_v56 = vpop.f32.mrf.mxu0  ;;  %v35645_v26 = vpop.f32.mrf.mxu1 }
 0x249   :  { %19061 = vmatpush.bf16.msra.mxu3 %v31731_v51  ;;  %v18789_v51 = vpop.f32.mrf.mxu3  ;;  %41738 = vst [vmem:[#allocation13_spill] sm:$0xff] %v35637_v56 }
 0x24a   :  { %19020 = vmatpush.bf16.msra.mxu0 %v31706_v57  ;;  %v35569_v57 = vadd.f32 %v18789_v51, %v18776_v41  ;;  %v21914_v41 = vld [vmem:[%s41724_s0 + $0x128] sm:$0xf]  ;;  %v31725_v51 = vld [vmem:[%s41723_s1 + $0x12c0] sm:$0xff]  ;;  %41739 = vst [vmem:[#allocation14_spill] sm:$0xff] %v35645_v26 }
 0x24b   :  { %19048 = vmatpush.bf16.msra.mxu2 %v31722_v58  ;;  %v31703_v58 = vld [vmem:[%s41723_s1 + $0x1210] sm:$0xff] }
 0x24c   :  { %19034 = vmatpush.bf16.msra.mxu1 %v31714_v33  ;;  %v31719_v33 = vld [vmem:[%s41723_s1 + $0x1290] sm:$0xff] }
 0x24d   :  { %19062 = vmatpush.bf16.msra.mxu3 %v31730_v8  ;;  %v31711_v8 = vld [vmem:[%s41723_s1 + $0x1250] sm:$0xff] }
 0x24e   :  { %19021 = vmatpush.bf16.msra.mxu0 %v31705_v22  ;;  %v31718_v22 = vld [vmem:[%s41723_s1 + $0x1288] sm:$0xff] }
 0x24f   :  { %19049 = vmatpush.bf16.msra.mxu2 %v31721_v44  ;;  %v31710_v44 = vld [vmem:[%s41723_s1 + $0x1248] sm:$0xff] }
 0x250   :  { %19035 = vmatpush.bf16.msra.mxu1 %v31713_v37  ;;  %v31717_v37 = vld [vmem:[%s41723_s1 + $0x1280] sm:$0xff] }
 0x251   :  { %19063 = vmatpush.bf16.msra.mxu3 %v31729_v10  ;;  %v31740_v10 = vld [vmem:[%s41723_s1 + $0x1338] sm:$0xff] }
 0x252   :  { %19022 = vmatpush.bf16.msra.mxu0 %v31704_v39  ;;  %v31756_v39 = vld [vmem:[%s41723_s1 + $0x13b8] sm:$0xff] }
 0x253   :  { %19050 = vmatpush.bf16.msra.mxu2 %v31720_v46  ;;  %v21906_v46 = vld [vmem:[%s41724_s0 + $0x120] sm:$0xf] }
 0x254   :  { %19036 = vmatpush.bf16.msra.mxu1 %v31712_v49  ;;  %v31033_v49 = vld [vmem:[%s41724_s0 + $0x528] sm:$0x70] }
 0x255   :  { %19064 = vmatpush.bf16.msra.mxu3 %v31728_v43  ;;  %v31709_v43 = vld [vmem:[%s41723_s1 + $0x1240] sm:$0xff] }
 0x256   :  { %19023 = vmatpush.bf16.msra.mxu0 %v31703_v58  ;;  %v30904_v58 = vld [vmem:[%s41724_s0 + $0x124] sm:$0xf] }
 0x257   :  { %19051 = vmatpush.bf16.msra.mxu2 %v31719_v33  ;;  %v21908_v33 = vld [vmem:[%s41724_s0 + $0x524] sm:$0x70] }
 0x258   :  { %19037 = vmatpush.bf16.msra.mxu1 %v31711_v8  ;;  %v30905_v8 = vld [vmem:[%s41724_s0 + $0x12c] sm:$0xf]  ;;  %v21911_v54 = vor.u32 %v30904_v58, %v21908_v33  ;;  %v31737_v58 = vld [vmem:[%s41723_s1 + $0x1320] sm:$0xff] }
 0x259   :  { %19065 = vmatpush.bf16.msra.mxu3 %v31727_v0  ;;  %v21916_v0 = vld [vmem:[%s41724_s0 + $0x52c] sm:$0x70]  ;;  %v31753_v33 = vld [vmem:[%s41723_s1 + $0x13a0] sm:$0xff] }
 0x25a   :  { %19024 = vmatpush.bf16.msra.mxu0 %v31702_v61  ;;  %v21907_v61 = vor.u32 %v31032_v48, %v21906_v46  ;;  %v21919_v52 = vor.u32 %v30905_v8, %v21916_v0  ;;  %v35659_v46 = vpop.f32.mrf.mxu2  ;;  %v31738_v48 = vld [vmem:[%s41723_s1 + $0x1328] sm:$0xff] }
 0x25b   :  { %19052 = vmatpush.bf16.msra.mxu2 %v31718_v22  ;;  %v21915_v22 = vor.u32 %v31033_v49, %v21914_v41  ;;  %41740 = vst [vmem:[#allocation15_spill] sm:$0xff] %v35659_v46  ;;  %v31754_v41 = vld [vmem:[%s41723_s1 + $0x13a8] sm:$0xff]  ;;  %v35667_v49 = vpop.f32.mrf.mxu3 }
 0x25c   :  { %19038 = vmatpush.bf16.msra.mxu1 %v31710_v44  ;;  %v31748_v44 = vld [vmem:[%s41723_s1 + $0x1378] sm:$0xff]  ;;  %41741 = vst [vmem:[#allocation16_spill] sm:$0xff] %v35667_v49 }
 0x25d   :  { %19066 = vmatpush.bf16.msra.mxu3 %v31726_v7  ;;  %v31764_v7 = vld [vmem:[%s41723_s1 + $0x13f8] sm:$0xff] }
 0x25e   :  { %19025 = vmatpush.bf16.msra.mxu0 %v31701_v34  ;;  %v31739_v34 = vld [vmem:[%s41723_s1 + $0x1330] sm:$0xff] }
 0x25f   :  { %19053 = vmatpush.bf16.msra.mxu2 %v31717_v37  ;;  %v31755_v37 = vld [vmem:[%s41723_s1 + $0x13b0] sm:$0xff] }
 0x260   :  { %19039 = vmatpush.bf16.msra.mxu1 %v31709_v43  ;;  %v18803_v43 = vpop.f32.mrf.mxu0  ;;  %v18817_v8 = vpop.f32.mrf.mxu1 }
 0x261   :  { %19067 = vmatpush.bf16.msra.mxu3 %v31725_v51  ;;  %19026 = vmatmul.bf16.vlgmr.msra.gmra.mxu0 %v21907_v61  ;;  %v18804_v51 = vadd.f32 %v18803_v43, %v35569_v57  ;;  %v31745_v61 = vld [vmem:[%s41723_s1 + $0x1360] sm:$0xff]  ;;  %v31759_v43 = vld [vmem:[%s41723_s1 + $0x13d0] sm:$0xff] }
 0x262   :  { %19074 = vmatpush.bf16.msrb.mxu0 %v31740_v10  ;;  %19054 = vmatmul.bf16.vlgmr.msra.gmra.mxu2 %v21915_v22  ;;  %v31747_v10 = vld [vmem:[%s41723_s1 + $0x1370] sm:$0xff]  ;;  %v31761_v57 = vld [vmem:[%s41723_s1 + $0x13e0] sm:$0xff]  ;;  %v31736_v22 = vld [vmem:[%s41723_s1 + $0x1318] sm:$0xff] }
 0x263   :  { %19102 = vmatpush.bf16.msrb.mxu2 %v31756_v39  ;;  %v31763_v39 = vld [vmem:[%s41723_s1 + $0x13f0] sm:$0xff]  ;;  %19040 = vmatmul.bf16.vlgmr.msra.gmra.mxu1 %v21911_v54  ;;  %v31762_v54 = vld [vmem:[%s41723_s1 + $0x13e8] sm:$0xff]  ;;  %v18818_v0 = vadd.f32 %v18817_v8, %v18804_v51 }
 0x264   :  { %19088 = vmatpush.bf16.msrb.mxu1 %v31748_v44  ;;  %19068 = vmatmul.bf16.vlgmr.msra.gmra.mxu3 %v21919_v52  ;;  %v31746_v52 = vld [vmem:[%s41723_s1 + $0x1368] sm:$0xff]  ;;  %v31752_v44 = vld [vmem:[%s41723_s1 + $0x1398] sm:$0xff] }
 0x265   :  { %19116 = vmatpush.bf16.msrb.mxu3 %v31764_v7  ;;  %v18831_v7 = vpop.f32.mrf.mxu2  ;;  %v31734_v51 = vld [vmem:[%s41723_s1 + $0x1308] sm:$0xff] }
 0x266   :  { %19075 = vmatpush.bf16.msrb.mxu0 %v31739_v34  ;;  %v18832_v34 = vadd.f32 %v18831_v7, %v18818_v0  ;;  %v31758_v8 = vld [vmem:[%s41723_s1 + $0x13c8] sm:$0xff]  ;;  %v31733_v0 = vld [vmem:[%s41723_s1 + $0x1300] sm:$0xff]  ;;  %v31034_v7 = vld [vmem:[%s41724_s0 + $0x530] sm:$0x70] }
 0x267   :  { %19103 = vmatpush.bf16.msrb.mxu2 %v31755_v37  ;;  %v31744_v37 = vld [vmem:[%s41723_s1 + $0x1358] sm:$0xff] }
 0x268   :  { %19089 = vmatpush.bf16.msrb.mxu1 %v31747_v10  ;;  %v31760_v10 = vld [vmem:[%s41723_s1 + $0x13d8] sm:$0xff]  ;;  %v35768_v49 = vpop.f32.mrf.mxu0  ;;  %v35776_v56 = vpop.f32.mrf.mxu1 }
 0x269   :  { %19117 = vmatpush.bf16.msrb.mxu3 %v31763_v39  ;;  %v18845_v39 = vpop.f32.mrf.mxu3  ;;  %41742 = vst [vmem:[#allocation17_spill] sm:$0xff] %v35768_v49 }
 0x26a   :  { %19076 = vmatpush.bf16.msrb.mxu0 %v31738_v48  ;;  %v35700_v48 = vadd.f32 %v18845_v39, %v18832_v34  ;;  %v21930_v34 = vld [vmem:[%s41724_s0 + $0x138] sm:$0xf]  ;;  %v31757_v39 = vld [vmem:[%s41723_s1 + $0x13c0] sm:$0xff]  ;;  %41743 = vst [vmem:[#allocation18_spill] sm:$0xff] %v35776_v56 }
 0x26b   :  { %19104 = vmatpush.bf16.msrb.mxu2 %v31754_v41  ;;  %v31735_v41 = vld [vmem:[%s41723_s1 + $0x1310] sm:$0xff] }
 0x26c   :  { %19090 = vmatpush.bf16.msrb.mxu1 %v31746_v52  ;;  %v31751_v52 = vld [vmem:[%s41723_s1 + $0x1390] sm:$0xff] }
 0x26d   :  { %19118 = vmatpush.bf16.msrb.mxu3 %v31762_v54  ;;  %v31743_v54 = vld [vmem:[%s41723_s1 + $0x1350] sm:$0xff] }
 0x26e   :  { %19077 = vmatpush.bf16.msrb.mxu0 %v31737_v58  ;;  %v31750_v58 = vld [vmem:[%s41723_s1 + $0x1388] sm:$0xff] }
 0x26f   :  { %19105 = vmatpush.bf16.msrb.mxu2 %v31753_v33  ;;  %v31742_v33 = vld [vmem:[%s41723_s1 + $0x1348] sm:$0xff] }
 0x270   :  { %19091 = vmatpush.bf16.msrb.mxu1 %v31745_v61  ;;  %v31749_v61 = vld [vmem:[%s41723_s1 + $0x1380] sm:$0xff] }
 0x271   :  { %19119 = vmatpush.bf16.msrb.mxu3 %v31761_v57  ;;  %v31772_v57 = vld [vmem:[%s41723_s1 + $0x1438] sm:$0xff] }
 0x272   :  { %19078 = vmatpush.bf16.msrb.mxu0 %v31736_v22  ;;  %v31788_v22 = vld [vmem:[%s41723_s1 + $0x14b8] sm:$0xff] }
 0x273   :  { %19106 = vmatpush.bf16.msrb.mxu2 %v31752_v44  ;;  %v21922_v44 = vld [vmem:[%s41724_s0 + $0x130] sm:$0xf] }
 0x274   :  { %19092 = vmatpush.bf16.msrb.mxu1 %v31744_v37  ;;  %v31035_v37 = vld [vmem:[%s41724_s0 + $0x538] sm:$0x70] }
 0x275   :  { %19120 = vmatpush.bf16.msrb.mxu3 %v31760_v10  ;;  %v31741_v10 = vld [vmem:[%s41723_s1 + $0x1340] sm:$0xff] }
 0x276   :  { %19079 = vmatpush.bf16.msrb.mxu0 %v31735_v41  ;;  %v30906_v41 = vld [vmem:[%s41724_s0 + $0x134] sm:$0xf] }
 0x277   :  { %19107 = vmatpush.bf16.msrb.mxu2 %v31751_v52  ;;  %v21924_v52 = vld [vmem:[%s41724_s0 + $0x534] sm:$0x70] }
 0x278   :  { %19093 = vmatpush.bf16.msrb.mxu1 %v31743_v54  ;;  %v30907_v54 = vld [vmem:[%s41724_s0 + $0x13c] sm:$0xf]  ;;  %v21927_v46 = vor.u32 %v30906_v41, %v21924_v52  ;;  %v31769_v41 = vld [vmem:[%s41723_s1 + $0x1420] sm:$0xff] }
 0x279   :  { %19121 = vmatpush.bf16.msrb.mxu3 %v31759_v43  ;;  %v21932_v43 = vld [vmem:[%s41724_s0 + $0x53c] sm:$0x70] }
 0x27a   :  { %19080 = vmatpush.bf16.msrb.mxu0 %v31734_v51  ;;  %v21923_v51 = vor.u32 %v31034_v7, %v21922_v44  ;;  %v21935_v26 = vor.u32 %v30907_v54, %v21932_v43  ;;  %v35790_v44 = vpop.f32.mrf.mxu2  ;;  %v31770_v7 = vld [vmem:[%s41723_s1 + $0x1428] sm:$0xff]  ;;  %v31785_v52 = vld [vmem:[%s41723_s1 + $0x14a0] sm:$0xff] }
 0x27b   :  { %19108 = vmatpush.bf16.msrb.mxu2 %v31750_v58  ;;  %v21931_v58 = vor.u32 %v31035_v37, %v21930_v34  ;;  %41744 = vst [vmem:[#allocation19_spill] sm:$0xff] %v35790_v44  ;;  %v31786_v34 = vld [vmem:[%s41723_s1 + $0x14a8] sm:$0xff]  ;;  %v35798_v37 = vpop.f32.mrf.mxu3 }
 0x27c   :  { %19094 = vmatpush.bf16.msrb.mxu1 %v31742_v33  ;;  %v31780_v33 = vld [vmem:[%s41723_s1 + $0x1478] sm:$0xff]  ;;  %41745 = vst [vmem:[#allocation20_spill] sm:$0xff] %v35798_v37 }
 0x27d   :  { %19122 = vmatpush.bf16.msrb.mxu3 %v31758_v8  ;;  %v31796_v8 = vld [vmem:[%s41723_s1 + $0x14f8] sm:$0xff] }
 0x27e   :  { %19081 = vmatpush.bf16.msrb.mxu0 %v31733_v0  ;;  %v31771_v0 = vld [vmem:[%s41723_s1 + $0x1430] sm:$0xff] }
 0x27f   :  { %19109 = vmatpush.bf16.msrb.mxu2 %v31749_v61  ;;  %v31787_v61 = vld [vmem:[%s41723_s1 + $0x14b0] sm:$0xff] }
 0x280   :  { %19095 = vmatpush.bf16.msrb.mxu1 %v31741_v10  ;;  %v18859_v10 = vpop.f32.mrf.mxu0  ;;  %v18873_v54 = vpop.f32.mrf.mxu1 }
 0x281   :  { %19123 = vmatpush.bf16.msrb.mxu3 %v31757_v39  ;;  %19082 = vmatmul.bf16.vlgmr.msrb.gmra.mxu0 %v21923_v51  ;;  %v18860_v39 = vadd.f32 %v18859_v10, %v35700_v48  ;;  %v31777_v51 = vld [vmem:[%s41723_s1 + $0x1460] sm:$0xff]  ;;  %v31791_v10 = vld [vmem:[%s41723_s1 + $0x14d0] sm:$0xff] }
 0x282   :  { %19130 = vmatpush.bf16.msra.mxu0 %v31772_v57  ;;  %19110 = vmatmul.bf16.vlgmr.msrb.gmra.mxu2 %v21931_v58  ;;  %v31779_v57 = vld [vmem:[%s41723_s1 + $0x1470] sm:$0xff]  ;;  %v31793_v48 = vld [vmem:[%s41723_s1 + $0x14e0] sm:$0xff]  ;;  %v31768_v58 = vld [vmem:[%s41723_s1 + $0x1418] sm:$0xff] }
 0x283   :  { %19158 = vmatpush.bf16.msra.mxu2 %v31788_v22  ;;  %v31795_v22 = vld [vmem:[%s41723_s1 + $0x14f0] sm:$0xff]  ;;  %19096 = vmatmul.bf16.vlgmr.msrb.gmra.mxu1 %v21927_v46  ;;  %v31794_v46 = vld [vmem:[%s41723_s1 + $0x14e8] sm:$0xff]  ;;  %v18874_v43 = vadd.f32 %v18873_v54, %v18860_v39 }
 0x284   :  { %19144 = vmatpush.bf16.msra.mxu1 %v31780_v33  ;;  %19124 = vmatmul.bf16.vlgmr.msrb.gmra.mxu3 %v21935_v26  ;;  %v31778_v26 = vld [vmem:[%s41723_s1 + $0x1468] sm:$0xff]  ;;  %v31784_v33 = vld [vmem:[%s41723_s1 + $0x1498] sm:$0xff] }
 0x285   :  { %19172 = vmatpush.bf16.msra.mxu3 %v31796_v8  ;;  %v18887_v8 = vpop.f32.mrf.mxu2  ;;  %v31766_v39 = vld [vmem:[%s41723_s1 + $0x1408] sm:$0xff] }
 0x286   :  { %19131 = vmatpush.bf16.msra.mxu0 %v31771_v0  ;;  %v18888_v0 = vadd.f32 %v18887_v8, %v18874_v43  ;;  %v31790_v54 = vld [vmem:[%s41723_s1 + $0x14c8] sm:$0xff]  ;;  %v31765_v43 = vld [vmem:[%s41723_s1 + $0x1400] sm:$0xff] }
 0x287   :  { %19159 = vmatpush.bf16.msra.mxu2 %v31787_v61  ;;  %v31776_v61 = vld [vmem:[%s41723_s1 + $0x1458] sm:$0xff]  ;;  %v31036_v8 = vld [vmem:[%s41724_s0 + $0x540] sm:$0x70] }
 0x288   :  { %19145 = vmatpush.bf16.msra.mxu1 %v31779_v57  ;;  %v31792_v57 = vld [vmem:[%s41723_s1 + $0x14d8] sm:$0xff]  ;;  %v35899_v37 = vpop.f32.mrf.mxu0  ;;  %v35907_v49 = vpop.f32.mrf.mxu1 }
 0x289   :  { %19173 = vmatpush.bf16.msra.mxu3 %v31795_v22  ;;  %v18901_v22 = vpop.f32.mrf.mxu3  ;;  %41746 = vst [vmem:[#allocation21_spill] sm:$0xff] %v35899_v37 }
 0x28a   :  { %19132 = vmatpush.bf16.msra.mxu0 %v31770_v7  ;;  %v35831_v7 = vadd.f32 %v18901_v22, %v18888_v0  ;;  %v21946_v0 = vld [vmem:[%s41724_s0 + $0x148] sm:$0xf]  ;;  %v31789_v22 = vld [vmem:[%s41723_s1 + $0x14c0] sm:$0xff]  ;;  %41747 = vst [vmem:[#allocation22_spill] sm:$0xff] %v35907_v49 }
 0x28b   :  { %19160 = vmatpush.bf16.msra.mxu2 %v31786_v34  ;;  %v31767_v34 = vld [vmem:[%s41723_s1 + $0x1410] sm:$0xff] }
 0x28c   :  { %19146 = vmatpush.bf16.msra.mxu1 %v31778_v26  ;;  %v31783_v26 = vld [vmem:[%s41723_s1 + $0x1490] sm:$0xff] }
 0x28d   :  { %19174 = vmatpush.bf16.msra.mxu3 %v31794_v46  ;;  %v31775_v46 = vld [vmem:[%s41723_s1 + $0x1450] sm:$0xff] }
 0x28e   :  { %19133 = vmatpush.bf16.msra.mxu0 %v31769_v41  ;;  %v31782_v41 = vld [vmem:[%s41723_s1 + $0x1488] sm:$0xff] }
 0x28f   :  { %19161 = vmatpush.bf16.msra.mxu2 %v31785_v52  ;;  %v31774_v52 = vld [vmem:[%s41723_s1 + $0x1448] sm:$0xff] }
 0x290   :  { %19147 = vmatpush.bf16.msra.mxu1 %v31777_v51  ;;  %v31781_v51 = vld [vmem:[%s41723_s1 + $0x1480] sm:$0xff] }
 0x291   :  { %19175 = vmatpush.bf16.msra.mxu3 %v31793_v48  ;;  %v31804_v48 = vld [vmem:[%s41723_s1 + $0x1538] sm:$0xff] }
 0x292   :  { %19134 = vmatpush.bf16.msra.mxu0 %v31768_v58  ;;  %v31820_v58 = vld [vmem:[%s41723_s1 + $0x15b8] sm:$0xff] }
 0x293   :  { %19162 = vmatpush.bf16.msra.mxu2 %v31784_v33  ;;  %v21938_v33 = vld [vmem:[%s41724_s0 + $0x140] sm:$0xf] }
 0x294   :  { %19148 = vmatpush.bf16.msra.mxu1 %v31776_v61  ;;  %v31037_v61 = vld [vmem:[%s41724_s0 + $0x548] sm:$0x70] }
 0x295   :  { %19176 = vmatpush.bf16.msra.mxu3 %v31792_v57  ;;  %v31773_v57 = vld [vmem:[%s41723_s1 + $0x1440] sm:$0xff] }
 0x296   :  { %19135 = vmatpush.bf16.msra.mxu0 %v31767_v34  ;;  %v30908_v34 = vld [vmem:[%s41724_s0 + $0x144] sm:$0xf] }
 0x297   :  { %19163 = vmatpush.bf16.msra.mxu2 %v31783_v26  ;;  %v21940_v26 = vld [vmem:[%s41724_s0 + $0x544] sm:$0x70] }
 0x298   :  { %19149 = vmatpush.bf16.msra.mxu1 %v31775_v46  ;;  %v30909_v46 = vld [vmem:[%s41724_s0 + $0x14c] sm:$0xf]  ;;  %v21943_v44 = vor.u32 %v30908_v34, %v21940_v26  ;;  %v31801_v34 = vld [vmem:[%s41723_s1 + $0x1520] sm:$0xff] }
 0x299   :  { %19177 = vmatpush.bf16.msra.mxu3 %v31791_v10  ;;  %v21948_v10 = vld [vmem:[%s41724_s0 + $0x54c] sm:$0x70]  ;;  %v31817_v26 = vld [vmem:[%s41723_s1 + $0x15a0] sm:$0xff] }
 0x29a   :  { %19136 = vmatpush.bf16.msra.mxu0 %v31766_v39  ;;  %v21939_v39 = vor.u32 %v31036_v8, %v21938_v33  ;;  %v21951_v56 = vor.u32 %v30909_v46, %v21948_v10  ;;  %v35921_v33 = vpop.f32.mrf.mxu2  ;;  %v31802_v8 = vld [vmem:[%s41723_s1 + $0x1528] sm:$0xff] }
 0x29b   :  { %19164 = vmatpush.bf16.msra.mxu2 %v31782_v41  ;;  %v21947_v41 = vor.u32 %v31037_v61, %v21946_v0  ;;  %41748 = vst [vmem:[#allocation23_spill] sm:$0xff] %v35921_v33  ;;  %v31818_v0 = vld [vmem:[%s41723_s1 + $0x15a8] sm:$0xff]  ;;  %v35929_v61 = vpop.f32.mrf.mxu3 }
 0x29c   :  { %19150 = vmatpush.bf16.msra.mxu1 %v31774_v52  ;;  %v31812_v52 = vld [vmem:[%s41723_s1 + $0x1578] sm:$0xff]  ;;  %41749 = vst [vmem:[#allocation24_spill] sm:$0xff] %v35929_v61 }
 0x29d   :  { %19178 = vmatpush.bf16.msra.mxu3 %v31790_v54  ;;  %v31828_v54 = vld [vmem:[%s41723_s1 + $0x15f8] sm:$0xff] }
 0x29e   :  { %19137 = vmatpush.bf16.msra.mxu0 %v31765_v43  ;;  %v31803_v43 = vld [vmem:[%s41723_s1 + $0x1530] sm:$0xff] }
 0x29f   :  { %19165 = vmatpush.bf16.msra.mxu2 %v31781_v51  ;;  %v31819_v51 = vld [vmem:[%s41723_s1 + $0x15b0] sm:$0xff] }
 0x2a0   :  { %19151 = vmatpush.bf16.msra.mxu1 %v31773_v57  ;;  %v18915_v57 = vpop.f32.mrf.mxu0  ;;  %v18929_v46 = vpop.f32.mrf.mxu1 }
 0x2a1   :  { %19179 = vmatpush.bf16.msra.mxu3 %v31789_v22  ;;  %19138 = vmatmul.bf16.vlgmr.msra.gmra.mxu0 %v21939_v39  ;;  %v18916_v22 = vadd.f32 %v18915_v57, %v35831_v7  ;;  %v31809_v39 = vld [vmem:[%s41723_s1 + $0x1560] sm:$0xff]  ;;  %v31823_v57 = vld [vmem:[%s41723_s1 + $0x15d0] sm:$0xff] }
 0x2a2   :  { %19186 = vmatpush.bf16.msrb.mxu0 %v31804_v48  ;;  %19166 = vmatmul.bf16.vlgmr.msra.gmra.mxu2 %v21947_v41  ;;  %v31811_v48 = vld [vmem:[%s41723_s1 + $0x1570] sm:$0xff]  ;;  %v31825_v7 = vld [vmem:[%s41723_s1 + $0x15e0] sm:$0xff]  ;;  %v31800_v41 = vld [vmem:[%s41723_s1 + $0x1518] sm:$0xff] }
 0x2a3   :  { %19214 = vmatpush.bf16.msrb.mxu2 %v31820_v58  ;;  %v31827_v58 = vld [vmem:[%s41723_s1 + $0x15f0] sm:$0xff]  ;;  %19152 = vmatmul.bf16.vlgmr.msra.gmra.mxu1 %v21943_v44  ;;  %v31826_v44 = vld [vmem:[%s41723_s1 + $0x15e8] sm:$0xff]  ;;  %v18930_v10 = vadd.f32 %v18929_v46, %v18916_v22 }
 0x2a4   :  { %19200 = vmatpush.bf16.msrb.mxu1 %v31812_v52  ;;  %19180 = vmatmul.bf16.vlgmr.msra.gmra.mxu3 %v21951_v56  ;;  %v31810_v56 = vld [vmem:[%s41723_s1 + $0x1568] sm:$0xff]  ;;  %v31816_v52 = vld [vmem:[%s41723_s1 + $0x1598] sm:$0xff] }
 0x2a5   :  { %19228 = vmatpush.bf16.msrb.mxu3 %v31828_v54  ;;  %v18943_v54 = vpop.f32.mrf.mxu2  ;;  %v31798_v22 = vld [vmem:[%s41723_s1 + $0x1508] sm:$0xff] }
 0x2a6   :  { %19187 = vmatpush.bf16.msrb.mxu0 %v31803_v43  ;;  %v18944_v43 = vadd.f32 %v18943_v54, %v18930_v10  ;;  %v31822_v46 = vld [vmem:[%s41723_s1 + $0x15c8] sm:$0xff]  ;;  %v31797_v10 = vld [vmem:[%s41723_s1 + $0x1500] sm:$0xff]  ;;  %v31038_v54 = vld [vmem:[%s41724_s0 + $0x550] sm:$0x70] }
 0x2a7   :  { %19215 = vmatpush.bf16.msrb.mxu2 %v31819_v51  ;;  %v31808_v51 = vld [vmem:[%s41723_s1 + $0x1558] sm:$0xff] }
 0x2a8   :  { %19201 = vmatpush.bf16.msrb.mxu1 %v31811_v48  ;;  %v31824_v48 = vld [vmem:[%s41723_s1 + $0x15d8] sm:$0xff]  ;;  %v36030_v61 = vpop.f32.mrf.mxu0  ;;  %v36038_v37 = vpop.f32.mrf.mxu1 }
 0x2a9   :  { %19229 = vmatpush.bf16.msrb.mxu3 %v31827_v58  ;;  %v18957_v58 = vpop.f32.mrf.mxu3  ;;  %41750 = vst [vmem:[#allocation25_spill] sm:$0xff] %v36030_v61 }
 0x2aa   :  { %19188 = vmatpush.bf16.msrb.mxu0 %v31802_v8  ;;  %v35962_v8 = vadd.f32 %v18957_v58, %v18944_v43  ;;  %v21962_v43 = vld [vmem:[%s41724_s0 + $0x158] sm:$0xf]  ;;  %v31821_v58 = vld [vmem:[%s41723_s1 + $0x15c0] sm:$0xff]  ;;  %41751 = vst [vmem:[#allocation26_spill] sm:$0xff] %v36038_v37 }
 0x2ab   :  { %19216 = vmatpush.bf16.msrb.mxu2 %v31818_v0  ;;  %v31799_v0 = vld [vmem:[%s41723_s1 + $0x1510] sm:$0xff] }
 0x2ac   :  { %19202 = vmatpush.bf16.msrb.mxu1 %v31810_v56  ;;  %v31815_v56 = vld [vmem:[%s41723_s1 + $0x1590] sm:$0xff] }
 0x2ad   :  { %19230 = vmatpush.bf16.msrb.mxu3 %v31826_v44  ;;  %v31807_v44 = vld [vmem:[%s41723_s1 + $0x1550] sm:$0xff] }
 0x2ae   :  { %19189 = vmatpush.bf16.msrb.mxu0 %v31801_v34  ;;  %v31814_v34 = vld [vmem:[%s41723_s1 + $0x1588] sm:$0xff] }
 0x2af   :  { %19217 = vmatpush.bf16.msrb.mxu2 %v31817_v26  ;;  %v31806_v26 = vld [vmem:[%s41723_s1 + $0x1548] sm:$0xff] }
 0x2b0   :  { %19203 = vmatpush.bf16.msrb.mxu1 %v31809_v39  ;;  %v31813_v39 = vld [vmem:[%s41723_s1 + $0x1580] sm:$0xff] }
 0x2b1   :  { %19231 = vmatpush.bf16.msrb.mxu3 %v31825_v7  ;;  %v31836_v7 = vld [vmem:[%s41723_s1 + $0x1638] sm:$0xff] }
 0x2b2   :  { %19190 = vmatpush.bf16.msrb.mxu0 %v31800_v41  ;;  %v31852_v41 = vld [vmem:[%s41723_s1 + $0x16b8] sm:$0xff] }
 0x2b3   :  { %19218 = vmatpush.bf16.msrb.mxu2 %v31816_v52  ;;  %v21954_v52 = vld [vmem:[%s41724_s0 + $0x150] sm:$0xf] }
 0x2b4   :  { %19204 = vmatpush.bf16.msrb.mxu1 %v31808_v51  ;;  %v31039_v51 = vld [vmem:[%s41724_s0 + $0x558] sm:$0x70] }
 0x2b5   :  { %19232 = vmatpush.bf16.msrb.mxu3 %v31824_v48  ;;  %v31805_v48 = vld [vmem:[%s41723_s1 + $0x1540] sm:$0xff] }
 0x2b6   :  { %19191 = vmatpush.bf16.msrb.mxu0 %v31799_v0  ;;  %v30910_v0 = vld [vmem:[%s41724_s0 + $0x154] sm:$0xf] }
 0x2b7   :  { %19219 = vmatpush.bf16.msrb.mxu2 %v31815_v56  ;;  %v21956_v56 = vld [vmem:[%s41724_s0 + $0x554] sm:$0x70] }
 0x2b8   :  { %19205 = vmatpush.bf16.msrb.mxu1 %v31807_v44  ;;  %v30911_v44 = vld [vmem:[%s41724_s0 + $0x15c] sm:$0xf]  ;;  %v21959_v33 = vor.u32 %v30910_v0, %v21956_v56  ;;  %v31833_v0 = vld [vmem:[%s41723_s1 + $0x1620] sm:$0xff] }
 0x2b9   :  { %19233 = vmatpush.bf16.msrb.mxu3 %v31823_v57  ;;  %v21964_v57 = vld [vmem:[%s41724_s0 + $0x55c] sm:$0x70] }
 0x2ba   :  { %19192 = vmatpush.bf16.msrb.mxu0 %v31798_v22  ;;  %v21955_v22 = vor.u32 %v31038_v54, %v21954_v52  ;;  %v21967_v49 = vor.u32 %v30911_v44, %v21964_v57  ;;  %v36052_v52 = vpop.f32.mrf.mxu2  ;;  %v31834_v54 = vld [vmem:[%s41723_s1 + $0x1628] sm:$0xff]  ;;  %v31849_v56 = vld [vmem:[%s41723_s1 + $0x16a0] sm:$0xff] }
 0x2bb   :  { %19220 = vmatpush.bf16.msrb.mxu2 %v31814_v34  ;;  %v21963_v34 = vor.u32 %v31039_v51, %v21962_v43  ;;  %41752 = vst [vmem:[#allocation27_spill] sm:$0xff] %v36052_v52  ;;  %v31850_v43 = vld [vmem:[%s41723_s1 + $0x16a8] sm:$0xff]  ;;  %v36060_v51 = vpop.f32.mrf.mxu3 }
 0x2bc   :  { %19206 = vmatpush.bf16.msrb.mxu1 %v31806_v26  ;;  %v31844_v26 = vld [vmem:[%s41723_s1 + $0x1678] sm:$0xff]  ;;  %41753 = vst [vmem:[#allocation28_spill] sm:$0xff] %v36060_v51 }
 0x2bd   :  { %19234 = vmatpush.bf16.msrb.mxu3 %v31822_v46  ;;  %v31860_v46 = vld [vmem:[%s41723_s1 + $0x16f8] sm:$0xff] }
 0x2be   :  { %19193 = vmatpush.bf16.msrb.mxu0 %v31797_v10  ;;  %v31835_v10 = vld [vmem:[%s41723_s1 + $0x1630] sm:$0xff] }
 0x2bf   :  { %19221 = vmatpush.bf16.msrb.mxu2 %v31813_v39  ;;  %v31851_v39 = vld [vmem:[%s41723_s1 + $0x16b0] sm:$0xff] }
 0x2c0   :  { %19207 = vmatpush.bf16.msrb.mxu1 %v31805_v48  ;;  %v18971_v48 = vpop.f32.mrf.mxu0  ;;  %v18985_v44 = vpop.f32.mrf.mxu1 }
 0x2c1   :  { %19235 = vmatpush.bf16.msrb.mxu3 %v31821_v58  ;;  %19194 = vmatmul.bf16.vlgmr.msrb.gmra.mxu0 %v21955_v22  ;;  %v18972_v58 = vadd.f32 %v18971_v48, %v35962_v8  ;;  %v31841_v22 = vld [vmem:[%s41723_s1 + $0x1660] sm:$0xff]  ;;  %v31855_v48 = vld [vmem:[%s41723_s1 + $0x16d0] sm:$0xff] }
 0x2c2   :  { %19242 = vmatpush.bf16.msra.mxu0 %v31836_v7  ;;  %19222 = vmatmul.bf16.vlgmr.msrb.gmra.mxu2 %v21963_v34  ;;  %v31843_v7 = vld [vmem:[%s41723_s1 + $0x1670] sm:$0xff]  ;;  %v31857_v8 = vld [vmem:[%s41723_s1 + $0x16e0] sm:$0xff]  ;;  %v31832_v34 = vld [vmem:[%s41723_s1 + $0x1618] sm:$0xff] }
 0x2c3   :  { %19270 = vmatpush.bf16.msra.mxu2 %v31852_v41  ;;  %v31859_v41 = vld [vmem:[%s41723_s1 + $0x16f0] sm:$0xff]  ;;  %19208 = vmatmul.bf16.vlgmr.msrb.gmra.mxu1 %v21959_v33  ;;  %v31858_v33 = vld [vmem:[%s41723_s1 + $0x16e8] sm:$0xff]  ;;  %v18986_v57 = vadd.f32 %v18985_v44, %v18972_v58 }
 0x2c4   :  { %19256 = vmatpush.bf16.msra.mxu1 %v31844_v26  ;;  %19236 = vmatmul.bf16.vlgmr.msrb.gmra.mxu3 %v21967_v49  ;;  %v31842_v49 = vld [vmem:[%s41723_s1 + $0x1668] sm:$0xff]  ;;  %v31848_v26 = vld [vmem:[%s41723_s1 + $0x1698] sm:$0xff] }
 0x2c5   :  { %19284 = vmatpush.bf16.msra.mxu3 %v31860_v46  ;;  %v18999_v46 = vpop.f32.mrf.mxu2  ;;  %v31830_v58 = vld [vmem:[%s41723_s1 + $0x1608] sm:$0xff] }
 0x2c6   :  { %19243 = vmatpush.bf16.msra.mxu0 %v31835_v10  ;;  %v19000_v10 = vadd.f32 %v18999_v46, %v18986_v57  ;;  %v31854_v44 = vld [vmem:[%s41723_s1 + $0x16c8] sm:$0xff]  ;;  %v31829_v57 = vld [vmem:[%s41723_s1 + $0x1600] sm:$0xff] }
 0x2c7   :  { %19271 = vmatpush.bf16.msra.mxu2 %v31851_v39  ;;  %v31840_v39 = vld [vmem:[%s41723_s1 + $0x1658] sm:$0xff]  ;;  %v31040_v46 = vld [vmem:[%s41724_s0 + $0x560] sm:$0x70] }
 0x2c8   :  { %19257 = vmatpush.bf16.msra.mxu1 %v31843_v7  ;;  %v31856_v7 = vld [vmem:[%s41723_s1 + $0x16d8] sm:$0xff]  ;;  %v36161_v51 = vpop.f32.mrf.mxu0  ;;  %v36169_v61 = vpop.f32.mrf.mxu1 }
 0x2c9   :  { %19285 = vmatpush.bf16.msra.mxu3 %v31859_v41  ;;  %v19013_v41 = vpop.f32.mrf.mxu3  ;;  %41754 = vst [vmem:[#allocation29_spill] sm:$0xff] %v36161_v51 }
 0x2ca   :  { %19244 = vmatpush.bf16.msra.mxu0 %v31834_v54  ;;  %v36093_v54 = vadd.f32 %v19013_v41, %v19000_v10  ;;  %v21978_v10 = vld [vmem:[%s41724_s0 + $0x168] sm:$0xf]  ;;  %v31853_v41 = vld [vmem:[%s41723_s1 + $0x16c0] sm:$0xff]  ;;  %41755 = vst [vmem:[#allocation30_spill] sm:$0xff] %v36169_v61 }
 0x2cb   :  { %19272 = vmatpush.bf16.msra.mxu2 %v31850_v43  ;;  %v31831_v43 = vld [vmem:[%s41723_s1 + $0x1610] sm:$0xff] }
 0x2cc   :  { %19258 = vmatpush.bf16.msra.mxu1 %v31842_v49  ;;  %v31847_v49 = vld [vmem:[%s41723_s1 + $0x1690] sm:$0xff] }
 0x2cd   :  { %19286 = vmatpush.bf16.msra.mxu3 %v31858_v33  ;;  %v31839_v33 = vld [vmem:[%s41723_s1 + $0x1650] sm:$0xff] }
 0x2ce   :  { %19245 = vmatpush.bf16.msra.mxu0 %v31833_v0  ;;  %v31846_v0 = vld [vmem:[%s41723_s1 + $0x1688] sm:$0xff] }
 0x2cf   :  { %19273 = vmatpush.bf16.msra.mxu2 %v31849_v56  ;;  %v31838_v56 = vld [vmem:[%s41723_s1 + $0x1648] sm:$0xff] }
 0x2d0   :  { %19259 = vmatpush.bf16.msra.mxu1 %v31841_v22  ;;  %v31845_v22 = vld [vmem:[%s41723_s1 + $0x1680] sm:$0xff] }
 0x2d1   :  { %19287 = vmatpush.bf16.msra.mxu3 %v31857_v8  ;;  %v31868_v8 = vld [vmem:[%s41723_s1 + $0x1738] sm:$0xff] }
 0x2d2   :  { %19246 = vmatpush.bf16.msra.mxu0 %v31832_v34  ;;  %v31884_v34 = vld [vmem:[%s41723_s1 + $0x17b8] sm:$0xff] }
 0x2d3   :  { %19274 = vmatpush.bf16.msra.mxu2 %v31848_v26  ;;  %v21970_v26 = vld [vmem:[%s41724_s0 + $0x160] sm:$0xf] }
 0x2d4   :  { %19260 = vmatpush.bf16.msra.mxu1 %v31840_v39  ;;  %v31041_v39 = vld [vmem:[%s41724_s0 + $0x568] sm:$0x70] }
 0x2d5   :  { %19288 = vmatpush.bf16.msra.mxu3 %v31856_v7  ;;  %v31837_v7 = vld [vmem:[%s41723_s1 + $0x1640] sm:$0xff] }
 0x2d6   :  { %19247 = vmatpush.bf16.msra.mxu0 %v31831_v43  ;;  %v30912_v43 = vld [vmem:[%s41724_s0 + $0x164] sm:$0xf] }
 0x2d7   :  { %19275 = vmatpush.bf16.msra.mxu2 %v31847_v49  ;;  %v21972_v49 = vld [vmem:[%s41724_s0 + $0x564] sm:$0x70] }
 0x2d8   :  { %19261 = vmatpush.bf16.msra.mxu1 %v31839_v33  ;;  %v30913_v33 = vld [vmem:[%s41724_s0 + $0x16c] sm:$0xf]  ;;  %v21975_v52 = vor.u32 %v30912_v43, %v21972_v49  ;;  %v31865_v43 = vld [vmem:[%s41723_s1 + $0x1720] sm:$0xff] }
 0x2d9   :  { %19289 = vmatpush.bf16.msra.mxu3 %v31855_v48  ;;  %v21980_v48 = vld [vmem:[%s41724_s0 + $0x56c] sm:$0x70]  ;;  %v31881_v49 = vld [vmem:[%s41723_s1 + $0x17a0] sm:$0xff] }
 0x2da   :  { %19248 = vmatpush.bf16.msra.mxu0 %v31830_v58  ;;  %v21971_v58 = vor.u32 %v31040_v46, %v21970_v26  ;;  %v21983_v37 = vor.u32 %v30913_v33, %v21980_v48  ;;  %v36183_v26 = vpop.f32.mrf.mxu2  ;;  %v31866_v46 = vld [vmem:[%s41723_s1 + $0x1728] sm:$0xff] }
 0x2db   :  { %19276 = vmatpush.bf16.msra.mxu2 %v31846_v0  ;;  %v21979_v0 = vor.u32 %v31041_v39, %v21978_v10  ;;  %41756 = vst [vmem:[#allocation31_spill] sm:$0xff] %v36183_v26  ;;  %v31882_v10 = vld [vmem:[%s41723_s1 + $0x17a8] sm:$0xff]  ;;  %v36191_v39 = vpop.f32.mrf.mxu3 }
 0x2dc   :  { %19262 = vmatpush.bf16.msra.mxu1 %v31838_v56  ;;  %v31876_v56 = vld [vmem:[%s41723_s1 + $0x1778] sm:$0xff]  ;;  %41757 = vst [vmem:[#allocation32_spill] sm:$0xff] %v36191_v39 }
 0x2dd   :  { %19290 = vmatpush.bf16.msra.mxu3 %v31854_v44  ;;  %v31892_v44 = vld [vmem:[%s41723_s1 + $0x17f8] sm:$0xff] }
 0x2de   :  { %19249 = vmatpush.bf16.msra.mxu0 %v31829_v57  ;;  %v31867_v57 = vld [vmem:[%s41723_s1 + $0x1730] sm:$0xff] }
 0x2df   :  { %19277 = vmatpush.bf16.msra.mxu2 %v31845_v22  ;;  %v31883_v22 = vld [vmem:[%s41723_s1 + $0x17b0] sm:$0xff] }
 0x2e0   :  { %19263 = vmatpush.bf16.msra.mxu1 %v31837_v7  ;;  %v19027_v7 = vpop.f32.mrf.mxu0  ;;  %v19041_v33 = vpop.f32.mrf.mxu1 }
 0x2e1   :  { %19291 = vmatpush.bf16.msra.mxu3 %v31853_v41  ;;  %19250 = vmatmul.bf16.vlgmr.msra.gmra.mxu0 %v21971_v58  ;;  %v19028_v41 = vadd.f32 %v19027_v7, %v36093_v54  ;;  %v31873_v58 = vld [vmem:[%s41723_s1 + $0x1760] sm:$0xff]  ;;  %v31887_v7 = vld [vmem:[%s41723_s1 + $0x17d0] sm:$0xff] }
 0x2e2   :  { %19298 = vmatpush.bf16.msrb.mxu0 %v31868_v8  ;;  %19278 = vmatmul.bf16.vlgmr.msra.gmra.mxu2 %v21979_v0  ;;  %v31875_v8 = vld [vmem:[%s41723_s1 + $0x1770] sm:$0xff]  ;;  %v31889_v54 = vld [vmem:[%s41723_s1 + $0x17e0] sm:$0xff]  ;;  %v31864_v0 = vld [vmem:[%s41723_s1 + $0x1718] sm:$0xff] }
 0x2e3   :  { %19326 = vmatpush.bf16.msrb.mxu2 %v31884_v34  ;;  %v31891_v34 = vld [vmem:[%s41723_s1 + $0x17f0] sm:$0xff]  ;;  %19264 = vmatmul.bf16.vlgmr.msra.gmra.mxu1 %v21975_v52  ;;  %v31890_v52 = vld [vmem:[%s41723_s1 + $0x17e8] sm:$0xff]  ;;  %v19042_v48 = vadd.f32 %v19041_v33, %v19028_v41 }
 0x2e4   :  { %19312 = vmatpush.bf16.msrb.mxu1 %v31876_v56  ;;  %19292 = vmatmul.bf16.vlgmr.msra.gmra.mxu3 %v21983_v37  ;;  %v31874_v37 = vld [vmem:[%s41723_s1 + $0x1768] sm:$0xff]  ;;  %v31880_v56 = vld [vmem:[%s41723_s1 + $0x1798] sm:$0xff] }
 0x2e5   :  { %19340 = vmatpush.bf16.msrb.mxu3 %v31892_v44  ;;  %v19055_v44 = vpop.f32.mrf.mxu2  ;;  %v31862_v41 = vld [vmem:[%s41723_s1 + $0x1708] sm:$0xff] }
 0x2e6   :  { %19299 = vmatpush.bf16.msrb.mxu0 %v31867_v57  ;;  %v19056_v57 = vadd.f32 %v19055_v44, %v19042_v48  ;;  %v31886_v33 = vld [vmem:[%s41723_s1 + $0x17c8] sm:$0xff]  ;;  %v31861_v48 = vld [vmem:[%s41723_s1 + $0x1700] sm:$0xff]  ;;  %v31042_v44 = vld [vmem:[%s41724_s0 + $0x570] sm:$0x70] }
 0x2e7   :  { %19327 = vmatpush.bf16.msrb.mxu2 %v31883_v22  ;;  %v31872_v22 = vld [vmem:[%s41723_s1 + $0x1758] sm:$0xff] }
 0x2e8   :  { %19313 = vmatpush.bf16.msrb.mxu1 %v31875_v8  ;;  %v31888_v8 = vld [vmem:[%s41723_s1 + $0x17d8] sm:$0xff]  ;;  %v36292_v39 = vpop.f32.mrf.mxu0  ;;  %v36300_v51 = vpop.f32.mrf.mxu1 }
 0x2e9   :  { %19341 = vmatpush.bf16.msrb.mxu3 %v31891_v34  ;;  %v19069_v34 = vpop.f32.mrf.mxu3  ;;  %41758 = vst [vmem:[#allocation33_spill] sm:$0xff] %v36292_v39 }
 0x2ea   :  { %19300 = vmatpush.bf16.msrb.mxu0 %v31866_v46  ;;  %v36224_v46 = vadd.f32 %v19069_v34, %v19056_v57  ;;  %v21994_v57 = vld [vmem:[%s41724_s0 + $0x178] sm:$0xf]  ;;  %v31885_v34 = vld [vmem:[%s41723_s1 + $0x17c0] sm:$0xff]  ;;  %41759 = vst [vmem:[#allocation34_spill] sm:$0xff] %v36300_v51 }
 0x2eb   :  { %19328 = vmatpush.bf16.msrb.mxu2 %v31882_v10  ;;  %v31863_v10 = vld [vmem:[%s41723_s1 + $0x1710] sm:$0xff] }
 0x2ec   :  { %19314 = vmatpush.bf16.msrb.mxu1 %v31874_v37  ;;  %v31879_v37 = vld [vmem:[%s41723_s1 + $0x1790] sm:$0xff] }
 0x2ed   :  { %19342 = vmatpush.bf16.msrb.mxu3 %v31890_v52  ;;  %v31871_v52 = vld [vmem:[%s41723_s1 + $0x1750] sm:$0xff] }
 0x2ee   :  { %19301 = vmatpush.bf16.msrb.mxu0 %v31865_v43  ;;  %v31878_v43 = vld [vmem:[%s41723_s1 + $0x1788] sm:$0xff] }
 0x2ef   :  { %19329 = vmatpush.bf16.msrb.mxu2 %v31881_v49  ;;  %v31870_v49 = vld [vmem:[%s41723_s1 + $0x1748] sm:$0xff] }
 0x2f0   :  { %19315 = vmatpush.bf16.msrb.mxu1 %v31873_v58  ;;  %v31877_v58 = vld [vmem:[%s41723_s1 + $0x1780] sm:$0xff] }
 0x2f1   :  { %19343 = vmatpush.bf16.msrb.mxu3 %v31889_v54  ;;  %v31900_v54 = vld [vmem:[%s41723_s1 + $0x1838] sm:$0xff] }
 0x2f2   :  { %19302 = vmatpush.bf16.msrb.mxu0 %v31864_v0  ;;  %v31916_v0 = vld [vmem:[%s41723_s1 + $0x18b8] sm:$0xff] }
 0x2f3   :  { %19330 = vmatpush.bf16.msrb.mxu2 %v31880_v56  ;;  %v21986_v56 = vld [vmem:[%s41724_s0 + $0x170] sm:$0xf] }
 0x2f4   :  { %19316 = vmatpush.bf16.msrb.mxu1 %v31872_v22  ;;  %v31043_v22 = vld [vmem:[%s41724_s0 + $0x578] sm:$0x70] }
 0x2f5   :  { %19344 = vmatpush.bf16.msrb.mxu3 %v31888_v8  ;;  %v31869_v8 = vld [vmem:[%s41723_s1 + $0x1740] sm:$0xff] }
 0x2f6   :  { %19303 = vmatpush.bf16.msrb.mxu0 %v31863_v10  ;;  %v30914_v10 = vld [vmem:[%s41724_s0 + $0x174] sm:$0xf] }
 0x2f7   :  { %19331 = vmatpush.bf16.msrb.mxu2 %v31879_v37  ;;  %v21988_v37 = vld [vmem:[%s41724_s0 + $0x574] sm:$0x70] }
 0x2f8   :  { %19317 = vmatpush.bf16.msrb.mxu1 %v31871_v52  ;;  %v30915_v52 = vld [vmem:[%s41724_s0 + $0x17c] sm:$0xf]  ;;  %v21991_v26 = vor.u32 %v30914_v10, %v21988_v37  ;;  %v31897_v10 = vld [vmem:[%s41723_s1 + $0x1820] sm:$0xff] }
 0x2f9   :  { %19345 = vmatpush.bf16.msrb.mxu3 %v31887_v7  ;;  %v21996_v7 = vld [vmem:[%s41724_s0 + $0x57c] sm:$0x70] }
 0x2fa   :  { %19304 = vmatpush.bf16.msrb.mxu0 %v31862_v41  ;;  %v21987_v41 = vor.u32 %v31042_v44, %v21986_v56  ;;  %v21999_v61 = vor.u32 %v30915_v52, %v21996_v7  ;;  %v36314_v56 = vpop.f32.mrf.mxu2  ;;  %v31898_v44 = vld [vmem:[%s41723_s1 + $0x1828] sm:$0xff]  ;;  %v31913_v37 = vld [vmem:[%s41723_s1 + $0x18a0] sm:$0xff] }
 0x2fb   :  { %19332 = vmatpush.bf16.msrb.mxu2 %v31878_v43  ;;  %v21995_v43 = vor.u32 %v31043_v22, %v21994_v57  ;;  %41760 = vst [vmem:[#allocation35_spill] sm:$0xff] %v36314_v56  ;;  %v31914_v57 = vld [vmem:[%s41723_s1 + $0x18a8] sm:$0xff]  ;;  %v36322_v22 = vpop.f32.mrf.mxu3 }
 0x2fc   :  { %19318 = vmatpush.bf16.msrb.mxu1 %v31870_v49  ;;  %v31908_v49 = vld [vmem:[%s41723_s1 + $0x1878] sm:$0xff]  ;;  %41761 = vst [vmem:[#allocation36_spill] sm:$0xff] %v36322_v22 }
 0x2fd   :  { %19346 = vmatpush.bf16.msrb.mxu3 %v31886_v33  ;;  %v31924_v33 = vld [vmem:[%s41723_s1 + $0x18f8] sm:$0xff] }
 0x2fe   :  { %19305 = vmatpush.bf16.msrb.mxu0 %v31861_v48  ;;  %v31899_v48 = vld [vmem:[%s41723_s1 + $0x1830] sm:$0xff] }
 0x2ff   :  { %19333 = vmatpush.bf16.msrb.mxu2 %v31877_v58  ;;  %v31915_v58 = vld [vmem:[%s41723_s1 + $0x18b0] sm:$0xff] }
 0x300   :  { %19319 = vmatpush.bf16.msrb.mxu1 %v31869_v8  ;;  %v19083_v8 = vpop.f32.mrf.mxu0  ;;  %v19097_v52 = vpop.f32.mrf.mxu1 }
 0x301   :  { %19347 = vmatpush.bf16.msrb.mxu3 %v31885_v34  ;;  %19306 = vmatmul.bf16.vlgmr.msrb.gmra.mxu0 %v21987_v41  ;;  %v19084_v34 = vadd.f32 %v19083_v8, %v36224_v46  ;;  %v31905_v41 = vld [vmem:[%s41723_s1 + $0x1860] sm:$0xff]  ;;  %v31919_v8 = vld [vmem:[%s41723_s1 + $0x18d0] sm:$0xff] }
 0x302   :  { %19354 = vmatpush.bf16.msra.mxu0 %v31900_v54  ;;  %19334 = vmatmul.bf16.vlgmr.msrb.gmra.mxu2 %v21995_v43  ;;  %v31907_v54 = vld [vmem:[%s41723_s1 + $0x1870] sm:$0xff]  ;;  %v31921_v46 = vld [vmem:[%s41723_s1 + $0x18e0] sm:$0xff]  ;;  %v31896_v43 = vld [vmem:[%s41723_s1 + $0x1818] sm:$0xff] }
 0x303   :  { %19382 = vmatpush.bf16.msra.mxu2 %v31916_v0  ;;  %v31923_v0 = vld [vmem:[%s41723_s1 + $0x18f0] sm:$0xff]  ;;  %19320 = vmatmul.bf16.vlgmr.msrb.gmra.mxu1 %v21991_v26  ;;  %v31922_v26 = vld [vmem:[%s41723_s1 + $0x18e8] sm:$0xff]  ;;  %v19098_v7 = vadd.f32 %v19097_v52, %v19084_v34 }
 0x304   :  { %19368 = vmatpush.bf16.msra.mxu1 %v31908_v49  ;;  %19348 = vmatmul.bf16.vlgmr.msrb.gmra.mxu3 %v21999_v61  ;;  %v31906_v61 = vld [vmem:[%s41723_s1 + $0x1868] sm:$0xff]  ;;  %v31912_v49 = vld [vmem:[%s41723_s1 + $0x1898] sm:$0xff] }
 0x305   :  { %19396 = vmatpush.bf16.msra.mxu3 %v31924_v33  ;;  %v19111_v33 = vpop.f32.mrf.mxu2  ;;  %v31894_v34 = vld [vmem:[%s41723_s1 + $0x1808] sm:$0xff] }
 0x306   :  { %19355 = vmatpush.bf16.msra.mxu0 %v31899_v48  ;;  %v19112_v48 = vadd.f32 %v19111_v33, %v19098_v7  ;;  %v31918_v52 = vld [vmem:[%s41723_s1 + $0x18c8] sm:$0xff]  ;;  %v31893_v7 = vld [vmem:[%s41723_s1 + $0x1800] sm:$0xff] }
 0x307   :  { %19383 = vmatpush.bf16.msra.mxu2 %v31915_v58  ;;  %v31904_v58 = vld [vmem:[%s41723_s1 + $0x1858] sm:$0xff]  ;;  %v31044_v33 = vld [vmem:[%s41724_s0 + $0x580] sm:$0x70] }
 0x308   :  { %19369 = vmatpush.bf16.msra.mxu1 %v31907_v54  ;;  %v31920_v54 = vld [vmem:[%s41723_s1 + $0x18d8] sm:$0xff]  ;;  %v36423_v22 = vpop.f32.mrf.mxu0  ;;  %v36431_v39 = vpop.f32.mrf.mxu1 }
 0x309   :  { %19397 = vmatpush.bf16.msra.mxu3 %v31923_v0  ;;  %v19125_v0 = vpop.f32.mrf.mxu3  ;;  %41762 = vst [vmem:[#allocation37_spill] sm:$0xff] %v36423_v22 }
 0x30a   :  { %19356 = vmatpush.bf16.msra.mxu0 %v31898_v44  ;;  %v36355_v44 = vadd.f32 %v19125_v0, %v19112_v48  ;;  %v22010_v48 = vld [vmem:[%s41724_s0 + $0x188] sm:$0xf]  ;;  %v31917_v0 = vld [vmem:[%s41723_s1 + $0x18c0] sm:$0xff]  ;;  %41763 = vst [vmem:[#allocation38_spill] sm:$0xff] %v36431_v39 }
 0x30b   :  { %19384 = vmatpush.bf16.msra.mxu2 %v31914_v57  ;;  %v31895_v57 = vld [vmem:[%s41723_s1 + $0x1810] sm:$0xff] }
 0x30c   :  { %19370 = vmatpush.bf16.msra.mxu1 %v31906_v61  ;;  %v31911_v61 = vld [vmem:[%s41723_s1 + $0x1890] sm:$0xff] }
 0x30d   :  { %19398 = vmatpush.bf16.msra.mxu3 %v31922_v26  ;;  %v31903_v26 = vld [vmem:[%s41723_s1 + $0x1850] sm:$0xff] }
 0x30e   :  { %19357 = vmatpush.bf16.msra.mxu0 %v31897_v10  ;;  %v31910_v10 = vld [vmem:[%s41723_s1 + $0x1888] sm:$0xff] }
 0x30f   :  { %19385 = vmatpush.bf16.msra.mxu2 %v31913_v37  ;;  %v31902_v37 = vld [vmem:[%s41723_s1 + $0x1848] sm:$0xff] }
 0x310   :  { %19371 = vmatpush.bf16.msra.mxu1 %v31905_v41  ;;  %v31909_v41 = vld [vmem:[%s41723_s1 + $0x1880] sm:$0xff] }
 0x311   :  { %19399 = vmatpush.bf16.msra.mxu3 %v31921_v46  ;;  %v31932_v46 = vld [vmem:[%s41723_s1 + $0x1938] sm:$0xff] }
 0x312   :  { %19358 = vmatpush.bf16.msra.mxu0 %v31896_v43  ;;  %v31948_v43 = vld [vmem:[%s41723_s1 + $0x19b8] sm:$0xff] }
 0x313   :  { %19386 = vmatpush.bf16.msra.mxu2 %v31912_v49  ;;  %v22002_v49 = vld [vmem:[%s41724_s0 + $0x180] sm:$0xf] }
 0x314   :  { %19372 = vmatpush.bf16.msra.mxu1 %v31904_v58  ;;  %v31045_v58 = vld [vmem:[%s41724_s0 + $0x588] sm:$0x70] }
 0x315   :  { %19400 = vmatpush.bf16.msra.mxu3 %v31920_v54  ;;  %v31901_v54 = vld [vmem:[%s41723_s1 + $0x1840] sm:$0xff] }
 0x316   :  { %19359 = vmatpush.bf16.msra.mxu0 %v31895_v57  ;;  %v30916_v57 = vld [vmem:[%s41724_s0 + $0x184] sm:$0xf] }
 0x317   :  { %19387 = vmatpush.bf16.msra.mxu2 %v31911_v61  ;;  %v22004_v61 = vld [vmem:[%s41724_s0 + $0x584] sm:$0x70] }
 0x318   :  { %19373 = vmatpush.bf16.msra.mxu1 %v31903_v26  ;;  %v30917_v26 = vld [vmem:[%s41724_s0 + $0x18c] sm:$0xf]  ;;  %v22007_v56 = vor.u32 %v30916_v57, %v22004_v61  ;;  %v31929_v57 = vld [vmem:[%s41723_s1 + $0x1920] sm:$0xff] }
 0x319   :  { %19401 = vmatpush.bf16.msra.mxu3 %v31919_v8  ;;  %v22012_v8 = vld [vmem:[%s41724_s0 + $0x58c] sm:$0x70]  ;;  %v31945_v61 = vld [vmem:[%s41723_s1 + $0x19a0] sm:$0xff] }
 0x31a   :  { %19360 = vmatpush.bf16.msra.mxu0 %v31894_v34  ;;  %v22003_v34 = vor.u32 %v31044_v33, %v22002_v49  ;;  %v22015_v51 = vor.u32 %v30917_v26, %v22012_v8  ;;  %v36445_v49 = vpop.f32.mrf.mxu2  ;;  %v31930_v33 = vld [vmem:[%s41723_s1 + $0x1928] sm:$0xff] }
 0x31b   :  { %19388 = vmatpush.bf16.msra.mxu2 %v31910_v10  ;;  %v22011_v10 = vor.u32 %v31045_v58, %v22010_v48  ;;  %41764 = vst [vmem:[#allocation39_spill] sm:$0xff] %v36445_v49  ;;  %v31946_v48 = vld [vmem:[%s41723_s1 + $0x19a8] sm:$0xff]  ;;  %v36453_v58 = vpop.f32.mrf.mxu3 }
 0x31c   :  { %19374 = vmatpush.bf16.msra.mxu1 %v31902_v37  ;;  %v31940_v37 = vld [vmem:[%s41723_s1 + $0x1978] sm:$0xff]  ;;  %41765 = vst [vmem:[#allocation40_spill] sm:$0xff] %v36453_v58 }
 0x31d   :  { %19402 = vmatpush.bf16.msra.mxu3 %v31918_v52  ;;  %v31956_v52 = vld [vmem:[%s41723_s1 + $0x19f8] sm:$0xff] }
 0x31e   :  { %19361 = vmatpush.bf16.msra.mxu0 %v31893_v7  ;;  %v31931_v7 = vld [vmem:[%s41723_s1 + $0x1930] sm:$0xff] }
 0x31f   :  { %19389 = vmatpush.bf16.msra.mxu2 %v31909_v41  ;;  %v31947_v41 = vld [vmem:[%s41723_s1 + $0x19b0] sm:$0xff] }
 0x320   :  { %19375 = vmatpush.bf16.msra.mxu1 %v31901_v54  ;;  %v19139_v54 = vpop.f32.mrf.mxu0  ;;  %v19153_v26 = vpop.f32.mrf.mxu1 }
 0x321   :  { %19403 = vmatpush.bf16.msra.mxu3 %v31917_v0  ;;  %19362 = vmatmul.bf16.vlgmr.msra.gmra.mxu0 %v22003_v34  ;;  %v19140_v0 = vadd.f32 %v19139_v54, %v36355_v44  ;;  %v31937_v34 = vld [vmem:[%s41723_s1 + $0x1960] sm:$0xff]  ;;  %v31951_v54 = vld [vmem:[%s41723_s1 + $0x19d0] sm:$0xff] }
 0x322   :  { %19410 = vmatpush.bf16.msrb.mxu0 %v31932_v46  ;;  %19390 = vmatmul.bf16.vlgmr.msra.gmra.mxu2 %v22011_v10  ;;  %v31939_v46 = vld [vmem:[%s41723_s1 + $0x1970] sm:$0xff]  ;;  %v31953_v44 = vld [vmem:[%s41723_s1 + $0x19e0] sm:$0xff]  ;;  %v31928_v10 = vld [vmem:[%s41723_s1 + $0x1918] sm:$0xff] }
 0x323   :  { %19438 = vmatpush.bf16.msrb.mxu2 %v31948_v43  ;;  %v31955_v43 = vld [vmem:[%s41723_s1 + $0x19f0] sm:$0xff]  ;;  %19376 = vmatmul.bf16.vlgmr.msra.gmra.mxu1 %v22007_v56  ;;  %v31954_v56 = vld [vmem:[%s41723_s1 + $0x19e8] sm:$0xff]  ;;  %v19154_v8 = vadd.f32 %v19153_v26, %v19140_v0 }
 0x324   :  { %19424 = vmatpush.bf16.msrb.mxu1 %v31940_v37  ;;  %19404 = vmatmul.bf16.vlgmr.msra.gmra.mxu3 %v22015_v51  ;;  %v31938_v51 = vld [vmem:[%s41723_s1 + $0x1968] sm:$0xff]  ;;  %v31944_v37 = vld [vmem:[%s41723_s1 + $0x1998] sm:$0xff] }
 0x325   :  { %19452 = vmatpush.bf16.msrb.mxu3 %v31956_v52  ;;  %v19167_v52 = vpop.f32.mrf.mxu2  ;;  %v31926_v0 = vld [vmem:[%s41723_s1 + $0x1908] sm:$0xff] }
 0x326   :  { %19411 = vmatpush.bf16.msrb.mxu0 %v31931_v7  ;;  %v19168_v7 = vadd.f32 %v19167_v52, %v19154_v8  ;;  %v31950_v26 = vld [vmem:[%s41723_s1 + $0x19c8] sm:$0xff]  ;;  %v31925_v8 = vld [vmem:[%s41723_s1 + $0x1900] sm:$0xff]  ;;  %v31046_v52 = vld [vmem:[%s41724_s0 + $0x590] sm:$0x70] }
 0x327   :  { %19439 = vmatpush.bf16.msrb.mxu2 %v31947_v41  ;;  %v31936_v41 = vld [vmem:[%s41723_s1 + $0x1958] sm:$0xff] }
 0x328   :  { %19425 = vmatpush.bf16.msrb.mxu1 %v31939_v46  ;;  %v31952_v46 = vld [vmem:[%s41723_s1 + $0x19d8] sm:$0xff]  ;;  %v36554_v58 = vpop.f32.mrf.mxu0  ;;  %v36562_v22 = vpop.f32.mrf.mxu1 }
 0x329   :  { %19453 = vmatpush.bf16.msrb.mxu3 %v31955_v43  ;;  %v19181_v43 = vpop.f32.mrf.mxu3  ;;  %41766 = vst [vmem:[#allocation41_spill] sm:$0xff] %v36554_v58 }
 0x32a   :  { %19412 = vmatpush.bf16.msrb.mxu0 %v31930_v33  ;;  %v36486_v33 = vadd.f32 %v19181_v43, %v19168_v7  ;;  %v22026_v7 = vld [vmem:[%s41724_s0 + $0x198] sm:$0xf]  ;;  %v31949_v43 = vld [vmem:[%s41723_s1 + $0x19c0] sm:$0xff]  ;;  %41767 = vst [vmem:[#allocation42_spill] sm:$0xff] %v36562_v22 }
 0x32b   :  { %19440 = vmatpush.bf16.msrb.mxu2 %v31946_v48  ;;  %v31927_v48 = vld [vmem:[%s41723_s1 + $0x1910] sm:$0xff] }
 0x32c   :  { %19426 = vmatpush.bf16.msrb.mxu1 %v31938_v51  ;;  %v31943_v51 = vld [vmem:[%s41723_s1 + $0x1990] sm:$0xff] }
 0x32d   :  { %19454 = vmatpush.bf16.msrb.mxu3 %v31954_v56  ;;  %v31935_v56 = vld [vmem:[%s41723_s1 + $0x1950] sm:$0xff] }
 0x32e   :  { %19413 = vmatpush.bf16.msrb.mxu0 %v31929_v57  ;;  %v31942_v57 = vld [vmem:[%s41723_s1 + $0x1988] sm:$0xff] }
 0x32f   :  { %19441 = vmatpush.bf16.msrb.mxu2 %v31945_v61  ;;  %v31934_v61 = vld [vmem:[%s41723_s1 + $0x1948] sm:$0xff] }
 0x330   :  { %19427 = vmatpush.bf16.msrb.mxu1 %v31937_v34  ;;  %v31941_v34 = vld [vmem:[%s41723_s1 + $0x1980] sm:$0xff] }
 0x331   :  { %19455 = vmatpush.bf16.msrb.mxu3 %v31953_v44  ;;  %v31964_v44 = vld [vmem:[%s41723_s1 + $0x1a38] sm:$0xff] }
 0x332   :  { %19414 = vmatpush.bf16.msrb.mxu0 %v31928_v10  ;;  %v31980_v10 = vld [vmem:[%s41723_s1 + $0x1ab8] sm:$0xff] }
 0x333   :  { %19442 = vmatpush.bf16.msrb.mxu2 %v31944_v37  ;;  %v22018_v37 = vld [vmem:[%s41724_s0 + $0x190] sm:$0xf] }
 0x334   :  { %19428 = vmatpush.bf16.msrb.mxu1 %v31936_v41  ;;  %v31047_v41 = vld [vmem:[%s41724_s0 + $0x598] sm:$0x70] }
 0x335   :  { %19456 = vmatpush.bf16.msrb.mxu3 %v31952_v46  ;;  %v31933_v46 = vld [vmem:[%s41723_s1 + $0x1940] sm:$0xff] }
 0x336   :  { %19415 = vmatpush.bf16.msrb.mxu0 %v31927_v48  ;;  %v30918_v48 = vld [vmem:[%s41724_s0 + $0x194] sm:$0xf] }
 0x337   :  { %19443 = vmatpush.bf16.msrb.mxu2 %v31943_v51  ;;  %v22020_v51 = vld [vmem:[%s41724_s0 + $0x594] sm:$0x70] }
 0x338   :  { %19429 = vmatpush.bf16.msrb.mxu1 %v31935_v56  ;;  %v30919_v56 = vld [vmem:[%s41724_s0 + $0x19c] sm:$0xf]  ;;  %v22023_v49 = vor.u32 %v30918_v48, %v22020_v51  ;;  %v31961_v48 = vld [vmem:[%s41723_s1 + $0x1a20] sm:$0xff] }
 0x339   :  { %19457 = vmatpush.bf16.msrb.mxu3 %v31951_v54  ;;  %v22028_v54 = vld [vmem:[%s41724_s0 + $0x59c] sm:$0x70] }
 0x33a   :  { %19416 = vmatpush.bf16.msrb.mxu0 %v31926_v0  ;;  %v22019_v0 = vor.u32 %v31046_v52, %v22018_v37  ;;  %v22031_v39 = vor.u32 %v30919_v56, %v22028_v54  ;;  %v36576_v37 = vpop.f32.mrf.mxu2  ;;  %v31962_v52 = vld [vmem:[%s41723_s1 + $0x1a28] sm:$0xff]  ;;  %v31977_v51 = vld [vmem:[%s41723_s1 + $0x1aa0] sm:$0xff] }
 0x33b   :  { %19444 = vmatpush.bf16.msrb.mxu2 %v31942_v57  ;;  %v22027_v57 = vor.u32 %v31047_v41, %v22026_v7  ;;  %41768 = vst [vmem:[#allocation43_spill] sm:$0xff] %v36576_v37  ;;  %v31978_v7 = vld [vmem:[%s41723_s1 + $0x1aa8] sm:$0xff]  ;;  %v36584_v41 = vpop.f32.mrf.mxu3 }
 0x33c   :  { %19430 = vmatpush.bf16.msrb.mxu1 %v31934_v61  ;;  %v31972_v61 = vld [vmem:[%s41723_s1 + $0x1a78] sm:$0xff]  ;;  %41769 = vst [vmem:[#allocation44_spill] sm:$0xff] %v36584_v41 }
 0x33d   :  { %19458 = vmatpush.bf16.msrb.mxu3 %v31950_v26  ;;  %v31988_v26 = vld [vmem:[%s41723_s1 + $0x1af8] sm:$0xff] }
 0x33e   :  { %19417 = vmatpush.bf16.msrb.mxu0 %v31925_v8  ;;  %v31963_v8 = vld [vmem:[%s41723_s1 + $0x1a30] sm:$0xff] }
 0x33f   :  { %19445 = vmatpush.bf16.msrb.mxu2 %v31941_v34  ;;  %v31979_v34 = vld [vmem:[%s41723_s1 + $0x1ab0] sm:$0xff] }
 0x340   :  { %19431 = vmatpush.bf16.msrb.mxu1 %v31933_v46  ;;  %v19195_v46 = vpop.f32.mrf.mxu0  ;;  %v19209_v56 = vpop.f32.mrf.mxu1 }
 0x341   :  { %19459 = vmatpush.bf16.msrb.mxu3 %v31949_v43  ;;  %19418 = vmatmul.bf16.vlgmr.msrb.gmra.mxu0 %v22019_v0  ;;  %v19196_v43 = vadd.f32 %v19195_v46, %v36486_v33  ;;  %v31969_v0 = vld [vmem:[%s41723_s1 + $0x1a60] sm:$0xff]  ;;  %v31983_v46 = vld [vmem:[%s41723_s1 + $0x1ad0] sm:$0xff] }
 0x342   :  { %19466 = vmatpush.bf16.msra.mxu0 %v31964_v44  ;;  %19446 = vmatmul.bf16.vlgmr.msrb.gmra.mxu2 %v22027_v57  ;;  %v31971_v44 = vld [vmem:[%s41723_s1 + $0x1a70] sm:$0xff]  ;;  %v31985_v33 = vld [vmem:[%s41723_s1 + $0x1ae0] sm:$0xff]  ;;  %v31960_v57 = vld [vmem:[%s41723_s1 + $0x1a18] sm:$0xff] }
 0x343   :  { %19494 = vmatpush.bf16.msra.mxu2 %v31980_v10  ;;  %v31987_v10 = vld [vmem:[%s41723_s1 + $0x1af0] sm:$0xff]  ;;  %19432 = vmatmul.bf16.vlgmr.msrb.gmra.mxu1 %v22023_v49  ;;  %v31986_v49 = vld [vmem:[%s41723_s1 + $0x1ae8] sm:$0xff]  ;;  %v19210_v54 = vadd.f32 %v19209_v56, %v19196_v43 }
 0x344   :  { %19480 = vmatpush.bf16.msra.mxu1 %v31972_v61  ;;  %19460 = vmatmul.bf16.vlgmr.msrb.gmra.mxu3 %v22031_v39  ;;  %v31970_v39 = vld [vmem:[%s41723_s1 + $0x1a68] sm:$0xff]  ;;  %v31976_v61 = vld [vmem:[%s41723_s1 + $0x1a98] sm:$0xff] }
 0x345   :  { %19508 = vmatpush.bf16.msra.mxu3 %v31988_v26  ;;  %v19223_v26 = vpop.f32.mrf.mxu2  ;;  %v31958_v43 = vld [vmem:[%s41723_s1 + $0x1a08] sm:$0xff] }
 0x346   :  { %19467 = vmatpush.bf16.msra.mxu0 %v31963_v8  ;;  %v19224_v8 = vadd.f32 %v19223_v26, %v19210_v54  ;;  %v31982_v56 = vld [vmem:[%s41723_s1 + $0x1ac8] sm:$0xff]  ;;  %v31957_v54 = vld [vmem:[%s41723_s1 + $0x1a00] sm:$0xff] }
 0x347   :  { %19495 = vmatpush.bf16.msra.mxu2 %v31979_v34  ;;  %v31968_v34 = vld [vmem:[%s41723_s1 + $0x1a58] sm:$0xff]  ;;  %v31048_v26 = vld [vmem:[%s41724_s0 + $0x5a0] sm:$0x70] }
 0x348   :  { %19481 = vmatpush.bf16.msra.mxu1 %v31971_v44  ;;  %v31984_v44 = vld [vmem:[%s41723_s1 + $0x1ad8] sm:$0xff]  ;;  %v36685_v41 = vpop.f32.mrf.mxu0  ;;  %v36693_v58 = vpop.f32.mrf.mxu1 }
 0x349   :  { %19509 = vmatpush.bf16.msra.mxu3 %v31987_v10  ;;  %v19237_v10 = vpop.f32.mrf.mxu3  ;;  %41770 = vst [vmem:[#allocation45_spill] sm:$0xff] %v36685_v41 }
 0x34a   :  { %19468 = vmatpush.bf16.msra.mxu0 %v31962_v52  ;;  %v36617_v52 = vadd.f32 %v19237_v10, %v19224_v8  ;;  %v22042_v8 = vld [vmem:[%s41724_s0 + $0x1a8] sm:$0xf]  ;;  %v31981_v10 = vld [vmem:[%s41723_s1 + $0x1ac0] sm:$0xff]  ;;  %41771 = vst [vmem:[#allocation46_spill] sm:$0xff] %v36693_v58 }
 0x34b   :  { %19496 = vmatpush.bf16.msra.mxu2 %v31978_v7  ;;  %v31959_v7 = vld [vmem:[%s41723_s1 + $0x1a10] sm:$0xff] }
 0x34c   :  { %19482 = vmatpush.bf16.msra.mxu1 %v31970_v39  ;;  %v31975_v39 = vld [vmem:[%s41723_s1 + $0x1a90] sm:$0xff] }
 0x34d   :  { %19510 = vmatpush.bf16.msra.mxu3 %v31986_v49  ;;  %v31967_v49 = vld [vmem:[%s41723_s1 + $0x1a50] sm:$0xff] }
 0x34e   :  { %19469 = vmatpush.bf16.msra.mxu0 %v31961_v48  ;;  %v31974_v48 = vld [vmem:[%s41723_s1 + $0x1a88] sm:$0xff] }
 0x34f   :  { %19497 = vmatpush.bf16.msra.mxu2 %v31977_v51  ;;  %v31966_v51 = vld [vmem:[%s41723_s1 + $0x1a48] sm:$0xff] }
 0x350   :  { %19483 = vmatpush.bf16.msra.mxu1 %v31969_v0  ;;  %v31973_v0 = vld [vmem:[%s41723_s1 + $0x1a80] sm:$0xff] }
 0x351   :  { %19511 = vmatpush.bf16.msra.mxu3 %v31985_v33  ;;  %v31996_v33 = vld [vmem:[%s41723_s1 + $0x1b38] sm:$0xff] }
 0x352   :  { %19470 = vmatpush.bf16.msra.mxu0 %v31960_v57  ;;  %v32012_v57 = vld [vmem:[%s41723_s1 + $0x1bb8] sm:$0xff] }
 0x353   :  { %19498 = vmatpush.bf16.msra.mxu2 %v31976_v61  ;;  %v22034_v61 = vld [vmem:[%s41724_s0 + $0x1a0] sm:$0xf] }
 0x354   :  { %19484 = vmatpush.bf16.msra.mxu1 %v31968_v34  ;;  %v31049_v34 = vld [vmem:[%s41724_s0 + $0x5a8] sm:$0x70] }
 0x355   :  { %19512 = vmatpush.bf16.msra.mxu3 %v31984_v44  ;;  %v31965_v44 = vld [vmem:[%s41723_s1 + $0x1a40] sm:$0xff] }
 0x356   :  { %19471 = vmatpush.bf16.msra.mxu0 %v31959_v7  ;;  %v30920_v7 = vld [vmem:[%s41724_s0 + $0x1a4] sm:$0xf] }
 0x357   :  { %19499 = vmatpush.bf16.msra.mxu2 %v31975_v39  ;;  %v22036_v39 = vld [vmem:[%s41724_s0 + $0x5a4] sm:$0x70] }
 0x358   :  { %19485 = vmatpush.bf16.msra.mxu1 %v31967_v49  ;;  %v30921_v49 = vld [vmem:[%s41724_s0 + $0x1ac] sm:$0xf]  ;;  %v22039_v37 = vor.u32 %v30920_v7, %v22036_v39  ;;  %v31993_v7 = vld [vmem:[%s41723_s1 + $0x1b20] sm:$0xff] }
 0x359   :  { %19513 = vmatpush.bf16.msra.mxu3 %v31983_v46  ;;  %v22044_v46 = vld [vmem:[%s41724_s0 + $0x5ac] sm:$0x70]  ;;  %v32009_v39 = vld [vmem:[%s41723_s1 + $0x1ba0] sm:$0xff] }
 0x35a   :  { %19472 = vmatpush.bf16.msra.mxu0 %v31958_v43  ;;  %v22035_v43 = vor.u32 %v31048_v26, %v22034_v61  ;;  %v22047_v22 = vor.u32 %v30921_v49, %v22044_v46  ;;  %v36707_v61 = vpop.f32.mrf.mxu2  ;;  %v31994_v26 = vld [vmem:[%s41723_s1 + $0x1b28] sm:$0xff] }
 0x35b   :  { %19500 = vmatpush.bf16.msra.mxu2 %v31974_v48  ;;  %v22043_v48 = vor.u32 %v31049_v34, %v22042_v8  ;;  %41772 = vst [vmem:[#allocation47_spill] sm:$0xff] %v36707_v61  ;;  %v32010_v8 = vld [vmem:[%s41723_s1 + $0x1ba8] sm:$0xff]  ;;  %v36715_v34 = vpop.f32.mrf.mxu3 }
 0x35c   :  { %19486 = vmatpush.bf16.msra.mxu1 %v31966_v51  ;;  %v32004_v51 = vld [vmem:[%s41723_s1 + $0x1b78] sm:$0xff]  ;;  %41773 = vst [vmem:[#allocation48_spill] sm:$0xff] %v36715_v34 }
 0x35d   :  { %19514 = vmatpush.bf16.msra.mxu3 %v31982_v56  ;;  %v32020_v56 = vld [vmem:[%s41723_s1 + $0x1bf8] sm:$0xff] }
 0x35e   :  { %19473 = vmatpush.bf16.msra.mxu0 %v31957_v54  ;;  %v31995_v54 = vld [vmem:[%s41723_s1 + $0x1b30] sm:$0xff] }
 0x35f   :  { %19501 = vmatpush.bf16.msra.mxu2 %v31973_v0  ;;  %v32011_v0 = vld [vmem:[%s41723_s1 + $0x1bb0] sm:$0xff] }
 0x360   :  { %19487 = vmatpush.bf16.msra.mxu1 %v31965_v44  ;;  %v19251_v44 = vpop.f32.mrf.mxu0  ;;  %v19265_v49 = vpop.f32.mrf.mxu1 }
 0x361   :  { %19515 = vmatpush.bf16.msra.mxu3 %v31981_v10  ;;  %19474 = vmatmul.bf16.vlgmr.msra.gmra.mxu0 %v22035_v43  ;;  %v19252_v10 = vadd.f32 %v19251_v44, %v36617_v52  ;;  %v32001_v43 = vld [vmem:[%s41723_s1 + $0x1b60] sm:$0xff]  ;;  %v32015_v44 = vld [vmem:[%s41723_s1 + $0x1bd0] sm:$0xff] }
 0x362   :  { %19522 = vmatpush.bf16.msrb.mxu0 %v31996_v33  ;;  %19502 = vmatmul.bf16.vlgmr.msra.gmra.mxu2 %v22043_v48  ;;  %v32003_v33 = vld [vmem:[%s41723_s1 + $0x1b70] sm:$0xff]  ;;  %v32017_v52 = vld [vmem:[%s41723_s1 + $0x1be0] sm:$0xff]  ;;  %v31992_v48 = vld [vmem:[%s41723_s1 + $0x1b18] sm:$0xff] }
 0x363   :  { %19550 = vmatpush.bf16.msrb.mxu2 %v32012_v57  ;;  %v32019_v57 = vld [vmem:[%s41723_s1 + $0x1bf0] sm:$0xff]  ;;  %19488 = vmatmul.bf16.vlgmr.msra.gmra.mxu1 %v22039_v37  ;;  %v32018_v37 = vld [vmem:[%s41723_s1 + $0x1be8] sm:$0xff]  ;;  %v19266_v46 = vadd.f32 %v19265_v49, %v19252_v10 }
 0x364   :  { %19536 = vmatpush.bf16.msrb.mxu1 %v32004_v51  ;;  %19516 = vmatmul.bf16.vlgmr.msra.gmra.mxu3 %v22047_v22  ;;  %v32002_v22 = vld [vmem:[%s41723_s1 + $0x1b68] sm:$0xff]  ;;  %v32008_v51 = vld [vmem:[%s41723_s1 + $0x1b98] sm:$0xff] }
 0x365   :  { %19564 = vmatpush.bf16.msrb.mxu3 %v32020_v56  ;;  %v19279_v56 = vpop.f32.mrf.mxu2  ;;  %v31990_v10 = vld [vmem:[%s41723_s1 + $0x1b08] sm:$0xff] }
 0x366   :  { %19523 = vmatpush.bf16.msrb.mxu0 %v31995_v54  ;;  %v19280_v54 = vadd.f32 %v19279_v56, %v19266_v46  ;;  %v32014_v49 = vld [vmem:[%s41723_s1 + $0x1bc8] sm:$0xff]  ;;  %v31989_v46 = vld [vmem:[%s41723_s1 + $0x1b00] sm:$0xff]  ;;  %v31050_v56 = vld [vmem:[%s41724_s0 + $0x5b0] sm:$0x70] }
 0x367   :  { %19551 = vmatpush.bf16.msrb.mxu2 %v32011_v0  ;;  %v32000_v0 = vld [vmem:[%s41723_s1 + $0x1b58] sm:$0xff] }
 0x368   :  { %19537 = vmatpush.bf16.msrb.mxu1 %v32003_v33  ;;  %v32016_v33 = vld [vmem:[%s41723_s1 + $0x1bd8] sm:$0xff]  ;;  %v36816_v34 = vpop.f32.mrf.mxu0  ;;  %v36824_v41 = vpop.f32.mrf.mxu1 }
 0x369   :  { %19565 = vmatpush.bf16.msrb.mxu3 %v32019_v57  ;;  %v19293_v57 = vpop.f32.mrf.mxu3  ;;  %41774 = vst [vmem:[#allocation49_spill] sm:$0xff] %v36816_v34 }
 0x36a   :  { %19524 = vmatpush.bf16.msrb.mxu0 %v31994_v26  ;;  %v36748_v26 = vadd.f32 %v19293_v57, %v19280_v54  ;;  %v22058_v54 = vld [vmem:[%s41724_s0 + $0x1b8] sm:$0xf]  ;;  %v32013_v57 = vld [vmem:[%s41723_s1 + $0x1bc0] sm:$0xff]  ;;  %41775 = vst [vmem:[#allocation50_spill] sm:$0xff] %v36824_v41 }
 0x36b   :  { %19552 = vmatpush.bf16.msrb.mxu2 %v32010_v8  ;;  %v31991_v8 = vld [vmem:[%s41723_s1 + $0x1b10] sm:$0xff] }
 0x36c   :  { %19538 = vmatpush.bf16.msrb.mxu1 %v32002_v22  ;;  %v32007_v22 = vld [vmem:[%s41723_s1 + $0x1b90] sm:$0xff] }
 0x36d   :  { %19566 = vmatpush.bf16.msrb.mxu3 %v32018_v37  ;;  %v31999_v37 = vld [vmem:[%s41723_s1 + $0x1b50] sm:$0xff] }
 0x36e   :  { %19525 = vmatpush.bf16.msrb.mxu0 %v31993_v7  ;;  %v32006_v7 = vld [vmem:[%s41723_s1 + $0x1b88] sm:$0xff] }
 0x36f   :  { %19553 = vmatpush.bf16.msrb.mxu2 %v32009_v39  ;;  %v31998_v39 = vld [vmem:[%s41723_s1 + $0x1b48] sm:$0xff] }
 0x370   :  { %19539 = vmatpush.bf16.msrb.mxu1 %v32001_v43  ;;  %v32005_v43 = vld [vmem:[%s41723_s1 + $0x1b80] sm:$0xff] }
 0x371   :  { %19567 = vmatpush.bf16.msrb.mxu3 %v32017_v52  ;;  %v32028_v52 = vld [vmem:[%s41723_s1 + $0x1c38] sm:$0xff] }
 0x372   :  { %19526 = vmatpush.bf16.msrb.mxu0 %v31992_v48  ;;  %v32044_v48 = vld [vmem:[%s41723_s1 + $0x1cb8] sm:$0xff] }
 0x373   :  { %19554 = vmatpush.bf16.msrb.mxu2 %v32008_v51  ;;  %v22050_v51 = vld [vmem:[%s41724_s0 + $0x1b0] sm:$0xf] }
 0x374   :  { %19540 = vmatpush.bf16.msrb.mxu1 %v32000_v0  ;;  %v31051_v0 = vld [vmem:[%s41724_s0 + $0x5b8] sm:$0x70] }
 0x375   :  { %19568 = vmatpush.bf16.msrb.mxu3 %v32016_v33  ;;  %v31997_v33 = vld [vmem:[%s41723_s1 + $0x1b40] sm:$0xff] }
 0x376   :  { %19527 = vmatpush.bf16.msrb.mxu0 %v31991_v8  ;;  %v30922_v8 = vld [vmem:[%s41724_s0 + $0x1b4] sm:$0xf] }
 0x377   :  { %19555 = vmatpush.bf16.msrb.mxu2 %v32007_v22  ;;  %v22052_v22 = vld [vmem:[%s41724_s0 + $0x5b4] sm:$0x70] }
 0x378   :  { %19541 = vmatpush.bf16.msrb.mxu1 %v31999_v37  ;;  %v30923_v37 = vld [vmem:[%s41724_s0 + $0x1bc] sm:$0xf]  ;;  %v22055_v61 = vor.u32 %v30922_v8, %v22052_v22  ;;  %v32025_v8 = vld [vmem:[%s41723_s1 + $0x1c20] sm:$0xff] }
 0x379   :  { %19569 = vmatpush.bf16.msrb.mxu3 %v32015_v44  ;;  %v22060_v44 = vld [vmem:[%s41724_s0 + $0x5bc] sm:$0x70] }
 0x37a   :  { %19528 = vmatpush.bf16.msrb.mxu0 %v31990_v10  ;;  %v22051_v10 = vor.u32 %v31050_v56, %v22050_v51  ;;  %v22063_v58 = vor.u32 %v30923_v37, %v22060_v44  ;;  %v36838_v51 = vpop.f32.mrf.mxu2  ;;  %v32026_v56 = vld [vmem:[%s41723_s1 + $0x1c28] sm:$0xff]  ;;  %v32041_v22 = vld [vmem:[%s41723_s1 + $0x1ca0] sm:$0xff] }
 0x37b   :  { %19556 = vmatpush.bf16.msrb.mxu2 %v32006_v7  ;;  %v22059_v7 = vor.u32 %v31051_v0, %v22058_v54  ;;  %41776 = vst [vmem:[#allocation51_spill] sm:$0xff] %v36838_v51  ;;  %v32042_v54 = vld [vmem:[%s41723_s1 + $0x1ca8] sm:$0xff]  ;;  %v36846_v0 = vpop.f32.mrf.mxu3 }
 0x37c   :  { %19542 = vmatpush.bf16.msrb.mxu1 %v31998_v39  ;;  %v32036_v39 = vld [vmem:[%s41723_s1 + $0x1c78] sm:$0xff]  ;;  %41777 = vst [vmem:[#allocation52_spill] sm:$0xff] %v36846_v0 }
 0x37d   :  { %19570 = vmatpush.bf16.msrb.mxu3 %v32014_v49  ;;  %v32052_v49 = vld [vmem:[%s41723_s1 + $0x1cf8] sm:$0xff] }
 0x37e   :  { %19529 = vmatpush.bf16.msrb.mxu0 %v31989_v46  ;;  %v32027_v46 = vld [vmem:[%s41723_s1 + $0x1c30] sm:$0xff] }
 0x37f   :  { %19557 = vmatpush.bf16.msrb.mxu2 %v32005_v43  ;;  %v32043_v43 = vld [vmem:[%s41723_s1 + $0x1cb0] sm:$0xff] }
 0x380   :  { %19543 = vmatpush.bf16.msrb.mxu1 %v31997_v33  ;;  %v19307_v33 = vpop.f32.mrf.mxu0  ;;  %v19321_v37 = vpop.f32.mrf.mxu1 }
 0x381   :  { %19571 = vmatpush.bf16.msrb.mxu3 %v32013_v57  ;;  %19530 = vmatmul.bf16.vlgmr.msrb.gmra.mxu0 %v22051_v10  ;;  %v19308_v57 = vadd.f32 %v19307_v33, %v36748_v26  ;;  %v32033_v10 = vld [vmem:[%s41723_s1 + $0x1c60] sm:$0xff]  ;;  %v32047_v33 = vld [vmem:[%s41723_s1 + $0x1cd0] sm:$0xff] }
 0x382   :  { %19578 = vmatpush.bf16.msra.mxu0 %v32028_v52  ;;  %19558 = vmatmul.bf16.vlgmr.msrb.gmra.mxu2 %v22059_v7  ;;  %v32035_v52 = vld [vmem:[%s41723_s1 + $0x1c70] sm:$0xff]  ;;  %v32049_v26 = vld [vmem:[%s41723_s1 + $0x1ce0] sm:$0xff]  ;;  %v32024_v7 = vld [vmem:[%s41723_s1 + $0x1c18] sm:$0xff] }
 0x383   :  { %19606 = vmatpush.bf16.msra.mxu2 %v32044_v48  ;;  %v32051_v48 = vld [vmem:[%s41723_s1 + $0x1cf0] sm:$0xff]  ;;  %19544 = vmatmul.bf16.vlgmr.msrb.gmra.mxu1 %v22055_v61  ;;  %v32050_v61 = vld [vmem:[%s41723_s1 + $0x1ce8] sm:$0xff]  ;;  %v19322_v44 = vadd.f32 %v19321_v37, %v19308_v57 }
 0x384   :  { %19592 = vmatpush.bf16.msra.mxu1 %v32036_v39  ;;  %19572 = vmatmul.bf16.vlgmr.msrb.gmra.mxu3 %v22063_v58  ;;  %v32034_v58 = vld [vmem:[%s41723_s1 + $0x1c68] sm:$0xff]  ;;  %v32040_v39 = vld [vmem:[%s41723_s1 + $0x1c98] sm:$0xff] }
 0x385   :  { %19620 = vmatpush.bf16.msra.mxu3 %v32052_v49  ;;  %v19335_v49 = vpop.f32.mrf.mxu2  ;;  %v32022_v57 = vld [vmem:[%s41723_s1 + $0x1c08] sm:$0xff] }
 0x386   :  { %19579 = vmatpush.bf16.msra.mxu0 %v32027_v46  ;;  %v19336_v46 = vadd.f32 %v19335_v49, %v19322_v44  ;;  %v32046_v37 = vld [vmem:[%s41723_s1 + $0x1cc8] sm:$0xff]  ;;  %v32021_v44 = vld [vmem:[%s41723_s1 + $0x1c00] sm:$0xff] }
 0x387   :  { %19607 = vmatpush.bf16.msra.mxu2 %v32043_v43  ;;  %v32032_v43 = vld [vmem:[%s41723_s1 + $0x1c58] sm:$0xff]  ;;  %v31052_v49 = vld [vmem:[%s41724_s0 + $0x5c0] sm:$0x70] }
 0x388   :  { %19593 = vmatpush.bf16.msra.mxu1 %v32035_v52  ;;  %v32048_v52 = vld [vmem:[%s41723_s1 + $0x1cd8] sm:$0xff]  ;;  %v36947_v0 = vpop.f32.mrf.mxu0  ;;  %v36955_v34 = vpop.f32.mrf.mxu1 }
 0x389   :  { %19621 = vmatpush.bf16.msra.mxu3 %v32051_v48  ;;  %v19349_v48 = vpop.f32.mrf.mxu3  ;;  %41778 = vst [vmem:[#allocation53_spill] sm:$0xff] %v36947_v0 }
 0x38a   :  { %19580 = vmatpush.bf16.msra.mxu0 %v32026_v56  ;;  %v36879_v56 = vadd.f32 %v19349_v48, %v19336_v46  ;;  %v22074_v46 = vld [vmem:[%s41724_s0 + $0x1c8] sm:$0xf]  ;;  %v32045_v48 = vld [vmem:[%s41723_s1 + $0x1cc0] sm:$0xff]  ;;  %41779 = vst [vmem:[#allocation54_spill] sm:$0xff] %v36955_v34 }
 0x38b   :  { %19608 = vmatpush.bf16.msra.mxu2 %v32042_v54  ;;  %v32023_v54 = vld [vmem:[%s41723_s1 + $0x1c10] sm:$0xff] }
 0x38c   :  { %19594 = vmatpush.bf16.msra.mxu1 %v32034_v58  ;;  %v32039_v58 = vld [vmem:[%s41723_s1 + $0x1c90] sm:$0xff] }
 0x38d   :  { %19622 = vmatpush.bf16.msra.mxu3 %v32050_v61  ;;  %v32031_v61 = vld [vmem:[%s41723_s1 + $0x1c50] sm:$0xff] }
 0x38e   :  { %19581 = vmatpush.bf16.msra.mxu0 %v32025_v8  ;;  %v32038_v8 = vld [vmem:[%s41723_s1 + $0x1c88] sm:$0xff] }
 0x38f   :  { %19609 = vmatpush.bf16.msra.mxu2 %v32041_v22  ;;  %v32030_v22 = vld [vmem:[%s41723_s1 + $0x1c48] sm:$0xff] }
 0x390   :  { %19595 = vmatpush.bf16.msra.mxu1 %v32033_v10  ;;  %v32037_v10 = vld [vmem:[%s41723_s1 + $0x1c80] sm:$0xff] }
 0x391   :  { %19623 = vmatpush.bf16.msra.mxu3 %v32049_v26  ;;  %v32060_v26 = vld [vmem:[%s41723_s1 + $0x1d38] sm:$0xff] }
 0x392   :  { %19582 = vmatpush.bf16.msra.mxu0 %v32024_v7  ;;  %v32076_v7 = vld [vmem:[%s41723_s1 + $0x1db8] sm:$0xff] }
 0x393   :  { %19610 = vmatpush.bf16.msra.mxu2 %v32040_v39  ;;  %v22066_v39 = vld [vmem:[%s41724_s0 + $0x1c0] sm:$0xf] }
 0x394   :  { %19596 = vmatpush.bf16.msra.mxu1 %v32032_v43  ;;  %v31053_v43 = vld [vmem:[%s41724_s0 + $0x5c8] sm:$0x70] }
 0x395   :  { %19624 = vmatpush.bf16.msra.mxu3 %v32048_v52  ;;  %v32029_v52 = vld [vmem:[%s41723_s1 + $0x1c40] sm:$0xff] }
 0x396   :  { %19583 = vmatpush.bf16.msra.mxu0 %v32023_v54  ;;  %v30924_v54 = vld [vmem:[%s41724_s0 + $0x1c4] sm:$0xf] }
 0x397   :  { %19611 = vmatpush.bf16.msra.mxu2 %v32039_v58  ;;  %v22068_v58 = vld [vmem:[%s41724_s0 + $0x5c4] sm:$0x70] }
 0x398   :  { %19597 = vmatpush.bf16.msra.mxu1 %v32031_v61  ;;  %v30925_v61 = vld [vmem:[%s41724_s0 + $0x1cc] sm:$0xf]  ;;  %v22071_v51 = vor.u32 %v30924_v54, %v22068_v58  ;;  %v32057_v54 = vld [vmem:[%s41723_s1 + $0x1d20] sm:$0xff] }
 0x399   :  { %19625 = vmatpush.bf16.msra.mxu3 %v32047_v33  ;;  %v22076_v33 = vld [vmem:[%s41724_s0 + $0x5cc] sm:$0x70]  ;;  %v32073_v58 = vld [vmem:[%s41723_s1 + $0x1da0] sm:$0xff] }
 0x39a   :  { %19584 = vmatpush.bf16.msra.mxu0 %v32022_v57  ;;  %v22067_v57 = vor.u32 %v31052_v49, %v22066_v39  ;;  %v22079_v41 = vor.u32 %v30925_v61, %v22076_v33  ;;  %v36969_v39 = vpop.f32.mrf.mxu2  ;;  %v32058_v49 = vld [vmem:[%s41723_s1 + $0x1d28] sm:$0xff] }
 0x39b   :  { %19612 = vmatpush.bf16.msra.mxu2 %v32038_v8  ;;  %v22075_v8 = vor.u32 %v31053_v43, %v22074_v46  ;;  %41780 = vst [vmem:[#allocation55_spill] sm:$0xff] %v36969_v39  ;;  %v32074_v46 = vld [vmem:[%s41723_s1 + $0x1da8] sm:$0xff]  ;;  %v36977_v43 = vpop.f32.mrf.mxu3 }
 0x39c   :  { %19598 = vmatpush.bf16.msra.mxu1 %v32030_v22  ;;  %v32068_v22 = vld [vmem:[%s41723_s1 + $0x1d78] sm:$0xff]  ;;  %41781 = vst [vmem:[#allocation56_spill] sm:$0xff] %v36977_v43 }
 0x39d   :  { %19626 = vmatpush.bf16.msra.mxu3 %v32046_v37  ;;  %v32084_v37 = vld [vmem:[%s41723_s1 + $0x1df8] sm:$0xff] }
 0x39e   :  { %19585 = vmatpush.bf16.msra.mxu0 %v32021_v44  ;;  %v32059_v44 = vld [vmem:[%s41723_s1 + $0x1d30] sm:$0xff] }
 0x39f   :  { %19613 = vmatpush.bf16.msra.mxu2 %v32037_v10  ;;  %v32075_v10 = vld [vmem:[%s41723_s1 + $0x1db0] sm:$0xff] }
 0x3a0   :  { %19599 = vmatpush.bf16.msra.mxu1 %v32029_v52  ;;  %v19363_v52 = vpop.f32.mrf.mxu0  ;;  %v19377_v61 = vpop.f32.mrf.mxu1 }
 0x3a1   :  { %19627 = vmatpush.bf16.msra.mxu3 %v32045_v48  ;;  %19586 = vmatmul.bf16.vlgmr.msra.gmra.mxu0 %v22067_v57  ;;  %v19364_v48 = vadd.f32 %v19363_v52, %v36879_v56  ;;  %v32065_v57 = vld [vmem:[%s41723_s1 + $0x1d60] sm:$0xff]  ;;  %v32079_v52 = vld [vmem:[%s41723_s1 + $0x1dd0] sm:$0xff] }
 0x3a2   :  { %19634 = vmatpush.bf16.msrb.mxu0 %v32060_v26  ;;  %19614 = vmatmul.bf16.vlgmr.msra.gmra.mxu2 %v22075_v8  ;;  %v32067_v26 = vld [vmem:[%s41723_s1 + $0x1d70] sm:$0xff]  ;;  %v32081_v56 = vld [vmem:[%s41723_s1 + $0x1de0] sm:$0xff]  ;;  %v32056_v8 = vld [vmem:[%s41723_s1 + $0x1d18] sm:$0xff] }
 0x3a3   :  { %19662 = vmatpush.bf16.msrb.mxu2 %v32076_v7  ;;  %v32083_v7 = vld [vmem:[%s41723_s1 + $0x1df0] sm:$0xff]  ;;  %19600 = vmatmul.bf16.vlgmr.msra.gmra.mxu1 %v22071_v51  ;;  %v32082_v51 = vld [vmem:[%s41723_s1 + $0x1de8] sm:$0xff]  ;;  %v19378_v33 = vadd.f32 %v19377_v61, %v19364_v48 }
 0x3a4   :  { %19648 = vmatpush.bf16.msrb.mxu1 %v32068_v22  ;;  %19628 = vmatmul.bf16.vlgmr.msra.gmra.mxu3 %v22079_v41  ;;  %v32066_v41 = vld [vmem:[%s41723_s1 + $0x1d68] sm:$0xff]  ;;  %v32072_v22 = vld [vmem:[%s41723_s1 + $0x1d98] sm:$0xff] }
 0x3a5   :  { %19676 = vmatpush.bf16.msrb.mxu3 %v32084_v37  ;;  %v19391_v37 = vpop.f32.mrf.mxu2  ;;  %v32054_v48 = vld [vmem:[%s41723_s1 + $0x1d08] sm:$0xff] }
 0x3a6   :  { %19635 = vmatpush.bf16.msrb.mxu0 %v32059_v44  ;;  %v19392_v44 = vadd.f32 %v19391_v37, %v19378_v33  ;;  %v32078_v61 = vld [vmem:[%s41723_s1 + $0x1dc8] sm:$0xff]  ;;  %v32053_v33 = vld [vmem:[%s41723_s1 + $0x1d00] sm:$0xff]  ;;  %v31054_v37 = vld [vmem:[%s41724_s0 + $0x5d0] sm:$0x70] }
 0x3a7   :  { %19663 = vmatpush.bf16.msrb.mxu2 %v32075_v10  ;;  %v32064_v10 = vld [vmem:[%s41723_s1 + $0x1d58] sm:$0xff] }
 0x3a8   :  { %19649 = vmatpush.bf16.msrb.mxu1 %v32067_v26  ;;  %v32080_v26 = vld [vmem:[%s41723_s1 + $0x1dd8] sm:$0xff]  ;;  %v37078_v43 = vpop.f32.mrf.mxu0  ;;  %v37086_v0 = vpop.f32.mrf.mxu1 }
 0x3a9   :  { %19677 = vmatpush.bf16.msrb.mxu3 %v32083_v7  ;;  %v19405_v7 = vpop.f32.mrf.mxu3  ;;  %41782 = vst [vmem:[#allocation57_spill] sm:$0xff] %v37078_v43 }
 0x3aa   :  { %19636 = vmatpush.bf16.msrb.mxu0 %v32058_v49  ;;  %v37010_v49 = vadd.f32 %v19405_v7, %v19392_v44  ;;  %v22090_v44 = vld [vmem:[%s41724_s0 + $0x1d8] sm:$0xf]  ;;  %v32077_v7 = vld [vmem:[%s41723_s1 + $0x1dc0] sm:$0xff]  ;;  %41783 = vst [vmem:[#allocation58_spill] sm:$0xff] %v37086_v0 }
 0x3ab   :  { %19664 = vmatpush.bf16.msrb.mxu2 %v32074_v46  ;;  %v32055_v46 = vld [vmem:[%s41723_s1 + $0x1d10] sm:$0xff] }
 0x3ac   :  { %19650 = vmatpush.bf16.msrb.mxu1 %v32066_v41  ;;  %v32071_v41 = vld [vmem:[%s41723_s1 + $0x1d90] sm:$0xff] }
 0x3ad   :  { %19678 = vmatpush.bf16.msrb.mxu3 %v32082_v51  ;;  %v32063_v51 = vld [vmem:[%s41723_s1 + $0x1d50] sm:$0xff] }
 0x3ae   :  { %19637 = vmatpush.bf16.msrb.mxu0 %v32057_v54  ;;  %v32070_v54 = vld [vmem:[%s41723_s1 + $0x1d88] sm:$0xff] }
 0x3af   :  { %19665 = vmatpush.bf16.msrb.mxu2 %v32073_v58  ;;  %v32062_v58 = vld [vmem:[%s41723_s1 + $0x1d48] sm:$0xff] }
 0x3b0   :  { %19651 = vmatpush.bf16.msrb.mxu1 %v32065_v57  ;;  %v32069_v57 = vld [vmem:[%s41723_s1 + $0x1d80] sm:$0xff] }
 0x3b1   :  { %19679 = vmatpush.bf16.msrb.mxu3 %v32081_v56  ;;  %v32092_v56 = vld [vmem:[%s41723_s1 + $0x1e38] sm:$0xff] }
 0x3b2   :  { %19638 = vmatpush.bf16.msrb.mxu0 %v32056_v8  ;;  %v32108_v8 = vld [vmem:[%s41723_s1 + $0x1eb8] sm:$0xff] }
 0x3b3   :  { %19666 = vmatpush.bf16.msrb.mxu2 %v32072_v22  ;;  %v22082_v22 = vld [vmem:[%s41724_s0 + $0x1d0] sm:$0xf] }
 0x3b4   :  { %19652 = vmatpush.bf16.msrb.mxu1 %v32064_v10  ;;  %v31055_v10 = vld [vmem:[%s41724_s0 + $0x5d8] sm:$0x70] }
 0x3b5   :  { %19680 = vmatpush.bf16.msrb.mxu3 %v32080_v26  ;;  %v32061_v26 = vld [vmem:[%s41723_s1 + $0x1d40] sm:$0xff] }
 0x3b6   :  { %19639 = vmatpush.bf16.msrb.mxu0 %v32055_v46  ;;  %v30926_v46 = vld [vmem:[%s41724_s0 + $0x1d4] sm:$0xf] }
 0x3b7   :  { %19667 = vmatpush.bf16.msrb.mxu2 %v32071_v41  ;;  %v22084_v41 = vld [vmem:[%s41724_s0 + $0x5d4] sm:$0x70] }
 0x3b8   :  { %19653 = vmatpush.bf16.msrb.mxu1 %v32063_v51  ;;  %v30927_v51 = vld [vmem:[%s41724_s0 + $0x1dc] sm:$0xf]  ;;  %v22087_v39 = vor.u32 %v30926_v46, %v22084_v41  ;;  %v32089_v46 = vld [vmem:[%s41723_s1 + $0x1e20] sm:$0xff] }
 0x3b9   :  { %19681 = vmatpush.bf16.msrb.mxu3 %v32079_v52  ;;  %v22092_v52 = vld [vmem:[%s41724_s0 + $0x5dc] sm:$0x70] }
 0x3ba   :  { %19640 = vmatpush.bf16.msrb.mxu0 %v32054_v48  ;;  %v22083_v48 = vor.u32 %v31054_v37, %v22082_v22  ;;  %v22095_v34 = vor.u32 %v30927_v51, %v22092_v52  ;;  %v37100_v22 = vpop.f32.mrf.mxu2  ;;  %v32090_v37 = vld [vmem:[%s41723_s1 + $0x1e28] sm:$0xff]  ;;  %v32105_v41 = vld [vmem:[%s41723_s1 + $0x1ea0] sm:$0xff] }
 0x3bb   :  { %19668 = vmatpush.bf16.msrb.mxu2 %v32070_v54  ;;  %v22091_v54 = vor.u32 %v31055_v10, %v22090_v44  ;;  %41784 = vst [vmem:[#allocation59_spill] sm:$0xff] %v37100_v22  ;;  %v32106_v44 = vld [vmem:[%s41723_s1 + $0x1ea8] sm:$0xff]  ;;  %v37108_v10 = vpop.f32.mrf.mxu3 }
 0x3bc   :  { %19654 = vmatpush.bf16.msrb.mxu1 %v32062_v58  ;;  %v32100_v58 = vld [vmem:[%s41723_s1 + $0x1e78] sm:$0xff]  ;;  %41785 = vst [vmem:[#allocation60_spill] sm:$0xff] %v37108_v10 }
 0x3bd   :  { %19682 = vmatpush.bf16.msrb.mxu3 %v32078_v61  ;;  %v32116_v61 = vld [vmem:[%s41723_s1 + $0x1ef8] sm:$0xff] }
 0x3be   :  { %19641 = vmatpush.bf16.msrb.mxu0 %v32053_v33  ;;  %v32091_v33 = vld [vmem:[%s41723_s1 + $0x1e30] sm:$0xff] }
 0x3bf   :  { %19669 = vmatpush.bf16.msrb.mxu2 %v32069_v57  ;;  %v32107_v57 = vld [vmem:[%s41723_s1 + $0x1eb0] sm:$0xff] }
 0x3c0   :  { %19655 = vmatpush.bf16.msrb.mxu1 %v32061_v26  ;;  %v19419_v26 = vpop.f32.mrf.mxu0  ;;  %v19433_v51 = vpop.f32.mrf.mxu1 }
 0x3c1   :  { %19683 = vmatpush.bf16.msrb.mxu3 %v32077_v7  ;;  %19642 = vmatmul.bf16.vlgmr.msrb.gmra.mxu0 %v22083_v48  ;;  %v19420_v7 = vadd.f32 %v19419_v26, %v37010_v49  ;;  %v32097_v48 = vld [vmem:[%s41723_s1 + $0x1e60] sm:$0xff]  ;;  %v32111_v26 = vld [vmem:[%s41723_s1 + $0x1ed0] sm:$0xff] }
 0x3c2   :  { %19690 = vmatpush.bf16.msra.mxu0 %v32092_v56  ;;  %19670 = vmatmul.bf16.vlgmr.msrb.gmra.mxu2 %v22091_v54  ;;  %v32099_v56 = vld [vmem:[%s41723_s1 + $0x1e70] sm:$0xff]  ;;  %v32113_v49 = vld [vmem:[%s41723_s1 + $0x1ee0] sm:$0xff]  ;;  %v32088_v54 = vld [vmem:[%s41723_s1 + $0x1e18] sm:$0xff] }
 0x3c3   :  { %19718 = vmatpush.bf16.msra.mxu2 %v32108_v8  ;;  %v32115_v8 = vld [vmem:[%s41723_s1 + $0x1ef0] sm:$0xff]  ;;  %19656 = vmatmul.bf16.vlgmr.msrb.gmra.mxu1 %v22087_v39  ;;  %v32114_v39 = vld [vmem:[%s41723_s1 + $0x1ee8] sm:$0xff]  ;;  %v19434_v52 = vadd.f32 %v19433_v51, %v19420_v7 }
 0x3c4   :  { %19704 = vmatpush.bf16.msra.mxu1 %v32100_v58  ;;  %19684 = vmatmul.bf16.vlgmr.msrb.gmra.mxu3 %v22095_v34  ;;  %v32098_v34 = vld [vmem:[%s41723_s1 + $0x1e68] sm:$0xff]  ;;  %v32104_v58 = vld [vmem:[%s41723_s1 + $0x1e98] sm:$0xff] }
 0x3c5   :  { %19732 = vmatpush.bf16.msra.mxu3 %v32116_v61  ;;  %v19447_v61 = vpop.f32.mrf.mxu2  ;;  %v32086_v7 = vld [vmem:[%s41723_s1 + $0x1e08] sm:$0xff] }
 0x3c6   :  { %19691 = vmatpush.bf16.msra.mxu0 %v32091_v33  ;;  %v19448_v33 = vadd.f32 %v19447_v61, %v19434_v52  ;;  %v32110_v51 = vld [vmem:[%s41723_s1 + $0x1ec8] sm:$0xff]  ;;  %v32085_v52 = vld [vmem:[%s41723_s1 + $0x1e00] sm:$0xff] }
 0x3c7   :  { %19719 = vmatpush.bf16.msra.mxu2 %v32107_v57  ;;  %v32096_v57 = vld [vmem:[%s41723_s1 + $0x1e58] sm:$0xff]  ;;  %v31056_v61 = vld [vmem:[%s41724_s0 + $0x5e0] sm:$0x70] }
 0x3c8   :  { %19705 = vmatpush.bf16.msra.mxu1 %v32099_v56  ;;  %v32112_v56 = vld [vmem:[%s41723_s1 + $0x1ed8] sm:$0xff]  ;;  %v37209_v10 = vpop.f32.mrf.mxu0  ;;  %v37217_v43 = vpop.f32.mrf.mxu1 }
 0x3c9   :  { %19733 = vmatpush.bf16.msra.mxu3 %v32115_v8  ;;  %v19461_v8 = vpop.f32.mrf.mxu3  ;;  %41786 = vst [vmem:[#allocation61_spill] sm:$0xff] %v37209_v10 }
 0x3ca   :  { %19692 = vmatpush.bf16.msra.mxu0 %v32090_v37  ;;  %v37141_v37 = vadd.f32 %v19461_v8, %v19448_v33  ;;  %v22106_v33 = vld [vmem:[%s41724_s0 + $0x1e8] sm:$0xf]  ;;  %v32109_v8 = vld [vmem:[%s41723_s1 + $0x1ec0] sm:$0xff]  ;;  %41787 = vst [vmem:[#allocation62_spill] sm:$0xff] %v37217_v43 }
 0x3cb   :  { %19720 = vmatpush.bf16.msra.mxu2 %v32106_v44  ;;  %v32087_v44 = vld [vmem:[%s41723_s1 + $0x1e10] sm:$0xff] }
 0x3cc   :  { %19706 = vmatpush.bf16.msra.mxu1 %v32098_v34  ;;  %v32103_v34 = vld [vmem:[%s41723_s1 + $0x1e90] sm:$0xff] }
 0x3cd   :  { %19734 = vmatpush.bf16.msra.mxu3 %v32114_v39  ;;  %v32095_v39 = vld [vmem:[%s41723_s1 + $0x1e50] sm:$0xff] }
 0x3ce   :  { %19693 = vmatpush.bf16.msra.mxu0 %v32089_v46  ;;  %v32102_v46 = vld [vmem:[%s41723_s1 + $0x1e88] sm:$0xff] }
 0x3cf   :  { %19721 = vmatpush.bf16.msra.mxu2 %v32105_v41  ;;  %v32094_v41 = vld [vmem:[%s41723_s1 + $0x1e48] sm:$0xff] }
 0x3d0   :  { %19707 = vmatpush.bf16.msra.mxu1 %v32097_v48  ;;  %v32101_v48 = vld [vmem:[%s41723_s1 + $0x1e80] sm:$0xff] }
 0x3d1   :  { %19735 = vmatpush.bf16.msra.mxu3 %v32113_v49  ;;  %v32124_v49 = vld [vmem:[%s41723_s1 + $0x1f38] sm:$0xff] }
 0x3d2   :  { %19694 = vmatpush.bf16.msra.mxu0 %v32088_v54  ;;  %v32140_v54 = vld [vmem:[%s41723_s1 + $0x1fb8] sm:$0xff] }
 0x3d3   :  { %19722 = vmatpush.bf16.msra.mxu2 %v32104_v58  ;;  %v22098_v58 = vld [vmem:[%s41724_s0 + $0x1e0] sm:$0xf] }
 0x3d4   :  { %19708 = vmatpush.bf16.msra.mxu1 %v32096_v57  ;;  %v31057_v57 = vld [vmem:[%s41724_s0 + $0x5e8] sm:$0x70] }
 0x3d5   :  { %19736 = vmatpush.bf16.msra.mxu3 %v32112_v56  ;;  %v32093_v56 = vld [vmem:[%s41723_s1 + $0x1e40] sm:$0xff] }
 0x3d6   :  { %19695 = vmatpush.bf16.msra.mxu0 %v32087_v44  ;;  %v30928_v44 = vld [vmem:[%s41724_s0 + $0x1e4] sm:$0xf] }
 0x3d7   :  { %19723 = vmatpush.bf16.msra.mxu2 %v32103_v34  ;;  %v22100_v34 = vld [vmem:[%s41724_s0 + $0x5e4] sm:$0x70] }
 0x3d8   :  { %19709 = vmatpush.bf16.msra.mxu1 %v32095_v39  ;;  %v30929_v39 = vld [vmem:[%s41724_s0 + $0x1ec] sm:$0xf]  ;;  %v22103_v22 = vor.u32 %v30928_v44, %v22100_v34  ;;  %v32121_v44 = vld [vmem:[%s41723_s1 + $0x1f20] sm:$0xff] }
 0x3d9   :  { %19737 = vmatpush.bf16.msra.mxu3 %v32111_v26  ;;  %v22108_v26 = vld [vmem:[%s41724_s0 + $0x5ec] sm:$0x70]  ;;  %v32137_v34 = vld [vmem:[%s41723_s1 + $0x1fa0] sm:$0xff] }
 0x3da   :  { %19696 = vmatpush.bf16.msra.mxu0 %v32086_v7  ;;  %v22099_v7 = vor.u32 %v31056_v61, %v22098_v58  ;;  %v22111_v0 = vor.u32 %v30929_v39, %v22108_v26  ;;  %v37231_v58 = vpop.f32.mrf.mxu2  ;;  %v32122_v61 = vld [vmem:[%s41723_s1 + $0x1f28] sm:$0xff] }
 0x3db   :  { %19724 = vmatpush.bf16.msra.mxu2 %v32102_v46  ;;  %v22107_v46 = vor.u32 %v31057_v57, %v22106_v33  ;;  %41788 = vst [vmem:[#allocation63_spill] sm:$0xff] %v37231_v58  ;;  %v32138_v33 = vld [vmem:[%s41723_s1 + $0x1fa8] sm:$0xff]  ;;  %v37239_v57 = vpop.f32.mrf.mxu3 }
 0x3dc   :  { %19710 = vmatpush.bf16.msra.mxu1 %v32094_v41  ;;  %v32132_v41 = vld [vmem:[%s41723_s1 + $0x1f78] sm:$0xff]  ;;  %41789 = vst [vmem:[#allocation64_spill] sm:$0xff] %v37239_v57 }
 0x3dd   :  { %19738 = vmatpush.bf16.msra.mxu3 %v32110_v51  ;;  %v32148_v51 = vld [vmem:[%s41723_s1 + $0x1ff8] sm:$0xff] }
 0x3de   :  { %19697 = vmatpush.bf16.msra.mxu0 %v32085_v52  ;;  %v32123_v52 = vld [vmem:[%s41723_s1 + $0x1f30] sm:$0xff] }
 0x3df   :  { %19725 = vmatpush.bf16.msra.mxu2 %v32101_v48  ;;  %v32139_v48 = vld [vmem:[%s41723_s1 + $0x1fb0] sm:$0xff] }
 0x3e0   :  { %19711 = vmatpush.bf16.msra.mxu1 %v32093_v56  ;;  %v19475_v56 = vpop.f32.mrf.mxu0  ;;  %v19489_v39 = vpop.f32.mrf.mxu1 }
 0x3e1   :  { %19739 = vmatpush.bf16.msra.mxu3 %v32109_v8  ;;  %19698 = vmatmul.bf16.vlgmr.msra.gmra.mxu0 %v22099_v7  ;;  %v19476_v8 = vadd.f32 %v19475_v56, %v37141_v37  ;;  %v32129_v7 = vld [vmem:[%s41723_s1 + $0x1f60] sm:$0xff]  ;;  %v32143_v56 = vld [vmem:[%s41723_s1 + $0x1fd0] sm:$0xff] }
 0x3e2   :  { %19746 = vmatpush.bf16.msrb.mxu0 %v32124_v49  ;;  %19726 = vmatmul.bf16.vlgmr.msra.gmra.mxu2 %v22107_v46  ;;  %v32131_v49 = vld [vmem:[%s41723_s1 + $0x1f70] sm:$0xff]  ;;  %v32145_v37 = vld [vmem:[%s41723_s1 + $0x1fe0] sm:$0xff]  ;;  %v32120_v46 = vld [vmem:[%s41723_s1 + $0x1f18] sm:$0xff] }
 0x3e3   :  { %19774 = vmatpush.bf16.msrb.mxu2 %v32140_v54  ;;  %v32147_v54 = vld [vmem:[%s41723_s1 + $0x1ff0] sm:$0xff]  ;;  %19712 = vmatmul.bf16.vlgmr.msra.gmra.mxu1 %v22103_v22  ;;  %v32146_v22 = vld [vmem:[%s41723_s1 + $0x1fe8] sm:$0xff]  ;;  %v19490_v26 = vadd.f32 %v19489_v39, %v19476_v8 }
 0x3e4   :  { %19760 = vmatpush.bf16.msrb.mxu1 %v32132_v41  ;;  %19740 = vmatmul.bf16.vlgmr.msra.gmra.mxu3 %v22111_v0  ;;  %v32130_v0 = vld [vmem:[%s41723_s1 + $0x1f68] sm:$0xff]  ;;  %v32136_v41 = vld [vmem:[%s41723_s1 + $0x1f98] sm:$0xff] }
 0x3e5   :  { %19788 = vmatpush.bf16.msrb.mxu3 %v32148_v51  ;;  %v19503_v51 = vpop.f32.mrf.mxu2  ;;  %v32118_v8 = vld [vmem:[%s41723_s1 + $0x1f08] sm:$0xff] }
 0x3e6   :  { %19747 = vmatpush.bf16.msrb.mxu0 %v32123_v52  ;;  %v19504_v52 = vadd.f32 %v19503_v51, %v19490_v26  ;;  %v32142_v39 = vld [vmem:[%s41723_s1 + $0x1fc8] sm:$0xff]  ;;  %v32117_v26 = vld [vmem:[%s41723_s1 + $0x1f00] sm:$0xff]  ;;  %v31058_v51 = vld [vmem:[%s41724_s0 + $0x5f0] sm:$0x70] }
 0x3e7   :  { %19775 = vmatpush.bf16.msrb.mxu2 %v32139_v48  ;;  %v32128_v48 = vld [vmem:[%s41723_s1 + $0x1f58] sm:$0xff] }
 0x3e8   :  { %19761 = vmatpush.bf16.msrb.mxu1 %v32131_v49  ;;  %v32144_v49 = vld [vmem:[%s41723_s1 + $0x1fd8] sm:$0xff]  ;;  %v37340_v57 = vpop.f32.mrf.mxu0  ;;  %v37348_v10 = vpop.f32.mrf.mxu1 }
 0x3e9   :  { %19789 = vmatpush.bf16.msrb.mxu3 %v32147_v54  ;;  %v19517_v54 = vpop.f32.mrf.mxu3  ;;  %41790 = vst [vmem:[#allocation65_spill] sm:$0xff] %v37340_v57 }
 0x3ea   :  { %19748 = vmatpush.bf16.msrb.mxu0 %v32122_v61  ;;  %v37272_v61 = vadd.f32 %v19517_v54, %v19504_v52  ;;  %v22122_v52 = vld [vmem:[%s41724_s0 + $0x1f8] sm:$0xf]  ;;  %v32141_v54 = vld [vmem:[%s41723_s1 + $0x1fc0] sm:$0xff]  ;;  %41791 = vst [vmem:[#allocation66_spill] sm:$0xff] %v37348_v10 }
 0x3eb   :  { %19776 = vmatpush.bf16.msrb.mxu2 %v32138_v33  ;;  %v32119_v33 = vld [vmem:[%s41723_s1 + $0x1f10] sm:$0xff] }
 0x3ec   :  { %19762 = vmatpush.bf16.msrb.mxu1 %v32130_v0  ;;  %v32135_v0 = vld [vmem:[%s41723_s1 + $0x1f90] sm:$0xff] }
 0x3ed   :  { %19790 = vmatpush.bf16.msrb.mxu3 %v32146_v22  ;;  %v32127_v22 = vld [vmem:[%s41723_s1 + $0x1f50] sm:$0xff] }
 0x3ee   :  { %19749 = vmatpush.bf16.msrb.mxu0 %v32121_v44  ;;  %v32134_v44 = vld [vmem:[%s41723_s1 + $0x1f88] sm:$0xff] }
 0x3ef   :  { %19777 = vmatpush.bf16.msrb.mxu2 %v32137_v34  ;;  %v32126_v34 = vld [vmem:[%s41723_s1 + $0x1f48] sm:$0xff] }
 0x3f0   :  { %19763 = vmatpush.bf16.msrb.mxu1 %v32129_v7  ;;  %v32133_v7 = vld [vmem:[%s41723_s1 + $0x1f80] sm:$0xff] }
 0x3f1   :  { %19791 = vmatpush.bf16.msrb.mxu3 %v32145_v37  ;;  %v32156_v37 = vld [vmem:[%s41723_s1 + $0x2038] sm:$0xff] }
 0x3f2   :  { %19750 = vmatpush.bf16.msrb.mxu0 %v32120_v46  ;;  %v32172_v46 = vld [vmem:[%s41723_s1 + $0x20b8] sm:$0xff] }
 0x3f3   :  { %19778 = vmatpush.bf16.msrb.mxu2 %v32136_v41  ;;  %v22114_v41 = vld [vmem:[%s41724_s0 + $0x1f0] sm:$0xf] }
 0x3f4   :  { %19764 = vmatpush.bf16.msrb.mxu1 %v32128_v48  ;;  %v31059_v48 = vld [vmem:[%s41724_s0 + $0x5f8] sm:$0x70] }
 0x3f5   :  { %19792 = vmatpush.bf16.msrb.mxu3 %v32144_v49  ;;  %v32125_v49 = vld [vmem:[%s41723_s1 + $0x1f40] sm:$0xff] }
 0x3f6   :  { %19751 = vmatpush.bf16.msrb.mxu0 %v32119_v33  ;;  %v30930_v33 = vld [vmem:[%s41724_s0 + $0x1f4] sm:$0xf] }
 0x3f7   :  { %19779 = vmatpush.bf16.msrb.mxu2 %v32135_v0  ;;  %v22116_v0 = vld [vmem:[%s41724_s0 + $0x5f4] sm:$0x70] }
 0x3f8   :  { %19765 = vmatpush.bf16.msrb.mxu1 %v32127_v22  ;;  %v30931_v22 = vld [vmem:[%s41724_s0 + $0x1fc] sm:$0xf]  ;;  %v22119_v58 = vor.u32 %v30930_v33, %v22116_v0  ;;  %v32153_v33 = vld [vmem:[%s41723_s1 + $0x2020] sm:$0xff] }
 0x3f9   :  { %19793 = vmatpush.bf16.msrb.mxu3 %v32143_v56  ;;  %v22124_v56 = vld [vmem:[%s41724_s0 + $0x5fc] sm:$0x70] }
 0x3fa   :  { %19752 = vmatpush.bf16.msrb.mxu0 %v32118_v8  ;;  %v22115_v8 = vor.u32 %v31058_v51, %v22114_v41  ;;  %v22127_v43 = vor.u32 %v30931_v22, %v22124_v56  ;;  %v37362_v41 = vpop.f32.mrf.mxu2  ;;  %v32154_v51 = vld [vmem:[%s41723_s1 + $0x2028] sm:$0xff]  ;;  %v32169_v0 = vld [vmem:[%s41723_s1 + $0x20a0] sm:$0xff] }
 0x3fb   :  { %19780 = vmatpush.bf16.msrb.mxu2 %v32134_v44  ;;  %v22123_v44 = vor.u32 %v31059_v48, %v22122_v52  ;;  %41792 = vst [vmem:[#allocation67_spill] sm:$0xff] %v37362_v41  ;;  %v32170_v52 = vld [vmem:[%s41723_s1 + $0x20a8] sm:$0xff]  ;;  %v37370_v48 = vpop.f32.mrf.mxu3 }
 0x3fc   :  { %19766 = vmatpush.bf16.msrb.mxu1 %v32126_v34  ;;  %v32164_v34 = vld [vmem:[%s41723_s1 + $0x2078] sm:$0xff]  ;;  %41793 = vst [vmem:[#allocation68_spill] sm:$0xff] %v37370_v48 }
 0x3fd   :  { %19794 = vmatpush.bf16.msrb.mxu3 %v32142_v39  ;;  %v32180_v39 = vld [vmem:[%s41723_s1 + $0x20f8] sm:$0xff] }
 0x3fe   :  { %19753 = vmatpush.bf16.msrb.mxu0 %v32117_v26  ;;  %v32155_v26 = vld [vmem:[%s41723_s1 + $0x2030] sm:$0xff] }
 0x3ff   :  { %19781 = vmatpush.bf16.msrb.mxu2 %v32133_v7  ;;  %v32171_v7 = vld [vmem:[%s41723_s1 + $0x20b0] sm:$0xff] }
 0x400   :  { %19767 = vmatpush.bf16.msrb.mxu1 %v32125_v49  ;;  %v19531_v49 = vpop.f32.mrf.mxu0  ;;  %v19545_v22 = vpop.f32.mrf.mxu1 }
 0x401   :  { %19795 = vmatpush.bf16.msrb.mxu3 %v32141_v54  ;;  %19754 = vmatmul.bf16.vlgmr.msrb.gmra.mxu0 %v22115_v8  ;;  %v19532_v54 = vadd.f32 %v19531_v49, %v37272_v61  ;;  %v32161_v8 = vld [vmem:[%s41723_s1 + $0x2060] sm:$0xff]  ;;  %v32175_v49 = vld [vmem:[%s41723_s1 + $0x20d0] sm:$0xff] }
 0x402   :  { %19802 = vmatpush.bf16.msra.mxu0 %v32156_v37  ;;  %19782 = vmatmul.bf16.vlgmr.msrb.gmra.mxu2 %v22123_v44  ;;  %v32163_v37 = vld [vmem:[%s41723_s1 + $0x2070] sm:$0xff]  ;;  %v32177_v61 = vld [vmem:[%s41723_s1 + $0x20e0] sm:$0xff]  ;;  %v32152_v44 = vld [vmem:[%s41723_s1 + $0x2018] sm:$0xff] }
 0x403   :  { %19830 = vmatpush.bf16.msra.mxu2 %v32172_v46  ;;  %v32179_v46 = vld [vmem:[%s41723_s1 + $0x20f0] sm:$0xff]  ;;  %19768 = vmatmul.bf16.vlgmr.msrb.gmra.mxu1 %v22119_v58  ;;  %v32178_v58 = vld [vmem:[%s41723_s1 + $0x20e8] sm:$0xff]  ;;  %v19546_v56 = vadd.f32 %v19545_v22, %v19532_v54 }
 0x404   :  { %19816 = vmatpush.bf16.msra.mxu1 %v32164_v34  ;;  %19796 = vmatmul.bf16.vlgmr.msrb.gmra.mxu3 %v22127_v43  ;;  %v32162_v43 = vld [vmem:[%s41723_s1 + $0x2068] sm:$0xff]  ;;  %v32168_v34 = vld [vmem:[%s41723_s1 + $0x2098] sm:$0xff] }
 0x405   :  { %19844 = vmatpush.bf16.msra.mxu3 %v32180_v39  ;;  %v19559_v39 = vpop.f32.mrf.mxu2  ;;  %v32150_v54 = vld [vmem:[%s41723_s1 + $0x2008] sm:$0xff] }
 0x406   :  { %19803 = vmatpush.bf16.msra.mxu0 %v32155_v26  ;;  %v19560_v26 = vadd.f32 %v19559_v39, %v19546_v56  ;;  %v32174_v22 = vld [vmem:[%s41723_s1 + $0x20c8] sm:$0xff]  ;;  %v32149_v56 = vld [vmem:[%s41723_s1 + $0x2000] sm:$0xff] }
 0x407   :  { %19831 = vmatpush.bf16.msra.mxu2 %v32171_v7  ;;  %v32160_v7 = vld [vmem:[%s41723_s1 + $0x2058] sm:$0xff]  ;;  %v31060_v39 = vld [vmem:[%s41724_s0 + $0x600] sm:$0x70] }
 0x408   :  { %19817 = vmatpush.bf16.msra.mxu1 %v32163_v37  ;;  %v32176_v37 = vld [vmem:[%s41723_s1 + $0x20d8] sm:$0xff]  ;;  %v37471_v48 = vpop.f32.mrf.mxu0  ;;  %v37479_v57 = vpop.f32.mrf.mxu1 }
 0x409   :  { %19845 = vmatpush.bf16.msra.mxu3 %v32179_v46  ;;  %v19573_v46 = vpop.f32.mrf.mxu3  ;;  %41794 = vst [vmem:[#allocation69_spill] sm:$0xff] %v37471_v48 }
 0x40a   :  { %19804 = vmatpush.bf16.msra.mxu0 %v32154_v51  ;;  %v37403_v51 = vadd.f32 %v19573_v46, %v19560_v26  ;;  %v22138_v26 = vld [vmem:[%s41724_s0 + $0x208] sm:$0xf]  ;;  %v32173_v46 = vld [vmem:[%s41723_s1 + $0x20c0] sm:$0xff]  ;;  %41795 = vst [vmem:[#allocation70_spill] sm:$0xff] %v37479_v57 }
 0x40b   :  { %19832 = vmatpush.bf16.msra.mxu2 %v32170_v52  ;;  %v32151_v52 = vld [vmem:[%s41723_s1 + $0x2010] sm:$0xff] }
 0x40c   :  { %19818 = vmatpush.bf16.msra.mxu1 %v32162_v43  ;;  %v32167_v43 = vld [vmem:[%s41723_s1 + $0x2090] sm:$0xff] }
 0x40d   :  { %19846 = vmatpush.bf16.msra.mxu3 %v32178_v58  ;;  %v32159_v58 = vld [vmem:[%s41723_s1 + $0x2050] sm:$0xff] }
 0x40e   :  { %19805 = vmatpush.bf16.msra.mxu0 %v32153_v33  ;;  %v32166_v33 = vld [vmem:[%s41723_s1 + $0x2088] sm:$0xff] }
 0x40f   :  { %19833 = vmatpush.bf16.msra.mxu2 %v32169_v0  ;;  %v32158_v0 = vld [vmem:[%s41723_s1 + $0x2048] sm:$0xff] }
 0x410   :  { %19819 = vmatpush.bf16.msra.mxu1 %v32161_v8  ;;  %v32165_v8 = vld [vmem:[%s41723_s1 + $0x2080] sm:$0xff] }
 0x411   :  { %19847 = vmatpush.bf16.msra.mxu3 %v32177_v61  ;;  %v32188_v61 = vld [vmem:[%s41723_s1 + $0x2138] sm:$0xff] }
 0x412   :  { %19806 = vmatpush.bf16.msra.mxu0 %v32152_v44  ;;  %v32204_v44 = vld [vmem:[%s41723_s1 + $0x21b8] sm:$0xff] }
 0x413   :  { %19834 = vmatpush.bf16.msra.mxu2 %v32168_v34  ;;  %v22130_v34 = vld [vmem:[%s41724_s0 + $0x200] sm:$0xf] }
 0x414   :  { %19820 = vmatpush.bf16.msra.mxu1 %v32160_v7  ;;  %v31061_v7 = vld [vmem:[%s41724_s0 + $0x608] sm:$0x70] }
 0x415   :  { %19848 = vmatpush.bf16.msra.mxu3 %v32176_v37  ;;  %v32157_v37 = vld [vmem:[%s41723_s1 + $0x2040] sm:$0xff] }
 0x416   :  { %19807 = vmatpush.bf16.msra.mxu0 %v32151_v52  ;;  %v30932_v52 = vld [vmem:[%s41724_s0 + $0x204] sm:$0xf] }
 0x417   :  { %19835 = vmatpush.bf16.msra.mxu2 %v32167_v43  ;;  %v22132_v43 = vld [vmem:[%s41724_s0 + $0x604] sm:$0x70] }
 0x418   :  { %19821 = vmatpush.bf16.msra.mxu1 %v32159_v58  ;;  %v30933_v58 = vld [vmem:[%s41724_s0 + $0x20c] sm:$0xf]  ;;  %v22135_v41 = vor.u32 %v30932_v52, %v22132_v43  ;;  %v32185_v52 = vld [vmem:[%s41723_s1 + $0x2120] sm:$0xff] }
 0x419   :  { %19849 = vmatpush.bf16.msra.mxu3 %v32175_v49  ;;  %v22140_v49 = vld [vmem:[%s41724_s0 + $0x60c] sm:$0x70]  ;;  %v32201_v43 = vld [vmem:[%s41723_s1 + $0x21a0] sm:$0xff] }
 0x41a   :  { %19808 = vmatpush.bf16.msra.mxu0 %v32150_v54  ;;  %v22131_v54 = vor.u32 %v31060_v39, %v22130_v34  ;;  %v22143_v10 = vor.u32 %v30933_v58, %v22140_v49  ;;  %v37493_v34 = vpop.f32.mrf.mxu2  ;;  %v32186_v39 = vld [vmem:[%s41723_s1 + $0x2128] sm:$0xff] }
 0x41b   :  { %19836 = vmatpush.bf16.msra.mxu2 %v32166_v33  ;;  %v22139_v33 = vor.u32 %v31061_v7, %v22138_v26  ;;  %41796 = vst [vmem:[#allocation71_spill] sm:$0xff] %v37493_v34  ;;  %v32202_v26 = vld [vmem:[%s41723_s1 + $0x21a8] sm:$0xff]  ;;  %v37501_v7 = vpop.f32.mrf.mxu3 }
 0x41c   :  { %19822 = vmatpush.bf16.msra.mxu1 %v32158_v0  ;;  %v32196_v0 = vld [vmem:[%s41723_s1 + $0x2178] sm:$0xff]  ;;  %41797 = vst [vmem:[#allocation72_spill] sm:$0xff] %v37501_v7 }
 0x41d   :  { %19850 = vmatpush.bf16.msra.mxu3 %v32174_v22  ;;  %v32212_v22 = vld [vmem:[%s41723_s1 + $0x21f8] sm:$0xff] }
 0x41e   :  { %19809 = vmatpush.bf16.msra.mxu0 %v32149_v56  ;;  %v32187_v56 = vld [vmem:[%s41723_s1 + $0x2130] sm:$0xff] }
 0x41f   :  { %19837 = vmatpush.bf16.msra.mxu2 %v32165_v8  ;;  %v32203_v8 = vld [vmem:[%s41723_s1 + $0x21b0] sm:$0xff] }
 0x420   :  { %19823 = vmatpush.bf16.msra.mxu1 %v32157_v37  ;;  %v19587_v37 = vpop.f32.mrf.mxu0  ;;  %v19601_v58 = vpop.f32.mrf.mxu1 }
 0x421   :  { %19851 = vmatpush.bf16.msra.mxu3 %v32173_v46  ;;  %19810 = vmatmul.bf16.vlgmr.msra.gmra.mxu0 %v22131_v54  ;;  %v19588_v46 = vadd.f32 %v19587_v37, %v37403_v51  ;;  %v32193_v54 = vld [vmem:[%s41723_s1 + $0x2160] sm:$0xff]  ;;  %v32207_v37 = vld [vmem:[%s41723_s1 + $0x21d0] sm:$0xff] }
 0x422   :  { %19858 = vmatpush.bf16.msrb.mxu0 %v32188_v61  ;;  %19838 = vmatmul.bf16.vlgmr.msra.gmra.mxu2 %v22139_v33  ;;  %v32195_v61 = vld [vmem:[%s41723_s1 + $0x2170] sm:$0xff]  ;;  %v32209_v51 = vld [vmem:[%s41723_s1 + $0x21e0] sm:$0xff]  ;;  %v32184_v33 = vld [vmem:[%s41723_s1 + $0x2118] sm:$0xff] }
 0x423   :  { %19886 = vmatpush.bf16.msrb.mxu2 %v32204_v44  ;;  %v32211_v44 = vld [vmem:[%s41723_s1 + $0x21f0] sm:$0xff]  ;;  %19824 = vmatmul.bf16.vlgmr.msra.gmra.mxu1 %v22135_v41  ;;  %v32210_v41 = vld [vmem:[%s41723_s1 + $0x21e8] sm:$0xff]  ;;  %v19602_v49 = vadd.f32 %v19601_v58, %v19588_v46 }
 0x424   :  { %19872 = vmatpush.bf16.msrb.mxu1 %v32196_v0  ;;  %19852 = vmatmul.bf16.vlgmr.msra.gmra.mxu3 %v22143_v10  ;;  %v32194_v10 = vld [vmem:[%s41723_s1 + $0x2168] sm:$0xff]  ;;  %v32200_v0 = vld [vmem:[%s41723_s1 + $0x2198] sm:$0xff] }
 0x425   :  { %19900 = vmatpush.bf16.msrb.mxu3 %v32212_v22  ;;  %v19615_v22 = vpop.f32.mrf.mxu2  ;;  %v32182_v46 = vld [vmem:[%s41723_s1 + $0x2108] sm:$0xff] }
 0x426   :  { %19859 = vmatpush.bf16.msrb.mxu0 %v32187_v56  ;;  %v19616_v56 = vadd.f32 %v19615_v22, %v19602_v49  ;;  %v32206_v58 = vld [vmem:[%s41723_s1 + $0x21c8] sm:$0xff]  ;;  %v32181_v49 = vld [vmem:[%s41723_s1 + $0x2100] sm:$0xff]  ;;  %v31062_v22 = vld [vmem:[%s41724_s0 + $0x610] sm:$0x70] }
 0x427   :  { %19887 = vmatpush.bf16.msrb.mxu2 %v32203_v8  ;;  %v32192_v8 = vld [vmem:[%s41723_s1 + $0x2158] sm:$0xff] }
 0x428   :  { %19873 = vmatpush.bf16.msrb.mxu1 %v32195_v61  ;;  %v32208_v61 = vld [vmem:[%s41723_s1 + $0x21d8] sm:$0xff]  ;;  %v37602_v7 = vpop.f32.mrf.mxu0  ;;  %v37610_v48 = vpop.f32.mrf.mxu1 }
 0x429   :  { %19901 = vmatpush.bf16.msrb.mxu3 %v32211_v44  ;;  %v19629_v44 = vpop.f32.mrf.mxu3  ;;  %41798 = vst [vmem:[#allocation73_spill] sm:$0xff] %v37602_v7 }
 0x42a   :  { %19860 = vmatpush.bf16.msrb.mxu0 %v32186_v39  ;;  %v37534_v39 = vadd.f32 %v19629_v44, %v19616_v56  ;;  %v22154_v56 = vld [vmem:[%s41724_s0 + $0x218] sm:$0xf]  ;;  %v32205_v44 = vld [vmem:[%s41723_s1 + $0x21c0] sm:$0xff]  ;;  %41799 = vst [vmem:[#allocation74_spill] sm:$0xff] %v37610_v48 }
 0x42b   :  { %19888 = vmatpush.bf16.msrb.mxu2 %v32202_v26  ;;  %v32183_v26 = vld [vmem:[%s41723_s1 + $0x2110] sm:$0xff] }
 0x42c   :  { %19874 = vmatpush.bf16.msrb.mxu1 %v32194_v10  ;;  %v32199_v10 = vld [vmem:[%s41723_s1 + $0x2190] sm:$0xff] }
 0x42d   :  { %19902 = vmatpush.bf16.msrb.mxu3 %v32210_v41  ;;  %v32191_v41 = vld [vmem:[%s41723_s1 + $0x2150] sm:$0xff] }
 0x42e   :  { %19861 = vmatpush.bf16.msrb.mxu0 %v32185_v52  ;;  %v32198_v52 = vld [vmem:[%s41723_s1 + $0x2188] sm:$0xff] }
 0x42f   :  { %19889 = vmatpush.bf16.msrb.mxu2 %v32201_v43  ;;  %v32190_v43 = vld [vmem:[%s41723_s1 + $0x2148] sm:$0xff] }
 0x430   :  { %19875 = vmatpush.bf16.msrb.mxu1 %v32193_v54  ;;  %v32197_v54 = vld [vmem:[%s41723_s1 + $0x2180] sm:$0xff] }
 0x431   :  { %19903 = vmatpush.bf16.msrb.mxu3 %v32209_v51  ;;  %v32220_v51 = vld [vmem:[%s41723_s1 + $0x2238] sm:$0xff] }
 0x432   :  { %19862 = vmatpush.bf16.msrb.mxu0 %v32184_v33  ;;  %v32236_v33 = vld [vmem:[%s41723_s1 + $0x22b8] sm:$0xff] }
 0x433   :  { %19890 = vmatpush.bf16.msrb.mxu2 %v32200_v0  ;;  %v22146_v0 = vld [vmem:[%s41724_s0 + $0x210] sm:$0xf] }
 0x434   :  { %19876 = vmatpush.bf16.msrb.mxu1 %v32192_v8  ;;  %v31063_v8 = vld [vmem:[%s41724_s0 + $0x618] sm:$0x70] }
 0x435   :  { %19904 = vmatpush.bf16.msrb.mxu3 %v32208_v61  ;;  %v32189_v61 = vld [vmem:[%s41723_s1 + $0x2140] sm:$0xff] }
 0x436   :  { %19863 = vmatpush.bf16.msrb.mxu0 %v32183_v26  ;;  %v30934_v26 = vld [vmem:[%s41724_s0 + $0x214] sm:$0xf] }
 0x437   :  { %19891 = vmatpush.bf16.msrb.mxu2 %v32199_v10  ;;  %v22148_v10 = vld [vmem:[%s41724_s0 + $0x614] sm:$0x70] }
 0x438   :  { %19877 = vmatpush.bf16.msrb.mxu1 %v32191_v41  ;;  %v30935_v41 = vld [vmem:[%s41724_s0 + $0x21c] sm:$0xf]  ;;  %v22151_v34 = vor.u32 %v30934_v26, %v22148_v10  ;;  %v32217_v26 = vld [vmem:[%s41723_s1 + $0x2220] sm:$0xff] }
 0x439   :  { %19905 = vmatpush.bf16.msrb.mxu3 %v32207_v37  ;;  %v22156_v37 = vld [vmem:[%s41724_s0 + $0x61c] sm:$0x70] }
 0x43a   :  { %19864 = vmatpush.bf16.msrb.mxu0 %v32182_v46  ;;  %v22147_v46 = vor.u32 %v31062_v22, %v22146_v0  ;;  %v22159_v57 = vor.u32 %v30935_v41, %v22156_v37  ;;  %v37624_v0 = vpop.f32.mrf.mxu2  ;;  %v32218_v22 = vld [vmem:[%s41723_s1 + $0x2228] sm:$0xff]  ;;  %v32233_v10 = vld [vmem:[%s41723_s1 + $0x22a0] sm:$0xff] }
 0x43b   :  { %19892 = vmatpush.bf16.msrb.mxu2 %v32198_v52  ;;  %v22155_v52 = vor.u32 %v31063_v8, %v22154_v56  ;;  %41800 = vst [vmem:[#allocation75_spill] sm:$0xff] %v37624_v0  ;;  %v32234_v56 = vld [vmem:[%s41723_s1 + $0x22a8] sm:$0xff]  ;;  %v37632_v8 = vpop.f32.mrf.mxu3 }
 0x43c   :  { %19878 = vmatpush.bf16.msrb.mxu1 %v32190_v43  ;;  %v32228_v43 = vld [vmem:[%s41723_s1 + $0x2278] sm:$0xff]  ;;  %41801 = vst [vmem:[#allocation76_spill] sm:$0xff] %v37632_v8 }
 0x43d   :  { %19906 = vmatpush.bf16.msrb.mxu3 %v32206_v58  ;;  %v32244_v58 = vld [vmem:[%s41723_s1 + $0x22f8] sm:$0xff] }
 0x43e   :  { %19865 = vmatpush.bf16.msrb.mxu0 %v32181_v49  ;;  %v32219_v49 = vld [vmem:[%s41723_s1 + $0x2230] sm:$0xff] }
 0x43f   :  { %19893 = vmatpush.bf16.msrb.mxu2 %v32197_v54  ;;  %v32235_v54 = vld [vmem:[%s41723_s1 + $0x22b0] sm:$0xff] }
 0x440   :  { %19879 = vmatpush.bf16.msrb.mxu1 %v32189_v61  ;;  %v19643_v61 = vpop.f32.mrf.mxu0  ;;  %v19657_v41 = vpop.f32.mrf.mxu1 }
 0x441   :  { %19907 = vmatpush.bf16.msrb.mxu3 %v32205_v44  ;;  %19866 = vmatmul.bf16.vlgmr.msrb.gmra.mxu0 %v22147_v46  ;;  %v19644_v44 = vadd.f32 %v19643_v61, %v37534_v39  ;;  %v32225_v46 = vld [vmem:[%s41723_s1 + $0x2260] sm:$0xff]  ;;  %v32239_v61 = vld [vmem:[%s41723_s1 + $0x22d0] sm:$0xff] }
 0x442   :  { %19914 = vmatpush.bf16.msra.mxu0 %v32220_v51  ;;  %19894 = vmatmul.bf16.vlgmr.msrb.gmra.mxu2 %v22155_v52  ;;  %v32227_v51 = vld [vmem:[%s41723_s1 + $0x2270] sm:$0xff]  ;;  %v32241_v39 = vld [vmem:[%s41723_s1 + $0x22e0] sm:$0xff]  ;;  %v32216_v52 = vld [vmem:[%s41723_s1 + $0x2218] sm:$0xff] }
 0x443   :  { %19942 = vmatpush.bf16.msra.mxu2 %v32236_v33  ;;  %v32243_v33 = vld [vmem:[%s41723_s1 + $0x22f0] sm:$0xff]  ;;  %19880 = vmatmul.bf16.vlgmr.msrb.gmra.mxu1 %v22151_v34  ;;  %v32242_v34 = vld [vmem:[%s41723_s1 + $0x22e8] sm:$0xff]  ;;  %v19658_v37 = vadd.f32 %v19657_v41, %v19644_v44 }
 0x444   :  { %19928 = vmatpush.bf16.msra.mxu1 %v32228_v43  ;;  %19908 = vmatmul.bf16.vlgmr.msrb.gmra.mxu3 %v22159_v57  ;;  %v32226_v57 = vld [vmem:[%s41723_s1 + $0x2268] sm:$0xff]  ;;  %v32232_v43 = vld [vmem:[%s41723_s1 + $0x2298] sm:$0xff] }
 0x445   :  { %19956 = vmatpush.bf16.msra.mxu3 %v32244_v58  ;;  %v19671_v58 = vpop.f32.mrf.mxu2  ;;  %v32214_v44 = vld [vmem:[%s41723_s1 + $0x2208] sm:$0xff] }
 0x446   :  { %19915 = vmatpush.bf16.msra.mxu0 %v32219_v49  ;;  %v19672_v49 = vadd.f32 %v19671_v58, %v19658_v37  ;;  %v32238_v41 = vld [vmem:[%s41723_s1 + $0x22c8] sm:$0xff]  ;;  %v32213_v37 = vld [vmem:[%s41723_s1 + $0x2200] sm:$0xff] }
 0x447   :  { %19943 = vmatpush.bf16.msra.mxu2 %v32235_v54  ;;  %v32224_v54 = vld [vmem:[%s41723_s1 + $0x2258] sm:$0xff]  ;;  %v31064_v58 = vld [vmem:[%s41724_s0 + $0x620] sm:$0x70] }
 0x448   :  { %19929 = vmatpush.bf16.msra.mxu1 %v32227_v51  ;;  %v32240_v51 = vld [vmem:[%s41723_s1 + $0x22d8] sm:$0xff]  ;;  %v37733_v8 = vpop.f32.mrf.mxu0  ;;  %v37741_v7 = vpop.f32.mrf.mxu1 }
 0x449   :  { %19957 = vmatpush.bf16.msra.mxu3 %v32243_v33  ;;  %v19685_v33 = vpop.f32.mrf.mxu3  ;;  %41802 = vst [vmem:[#allocation77_spill] sm:$0xff] %v37733_v8 }
 0x44a   :  { %19916 = vmatpush.bf16.msra.mxu0 %v32218_v22  ;;  %v37665_v22 = vadd.f32 %v19685_v33, %v19672_v49  ;;  %v22170_v49 = vld [vmem:[%s41724_s0 + $0x228] sm:$0xf]  ;;  %v32237_v33 = vld [vmem:[%s41723_s1 + $0x22c0] sm:$0xff]  ;;  %41803 = vst [vmem:[#allocation78_spill] sm:$0xff] %v37741_v7 }
 0x44b   :  { %19944 = vmatpush.bf16.msra.mxu2 %v32234_v56  ;;  %v32215_v56 = vld [vmem:[%s41723_s1 + $0x2210] sm:$0xff] }
 0x44c   :  { %19930 = vmatpush.bf16.msra.mxu1 %v32226_v57  ;;  %v32231_v57 = vld [vmem:[%s41723_s1 + $0x2290] sm:$0xff] }
 0x44d   :  { %19958 = vmatpush.bf16.msra.mxu3 %v32242_v34  ;;  %v32223_v34 = vld [vmem:[%s41723_s1 + $0x2250] sm:$0xff] }
 0x44e   :  { %19917 = vmatpush.bf16.msra.mxu0 %v32217_v26  ;;  %v32230_v26 = vld [vmem:[%s41723_s1 + $0x2288] sm:$0xff] }
 0x44f   :  { %19945 = vmatpush.bf16.msra.mxu2 %v32233_v10  ;;  %v32222_v10 = vld [vmem:[%s41723_s1 + $0x2248] sm:$0xff] }
 0x450   :  { %19931 = vmatpush.bf16.msra.mxu1 %v32225_v46  ;;  %v32229_v46 = vld [vmem:[%s41723_s1 + $0x2280] sm:$0xff] }
 0x451   :  { %19959 = vmatpush.bf16.msra.mxu3 %v32241_v39  ;;  %v32252_v39 = vld [vmem:[%s41723_s1 + $0x2338] sm:$0xff] }
 0x452   :  { %19918 = vmatpush.bf16.msra.mxu0 %v32216_v52  ;;  %v32268_v52 = vld [vmem:[%s41723_s1 + $0x23b8] sm:$0xff] }
 0x453   :  { %19946 = vmatpush.bf16.msra.mxu2 %v32232_v43  ;;  %v22162_v43 = vld [vmem:[%s41724_s0 + $0x220] sm:$0xf] }
 0x454   :  { %19932 = vmatpush.bf16.msra.mxu1 %v32224_v54  ;;  %v31065_v54 = vld [vmem:[%s41724_s0 + $0x628] sm:$0x70] }
 0x455   :  { %19960 = vmatpush.bf16.msra.mxu3 %v32240_v51  ;;  %v32221_v51 = vld [vmem:[%s41723_s1 + $0x2240] sm:$0xff] }
 0x456   :  { %19919 = vmatpush.bf16.msra.mxu0 %v32215_v56  ;;  %v30936_v56 = vld [vmem:[%s41724_s0 + $0x224] sm:$0xf] }
 0x457   :  { %19947 = vmatpush.bf16.msra.mxu2 %v32231_v57  ;;  %v22164_v57 = vld [vmem:[%s41724_s0 + $0x624] sm:$0x70] }
 0x458   :  { %19933 = vmatpush.bf16.msra.mxu1 %v32223_v34  ;;  %v30937_v34 = vld [vmem:[%s41724_s0 + $0x22c] sm:$0xf]  ;;  %v22167_v0 = vor.u32 %v30936_v56, %v22164_v57  ;;  %v32249_v56 = vld [vmem:[%s41723_s1 + $0x2320] sm:$0xff] }
 0x459   :  { %19961 = vmatpush.bf16.msra.mxu3 %v32239_v61  ;;  %v22172_v61 = vld [vmem:[%s41724_s0 + $0x62c] sm:$0x70]  ;;  %v32265_v57 = vld [vmem:[%s41723_s1 + $0x23a0] sm:$0xff] }
 0x45a   :  { %19920 = vmatpush.bf16.msra.mxu0 %v32214_v44  ;;  %v22163_v44 = vor.u32 %v31064_v58, %v22162_v43  ;;  %v22175_v48 = vor.u32 %v30937_v34, %v22172_v61  ;;  %v37755_v43 = vpop.f32.mrf.mxu2  ;;  %v32250_v58 = vld [vmem:[%s41723_s1 + $0x2328] sm:$0xff] }
 0x45b   :  { %19948 = vmatpush.bf16.msra.mxu2 %v32230_v26  ;;  %v22171_v26 = vor.u32 %v31065_v54, %v22170_v49  ;;  %41804 = vst [vmem:[#allocation79_spill] sm:$0xff] %v37755_v43  ;;  %v32266_v49 = vld [vmem:[%s41723_s1 + $0x23a8] sm:$0xff]  ;;  %v37763_v54 = vpop.f32.mrf.mxu3 }
 0x45c   :  { %19934 = vmatpush.bf16.msra.mxu1 %v32222_v10  ;;  %v32260_v10 = vld [vmem:[%s41723_s1 + $0x2378] sm:$0xff]  ;;  %41805 = vst [vmem:[#allocation80_spill] sm:$0xff] %v37763_v54 }
 0x45d   :  { %19962 = vmatpush.bf16.msra.mxu3 %v32238_v41  ;;  %v32276_v41 = vld [vmem:[%s41723_s1 + $0x23f8] sm:$0xff] }
 0x45e   :  { %19921 = vmatpush.bf16.msra.mxu0 %v32213_v37  ;;  %v32251_v37 = vld [vmem:[%s41723_s1 + $0x2330] sm:$0xff] }
 0x45f   :  { %19949 = vmatpush.bf16.msra.mxu2 %v32229_v46  ;;  %v32267_v46 = vld [vmem:[%s41723_s1 + $0x23b0] sm:$0xff] }
 0x460   :  { %19935 = vmatpush.bf16.msra.mxu1 %v32221_v51  ;;  %v19699_v51 = vpop.f32.mrf.mxu0  ;;  %v19713_v34 = vpop.f32.mrf.mxu1 }
 0x461   :  { %19963 = vmatpush.bf16.msra.mxu3 %v32237_v33  ;;  %19922 = vmatmul.bf16.vlgmr.msra.gmra.mxu0 %v22163_v44  ;;  %v19700_v33 = vadd.f32 %v19699_v51, %v37665_v22  ;;  %v32257_v44 = vld [vmem:[%s41723_s1 + $0x2360] sm:$0xff]  ;;  %v32271_v51 = vld [vmem:[%s41723_s1 + $0x23d0] sm:$0xff] }
 0x462   :  { %19970 = vmatpush.bf16.msrb.mxu0 %v32252_v39  ;;  %19950 = vmatmul.bf16.vlgmr.msra.gmra.mxu2 %v22171_v26  ;;  %v32259_v39 = vld [vmem:[%s41723_s1 + $0x2370] sm:$0xff]  ;;  %v32273_v22 = vld [vmem:[%s41723_s1 + $0x23e0] sm:$0xff]  ;;  %v32248_v26 = vld [vmem:[%s41723_s1 + $0x2318] sm:$0xff] }
 0x463   :  { %19998 = vmatpush.bf16.msrb.mxu2 %v32268_v52  ;;  %v32275_v52 = vld [vmem:[%s41723_s1 + $0x23f0] sm:$0xff]  ;;  %19936 = vmatmul.bf16.vlgmr.msra.gmra.mxu1 %v22167_v0  ;;  %v32274_v0 = vld [vmem:[%s41723_s1 + $0x23e8] sm:$0xff]  ;;  %v19714_v61 = vadd.f32 %v19713_v34, %v19700_v33 }
 0x464   :  { %19984 = vmatpush.bf16.msrb.mxu1 %v32260_v10  ;;  %19964 = vmatmul.bf16.vlgmr.msra.gmra.mxu3 %v22175_v48  ;;  %v32258_v48 = vld [vmem:[%s41723_s1 + $0x2368] sm:$0xff]  ;;  %v32264_v10 = vld [vmem:[%s41723_s1 + $0x2398] sm:$0xff] }
 0x465   :  { %20012 = vmatpush.bf16.msrb.mxu3 %v32276_v41  ;;  %v19727_v41 = vpop.f32.mrf.mxu2  ;;  %v32246_v33 = vld [vmem:[%s41723_s1 + $0x2308] sm:$0xff] }
 0x466   :  { %19971 = vmatpush.bf16.msrb.mxu0 %v32251_v37  ;;  %v19728_v37 = vadd.f32 %v19727_v41, %v19714_v61  ;;  %v32270_v34 = vld [vmem:[%s41723_s1 + $0x23c8] sm:$0xff]  ;;  %v32245_v61 = vld [vmem:[%s41723_s1 + $0x2300] sm:$0xff]  ;;  %v31066_v41 = vld [vmem:[%s41724_s0 + $0x630] sm:$0x70] }
 0x467   :  { %19999 = vmatpush.bf16.msrb.mxu2 %v32267_v46  ;;  %v32256_v46 = vld [vmem:[%s41723_s1 + $0x2358] sm:$0xff] }
 0x468   :  { %19985 = vmatpush.bf16.msrb.mxu1 %v32259_v39  ;;  %v32272_v39 = vld [vmem:[%s41723_s1 + $0x23d8] sm:$0xff]  ;;  %v37864_v54 = vpop.f32.mrf.mxu0  ;;  %v37872_v8 = vpop.f32.mrf.mxu1 }
 0x469   :  { %20013 = vmatpush.bf16.msrb.mxu3 %v32275_v52  ;;  %v19741_v52 = vpop.f32.mrf.mxu3  ;;  %41806 = vst [vmem:[#allocation81_spill] sm:$0xff] %v37864_v54 }
 0x46a   :  { %19972 = vmatpush.bf16.msrb.mxu0 %v32250_v58  ;;  %v37796_v58 = vadd.f32 %v19741_v52, %v19728_v37  ;;  %v22186_v37 = vld [vmem:[%s41724_s0 + $0x238] sm:$0xf]  ;;  %v32269_v52 = vld [vmem:[%s41723_s1 + $0x23c0] sm:$0xff]  ;;  %41807 = vst [vmem:[#allocation82_spill] sm:$0xff] %v37872_v8 }
 0x46b   :  { %20000 = vmatpush.bf16.msrb.mxu2 %v32266_v49  ;;  %v32247_v49 = vld [vmem:[%s41723_s1 + $0x2310] sm:$0xff] }
 0x46c   :  { %19986 = vmatpush.bf16.msrb.mxu1 %v32258_v48  ;;  %v32263_v48 = vld [vmem:[%s41723_s1 + $0x2390] sm:$0xff] }
 0x46d   :  { %20014 = vmatpush.bf16.msrb.mxu3 %v32274_v0  ;;  %v32255_v0 = vld [vmem:[%s41723_s1 + $0x2350] sm:$0xff] }
 0x46e   :  { %19973 = vmatpush.bf16.msrb.mxu0 %v32249_v56  ;;  %v32262_v56 = vld [vmem:[%s41723_s1 + $0x2388] sm:$0xff] }
 0x46f   :  { %20001 = vmatpush.bf16.msrb.mxu2 %v32265_v57  ;;  %v32254_v57 = vld [vmem:[%s41723_s1 + $0x2348] sm:$0xff] }
 0x470   :  { %19987 = vmatpush.bf16.msrb.mxu1 %v32257_v44  ;;  %v32261_v44 = vld [vmem:[%s41723_s1 + $0x2380] sm:$0xff] }
 0x471   :  { %20015 = vmatpush.bf16.msrb.mxu3 %v32273_v22  ;;  %v32284_v22 = vld [vmem:[%s41723_s1 + $0x2438] sm:$0xff] }
 0x472   :  { %19974 = vmatpush.bf16.msrb.mxu0 %v32248_v26  ;;  %v32300_v26 = vld [vmem:[%s41723_s1 + $0x24b8] sm:$0xff] }
 0x473   :  { %20002 = vmatpush.bf16.msrb.mxu2 %v32264_v10  ;;  %v22178_v10 = vld [vmem:[%s41724_s0 + $0x230] sm:$0xf] }
 0x474   :  { %19988 = vmatpush.bf16.msrb.mxu1 %v32256_v46  ;;  %v31067_v46 = vld [vmem:[%s41724_s0 + $0x638] sm:$0x70] }
 0x475   :  { %20016 = vmatpush.bf16.msrb.mxu3 %v32272_v39  ;;  %v32253_v39 = vld [vmem:[%s41723_s1 + $0x2340] sm:$0xff] }
 0x476   :  { %19975 = vmatpush.bf16.msrb.mxu0 %v32247_v49  ;;  %v30938_v49 = vld [vmem:[%s41724_s0 + $0x234] sm:$0xf] }
 0x477   :  { %20003 = vmatpush.bf16.msrb.mxu2 %v32263_v48  ;;  %v22180_v48 = vld [vmem:[%s41724_s0 + $0x634] sm:$0x70] }
 0x478   :  { %19989 = vmatpush.bf16.msrb.mxu1 %v32255_v0  ;;  %v30939_v0 = vld [vmem:[%s41724_s0 + $0x23c] sm:$0xf]  ;;  %v22183_v43 = vor.u32 %v30938_v49, %v22180_v48  ;;  %v32281_v49 = vld [vmem:[%s41723_s1 + $0x2420] sm:$0xff] }
 0x479   :  { %20017 = vmatpush.bf16.msrb.mxu3 %v32271_v51  ;;  %v22188_v51 = vld [vmem:[%s41724_s0 + $0x63c] sm:$0x70] }
 0x47a   :  { %19976 = vmatpush.bf16.msrb.mxu0 %v32246_v33  ;;  %v22179_v33 = vor.u32 %v31066_v41, %v22178_v10  ;;  %v22191_v7 = vor.u32 %v30939_v0, %v22188_v51  ;;  %v37886_v10 = vpop.f32.mrf.mxu2  ;;  %v32282_v41 = vld [vmem:[%s41723_s1 + $0x2428] sm:$0xff]  ;;  %v32297_v48 = vld [vmem:[%s41723_s1 + $0x24a0] sm:$0xff] }
 0x47b   :  { %20004 = vmatpush.bf16.msrb.mxu2 %v32262_v56  ;;  %v22187_v56 = vor.u32 %v31067_v46, %v22186_v37  ;;  %41808 = vst [vmem:[#allocation83_spill] sm:$0xff] %v37886_v10  ;;  %v32298_v37 = vld [vmem:[%s41723_s1 + $0x24a8] sm:$0xff]  ;;  %v37894_v46 = vpop.f32.mrf.mxu3 }
 0x47c   :  { %19990 = vmatpush.bf16.msrb.mxu1 %v32254_v57  ;;  %v32292_v57 = vld [vmem:[%s41723_s1 + $0x2478] sm:$0xff]  ;;  %41809 = vst [vmem:[#allocation84_spill] sm:$0xff] %v37894_v46 }
 0x47d   :  { %20018 = vmatpush.bf16.msrb.mxu3 %v32270_v34  ;;  %v32308_v34 = vld [vmem:[%s41723_s1 + $0x24f8] sm:$0xff] }
 0x47e   :  { %19977 = vmatpush.bf16.msrb.mxu0 %v32245_v61  ;;  %v32283_v61 = vld [vmem:[%s41723_s1 + $0x2430] sm:$0xff] }
 0x47f   :  { %20005 = vmatpush.bf16.msrb.mxu2 %v32261_v44  ;;  %v32299_v44 = vld [vmem:[%s41723_s1 + $0x24b0] sm:$0xff] }
 0x480   :  { %19991 = vmatpush.bf16.msrb.mxu1 %v32253_v39  ;;  %v19755_v39 = vpop.f32.mrf.mxu0  ;;  %v19769_v0 = vpop.f32.mrf.mxu1 }
 0x481   :  { %20019 = vmatpush.bf16.msrb.mxu3 %v32269_v52  ;;  %19978 = vmatmul.bf16.vlgmr.msrb.gmra.mxu0 %v22179_v33  ;;  %v19756_v52 = vadd.f32 %v19755_v39, %v37796_v58  ;;  %v32289_v33 = vld [vmem:[%s41723_s1 + $0x2460] sm:$0xff]  ;;  %v32303_v39 = vld [vmem:[%s41723_s1 + $0x24d0] sm:$0xff] }
 0x482   :  { %20026 = vmatpush.bf16.msra.mxu0 %v32284_v22  ;;  %20006 = vmatmul.bf16.vlgmr.msrb.gmra.mxu2 %v22187_v56  ;;  %v32291_v22 = vld [vmem:[%s41723_s1 + $0x2470] sm:$0xff]  ;;  %v32305_v58 = vld [vmem:[%s41723_s1 + $0x24e0] sm:$0xff]  ;;  %v32280_v56 = vld [vmem:[%s41723_s1 + $0x2418] sm:$0xff] }
 0x483   :  { %20054 = vmatpush.bf16.msra.mxu2 %v32300_v26  ;;  %v32307_v26 = vld [vmem:[%s41723_s1 + $0x24f0] sm:$0xff]  ;;  %19992 = vmatmul.bf16.vlgmr.msrb.gmra.mxu1 %v22183_v43  ;;  %v32306_v43 = vld [vmem:[%s41723_s1 + $0x24e8] sm:$0xff]  ;;  %v19770_v51 = vadd.f32 %v19769_v0, %v19756_v52  ;;  %v33182_v52 = vld [vmem:[%s41725_s2] ss:$0 sm:$0xff] }
 0x484   :  { %20040 = vmatpush.bf16.msra.mxu1 %v32292_v57  ;;  %20020 = vmatmul.bf16.vlgmr.msrb.gmra.mxu3 %v22191_v7  ;;  %v32290_v7 = vld [vmem:[%s41723_s1 + $0x2468] sm:$0xff]  ;;  %v32296_v57 = vld [vmem:[%s41723_s1 + $0x2498] sm:$0xff] }
 0x485   :  { %20068 = vmatpush.bf16.msra.mxu3 %v32308_v34  ;;  %v19783_v34 = vpop.f32.mrf.mxu2  ;;  %v32294_v0 = vld [vmem:[%s41723_s1 + $0x2488] sm:$0xff] }
 0x486   :  { %20027 = vmatpush.bf16.msra.mxu0 %v32283_v61  ;;  %v19784_v61 = vadd.f32 %v19783_v34, %v19770_v51  ;;  %v32286_v51 = vld [vmem:[%s41723_s1 + $0x2448] sm:$0xff]  ;;  %v32332_v34 = vld [vmem:[%s41723_s1 + $0x25b8] sm:$0xff] }
 0x487   :  { %20055 = vmatpush.bf16.msra.mxu2 %v32299_v44  ;;  %v32288_v44 = vld [vmem:[%s41723_s1 + $0x2458] sm:$0xff] }
 0x488   :  { %20041 = vmatpush.bf16.msra.mxu1 %v32291_v22  ;;  %v32304_v22 = vld [vmem:[%s41723_s1 + $0x24d8] sm:$0xff]  ;;  %v38001_v46 = vpop.f32.mrf.mxu0  ;;  %v38009_v54 = vpop.f32.mrf.mxu1 }
 0x489   :  { %20069 = vmatpush.bf16.msra.mxu3 %v32307_v26  ;;  %v19797_v26 = vpop.f32.mrf.mxu3 }
 0x48a   :  { %20028 = vmatpush.bf16.msra.mxu0 %v32282_v41  ;;  %v37927_v41 = vadd.f32 %v19797_v26, %v19784_v61  ;;  %v22194_v61 = vld [vmem:[%s41724_s0 + $0x240] sm:$0xf] }
 0x48b   :  { %20056 = vmatpush.bf16.msra.mxu2 %v32298_v37  ;;  %v32279_v37 = vld [vmem:[%s41723_s1 + $0x2410] sm:$0xff]  ;;  %v32285_v26 = vld [vmem:[%s41723_s1 + $0x2440] sm:$0xff] }
 0x48c   :  { %20042 = vmatpush.bf16.msra.mxu1 %v32290_v7  ;;  %v32295_v7 = vld [vmem:[%s41723_s1 + $0x2490] sm:$0xff] }
 0x48d   :  { %20070 = vmatpush.bf16.msra.mxu3 %v32306_v43  ;;  %v32287_v43 = vld [vmem:[%s41723_s1 + $0x2450] sm:$0xff] }
 0x48e   :  { %20029 = vmatpush.bf16.msra.mxu0 %v32281_v49  ;;  %v18022_v49 = vadd.f32 %v33182_v52, %v33925_v12  ;;  %v32302_v12 = vld [vmem:[%s41723_s1 + $0x24c8] sm:$0xff]  ;;  %v22204_v52 = vld [vmem:[%s41724_s0 + $0x64c] sm:$0x70] }
 0x48f   :  { %20057 = vmatpush.bf16.msra.mxu2 %v32297_v48  ;;  %v32278_v48 = vld [vmem:[%s41723_s1 + $0x2408] sm:$0xff] }
 0x490   :  { %20043 = vmatpush.bf16.msra.mxu1 %v32289_v33  ;;  %v32277_v33 = vld [vmem:[%s41723_s1 + $0x2400] sm:$0xff] }
 0x491   :  { %20071 = vmatpush.bf16.msra.mxu3 %v32305_v58  ;;  %v32293_v58 = vld [vmem:[%s41723_s1 + $0x2480] sm:$0xff] }
 0x492   :  { %20030 = vmatpush.bf16.msra.mxu0 %v32280_v56  ;;  %v18036_v56 = vadd.f32 %v33942_v20, %v18022_v49  ;;  %v22202_v20 = vld [vmem:[%s41724_s0 + $0x248] sm:$0xf] }
 0x493   :  { %20058 = vmatpush.bf16.msra.mxu2 %v32296_v57  ;;  %v32316_v57 = vld [vmem:[%s41723_s1 + $0x2538] sm:$0xff] }
 0x494   :  { %20044 = vmatpush.bf16.msra.mxu1 %v32288_v44  ;;  %v31068_v44 = vld [vmem:[%s41724_s0 + $0x640] sm:$0x70]  ;;  %v18050_v49 = vadd.f32 %v33956_v27, %v18036_v56  ;;  %v32315_v27 = vld [vmem:[%s41723_s1 + $0x2530] sm:$0xff] }
 0x495   :  { %20072 = vmatpush.bf16.msra.mxu3 %v32304_v22  ;;  %v31069_v22 = vld [vmem:[%s41724_s0 + $0x648] sm:$0x70]  ;;  %v32323_v56 = vld [vmem:[%s41723_s1 + $0x2570] sm:$0xff] }
 0x496   :  { %20031 = vmatpush.bf16.msra.mxu0 %v32279_v37  ;;  %v32301_v37 = vld [vmem:[%s41723_s1 + $0x24c0] sm:$0xff] }
 0x497   :  { %20059 = vmatpush.bf16.msra.mxu2 %v32295_v7  ;;  %v30940_v7 = vld [vmem:[%s41724_s0 + $0x244] sm:$0xf] }
 0x498   :  { %20045 = vmatpush.bf16.msra.mxu1 %v32287_v43  ;;  %v22196_v43 = vld [vmem:[%s41724_s0 + $0x644] sm:$0x70] }
 0x499   :  { %20073 = vmatpush.bf16.msra.mxu3 %v32303_v39  ;;  %v30941_v39 = vld [vmem:[%s41724_s0 + $0x24c] sm:$0xf]  ;;  %v22199_v10 = vor.u32 %v30940_v7, %v22196_v43  ;;  %v32329_v7 = vld [vmem:[%s41723_s1 + $0x25a0] sm:$0xff] }
 0x49a   :  { %20032 = vmatpush.bf16.msra.mxu0 %v32278_v48  ;;  %v22195_v48 = vor.u32 %v31068_v44, %v22194_v61  ;;  %v22207_v8 = vor.u32 %v30941_v39, %v22204_v52  ;;  %v38025_v61 = vpop.f32.mrf.mxu2  ;;  %v32330_v44 = vld [vmem:[%s41723_s1 + $0x25a8] sm:$0xff] }
 0x49b   :  { %20060 = vmatpush.bf16.msra.mxu2 %v32294_v0  ;;  %v22203_v0 = vor.u32 %v31069_v22, %v22202_v20  ;;  %v38033_v20 = vpop.f32.mrf.mxu3 }
 0x49c   :  { %20046 = vmatpush.bf16.msra.mxu1 %v32286_v51  ;;  %v32324_v51 = vld [vmem:[%s41723_s1 + $0x2578] sm:$0xff] }
 0x49d   :  { %20074 = vmatpush.bf16.msra.mxu3 %v32302_v12  ;;  %v32340_v12 = vld [vmem:[%s41723_s1 + $0x25f8] sm:$0xff] }
 0x49e   :  { %20033 = vmatpush.bf16.msra.mxu0 %v32277_v33  ;;  %v32331_v33 = vld [vmem:[%s41723_s1 + $0x25b0] sm:$0xff] }
 0x49f   :  { %20061 = vmatpush.bf16.msra.mxu2 %v32293_v58  ;;  %v18064_v58 = vadd.f32 %v33964_v30, %v18050_v49  ;;  %v32314_v30 = vld [vmem:[%s41723_s1 + $0x2528] sm:$0xff]  ;;  %v32312_v49 = vld [vmem:[%s41723_s1 + $0x2518] sm:$0xff] }
 0x4a0   :  { %20047 = vmatpush.bf16.msra.mxu1 %v32285_v26  ;;  %v19825_v43 = vpop.f32.mrf.mxu1 }
 0x4a1   :  { %20075 = vmatpush.bf16.msra.mxu3 %v32301_v37  ;;  %20034 = vmatmul.bf16.vlgmr.msra.gmra.mxu0 %v22195_v48  ;;  %v32313_v37 = vld [vmem:[%s41723_s1 + $0x2520] sm:$0xff] }
 0x4a2   :  { %20082 = vmatpush.bf16.msrb.mxu0 %v32316_v57  ;;  %20062 = vmatmul.bf16.vlgmr.msra.gmra.mxu2 %v22203_v0  ;;  %v32339_v57 = vld [vmem:[%s41723_s1 + $0x25f0] sm:$0xff] }
 0x4a3   :  { %20110 = vmatpush.bf16.msrb.mxu2 %v32332_v34  ;;  %v18078_v34 = vadd.f32 %v34065_v9, %v18064_v58  ;;  %20048 = vmatmul.bf16.vlgmr.msra.gmra.mxu1 %v22199_v10  ;;  %v32322_v9 = vld [vmem:[%s41723_s1 + $0x2568] sm:$0xff]  ;;  %v19811_v10 = vpop.f32.mrf.mxu0 }
 0x4a4   :  { %20096 = vmatpush.bf16.msrb.mxu1 %v32324_v51  ;;  %20076 = vmatmul.bf16.vlgmr.msra.gmra.mxu3 %v22207_v8  ;;  %v32338_v8 = vld [vmem:[%s41723_s1 + $0x25e8] sm:$0xff]  ;;  %v19812_v26 = vadd.f32 %v19811_v10, %v37927_v41  ;;  %v32337_v41 = vld [vmem:[%s41723_s1 + $0x25e0] sm:$0xff] }
 0x4a5   :  { %20124 = vmatpush.bf16.msrb.mxu3 %v32340_v12  ;;  %v18092_v22 = vadd.f32 %v34073_v15, %v18078_v34  ;;  %v32321_v15 = vld [vmem:[%s41723_s1 + $0x2560] sm:$0xff]  ;;  %v19839_v48 = vpop.f32.mrf.mxu2  ;;  %v32320_v12 = vld [vmem:[%s41723_s1 + $0x2558] sm:$0xff]  ;;  %v32319_v34 = vld [vmem:[%s41723_s1 + $0x2550] sm:$0xff] }
 0x4a6   :  { %20083 = vmatpush.bf16.msrb.mxu0 %v32315_v27  ;;  %v19826_v52 = vadd.f32 %v19825_v43, %v19812_v26  ;;  %v32336_v27 = vld [vmem:[%s41723_s1 + $0x25d8] sm:$0xff]  ;;  %v32318_v10 = vld [vmem:[%s41723_s1 + $0x2548] sm:$0xff]  ;;  %v32325_v26 = vld [vmem:[%s41723_s1 + $0x2580] sm:$0xff] }
 0x4a7   :  { %20111 = vmatpush.bf16.msrb.mxu2 %v32331_v33  ;;  %v18106_v39 = vadd.f32 %v34087_v21, %v18092_v22  ;;  %v32328_v21 = vld [vmem:[%s41723_s1 + $0x2598] sm:$0xff]  ;;  %v19853_v33 = vpop.f32.mrf.mxu3  ;;  %v32309_v22 = vld [vmem:[%s41723_s1 + $0x2500] sm:$0xff]  ;;  %v31070_v43 = vld [vmem:[%s41724_s0 + $0x650] sm:$0x70] }
 0x4a8   :  { %20097 = vmatpush.bf16.msrb.mxu1 %v32323_v56  ;;  %v19840_v51 = vadd.f32 %v19839_v48, %v19826_v52  ;;  %v31071_v52 = vld [vmem:[%s41724_s0 + $0x658] sm:$0x70]  ;;  %v22212_v48 = vld [vmem:[%s41724_s0 + $0x654] sm:$0x70] }
 0x4a9   :  { %20125 = vmatpush.bf16.msrb.mxu3 %v32339_v57  ;;  %v18120_v0 = vadd.f32 %v34095_v24, %v18106_v39  ;;  %v32311_v24 = vld [vmem:[%s41723_s1 + $0x2510] sm:$0xff]  ;;  %v22218_v39 = vld [vmem:[%s41724_s0 + $0x258] sm:$0xf] }
 0x4aa   :  { %20084 = vmatpush.bf16.msrb.mxu0 %v32314_v30  ;;  %v38070_v56 = vadd.f32 %v19853_v33, %v19840_v51  ;;  %v32327_v57 = vld [vmem:[%s41723_s1 + $0x2590] sm:$0xff] }
 0x4ab   :  { %20112 = vmatpush.bf16.msrb.mxu2 %v32330_v44  ;;  %v18134_v58 = vadd.f32 %v34196_v5, %v18120_v0  ;;  %v32335_v5 = vld [vmem:[%s41723_s1 + $0x25d0] sm:$0xff]  ;;  %v32310_v44 = vld [vmem:[%s41723_s1 + $0x2508] sm:$0xff]  ;;  %v22220_v0 = vld [vmem:[%s41724_s0 + $0x65c] sm:$0x70]  ;;  %v38142_v33 = vpop.f32.mrf.mxu0 }
 0x4ac   :  { %20098 = vmatpush.bf16.msrb.mxu1 %v32322_v9  ;;  %v32326_v9 = vld [vmem:[%s41723_s1 + $0x2588] sm:$0xff] }
 0x4ad   :  { %20126 = vmatpush.bf16.msrb.mxu3 %v32338_v8  ;;  %v18148_v30 = vadd.f32 %v34204_v11, %v18134_v58  ;;  %v32334_v11 = vld [vmem:[%s41723_s1 + $0x25c8] sm:$0xff]  ;;  %v32356_v58 = vld [vmem:[%s41723_s1 + $0x2678] sm:$0xff] }
 0x4ae   :  { %20085 = vmatpush.bf16.msrb.mxu0 %v32313_v37  ;;  %v32364_v37 = vld [vmem:[%s41723_s1 + $0x26b8] sm:$0xff] }
 0x4af   :  { %20113 = vmatpush.bf16.msrb.mxu2 %v32329_v7  ;;  %v18162_v8 = vadd.f32 %v34218_v18, %v18148_v30  ;;  %v32348_v18 = vld [vmem:[%s41723_s1 + $0x2638] sm:$0xff]  ;;  %v22210_v7 = vld [vmem:[%s41724_s0 + $0x250] sm:$0xf] }
 0x4b0   :  { %20099 = vmatpush.bf16.msrb.mxu1 %v32321_v15  ;;  %v32363_v30 = vld [vmem:[%s41723_s1 + $0x26b0] sm:$0xff] }
 0x4b1   :  { %20127 = vmatpush.bf16.msrb.mxu3 %v32337_v41  ;;  %v18176_v15 = vadd.f32 %v34226_v23, %v18162_v8  ;;  %v32317_v41 = vld [vmem:[%s41723_s1 + $0x2540] sm:$0xff]  ;;  %v30943_v23 = vld [vmem:[%s41724_s0 + $0x25c] sm:$0xf]  ;;  %v32371_v8 = vld [vmem:[%s41723_s1 + $0x26f0] sm:$0xff] }
 0x4b2   :  { %20086 = vmatpush.bf16.msrb.mxu0 %v32312_v49  ;;  %v32333_v49 = vld [vmem:[%s41723_s1 + $0x25c0] sm:$0xff] }
 0x4b3   :  { %20114 = vmatpush.bf16.msrb.mxu2 %v32328_v21  ;;  %v30942_v21 = vld [vmem:[%s41724_s0 + $0x254] sm:$0xf]  ;;  %v18190_v51 = vadd.f32 %v34327_v6, %v18176_v15 }
 0x4b4   :  { %20100 = vmatpush.bf16.msrb.mxu1 %v32320_v12  ;;  %v22211_v12 = vor.u32 %v31070_v43, %v22210_v7  ;;  %v32347_v6 = vld [vmem:[%s41723_s1 + $0x2630] sm:$0xff] }
 0x4b5   :  { %20128 = vmatpush.bf16.msrb.mxu3 %v32336_v27  ;;  %v22219_v27 = vor.u32 %v31071_v52, %v22218_v39  ;;  %v32345_v39 = vld [vmem:[%s41723_s1 + $0x2620] sm:$0xff] }
 0x4b6   :  { %20087 = vmatpush.bf16.msrb.mxu0 %v32311_v24  ;;  %v32372_v24 = vld [vmem:[%s41723_s1 + $0x26f8] sm:$0xff]  ;;  %v32361_v52 = vld [vmem:[%s41723_s1 + $0x26a0] sm:$0xff] }
 0x4b7   :  { %20115 = vmatpush.bf16.msrb.mxu2 %v32327_v57  ;;  %v22215_v57 = vor.u32 %v30942_v21, %v22212_v48  ;;  %v32344_v21 = vld [vmem:[%s41723_s1 + $0x2618] sm:$0xff] }
 0x4b8   :  { %20101 = vmatpush.bf16.msrb.mxu1 %v32319_v34  ;;  %v22223_v34 = vor.u32 %v30943_v23, %v22220_v0 }
 0x4b9   :  { %20129 = vmatpush.bf16.msrb.mxu3 %v32335_v5  ;;  %v38150_v5 = vpop.f32.mrf.mxu1 }
 0x4ba   :  { %20088 = vmatpush.bf16.msrb.mxu0 %v32310_v44  ;;  %v18204_v44 = vadd.f32 %v34335_v14, %v18190_v51  ;;  %v32346_v14 = vld [vmem:[%s41723_s1 + $0x2628] sm:$0xff]  ;;  %v32352_v51 = vld [vmem:[%s41723_s1 + $0x2658] sm:$0xff] }
 0x4bb   :  { %20116 = vmatpush.bf16.msrb.mxu2 %v32326_v9  ;;  %v32355_v9 = vld [vmem:[%s41723_s1 + $0x2670] sm:$0xff] }
 0x4bc   :  { %20102 = vmatpush.bf16.msrb.mxu1 %v32318_v10  ;;  %v18218_v10 = vadd.f32 %v34349_v25, %v18204_v44  ;;  %v32354_v25 = vld [vmem:[%s41723_s1 + $0x2668] sm:$0xff] }
 0x4bd   :  { %20130 = vmatpush.bf16.msrb.mxu3 %v32334_v11  ;;  %v38166_v11 = vpop.f32.mrf.mxu2  ;;  %v32358_v44 = vld [vmem:[%s41723_s1 + $0x2688] sm:$0xff] }
 0x4be   :  { %20089 = vmatpush.bf16.msrb.mxu0 %v32309_v22  ;;  %v32362_v22 = vld [vmem:[%s41723_s1 + $0x26a8] sm:$0xff]  ;;  %v18232_v7 = vadd.f32 %v34357_v29, %v18218_v10  ;;  %v32353_v29 = vld [vmem:[%s41723_s1 + $0x2660] sm:$0xff] }
 0x4bf   :  { %20117 = vmatpush.bf16.msrb.mxu2 %v32325_v26  ;;  %v38174_v26 = vpop.f32.mrf.mxu3  ;;  %v32341_v10 = vld [vmem:[%s41723_s1 + $0x2600] sm:$0xff] }
 0x4c0   :  { %20103 = vmatpush.bf16.msrb.mxu1 %v32317_v41  ;;  %v18246_v41 = vadd.f32 %v34458_v16, %v18232_v7  ;;  %v32360_v16 = vld [vmem:[%s41723_s1 + $0x2698] sm:$0xff]  ;;  %v31073_v7 = vld [vmem:[%s41724_s0 + $0x668] sm:$0x70] }
 0x4c1   :  { %20131 = vmatpush.bf16.msrb.mxu3 %v32333_v49  ;;  %20090 = vmatmul.bf16.vlgmr.msrb.gmra.mxu0 %v22211_v12  ;;  %v19881_v15 = vpop.f32.mrf.mxu1  ;;  %v32368_v12 = vld [vmem:[%s41723_s1 + $0x26d8] sm:$0xff] }
 0x4c2   :  { %20138 = vmatpush.bf16.msra.mxu0 %v32348_v18  ;;  %20118 = vmatmul.bf16.vlgmr.msrb.gmra.mxu2 %v22219_v27  ;;  %v32370_v18 = vld [vmem:[%s41723_s1 + $0x26e8] sm:$0xff]  ;;  %v18260_v23 = vadd.f32 %v34466_v28, %v18246_v41  ;;  %v32343_v28 = vld [vmem:[%s41723_s1 + $0x2610] sm:$0xff] }
 0x4c3   :  { %20166 = vmatpush.bf16.msra.mxu2 %v32364_v37  ;;  %20104 = vmatmul.bf16.vlgmr.msrb.gmra.mxu1 %v22215_v57  ;;  %v19867_v37 = vpop.f32.mrf.mxu0  ;;  %v32359_v57 = vld [vmem:[%s41723_s1 + $0x2690] sm:$0xff]  ;;  %v22228_v41 = vld [vmem:[%s41724_s0 + $0x664] sm:$0x70] }
 0x4c4   :  { %20152 = vmatpush.bf16.msra.mxu1 %v32356_v58  ;;  %20132 = vmatmul.bf16.vlgmr.msrb.gmra.mxu3 %v22223_v34  ;;  %v19868_v43 = vadd.f32 %v19867_v37, %v38070_v56  ;;  %v32369_v56 = vld [vmem:[%s41723_s1 + $0x26e0] sm:$0xff]  ;;  %v18274_v58 = vadd.f32 %v34480_v35, %v18260_v23  ;;  %v32351_v34 = vld [vmem:[%s41723_s1 + $0x2650] sm:$0xff]  ;;  %v22234_v37 = vld [vmem:[%s41724_s0 + $0x268] sm:$0xf] }
 0x4c5   :  { %20180 = vmatpush.bf16.msra.mxu3 %v32372_v24  ;;  %v19895_v48 = vpop.f32.mrf.mxu2  ;;  %v32367_v35 = vld [vmem:[%s41723_s1 + $0x26d0] sm:$0xff]  ;;  %v32404_v23 = vld [vmem:[%s41723_s1 + $0x27f8] sm:$0xff] }
 0x4c6   :  { %20139 = vmatpush.bf16.msra.mxu0 %v32347_v6  ;;  %v19882_v49 = vadd.f32 %v19881_v15, %v19868_v43  ;;  %v18288_v6 = vadd.f32 %v34488_v38, %v18274_v58  ;;  %v32366_v38 = vld [vmem:[%s41723_s1 + $0x26c8] sm:$0xff]  ;;  %v30944_v15 = vld [vmem:[%s41724_s0 + $0x264] sm:$0xf] }
 0x4c7   :  { %20167 = vmatpush.bf16.msra.mxu2 %v32363_v30  ;;  %v19909_v27 = vpop.f32.mrf.mxu3  ;;  %v32342_v30 = vld [vmem:[%s41723_s1 + $0x2608] sm:$0xff] }
 0x4c8   :  { %20153 = vmatpush.bf16.msra.mxu1 %v32355_v9  ;;  %v19896_v0 = vadd.f32 %v19895_v48, %v19882_v49  ;;  %v18302_v9 = vadd.f32 %v34589_v36, %v18288_v6  ;;  %v32380_v36 = vld [vmem:[%s41723_s1 + $0x2738] sm:$0xff]  ;;  %v22236_v49 = vld [vmem:[%s41724_s0 + $0x66c] sm:$0x70]  ;;  %v32394_v6 = vld [vmem:[%s41723_s1 + $0x27a8] sm:$0xff] }
 0x4c9   :  { %20181 = vmatpush.bf16.msra.mxu3 %v32371_v8  ;;  %v32350_v8 = vld [vmem:[%s41723_s1 + $0x2648] sm:$0xff]  ;;  %v32388_v48 = vld [vmem:[%s41723_s1 + $0x2778] sm:$0xff] }
 0x4ca   :  { %20140 = vmatpush.bf16.msra.mxu0 %v32346_v14  ;;  %v38211_v24 = vadd.f32 %v19909_v27, %v19896_v0  ;;  %v32357_v14 = vld [vmem:[%s41723_s1 + $0x2680] sm:$0xff]  ;;  %v18316_v43 = vadd.f32 %v34597_v42, %v18302_v9  ;;  %v30945_v42 = vld [vmem:[%s41724_s0 + $0x26c] sm:$0xf]  ;;  %v22231_v0 = vor.u32 %v30944_v15, %v22228_v41  ;;  %v32395_v27 = vld [vmem:[%s41723_s1 + $0x27b0] sm:$0xff] }
 0x4cb   :  { %20168 = vmatpush.bf16.msra.mxu2 %v32362_v22  ;;  %v32396_v22 = vld [vmem:[%s41723_s1 + $0x27b8] sm:$0xff] }
 0x4cc   :  { %20154 = vmatpush.bf16.msra.mxu1 %v32354_v25  ;;  %v22226_v25 = vld [vmem:[%s41724_s0 + $0x260] sm:$0xf] }
 0x4cd   :  { %20182 = vmatpush.bf16.msra.mxu3 %v32370_v18  ;;  %v31072_v18 = vld [vmem:[%s41724_s0 + $0x660] sm:$0x70] }
 0x4ce   :  { %20141 = vmatpush.bf16.msra.mxu0 %v32345_v39  ;;  %v32349_v39 = vld [vmem:[%s41723_s1 + $0x2640] sm:$0xff] }
 0x4cf   :  { %20169 = vmatpush.bf16.msra.mxu2 %v32361_v52  ;;  %v32365_v52 = vld [vmem:[%s41723_s1 + $0x26c0] sm:$0xff] }
 0x4d0   :  { %20155 = vmatpush.bf16.msra.mxu1 %v32353_v29  ;;  %v18330_v29 = vadd.f32 %v34611_v47, %v18316_v43  ;;  %v32379_v47 = vld [vmem:[%s41723_s1 + $0x2730] sm:$0xff] }
 0x4d1   :  { %20183 = vmatpush.bf16.msra.mxu3 %v32369_v56  ;;  %v22227_v56 = vor.u32 %v31072_v18, %v22226_v25  ;;  %v32376_v18 = vld [vmem:[%s41723_s1 + $0x2718] sm:$0xff] }
 0x4d2   :  { %20142 = vmatpush.bf16.msra.mxu0 %v32344_v21  ;;  %v22235_v21 = vor.u32 %v31073_v7, %v22234_v37  ;;  %v18344_v58 = vadd.f32 %v34619_v50, %v18330_v29  ;;  %v32378_v50 = vld [vmem:[%s41723_s1 + $0x2728] sm:$0xff]  ;;  %v32383_v29 = vld [vmem:[%s41723_s1 + $0x2750] sm:$0xff] }
 0x4d3   :  { %20170 = vmatpush.bf16.msra.mxu2 %v32360_v16  ;;  %v38283_v16 = vpop.f32.mrf.mxu0 }
 0x4d4   :  { %20156 = vmatpush.bf16.msra.mxu1 %v32352_v51  ;;  %v22239_v51 = vor.u32 %v30945_v42, %v22236_v49  ;;  %v32391_v49 = vld [vmem:[%s41723_s1 + $0x2790] sm:$0xff] }
 0x4d5   :  { %20184 = vmatpush.bf16.msra.mxu3 %v32368_v12  ;;  %v38291_v12 = vpop.f32.mrf.mxu1 }
 0x4d6   :  { %20143 = vmatpush.bf16.msra.mxu0 %v32343_v28  ;;  %v32387_v28 = vld [vmem:[%s41723_s1 + $0x2770] sm:$0xff] }
 0x4d7   :  { %20171 = vmatpush.bf16.msra.mxu2 %v32359_v57  ;;  %v32403_v57 = vld [vmem:[%s41723_s1 + $0x27f0] sm:$0xff] }
 0x4d8   :  { %20157 = vmatpush.bf16.msra.mxu1 %v32351_v34  ;;  %v18358_v34 = vadd.f32 %v34720_v53, %v18344_v58  ;;  %v32386_v53 = vld [vmem:[%s41723_s1 + $0x2768] sm:$0xff]  ;;  %v22242_v58 = vld [vmem:[%s41724_s0 + $0x270] sm:$0xf] }
 0x4d9   :  { %20185 = vmatpush.bf16.msra.mxu3 %v32367_v35  ;;  %v38307_v35 = vpop.f32.mrf.mxu2 }
 0x4da   :  { %20144 = vmatpush.bf16.msra.mxu0 %v32342_v30  ;;  %v38315_v30 = vpop.f32.mrf.mxu3 }
 0x4db   :  { %20172 = vmatpush.bf16.msra.mxu2 %v32358_v44  ;;  %v32402_v44 = vld [vmem:[%s41723_s1 + $0x27e8] sm:$0xff] }
 0x4dc   :  { %20158 = vmatpush.bf16.msra.mxu1 %v32350_v8  ;;  %v18372_v8 = vadd.f32 %v34728_v59, %v18358_v34  ;;  %v32385_v59 = vld [vmem:[%s41723_s1 + $0x2760] sm:$0xff]  ;;  %v31075_v34 = vld [vmem:[%s41724_s0 + $0x678] sm:$0x70] }
 0x4dd   :  { %20186 = vmatpush.bf16.msra.mxu3 %v32366_v38 }
 0x4de   :  { %20145 = vmatpush.bf16.msra.mxu0 %v32341_v10  ;;  %v19923_v9 = vpop.f32.mrf.mxu0  ;;  %v32377_v10 = vld [vmem:[%s41723_s1 + $0x2720] sm:$0xff] }
 0x4df   :  { %20173 = vmatpush.bf16.msra.mxu2 %v32357_v14  ;;  %v19924_v38 = vadd.f32 %v19923_v9, %v38211_v24  ;;  %v32393_v14 = vld [vmem:[%s41723_s1 + $0x27a0] sm:$0xff]  ;;  %v22244_v9 = vld [vmem:[%s41724_s0 + $0x674] sm:$0x70] }
 0x4e0   :  { %20159 = vmatpush.bf16.msra.mxu1 %v32349_v39  ;;  %v32401_v24 = vld [vmem:[%s41723_s1 + $0x27e0] sm:$0xff]  ;;  %v32384_v39 = vld [vmem:[%s41723_s1 + $0x2758] sm:$0xff] }
 0x4e1   :  { %20187 = vmatpush.bf16.msra.mxu3 %v32365_v52  ;;  %20146 = vmatmul.bf16.vlgmr.msra.gmra.mxu0 %v22227_v56  ;;  %v32400_v52 = vld [vmem:[%s41723_s1 + $0x27d8] sm:$0xff] }
 0x4e2   :  { %20194 = vmatpush.bf16.msrb.mxu0 %v32380_v36  ;;  %20174 = vmatmul.bf16.vlgmr.msra.gmra.mxu2 %v22235_v21  ;;  %v19937_v36 = vpop.f32.mrf.mxu1  ;;  %v32374_v21 = vld [vmem:[%s41723_s1 + $0x2708] sm:$0xff] }
 0x4e3   :  { %20222 = vmatpush.bf16.msrb.mxu2 %v32396_v22  ;;  %20160 = vmatmul.bf16.vlgmr.msra.gmra.mxu1 %v22231_v0  ;;  %v18386_v22 = vadd.f32 %v34742_v63, %v18372_v8  ;;  %v19938_v25 = vadd.f32 %v19937_v36, %v19924_v38  ;;  %v32392_v63 = vld [vmem:[%s41723_s1 + $0x2798] sm:$0xff]  ;;  %v32382_v0 = vld [vmem:[%s41723_s1 + $0x2748] sm:$0xff]  ;;  %v22252_v8 = vld [vmem:[%s41724_s0 + $0x67c] sm:$0x70] }
 0x4e4   :  { %20208 = vmatpush.bf16.msrb.mxu1 %v32388_v48  ;;  %20188 = vmatmul.bf16.vlgmr.msra.gmra.mxu3 %v22239_v51  ;;  %v32390_v48 = vld [vmem:[%s41723_s1 + $0x2788] sm:$0xff]  ;;  %v32373_v51 = vld [vmem:[%s41723_s1 + $0x2700] sm:$0xff] }
 0x4e5   :  { %20236 = vmatpush.bf16.msrb.mxu3 %v32404_v23  ;;  %v19951_v37 = vpop.f32.mrf.mxu2  ;;  %v18400_v7 = vadd.f32 %v34750_v2, %v18386_v22  ;;  %v32375_v2 = vld [vmem:[%s41723_s1 + $0x2710] sm:$0xff]  ;;  %v32420_v22 = vld [vmem:[%s41723_s1 + $0x2878] sm:$0xff] }
 0x4e6   :  { %20195 = vmatpush.bf16.msrb.mxu0 %v32379_v47  ;;  %v19952_v43 = vadd.f32 %v19951_v37, %v19938_v25  ;;  %v32389_v47 = vld [vmem:[%s41723_s1 + $0x2780] sm:$0xff]  ;;  %v38424_v36 = vpop.f32.mrf.mxu0  ;;  %v32436_v25 = vld [vmem:[%s41723_s1 + $0x28f8] sm:$0xff] }
 0x4e7   :  { %20223 = vmatpush.bf16.msrb.mxu2 %v32395_v27  ;;  %v19965_v15 = vpop.f32.mrf.mxu3  ;;  %v18414_v41 = vadd.f32 %v34851_v19, %v18400_v7  ;;  %v32399_v19 = vld [vmem:[%s41723_s1 + $0x27d0] sm:$0xff]  ;;  %v32428_v27 = vld [vmem:[%s41723_s1 + $0x28b8] sm:$0xff] }
 0x4e8   :  { %20209 = vmatpush.bf16.msrb.mxu1 %v32387_v28  ;;  %v38352_v42 = vadd.f32 %v19965_v15, %v19952_v43  ;;  %v31074_v28 = vld [vmem:[%s41724_s0 + $0x670] sm:$0x70]  ;;  %v32426_v15 = vld [vmem:[%s41723_s1 + $0x28a8] sm:$0xff] }
 0x4e9   :  { %20237 = vmatpush.bf16.msrb.mxu3 %v32403_v57  ;;  %v18428_v56 = vadd.f32 %v34859_v32, %v18414_v41  ;;  %v32398_v32 = vld [vmem:[%s41723_s1 + $0x27c8] sm:$0xff]  ;;  %v22250_v57 = vld [vmem:[%s41724_s0 + $0x278] sm:$0xf]  ;;  %v32419_v7 = vld [vmem:[%s41723_s1 + $0x2870] sm:$0xff] }
 0x4ea   :  { %20196 = vmatpush.bf16.msrb.mxu0 %v32378_v50  ;;  %v32435_v43 = vld [vmem:[%s41723_s1 + $0x28f0] sm:$0xff] }
 0x4eb   :  { %20224 = vmatpush.bf16.msrb.mxu2 %v32394_v6  ;;  %v18442_v23 = vadd.f32 %v34873_v40, %v18428_v56  ;;  %v32412_v40 = vld [vmem:[%s41723_s1 + $0x2838] sm:$0xff]  ;;  %v32381_v6 = vld [vmem:[%s41723_s1 + $0x2740] sm:$0xff] }
 0x4ec   :  { %20210 = vmatpush.bf16.msrb.mxu1 %v32386_v53  ;;  %v32397_v53 = vld [vmem:[%s41723_s1 + $0x27c0] sm:$0xff] }
 0x4ed   :  { %20238 = vmatpush.bf16.msrb.mxu3 %v32402_v44  ;;  %v18456_v50 = vadd.f32 %v34881_v45, %v18442_v23  ;;  %v30946_v44 = vld [vmem:[%s41724_s0 + $0x274] sm:$0xf]  ;;  %v30947_v45 = vld [vmem:[%s41724_s0 + $0x27c] sm:$0xf]  ;;  %v32409_v56 = vld [vmem:[%s41723_s1 + $0x2820] sm:$0xff] }
 0x4ee   :  { %20197 = vmatpush.bf16.msrb.mxu0 %v32377_v10  ;;  %v22243_v10 = vor.u32 %v31074_v28, %v22242_v58  ;;  %v32432_v58 = vld [vmem:[%s41723_s1 + $0x28d8] sm:$0xff] }
 0x4ef   :  { %20225 = vmatpush.bf16.msrb.mxu2 %v32393_v14  ;;  %v18470_v38 = vadd.f32 %v34982_v60, %v18456_v50  ;;  %v22251_v14 = vor.u32 %v31075_v34, %v22250_v57  ;;  %v32411_v60 = vld [vmem:[%s41723_s1 + $0x2830] sm:$0xff]  ;;  %v38456_v41 = vpop.f32.mrf.mxu3 }
 0x4f0   :  { %20211 = vmatpush.bf16.msrb.mxu1 %v32385_v59  ;;  %v22247_v59 = vor.u32 %v30946_v44, %v22244_v9  ;;  %v32423_v50 = vld [vmem:[%s41723_s1 + $0x2890] sm:$0xff]  ;;  %v32406_v44 = vld [vmem:[%s41723_s1 + $0x2808] sm:$0xff] }
 0x4f1   :  { %20239 = vmatpush.bf16.msrb.mxu3 %v32401_v24  ;;  %v22255_v24 = vor.u32 %v30947_v45, %v22252_v8  ;;  %v18484_v37 = vadd.f32 %v34990_v1, %v18470_v38  ;;  %v32410_v1 = vld [vmem:[%s41723_s1 + $0x2828] sm:$0xff]  ;;  %v32405_v38 = vld [vmem:[%s41723_s1 + $0x2800] sm:$0xff] }
 0x4f2   :  { %20198 = vmatpush.bf16.msrb.mxu0 %v32376_v18  ;;  %v38432_v18 = vpop.f32.mrf.mxu1  ;;  %v32422_v9 = vld [vmem:[%s41723_s1 + $0x2888] sm:$0xff] }
 0x4f3   :  { %20226 = vmatpush.bf16.msrb.mxu2 %v32392_v63  ;;  %v32427_v63 = vld [vmem:[%s41723_s1 + $0x28b0] sm:$0xff]  ;;  %v32414_v8 = vld [vmem:[%s41723_s1 + $0x2848] sm:$0xff] }
 0x4f4   :  { %20212 = vmatpush.bf16.msrb.mxu1 %v32384_v39  ;;  %v18498_v39 = vadd.f32 %v35004_v17, %v18484_v37  ;;  %v32418_v17 = vld [vmem:[%s41723_s1 + $0x2868] sm:$0xff]  ;;  %v32413_v37 = vld [vmem:[%s41723_s1 + $0x2840] sm:$0xff] }
 0x4f5   :  { %20240 = vmatpush.bf16.msrb.mxu3 %v32400_v52  ;;  %v38448_v52 = vpop.f32.mrf.mxu2 }
 0x4f6   :  { %20199 = vmatpush.bf16.msrb.mxu0 %v32375_v2  ;;  %v32434_v2 = vld [vmem:[%s41723_s1 + $0x28e8] sm:$0xff] }
 0x4f7   :  { %20227 = vmatpush.bf16.msrb.mxu2 %v32391_v49 }
 0x4f8   :  { %20213 = vmatpush.bf16.msrb.mxu1 %v32383_v29  ;;  %v18512_v29 = vadd.f32 %v35012_v4, %v18498_v39  ;;  %v32417_v4 = vld [vmem:[%s41723_s1 + $0x2860] sm:$0xff]  ;;  %v22260_v39 = vld [vmem:[%s41724_s0 + $0x684] sm:$0x70] }
 0x4f9   :  { %20241 = vmatpush.bf16.msrb.mxu3 %v32399_v19 }
 0x4fa   :  { %20200 = vmatpush.bf16.msrb.mxu0 %v32374_v21  ;;  %v32425_v21 = vld [vmem:[%s41723_s1 + $0x28a0] sm:$0xff]  ;;  %v18526_v23 = vadd.f32 %v35113_v55, %v18512_v29  ;;  %v32424_v55 = vld [vmem:[%s41723_s1 + $0x2898] sm:$0xff] }
 0x4fb   :  { %20228 = vmatpush.bf16.msrb.mxu2 %v32390_v48 }
 0x4fc   :  { %20214 = vmatpush.bf16.msrb.mxu1 %v32382_v0 }
 0x4fd   :  { %20242 = vmatpush.bf16.msrb.mxu3 %v32398_v32  ;;  %v32408_v32 = vld [vmem:[%s41723_s1 + $0x2818] sm:$0xff] }
 0x4fe   :  { %20201 = vmatpush.bf16.msrb.mxu0 %v32373_v51  ;;  %v19979_v49 = vpop.f32.mrf.mxu0 }
 0x4ff   :  { %20229 = vmatpush.bf16.msrb.mxu2 %v32389_v47  ;;  %v19980_v19 = vadd.f32 %v19979_v49, %v38352_v42  ;;  %v32433_v42 = vld [vmem:[%s41723_s1 + $0x28e0] sm:$0xff]  ;;  %v18540_v47 = vadd.f32 %v35121_v62, %v18526_v23  ;;  %v32407_v62 = vld [vmem:[%s41723_s1 + $0x2810] sm:$0xff] }
 0x500   :  { %20215 = vmatpush.bf16.msrb.mxu1 %v32381_v6  ;;  %v19993_v48 = vpop.f32.mrf.mxu1  ;;  %v32415_v6 = vld [vmem:[%s41723_s1 + $0x2850] sm:$0xff] }
 0x501   :  { %20243 = vmatpush.bf16.msrb.mxu3 %v32397_v53  ;;  %20202 = vmatmul.bf16.vlgmr.msrb.gmra.mxu0 %v22243_v10  ;;  %v19994_v0 = vadd.f32 %v19993_v48, %v19980_v19  ;;  %v18554_v57 = vadd.f32 %v35135_v13, %v18540_v47  ;;  %v32431_v13 = vld [vmem:[%s41723_s1 + $0x28d0] sm:$0xff]  ;;  %v32421_v10 = vld [vmem:[%s41723_s1 + $0x2880] sm:$0xff] }
 0x502   :  { %20250 = vmatpush.bf16.msra.mxu0 %v32412_v40  ;;  %20230 = vmatmul.bf16.vlgmr.msrb.gmra.mxu2 %v22251_v14  ;;  %v32460_v14 = vld [vmem:[%s41723_s1 + $0x29b8] sm:$0xff]  ;;  %v32467_v47 = vld [vmem:[%s41723_s1 + $0x29f0] sm:$0xff] }
 0x503   :  { %20278 = vmatpush.bf16.msra.mxu2 %v32428_v27  ;;  %20216 = vmatmul.bf16.vlgmr.msrb.gmra.mxu1 %v22247_v59  ;;  %v32416_v27 = vld [vmem:[%s41723_s1 + $0x2858] sm:$0xff]  ;;  %v18568_v53 = vadd.f32 %v35143_v31, %v18554_v57  ;;  %v32430_v31 = vld [vmem:[%s41723_s1 + $0x28c8] sm:$0xff] }
 0x504   :  { %20264 = vmatpush.bf16.msra.mxu1 %v32420_v22  ;;  %20244 = vmatmul.bf16.vlgmr.msrb.gmra.mxu3 %v22255_v24  ;;  %v22258_v22 = vld [vmem:[%s41724_s0 + $0x280] sm:$0xf]  ;;  %v22266_v59 = vld [vmem:[%s41724_s0 + $0x288] sm:$0xf]  ;;  %v31077_v24 = vld [vmem:[%s41724_s0 + $0x688] sm:$0x70] }
 0x505   :  { %20292 = vmatpush.bf16.msra.mxu3 %v32436_v25  ;;  %v20007_v51 = vpop.f32.mrf.mxu2  ;;  %v18582_v45 = vadd.f32 %v35244_v3, %v18568_v53  ;;  %v32444_v3 = vld [vmem:[%s41723_s1 + $0x2938] sm:$0xff]  ;;  %v31076_v25 = vld [vmem:[%s41724_s0 + $0x680] sm:$0x70]  ;;  %v22267_v29 = vor.u32 %v31077_v24, %v22266_v59  ;;  %v32458_v57 = vld [vmem:[%s41723_s1 + $0x29a8] sm:$0xff] }
 0x506   :  { %20251 = vmatpush.bf16.msra.mxu0 %v32411_v60  ;;  %v20008_v40 = vadd.f32 %v20007_v51, %v19994_v0  ;;  %v41810_v60 = vld [vmem:[#allocation2_spill] sm:$0xff]  ;;  %v22259_v49 = vor.u32 %v31076_v25, %v22258_v22  ;;  %v38565_v19 = vpop.f32.mrf.mxu0  ;;  %v32451_v51 = vld [vmem:[%s41723_s1 + $0x2970] sm:$0xff]  ;;  %v32440_v22 = vld [vmem:[%s41723_s1 + $0x2918] sm:$0xff] }
 0x507   :  { %20279 = vmatpush.bf16.msra.mxu2 %v32427_v63  ;;  %v20021_v28 = vpop.f32.mrf.mxu3  ;;  %v18596_v63 = vadd.f32 %v41810_v60, %v18582_v45  ;;  %v41814_v53 = vld [vmem:[#allocation6_spill] sm:$0xff]  ;;  %v32456_v25 = vld [vmem:[%s41723_s1 + $0x2998] sm:$0xff]  ;;  %v41816_v24 = vld [vmem:[#allocation8_spill] sm:$0xff] }
 0x508   :  { %20265 = vmatpush.bf16.msra.mxu1 %v32419_v7  ;;  %v38493_v34 = vadd.f32 %v20021_v28, %v20008_v40  ;;  %v32429_v7 = vld [vmem:[%s41723_s1 + $0x28c0] sm:$0xff]  ;;  %v38573_v0 = vpop.f32.mrf.mxu1  ;;  %v41813_v40 = vld [vmem:[#allocation5_spill] sm:$0xff]  ;;  %v32442_v28 = vld [vmem:[%s41723_s1 + $0x2928] sm:$0xff] }
 0x509   :  { %20293 = vmatpush.bf16.msra.mxu3 %v32435_v43  ;;  %v30948_v43 = vld [vmem:[%s41724_s0 + $0x284] sm:$0xf] }
 0x50a   :  { %20252 = vmatpush.bf16.msra.mxu0 %v32410_v1  ;;  %v30949_v1 = vld [vmem:[%s41724_s0 + $0x28c] sm:$0xf]  ;;  %v22263_v48 = vor.u32 %v30948_v43, %v22260_v39  ;;  %v32441_v45 = vld [vmem:[%s41723_s1 + $0x2920] sm:$0xff]  ;;  %v41817_v39 = vld [vmem:[#allocation9_spill] sm:$0xff] }
 0x50b   :  { %20280 = vmatpush.bf16.msra.mxu2 %v32426_v15  ;;  %v22268_v15 = vld [vmem:[%s41724_s0 + $0x68c] sm:$0x70] }
 0x50c   :  { %20266 = vmatpush.bf16.msra.mxu1 %v32418_v17  ;;  %v41811_v17 = vld [vmem:[#allocation3_spill] sm:$0xff]  ;;  %v22271_v23 = vor.u32 %v30949_v1, %v22268_v15 }
 0x50d   :  { %20294 = vmatpush.bf16.msra.mxu3 %v32434_v2  ;;  %v18610_v2 = vadd.f32 %v41811_v17, %v18596_v63  ;;  %v32439_v17 = vld [vmem:[%s41723_s1 + $0x2910] sm:$0xff] }
 0x50e   :  { %20253 = vmatpush.bf16.msra.mxu0 %v32409_v56  ;;  %v32452_v56 = vld [vmem:[%s41723_s1 + $0x2978] sm:$0xff] }
 0x50f   :  { %20281 = vmatpush.bf16.msra.mxu2 %v32425_v21  ;;  %v32468_v21 = vld [vmem:[%s41723_s1 + $0x29f8] sm:$0xff] }
 0x510   :  { %20267 = vmatpush.bf16.msra.mxu1 %v32417_v4  ;;  %v32443_v4 = vld [vmem:[%s41723_s1 + $0x2930] sm:$0xff] }
 0x511   :  { %20295 = vmatpush.bf16.msra.mxu3 %v32433_v42  ;;  %v32459_v42 = vld [vmem:[%s41723_s1 + $0x29b0] sm:$0xff] }
 0x512   :  { %20254 = vmatpush.bf16.msra.mxu0 %v32408_v32  ;;  %v41812_v32 = vld [vmem:[#allocation4_spill] sm:$0xff] }
 0x513   :  { %20282 = vmatpush.bf16.msra.mxu2 %v32424_v55  ;;  %v18624_v55 = vadd.f32 %v41812_v32, %v18610_v2  ;;  %v32455_v2 = vld [vmem:[%s41723_s1 + $0x2990] sm:$0xff]  ;;  %v32446_v32 = vld [vmem:[%s41723_s1 + $0x2948] sm:$0xff] }
 0x514   :  { %20268 = vmatpush.bf16.msra.mxu1 %v32416_v27 }
 0x515   :  { %20296 = vmatpush.bf16.msra.mxu3 %v32432_v58  ;;  %v18638_v27 = vadd.f32 %v41813_v40, %v18624_v55  ;;  %v38589_v58 = vpop.f32.mrf.mxu2  ;;  %v32462_v55 = vld [vmem:[%s41723_s1 + $0x29c8] sm:$0xff]  ;;  %v32476_v40 = vld [vmem:[%s41723_s1 + $0x2a38] sm:$0xff] }
 0x516   :  { %20255 = vmatpush.bf16.msra.mxu0 %v32407_v62  ;;  %v38597_v62 = vpop.f32.mrf.mxu3 }
 0x517   :  { %20283 = vmatpush.bf16.msra.mxu2 %v32423_v50  ;;  %v32450_v50 = vld [vmem:[%s41723_s1 + $0x2968] sm:$0xff] }
 0x518   :  { %20269 = vmatpush.bf16.msra.mxu1 %v32415_v6  ;;  %v32466_v6 = vld [vmem:[%s41723_s1 + $0x29e8] sm:$0xff] }
 0x519   :  { %20297 = vmatpush.bf16.msra.mxu3 %v32431_v13 }
 0x51a   :  { %20256 = vmatpush.bf16.msra.mxu0 %v32406_v44  ;;  %v18652_v44 = vadd.f32 %v41814_v53, %v18638_v27  ;;  %v32492_v27 = vld [vmem:[%s41723_s1 + $0x2ab8] sm:$0xff] }
 0x51b   :  { %20284 = vmatpush.bf16.msra.mxu2 %v32422_v9 }
 0x51c   :  { %20270 = vmatpush.bf16.msra.mxu1 %v32414_v8  ;;  %v32457_v8 = vld [vmem:[%s41723_s1 + $0x29a0] sm:$0xff] }
 0x51d   :  { %20298 = vmatpush.bf16.msra.mxu3 %v32430_v31 }
 0x51e   :  { %20257 = vmatpush.bf16.msra.mxu0 %v32405_v38  ;;  %v20035_v13 = vpop.f32.mrf.mxu0  ;;  %v41815_v38 = vld [vmem:[#allocation7_spill] sm:$0xff] }
 0x51f   :  { %20285 = vmatpush.bf16.msra.mxu2 %v32421_v10  ;;  %v20036_v9 = vadd.f32 %v20035_v13, %v38493_v34  ;;  %v18666_v10 = vadd.f32 %v41815_v38, %v18652_v44  ;;  %v32449_v34 = vld [vmem:[%s41723_s1 + $0x2960] sm:$0xff]  ;;  %v41820_v13 = vld [vmem:[#allocation12_spill] sm:$0xff] }
 0x520   :  { %20271 = vmatpush.bf16.msra.mxu1 %v32413_v37  ;;  %v20049_v31 = vpop.f32.mrf.mxu1  ;;  %v32448_v37 = vld [vmem:[%s41723_s1 + $0x2958] sm:$0xff]  ;;  %v32445_v44 = vld [vmem:[%s41723_s1 + $0x2940] sm:$0xff] }
 0x521   :  { %20299 = vmatpush.bf16.msra.mxu3 %v32429_v7  ;;  %20258 = vmatmul.bf16.vlgmr.msra.gmra.mxu0 %v22259_v49  ;;  %v18680_v60 = vadd.f32 %v41816_v24, %v18666_v10  ;;  %v32464_v7 = vld [vmem:[%s41723_s1 + $0x29d8] sm:$0xff]  ;;  %v32447_v49 = vld [vmem:[%s41723_s1 + $0x2950] sm:$0xff]  ;;  %v22284_v38 = vld [vmem:[%s41724_s0 + $0x69c] sm:$0x70] }
 0x522   :  { %20306 = vmatpush.bf16.msrb.mxu0 %v32444_v3  ;;  %20286 = vmatmul.bf16.vlgmr.msra.gmra.mxu2 %v22267_v29  ;;  %v20050_v3 = vadd.f32 %v20049_v31, %v20036_v9  ;;  %v32463_v29 = vld [vmem:[%s41723_s1 + $0x29d0] sm:$0xff]  ;;  %v32461_v9 = vld [vmem:[%s41723_s1 + $0x29c0] sm:$0xff]  ;;  %v30951_v31 = vld [vmem:[%s41724_s0 + $0x29c] sm:$0xf] }
 0x523   :  { %20334 = vmatpush.bf16.msrb.mxu2 %v32460_v14  ;;  %20272 = vmatmul.bf16.vlgmr.msra.gmra.mxu1 %v22263_v48  ;;  %v32465_v14 = vld [vmem:[%s41723_s1 + $0x29e0] sm:$0xff]  ;;  %v18694_v1 = vadd.f32 %v41817_v39, %v18680_v60  ;;  %v32438_v48 = vld [vmem:[%s41723_s1 + $0x2908] sm:$0xff]  ;;  %v41821_v10 = vld [vmem:[#allocation13_spill] sm:$0xff]  ;;  %v22287_v60 = vor.u32 %v30951_v31, %v22284_v38 }
 0x524   :  { %20320 = vmatpush.bf16.msrb.mxu1 %v32452_v56  ;;  %20300 = vmatmul.bf16.vlgmr.msra.gmra.mxu3 %v22271_v23  ;;  %v41818_v56 = vld [vmem:[#allocation10_spill] sm:$0xff]  ;;  %v32454_v23 = vld [vmem:[%s41723_s1 + $0x2988] sm:$0xff]  ;;  %v32480_v31 = vld [vmem:[%s41723_s1 + $0x2a58] sm:$0xff] }
 0x525   :  { %20348 = vmatpush.bf16.msrb.mxu3 %v32468_v21  ;;  %v20063_v59 = vpop.f32.mrf.mxu2  ;;  %v18708_v21 = vadd.f32 %v41818_v56, %v18694_v1  ;;  %v32483_v1 = vld [vmem:[%s41723_s1 + $0x2a70] sm:$0xff]  ;;  %v32474_v56 = vld [vmem:[%s41723_s1 + $0x2a28] sm:$0xff]  ;;  %v32496_v38 = vld [vmem:[%s41723_s1 + $0x2ad8] sm:$0xff] }
 0x526   :  { %20307 = vmatpush.bf16.msrb.mxu0 %v32443_v4  ;;  %v20064_v63 = vadd.f32 %v20063_v59, %v20050_v3  ;;  %v41819_v4 = vld [vmem:[#allocation11_spill] sm:$0xff]  ;;  %v32500_v59 = vld [vmem:[%s41723_s1 + $0x2af8] sm:$0xff] }
 0x527   :  { %20335 = vmatpush.bf16.msrb.mxu2 %v32459_v42  ;;  %v20077_v43 = vpop.f32.mrf.mxu3  ;;  %v18722_v42 = vadd.f32 %v41819_v4, %v18708_v21  ;;  %v32490_v21 = vld [vmem:[%s41723_s1 + $0x2aa8] sm:$0xff] }
 0x528   :  { %20321 = vmatpush.bf16.msrb.mxu1 %v32451_v51  ;;  %v38634_v15 = vadd.f32 %v20077_v43, %v20064_v63  ;;  %v32437_v51 = vld [vmem:[%s41723_s1 + $0x2900] sm:$0xff]  ;;  %v38714_v63 = vpop.f32.mrf.mxu1  ;;  %v32498_v4 = vld [vmem:[%s41723_s1 + $0x2ae8] sm:$0xff] }
 0x529   :  { %20349 = vmatpush.bf16.msrb.mxu3 %v32467_v47  ;;  %v32453_v47 = vld [vmem:[%s41723_s1 + $0x2980] sm:$0xff]  ;;  %v18736_v53 = vadd.f32 %v41820_v13, %v18722_v42  ;;  %v32472_v13 = vld [vmem:[%s41723_s1 + $0x2a18] sm:$0xff] }
 0x52a   :  { %20308 = vmatpush.bf16.msrb.mxu0 %v32442_v28  ;;  %v22274_v28 = vld [vmem:[%s41724_s0 + $0x290] sm:$0xf]  ;;  %v41822_v43 = vld [vmem:[#allocation14_spill] sm:$0xff] }
 0x52b   :  { %20336 = vmatpush.bf16.msrb.mxu2 %v32458_v57  ;;  %v31078_v57 = vld [vmem:[%s41724_s0 + $0x690] sm:$0x70]  ;;  %v18750_v3 = vadd.f32 %v41821_v10, %v18736_v53  ;;  %v32488_v53 = vld [vmem:[%s41723_s1 + $0x2a98] sm:$0xff] }
 0x52c   :  { %20322 = vmatpush.bf16.msrb.mxu1 %v32450_v50  ;;  %v22282_v50 = vld [vmem:[%s41724_s0 + $0x298] sm:$0xf] }
 0x52d   :  { %20350 = vmatpush.bf16.msrb.mxu3 %v32466_v6  ;;  %v31079_v6 = vld [vmem:[%s41724_s0 + $0x698] sm:$0x70]  ;;  %v18764_v39 = vadd.f32 %v41822_v43, %v18750_v3  ;;  %v41827_v3 = vld [vmem:[#allocation19_spill] sm:$0xff] }
 0x52e   :  { %20309 = vmatpush.bf16.msrb.mxu0 %v32441_v45  ;;  %v30950_v45 = vld [vmem:[%s41724_s0 + $0x294] sm:$0xf]  ;;  %v32470_v43 = vld [vmem:[%s41723_s1 + $0x2a08] sm:$0xff] }
 0x52f   :  { %20337 = vmatpush.bf16.msrb.mxu2 %v32457_v8  ;;  %v22276_v8 = vld [vmem:[%s41724_s0 + $0x694] sm:$0x70] }
 0x530   :  { %20323 = vmatpush.bf16.msrb.mxu1 %v32449_v34  ;;  %v22275_v34 = vor.u32 %v31078_v57, %v22274_v28  ;;  %v22279_v24 = vor.u32 %v30950_v45, %v22276_v8  ;;  %v41825_v28 = vld [vmem:[#allocation17_spill] sm:$0xff] }
 0x531   :  { %20351 = vmatpush.bf16.msrb.mxu3 %v32465_v14  ;;  %v22283_v14 = vor.u32 %v31079_v6, %v22282_v50  ;;  %v32497_v6 = vld [vmem:[%s41723_s1 + $0x2ae0] sm:$0xff] }
 0x532   :  { %20310 = vmatpush.bf16.msrb.mxu0 %v32440_v22  ;;  %v38706_v22 = vpop.f32.mrf.mxu0 }
 0x533   :  { %20338 = vmatpush.bf16.msrb.mxu2 %v32456_v25  ;;  %v32484_v25 = vld [vmem:[%s41723_s1 + $0x2a78] sm:$0xff] }
 0x534   :  { %20324 = vmatpush.bf16.msrb.mxu1 %v32448_v37  ;;  %v32475_v37 = vld [vmem:[%s41723_s1 + $0x2a30] sm:$0xff] }
 0x535   :  { %20352 = vmatpush.bf16.msrb.mxu3 %v32464_v7  ;;  %v32491_v7 = vld [vmem:[%s41723_s1 + $0x2ab0] sm:$0xff] }
 0x536   :  { %20311 = vmatpush.bf16.msrb.mxu0 %v32439_v17  ;;  %v32499_v17 = vld [vmem:[%s41723_s1 + $0x2af0] sm:$0xff] }
 0x537   :  { %20339 = vmatpush.bf16.msrb.mxu2 %v32455_v2  ;;  %v41823_v2 = vld [vmem:[#allocation15_spill] sm:$0xff] }
 0x538   :  { %20325 = vmatpush.bf16.msrb.mxu1 %v32447_v49  ;;  %v18778_v49 = vadd.f32 %v41823_v2, %v18764_v39  ;;  %v32486_v39 = vld [vmem:[%s41723_s1 + $0x2a88] sm:$0xff] }
 0x539   :  { %20353 = vmatpush.bf16.msrb.mxu3 %v32463_v29  ;;  %v38730_v29 = vpop.f32.mrf.mxu2  ;;  %v32478_v2 = vld [vmem:[%s41723_s1 + $0x2a48] sm:$0xff] }
 0x53a   :  { %20312 = vmatpush.bf16.msrb.mxu0 %v32438_v48  ;;  %v38738_v48 = vpop.f32.mrf.mxu3 }
 0x53b   :  { %20340 = vmatpush.bf16.msrb.mxu2 %v32454_v23  ;;  %v32482_v23 = vld [vmem:[%s41723_s1 + $0x2a68] sm:$0xff] }
 0x53c   :  { %20326 = vmatpush.bf16.msrb.mxu1 %v32446_v32  ;;  %v41824_v32 = vld [vmem:[#allocation16_spill] sm:$0xff] }
 0x53d   :  { %20354 = vmatpush.bf16.msrb.mxu3 %v32462_v55  ;;  %v18792_v55 = vadd.f32 %v41824_v32, %v18778_v49  ;;  %v32494_v49 = vld [vmem:[%s41723_s1 + $0x2ac8] sm:$0xff]  ;;  %v31080_v32 = vld [vmem:[%s41724_s0 + $0x6a0] sm:$0x70] }
 0x53e   :  { %20313 = vmatpush.bf16.msrb.mxu0 %v32437_v51  ;;  %v20091_v42 = vpop.f32.mrf.mxu0 }
 0x53f   :  { %20341 = vmatpush.bf16.msrb.mxu2 %v32453_v47  ;;  %v20092_v51 = vadd.f32 %v20091_v42, %v38634_v15  ;;  %v32473_v47 = vld [vmem:[%s41723_s1 + $0x2a20] sm:$0xff]  ;;  %v18806_v57 = vadd.f32 %v41825_v28, %v18792_v55  ;;  %v22298_v55 = vld [vmem:[%s41724_s0 + $0x2a8] sm:$0xf] }
 0x540   :  { %20327 = vmatpush.bf16.msrb.mxu1 %v32445_v44  ;;  %v32481_v15 = vld [vmem:[%s41723_s1 + $0x2a60] sm:$0xff] }
 0x541   :  { %20355 = vmatpush.bf16.msrb.mxu3 %v32461_v9  ;;  %20314 = vmatmul.bf16.vlgmr.msrb.gmra.mxu0 %v22275_v34  ;;  %v41826_v9 = vld [vmem:[#allocation18_spill] sm:$0xff] }
 0x542   :  { %20362 = vmatpush.bf16.msra.mxu0 %v32476_v40  ;;  %20342 = vmatmul.bf16.vlgmr.msrb.gmra.mxu2 %v22283_v14  ;;  %v32489_v40 = vld [vmem:[%s41723_s1 + $0x2aa0] sm:$0xff]  ;;  %v18820_v45 = vadd.f32 %v41826_v9, %v18806_v57 }
 0x543   :  { %20390 = vmatpush.bf16.msra.mxu2 %v32492_v27  ;;  %20328 = vmatmul.bf16.vlgmr.msrb.gmra.mxu1 %v22279_v24  ;;  %v20105_v27 = vpop.f32.mrf.mxu1  ;;  %v32479_v24 = vld [vmem:[%s41723_s1 + $0x2a50] sm:$0xff]  ;;  %v22290_v42 = vld [vmem:[%s41724_s0 + $0x2a0] sm:$0xf]  ;;  %v30952_v57 = vld [vmem:[%s41724_s0 + $0x2a4] sm:$0xf] }
 0x544   :  { %20376 = vmatpush.bf16.msra.mxu1 %v32484_v25  ;;  %20356 = vmatmul.bf16.vlgmr.msrb.gmra.mxu3 %v22287_v60  ;;  %v20106_v50 = vadd.f32 %v20105_v27, %v20092_v51  ;;  %v18834_v34 = vadd.f32 %v41827_v3, %v18820_v45  ;;  %v32471_v25 = vld [vmem:[%s41723_s1 + $0x2a10] sm:$0xff]  ;;  %v31081_v51 = vld [vmem:[%s41724_s0 + $0x6a8] sm:$0x70]  ;;  %v32477_v27 = vld [vmem:[%s41723_s1 + $0x2a40] sm:$0xff] }
 0x545   :  { %20404 = vmatpush.bf16.msra.mxu3 %v32500_v59  ;;  %v20119_v44 = vpop.f32.mrf.mxu2  ;;  %v32487_v59 = vld [vmem:[%s41723_s1 + $0x2a90] sm:$0xff]  ;;  %v32493_v28 = vld [vmem:[%s41723_s1 + $0x2ac0] sm:$0xff]  ;;  %v22299_v9 = vor.u32 %v31081_v51, %v22298_v55 }
 0x546   :  { %20363 = vmatpush.bf16.msra.mxu0 %v32475_v37  ;;  %v20120_v8 = vadd.f32 %v20119_v44, %v20106_v50  ;;  %v32495_v60 = vld [vmem:[%s41723_s1 + $0x2ad0] sm:$0xff]  ;;  %v22292_v50 = vld [vmem:[%s41724_s0 + $0x6a4] sm:$0x70]  ;;  %v22291_v44 = vor.u32 %v31080_v32, %v22290_v42  ;;  %v38847_v45 = vpop.f32.mrf.mxu0  ;;  %v32505_v32 = vld [vmem:[%s41723_s1 + $0x2b20] sm:$0xff] }
 0x547   :  { %20391 = vmatpush.bf16.msra.mxu2 %v32491_v7  ;;  %v20133_v10 = vpop.f32.mrf.mxu3  ;;  %v41828_v37 = vld [vmem:[#allocation20_spill] sm:$0xff]  ;;  %v32521_v55 = vld [vmem:[%s41723_s1 + $0x2ba0] sm:$0xff] }
 0x548   :  { %20377 = vmatpush.bf16.msra.mxu1 %v32483_v1  ;;  %v38775_v14 = vadd.f32 %v20133_v10, %v20120_v8  ;;  %v18848_v7 = vadd.f32 %v41828_v37, %v18834_v34  ;;  %v41829_v1 = vld [vmem:[#allocation21_spill] sm:$0xff]  ;;  %v32507_v34 = vld [vmem:[%s41723_s1 + $0x2b30] sm:$0xff] }
 0x549   :  { %20405 = vmatpush.bf16.msra.mxu3 %v32499_v17  ;;  %v32516_v8 = vld [vmem:[%s41723_s1 + $0x2b78] sm:$0xff]  ;;  %v32531_v37 = vld [vmem:[%s41723_s1 + $0x2bf0] sm:$0xff] }
 0x54a   :  { %20364 = vmatpush.bf16.msra.mxu0 %v32474_v56  ;;  %v18862_v17 = vadd.f32 %v41829_v1, %v18848_v7  ;;  %v32469_v56 = vld [vmem:[%s41723_s1 + $0x2a00] sm:$0xff]  ;;  %v41833_v7 = vld [vmem:[#allocation25_spill] sm:$0xff]  ;;  %v32506_v1 = vld [vmem:[%s41723_s1 + $0x2b28] sm:$0xff] }
 0x54b   :  { %20392 = vmatpush.bf16.msra.mxu2 %v32490_v21  ;;  %v32485_v21 = vld [vmem:[%s41723_s1 + $0x2a80] sm:$0xff]  ;;  %v38855_v3 = vpop.f32.mrf.mxu1 }
 0x54c   :  { %20378 = vmatpush.bf16.msra.mxu1 %v32482_v23  ;;  %v32508_v23 = vld [vmem:[%s41723_s1 + $0x2b38] sm:$0xff] }
 0x54d   :  { %20406 = vmatpush.bf16.msra.mxu3 %v32498_v4  ;;  %v32524_v4 = vld [vmem:[%s41723_s1 + $0x2bb8] sm:$0xff] }
 0x54e   :  { %20365 = vmatpush.bf16.msra.mxu0 %v32473_v47  ;;  %v41830_v47 = vld [vmem:[#allocation22_spill] sm:$0xff] }
 0x54f   :  { %20393 = vmatpush.bf16.msra.mxu2 %v32489_v40  ;;  %v18876_v40 = vadd.f32 %v41830_v47, %v18862_v17  ;;  %v32522_v17 = vld [vmem:[%s41723_s1 + $0x2ba8] sm:$0xff] }
 0x550   :  { %20379 = vmatpush.bf16.msra.mxu1 %v32481_v15  ;;  %v30953_v15 = vld [vmem:[%s41724_s0 + $0x2ac] sm:$0xf] }
 0x551   :  { %20407 = vmatpush.bf16.msra.mxu3 %v32497_v6  ;;  %v22300_v6 = vld [vmem:[%s41724_s0 + $0x6ac] sm:$0x70]  ;;  %v41835_v47 = vld [vmem:[#allocation27_spill] sm:$0xff] }
 0x552   :  { %20366 = vmatpush.bf16.msra.mxu0 %v32472_v13  ;;  %v41831_v13 = vld [vmem:[#allocation23_spill] sm:$0xff]  ;;  %v22303_v10 = vor.u32 %v30953_v15, %v22300_v6  ;;  %v41836_v6 = vld [vmem:[#allocation28_spill] sm:$0xff] }
 0x553   :  { %20394 = vmatpush.bf16.msra.mxu2 %v32488_v53  ;;  %v18890_v53 = vadd.f32 %v41831_v13, %v18876_v40 }
 0x554   :  { %20380 = vmatpush.bf16.msra.mxu1 %v32480_v31  ;;  %v32532_v31 = vld [vmem:[%s41723_s1 + $0x2bf8] sm:$0xff] }
 0x555   :  { %20408 = vmatpush.bf16.msra.mxu3 %v32496_v38  ;;  %v22295_v38 = vor.u32 %v30952_v57, %v22292_v50  ;;  %v32504_v57 = vld [vmem:[%s41723_s1 + $0x2b18] sm:$0xff] }
 0x556   :  { %20367 = vmatpush.bf16.msra.mxu0 %v32471_v25  ;;  %v32523_v25 = vld [vmem:[%s41723_s1 + $0x2bb0] sm:$0xff]  ;;  %v32520_v50 = vld [vmem:[%s41723_s1 + $0x2b98] sm:$0xff] }
 0x557   :  { %20395 = vmatpush.bf16.msra.mxu2 %v32487_v59  ;;  %v41832_v59 = vld [vmem:[#allocation24_spill] sm:$0xff] }
 0x558   :  { %20381 = vmatpush.bf16.msra.mxu1 %v32479_v24  ;;  %v18904_v24 = vadd.f32 %v41832_v59, %v18890_v53  ;;  %v32511_v59 = vld [vmem:[%s41723_s1 + $0x2b50] sm:$0xff] }
 0x559   :  { %20409 = vmatpush.bf16.msra.mxu3 %v32495_v60  ;;  %v32515_v60 = vld [vmem:[%s41723_s1 + $0x2b70] sm:$0xff] }
 0x55a   :  { %20368 = vmatpush.bf16.msra.mxu0 %v32470_v43  ;;  %v18918_v43 = vadd.f32 %v41833_v7, %v18904_v24  ;;  %v32527_v24 = vld [vmem:[%s41723_s1 + $0x2bd0] sm:$0xff]  ;;  %v32502_v7 = vld [vmem:[%s41723_s1 + $0x2b08] sm:$0xff] }
 0x55b   :  { %20396 = vmatpush.bf16.msra.mxu2 %v32486_v39  ;;  %v38871_v39 = vpop.f32.mrf.mxu2 }
 0x55c   :  { %20382 = vmatpush.bf16.msra.mxu1 %v32478_v2  ;;  %v38879_v2 = vpop.f32.mrf.mxu3 }
 0x55d   :  { %20410 = vmatpush.bf16.msra.mxu3 %v32494_v49  ;;  %v32514_v49 = vld [vmem:[%s41723_s1 + $0x2b68] sm:$0xff] }
 0x55e   :  { %20369 = vmatpush.bf16.msra.mxu0 %v32469_v56  ;;  %v32530_v56 = vld [vmem:[%s41723_s1 + $0x2be8] sm:$0xff] }
 0x55f   :  { %20397 = vmatpush.bf16.msra.mxu2 %v32485_v21  ;;  %v20147_v21 = vpop.f32.mrf.mxu0 }
 0x560   :  { %20383 = vmatpush.bf16.msra.mxu1 %v32477_v27  ;;  %v20148_v42 = vadd.f32 %v20147_v21, %v38775_v14  ;;  %v20161_v51 = vpop.f32.mrf.mxu1  ;;  %v32513_v14 = vld [vmem:[%s41723_s1 + $0x2b60] sm:$0xff] }
 0x561   :  { %20411 = vmatpush.bf16.msra.mxu3 %v32493_v28  ;;  %20370 = vmatmul.bf16.vlgmr.msra.gmra.mxu0 %v22291_v44  ;;  %v32529_v28 = vld [vmem:[%s41723_s1 + $0x2be0] sm:$0xff]  ;;  %v32512_v44 = vld [vmem:[%s41723_s1 + $0x2b58] sm:$0xff] }
 0x562   :  { %20418 = vmatpush.bf16.msrb.mxu0 %v32508_v23  ;;  %20398 = vmatmul.bf16.vlgmr.msra.gmra.mxu2 %v22299_v9  ;;  %v41834_v23 = vld [vmem:[#allocation26_spill] sm:$0xff]  ;;  %v20162_v27 = vadd.f32 %v20161_v51, %v20148_v42  ;;  %v32528_v9 = vld [vmem:[%s41723_s1 + $0x2bd8] sm:$0xff] }
 0x563   :  { %20446 = vmatpush.bf16.msrb.mxu2 %v32524_v4  ;;  %20384 = vmatmul.bf16.vlgmr.msra.gmra.mxu1 %v22295_v38  ;;  %v18932_v4 = vadd.f32 %v41834_v23, %v18918_v43  ;;  %v32518_v43 = vld [vmem:[%s41723_s1 + $0x2b88] sm:$0xff]  ;;  %v32501_v21 = vld [vmem:[%s41723_s1 + $0x2b00] sm:$0xff]  ;;  %v32556_v42 = vld [vmem:[%s41723_s1 + $0x2cb8] sm:$0xff] }
 0x564   :  { %20432 = vmatpush.bf16.msrb.mxu1 %v32516_v8  ;;  %20412 = vmatmul.bf16.vlgmr.msra.gmra.mxu3 %v22303_v10  ;;  %v32517_v23 = vld [vmem:[%s41723_s1 + $0x2b80] sm:$0xff]  ;;  %v22314_v51 = vld [vmem:[%s41724_s0 + $0x2b8] sm:$0xf] }
 0x565   :  { %20460 = vmatpush.bf16.msrb.mxu3 %v32532_v31  ;;  %v18946_v40 = vadd.f32 %v41835_v47, %v18932_v4  ;;  %v20175_v15 = vpop.f32.mrf.mxu2  ;;  %v41837_v31 = vld [vmem:[#allocation29_spill] sm:$0xff] }
 0x566   :  { %20419 = vmatpush.bf16.msrb.mxu0 %v32507_v34  ;;  %v20176_v53 = vadd.f32 %v20175_v15, %v20162_v27  ;;  %v32503_v34 = vld [vmem:[%s41723_s1 + $0x2b10] sm:$0xff]  ;;  %v32540_v4 = vld [vmem:[%s41723_s1 + $0x2c38] sm:$0xff] }
 0x567   :  { %20447 = vmatpush.bf16.msrb.mxu2 %v32523_v25  ;;  %v18960_v13 = vadd.f32 %v41836_v6, %v18946_v40  ;;  %v20189_v8 = vpop.f32.mrf.mxu3  ;;  %v32519_v25 = vld [vmem:[%s41723_s1 + $0x2b90] sm:$0xff]  ;;  %v31083_v47 = vld [vmem:[%s41724_s0 + $0x6b8] sm:$0x70]  ;;  %v22316_v6 = vld [vmem:[%s41724_s0 + $0x6bc] sm:$0x70] }
 0x568   :  { %20433 = vmatpush.bf16.msrb.mxu1 %v32515_v60  ;;  %v38916_v10 = vadd.f32 %v20189_v8, %v20176_v53  ;;  %v41838_v60 = vld [vmem:[#allocation30_spill] sm:$0xff]  ;;  %v41840_v40 = vld [vmem:[#allocation32_spill] sm:$0xff]  ;;  %v30955_v15 = vld [vmem:[%s41724_s0 + $0x2bc] sm:$0xf]  ;;  %v38988_v8 = vpop.f32.mrf.mxu0 }
 0x569   :  { %20461 = vmatpush.bf16.msrb.mxu3 %v32531_v37  ;;  %v18974_v38 = vadd.f32 %v41837_v31, %v18960_v13  ;;  %v41841_v13 = vld [vmem:[#allocation33_spill] sm:$0xff] }
 0x56a   :  { %20420 = vmatpush.bf16.msrb.mxu0 %v32506_v1  ;;  %v41839_v1 = vld [vmem:[#allocation31_spill] sm:$0xff]  ;;  %v32548_v31 = vld [vmem:[%s41723_s1 + $0x2c78] sm:$0xff] }
 0x56b   :  { %20448 = vmatpush.bf16.msrb.mxu2 %v32522_v17  ;;  %v18988_v37 = vadd.f32 %v41838_v60, %v18974_v38  ;;  %v32564_v38 = vld [vmem:[%s41723_s1 + $0x2cf8] sm:$0xff]  ;;  %v32555_v60 = vld [vmem:[%s41723_s1 + $0x2cb0] sm:$0xff] }
 0x56c   :  { %20434 = vmatpush.bf16.msrb.mxu1 %v32514_v49  ;;  %v32510_v49 = vld [vmem:[%s41723_s1 + $0x2b48] sm:$0xff] }
 0x56d   :  { %20462 = vmatpush.bf16.msrb.mxu3 %v32530_v56  ;;  %v19002_v17 = vadd.f32 %v41839_v1, %v18988_v37  ;;  %v32526_v56 = vld [vmem:[%s41723_s1 + $0x2bc8] sm:$0xff]  ;;  %v41842_v37 = vld [vmem:[#allocation34_spill] sm:$0xff]  ;;  %v32563_v1 = vld [vmem:[%s41723_s1 + $0x2cf0] sm:$0xff] }
 0x56e   :  { %20421 = vmatpush.bf16.msrb.mxu0 %v32505_v32  ;;  %v22306_v32 = vld [vmem:[%s41724_s0 + $0x2b0] sm:$0xf] }
 0x56f   :  { %20449 = vmatpush.bf16.msrb.mxu2 %v32521_v55  ;;  %v31082_v55 = vld [vmem:[%s41724_s0 + $0x6b0] sm:$0x70]  ;;  %v19016_v27 = vadd.f32 %v41840_v40, %v19002_v17  ;;  %v41843_v17 = vld [vmem:[#allocation35_spill] sm:$0xff] }
 0x570   :  { %20435 = vmatpush.bf16.msrb.mxu1 %v32513_v14  ;;  %v32509_v14 = vld [vmem:[%s41723_s1 + $0x2b40] sm:$0xff] }
 0x571   :  { %20463 = vmatpush.bf16.msrb.mxu3 %v32529_v28  ;;  %v32525_v28 = vld [vmem:[%s41723_s1 + $0x2bc0] sm:$0xff]  ;;  %v19030_v53 = vadd.f32 %v41841_v13, %v19016_v27  ;;  %v32536_v13 = vld [vmem:[%s41723_s1 + $0x2c18] sm:$0xff] }
 0x572   :  { %20422 = vmatpush.bf16.msrb.mxu0 %v32504_v57  ;;  %v30954_v57 = vld [vmem:[%s41724_s0 + $0x2b4] sm:$0xf]  ;;  %v32537_v27 = vld [vmem:[%s41723_s1 + $0x2c20] sm:$0xff] }
 0x573   :  { %20450 = vmatpush.bf16.msrb.mxu2 %v32520_v50  ;;  %v22308_v50 = vld [vmem:[%s41724_s0 + $0x6b4] sm:$0x70] }
 0x574   :  { %20436 = vmatpush.bf16.msrb.mxu1 %v32512_v44  ;;  %v22307_v44 = vor.u32 %v31082_v55, %v22306_v32  ;;  %v32562_v32 = vld [vmem:[%s41723_s1 + $0x2ce8] sm:$0xff] }
 0x575   :  { %20464 = vmatpush.bf16.msrb.mxu3 %v32528_v9  ;;  %v22315_v9 = vor.u32 %v31083_v47, %v22314_v51  ;;  %v41844_v51 = vld [vmem:[#allocation36_spill] sm:$0xff] }
 0x576   :  { %20423 = vmatpush.bf16.msrb.mxu0 %v32503_v34  ;;  %v22311_v34 = vor.u32 %v30954_v57, %v22308_v50  ;;  %v41845_v57 = vld [vmem:[#allocation37_spill] sm:$0xff] }
 0x577   :  { %20451 = vmatpush.bf16.msrb.mxu2 %v32519_v25  ;;  %v22319_v25 = vor.u32 %v30955_v15, %v22316_v6  ;;  %v32561_v6 = vld [vmem:[%s41723_s1 + $0x2ce0] sm:$0xff] }
 0x578   :  { %20437 = vmatpush.bf16.msrb.mxu1 %v32511_v59  ;;  %v38996_v59 = vpop.f32.mrf.mxu1 }
 0x579   :  { %20465 = vmatpush.bf16.msrb.mxu3 %v32527_v24  ;;  %v32539_v24 = vld [vmem:[%s41723_s1 + $0x2c30] sm:$0xff] }
 0x57a   :  { %20424 = vmatpush.bf16.msrb.mxu0 %v32502_v7  ;;  %v19044_v7 = vadd.f32 %v41842_v37, %v19030_v53  ;;  %v32552_v53 = vld [vmem:[%s41723_s1 + $0x2c98] sm:$0xff] }
 0x57b   :  { %20452 = vmatpush.bf16.msrb.mxu2 %v32518_v43  ;;  %v32547_v43 = vld [vmem:[%s41723_s1 + $0x2c70] sm:$0xff] }
 0x57c   :  { %20438 = vmatpush.bf16.msrb.mxu1 %v32510_v49  ;;  %v19058_v49 = vadd.f32 %v41843_v17, %v19044_v7  ;;  %v32543_v17 = vld [vmem:[%s41723_s1 + $0x2c50] sm:$0xff] }
 0x57d   :  { %20466 = vmatpush.bf16.msrb.mxu3 %v32526_v56  ;;  %v39012_v56 = vpop.f32.mrf.mxu2 }
 0x57e   :  { %20425 = vmatpush.bf16.msrb.mxu0 %v32501_v21  ;;  %v32538_v21 = vld [vmem:[%s41723_s1 + $0x2c28] sm:$0xff]  ;;  %v20203_v55 = vpop.f32.mrf.mxu0  ;;  %v19072_v47 = vadd.f32 %v41844_v51, %v19058_v49  ;;  %v32559_v49 = vld [vmem:[%s41723_s1 + $0x2cd0] sm:$0xff] }
 0x57f   :  { %20453 = vmatpush.bf16.msrb.mxu2 %v32517_v23  ;;  %v32554_v23 = vld [vmem:[%s41723_s1 + $0x2ca8] sm:$0xff]  ;;  %v20204_v40 = vadd.f32 %v20203_v55, %v38916_v10  ;;  %v32545_v10 = vld [vmem:[%s41723_s1 + $0x2c60] sm:$0xff]  ;;  %v41849_v55 = vld [vmem:[#allocation41_spill] sm:$0xff] }
 0x580   :  { %20439 = vmatpush.bf16.msrb.mxu1 %v32509_v14  ;;  %v32553_v14 = vld [vmem:[%s41723_s1 + $0x2ca0] sm:$0xff]  ;;  %v19086_v50 = vadd.f32 %v41845_v57, %v19072_v47  ;;  %v32542_v47 = vld [vmem:[%s41723_s1 + $0x2c48] sm:$0xff]  ;;  %v32588_v57 = vld [vmem:[%s41723_s1 + $0x2db8] sm:$0xff] }
 0x581   :  { %20467 = vmatpush.bf16.msrb.mxu3 %v32525_v28  ;;  %20426 = vmatmul.bf16.vlgmr.msrb.gmra.mxu0 %v22307_v44  ;;  %v20217_v28 = vpop.f32.mrf.mxu1 }
 0x582   :  { %20474 = vmatpush.bf16.msra.mxu0 %v32540_v4  ;;  %20454 = vmatmul.bf16.vlgmr.msrb.gmra.mxu2 %v22315_v9  ;;  %v39020_v4 = vpop.f32.mrf.mxu3  ;;  %v20218_v15 = vadd.f32 %v20217_v28, %v20204_v40  ;;  %v41846_v9 = vld [vmem:[#allocation38_spill] sm:$0xff]  ;;  %v32558_v40 = vld [vmem:[%s41723_s1 + $0x2cc8] sm:$0xff]  ;;  %v32572_v28 = vld [vmem:[%s41723_s1 + $0x2d38] sm:$0xff] }
 0x583   :  { %20502 = vmatpush.bf16.msra.mxu2 %v32556_v42  ;;  %20440 = vmatmul.bf16.vlgmr.msrb.gmra.mxu1 %v22311_v34  ;;  %v32546_v42 = vld [vmem:[%s41723_s1 + $0x2c68] sm:$0xff]  ;;  %v32544_v34 = vld [vmem:[%s41723_s1 + $0x2c58] sm:$0xff] }
 0x584   :  { %20488 = vmatpush.bf16.msra.mxu1 %v32548_v31  ;;  %20468 = vmatmul.bf16.vlgmr.msrb.gmra.mxu3 %v22319_v25  ;;  %v19100_v31 = vadd.f32 %v41846_v9, %v19086_v50  ;;  %v32560_v25 = vld [vmem:[%s41723_s1 + $0x2cd8] sm:$0xff]  ;;  %v22322_v50 = vld [vmem:[%s41724_s0 + $0x2c0] sm:$0xf] }
 0x585   :  { %20516 = vmatpush.bf16.msra.mxu3 %v32564_v38  ;;  %v20231_v44 = vpop.f32.mrf.mxu2  ;;  %v32557_v9 = vld [vmem:[%s41723_s1 + $0x2cc0] sm:$0xff] }
 0x586   :  { %20475 = vmatpush.bf16.msra.mxu0 %v32539_v24  ;;  %v20232_v38 = vadd.f32 %v20231_v44, %v20218_v15  ;;  %v31084_v15 = vld [vmem:[%s41724_s0 + $0x6c0] sm:$0x70] }
 0x587   :  { %20503 = vmatpush.bf16.msra.mxu2 %v32555_v60  ;;  %v41847_v60 = vld [vmem:[#allocation39_spill] sm:$0xff]  ;;  %v32541_v44 = vld [vmem:[%s41723_s1 + $0x2c40] sm:$0xff] }
 0x588   :  { %20489 = vmatpush.bf16.msra.mxu1 %v32547_v43  ;;  %v19114_v37 = vadd.f32 %v41847_v60, %v19100_v31  ;;  %v32535_v43 = vld [vmem:[%s41723_s1 + $0x2c10] sm:$0xff]  ;;  %v30956_v31 = vld [vmem:[%s41724_s0 + $0x2c4] sm:$0xf] }
 0x589   :  { %20517 = vmatpush.bf16.msra.mxu3 %v32563_v1  ;;  %v32551_v1 = vld [vmem:[%s41723_s1 + $0x2c90] sm:$0xff] }
 0x58a   :  { %20476 = vmatpush.bf16.msra.mxu0 %v32538_v21  ;;  %v20245_v24 = vpop.f32.mrf.mxu3  ;;  %v41848_v21 = vld [vmem:[#allocation40_spill] sm:$0xff] }
 0x58b   :  { %20504 = vmatpush.bf16.msra.mxu2 %v32554_v23  ;;  %v39057_v7 = vadd.f32 %v20245_v24, %v20232_v38  ;;  %v19128_v23 = vadd.f32 %v41848_v21, %v19114_v37  ;;  %v22324_v38 = vld [vmem:[%s41724_s0 + $0x6c4] sm:$0x70]  ;;  %v22323_v37 = vor.u32 %v31084_v15, %v22322_v50 }
 0x58c   :  { %20490 = vmatpush.bf16.msra.mxu1 %v32546_v42  ;;  %v32534_v42 = vld [vmem:[%s41723_s1 + $0x2c08] sm:$0xff]  ;;  %v22327_v21 = vor.u32 %v30956_v31, %v22324_v38  ;;  %v32569_v38 = vld [vmem:[%s41723_s1 + $0x2d20] sm:$0xff] }
 0x58d   :  { %20518 = vmatpush.bf16.msra.mxu3 %v32562_v32  ;;  %v32550_v32 = vld [vmem:[%s41723_s1 + $0x2c88] sm:$0xff]  ;;  %v19142_v51 = vadd.f32 %v41849_v55, %v19128_v23  ;;  %v32587_v55 = vld [vmem:[%s41723_s1 + $0x2db0] sm:$0xff] }
 0x58e   :  { %20477 = vmatpush.bf16.msra.mxu0 %v32537_v27  ;;  %v32533_v27 = vld [vmem:[%s41723_s1 + $0x2c00] sm:$0xff]  ;;  %v41851_v24 = vld [vmem:[#allocation43_spill] sm:$0xff] }
 0x58f   :  { %20505 = vmatpush.bf16.msra.mxu2 %v32553_v14  ;;  %v32549_v14 = vld [vmem:[%s41723_s1 + $0x2c80] sm:$0xff]  ;;  %v32570_v50 = vld [vmem:[%s41723_s1 + $0x2d28] sm:$0xff] }
 0x590   :  { %20491 = vmatpush.bf16.msra.mxu1 %v32545_v10  ;;  %v22330_v10 = vld [vmem:[%s41724_s0 + $0x2c8] sm:$0xf] }
 0x591   :  { %20519 = vmatpush.bf16.msra.mxu3 %v32561_v6  ;;  %v31085_v6 = vld [vmem:[%s41724_s0 + $0x6c8] sm:$0x70] }
 0x592   :  { %20478 = vmatpush.bf16.msra.mxu0 %v32536_v13  ;;  %v41850_v13 = vld [vmem:[#allocation42_spill] sm:$0xff]  ;;  %v32586_v15 = vld [vmem:[%s41723_s1 + $0x2da8] sm:$0xff] }
 0x593   :  { %20506 = vmatpush.bf16.msra.mxu2 %v32552_v53  ;;  %v19156_v53 = vadd.f32 %v41850_v13, %v19142_v51  ;;  %v41852_v51 = vld [vmem:[#allocation44_spill] sm:$0xff]  ;;  %v32594_v13 = vld [vmem:[%s41723_s1 + $0x2de8] sm:$0xff] }
 0x594   :  { %20492 = vmatpush.bf16.msra.mxu1 %v32544_v34  ;;  %v30957_v34 = vld [vmem:[%s41724_s0 + $0x2cc] sm:$0xf] }
 0x595   :  { %20520 = vmatpush.bf16.msra.mxu3 %v32560_v25  ;;  %v22332_v25 = vld [vmem:[%s41724_s0 + $0x6cc] sm:$0x70]  ;;  %v19170_v60 = vadd.f32 %v41851_v24, %v19156_v53  ;;  %v41855_v24 = vld [vmem:[#allocation47_spill] sm:$0xff] }
 0x596   :  { %20479 = vmatpush.bf16.msra.mxu0 %v32535_v43  ;;  %v22331_v43 = vor.u32 %v31085_v6, %v22330_v10  ;;  %v22335_v23 = vor.u32 %v30957_v34, %v22332_v25  ;;  %v39161_v10 = vpop.f32.mrf.mxu3  ;;  %v32578_v6 = vld [vmem:[%s41723_s1 + $0x2d68] sm:$0xff]  ;;  %v32585_v34 = vld [vmem:[%s41723_s1 + $0x2da0] sm:$0xff] }
 0x597   :  { %20507 = vmatpush.bf16.msra.mxu2 %v32551_v1  ;;  %v39129_v1 = vpop.f32.mrf.mxu0 }
 0x598   :  { %20493 = vmatpush.bf16.msra.mxu1 %v32543_v17  ;;  %v32580_v17 = vld [vmem:[%s41723_s1 + $0x2d78] sm:$0xff] }
 0x599   :  { %20521 = vmatpush.bf16.msra.mxu3 %v32559_v49  ;;  %v32596_v49 = vld [vmem:[%s41723_s1 + $0x2df8] sm:$0xff] }
 0x59a   :  { %20480 = vmatpush.bf16.msra.mxu0 %v32534_v42  ;;  %v39137_v42 = vpop.f32.mrf.mxu1 }
 0x59b   :  { %20508 = vmatpush.bf16.msra.mxu2 %v32550_v32  ;;  %v32571_v32 = vld [vmem:[%s41723_s1 + $0x2d30] sm:$0xff] }
 0x59c   :  { %20494 = vmatpush.bf16.msra.mxu1 %v32542_v47  ;;  %v19184_v47 = vadd.f32 %v41852_v51, %v19170_v60  ;;  %v32576_v51 = vld [vmem:[%s41723_s1 + $0x2d58] sm:$0xff] }
 0x59d   :  { %20522 = vmatpush.bf16.msra.mxu3 %v32558_v40  ;;  %v32579_v40 = vld [vmem:[%s41723_s1 + $0x2d70] sm:$0xff] }
 0x59e   :  { %20481 = vmatpush.bf16.msra.mxu0 %v32533_v27  ;;  %v32595_v27 = vld [vmem:[%s41723_s1 + $0x2df0] sm:$0xff] }
 0x59f   :  { %20509 = vmatpush.bf16.msra.mxu2 %v32549_v14  ;;  %v41853_v14 = vld [vmem:[#allocation45_spill] sm:$0xff]  ;;  %v20259_v53 = vpop.f32.mrf.mxu0 }
 0x5a0   :  { %20495 = vmatpush.bf16.msra.mxu1 %v32541_v44  ;;  %v41854_v44 = vld [vmem:[#allocation46_spill] sm:$0xff]  ;;  %v20260_v31 = vadd.f32 %v20259_v53, %v39057_v7 }
 0x5a1   :  { %20523 = vmatpush.bf16.msra.mxu3 %v32557_v9  ;;  %20482 = vmatmul.bf16.vlgmr.msra.gmra.mxu0 %v22323_v37  ;;  %v32577_v7 = vld [vmem:[%s41723_s1 + $0x2d60] sm:$0xff] }
 0x5a2   :  { %20530 = vmatpush.bf16.msrb.mxu0 %v32572_v28  ;;  %20510 = vmatmul.bf16.vlgmr.msra.gmra.mxu2 %v22331_v43  ;;  %v19198_v28 = vadd.f32 %v41853_v14, %v19184_v47  ;;  %v20273_v25 = vpop.f32.mrf.mxu1  ;;  %v32593_v43 = vld [vmem:[%s41723_s1 + $0x2de0] sm:$0xff]  ;;  %v32592_v47 = vld [vmem:[%s41723_s1 + $0x2dd8] sm:$0xff] }
 0x5a3   :  { %20558 = vmatpush.bf16.msrb.mxu2 %v32588_v57  ;;  %20496 = vmatmul.bf16.vlgmr.msra.gmra.mxu1 %v22327_v21  ;;  %v39153_v57 = vpop.f32.mrf.mxu2  ;;  %v20274_v37 = vadd.f32 %v20273_v25, %v20260_v31  ;;  %v41858_v53 = vld [vmem:[#allocation50_spill] sm:$0xff]  ;;  %v32582_v31 = vld [vmem:[%s41723_s1 + $0x2d88] sm:$0xff] }
 0x5a4   :  { %20544 = vmatpush.bf16.msrb.mxu1 %v32580_v17  ;;  %20524 = vmatmul.bf16.vlgmr.msra.gmra.mxu3 %v22335_v23  ;;  %v19212_v9 = vadd.f32 %v41854_v44, %v19198_v28  ;;  %v32568_v17 = vld [vmem:[%s41723_s1 + $0x2d18] sm:$0xff]  ;;  %v41856_v23 = vld [vmem:[#allocation48_spill] sm:$0xff]  ;;  %v32574_v25 = vld [vmem:[%s41723_s1 + $0x2d48] sm:$0xff] }
 0x5a5   :  { %20572 = vmatpush.bf16.msrb.mxu3 %v32596_v49  ;;  %v32584_v49 = vld [vmem:[%s41723_s1 + $0x2d98] sm:$0xff] }
 0x5a6   :  { %20531 = vmatpush.bf16.msrb.mxu0 %v32571_v32  ;;  %v19226_v60 = vadd.f32 %v41855_v24, %v19212_v9  ;;  %v32566_v9 = vld [vmem:[%s41723_s1 + $0x2d08] sm:$0xff] }
 0x5a7   :  { %20559 = vmatpush.bf16.msrb.mxu2 %v32587_v55  ;;  %v32590_v24 = vld [vmem:[%s41723_s1 + $0x2dc8] sm:$0xff] }
 0x5a8   :  { %20545 = vmatpush.bf16.msrb.mxu1 %v32579_v40  ;;  %v19240_v32 = vadd.f32 %v41856_v23, %v19226_v60  ;;  %v20301_v40 = vpop.f32.mrf.mxu3  ;;  %v32565_v60 = vld [vmem:[%s41723_s1 + $0x2d00] sm:$0xff]  ;;  %v31087_v23 = vld [vmem:[%s41724_s0 + $0x6d8] sm:$0x70] }
 0x5a9   :  { %20573 = vmatpush.bf16.msrb.mxu3 %v32595_v27  ;;  %v41857_v27 = vld [vmem:[#allocation49_spill] sm:$0xff] }
 0x5aa   :  { %20532 = vmatpush.bf16.msrb.mxu0 %v32570_v50  ;;  %v19254_v14 = vadd.f32 %v41857_v27, %v19240_v32  ;;  %v32567_v50 = vld [vmem:[%s41723_s1 + $0x2d10] sm:$0xff]  ;;  %v22340_v27 = vld [vmem:[%s41724_s0 + $0x6d4] sm:$0x70] }
 0x5ab   :  { %20560 = vmatpush.bf16.msrb.mxu2 %v32586_v15  ;;  %v20287_v21 = vpop.f32.mrf.mxu2  ;;  %v32583_v15 = vld [vmem:[%s41723_s1 + $0x2d90] sm:$0xff] }
 0x5ac   :  { %20546 = vmatpush.bf16.msrb.mxu1 %v32578_v6  ;;  %v20288_v55 = vadd.f32 %v20287_v21, %v20274_v37  ;;  %v32575_v6 = vld [vmem:[%s41723_s1 + $0x2d50] sm:$0xff]  ;;  %v19268_v44 = vadd.f32 %v41858_v53, %v19254_v14  ;;  %v32581_v37 = vld [vmem:[%s41723_s1 + $0x2d80] sm:$0xff]  ;;  %v22346_v21 = vld [vmem:[%s41724_s0 + $0x2d8] sm:$0xf] }
 0x5ad   :  { %20574 = vmatpush.bf16.msrb.mxu3 %v32594_v13  ;;  %v32591_v13 = vld [vmem:[%s41723_s1 + $0x2dd0] sm:$0xff]  ;;  %v30959_v14 = vld [vmem:[%s41724_s0 + $0x2dc] sm:$0xf]  ;;  %v22347_v53 = vor.u32 %v31087_v23, %v22346_v21 }
 0x5ae   :  { %20533 = vmatpush.bf16.msrb.mxu0 %v32569_v38  ;;  %v39198_v28 = vadd.f32 %v20301_v40, %v20288_v55  ;;  %v41859_v38 = vld [vmem:[#allocation51_spill] sm:$0xff]  ;;  %v41860_v32 = vld [vmem:[#allocation52_spill] sm:$0xff] }
 0x5af   :  { %20561 = vmatpush.bf16.msrb.mxu2 %v32585_v34  ;;  %v19282_v34 = vadd.f32 %v41859_v38, %v19268_v44  ;;  %v30958_v40 = vld [vmem:[%s41724_s0 + $0x2d4] sm:$0xf]  ;;  %v39270_v44 = vpop.f32.mrf.mxu0 }
 0x5b0   :  { %20547 = vmatpush.bf16.msrb.mxu1 %v32577_v7  ;;  %v32604_v7 = vld [vmem:[%s41723_s1 + $0x2e38] sm:$0xff]  ;;  %v22343_v38 = vor.u32 %v30958_v40, %v22340_v27  ;;  %v32626_v40 = vld [vmem:[%s41723_s1 + $0x2ee8] sm:$0xff] }
 0x5b1   :  { %20575 = vmatpush.bf16.msrb.mxu3 %v32593_v43  ;;  %v32620_v43 = vld [vmem:[%s41723_s1 + $0x2eb8] sm:$0xff]  ;;  %v19296_v55 = vadd.f32 %v41860_v32, %v19282_v34  ;;  %v32602_v32 = vld [vmem:[%s41723_s1 + $0x2e28] sm:$0xff] }
 0x5b2   :  { %20534 = vmatpush.bf16.msrb.mxu0 %v32568_v17  ;;  %v22338_v17 = vld [vmem:[%s41724_s0 + $0x2d0] sm:$0xf] }
 0x5b3   :  { %20562 = vmatpush.bf16.msrb.mxu2 %v32584_v49  ;;  %v31086_v49 = vld [vmem:[%s41724_s0 + $0x6d0] sm:$0x70]  ;;  %v39294_v23 = vpop.f32.mrf.mxu2 }
 0x5b4   :  { %20548 = vmatpush.bf16.msrb.mxu1 %v32576_v51  ;;  %v32573_v51 = vld [vmem:[%s41723_s1 + $0x2d40] sm:$0xff]  ;;  %41864 = vst [vmem:[#allocation2_spill] sm:$0xff] %v39294_v23 }
 0x5b5   :  { %20576 = vmatpush.bf16.msrb.mxu3 %v32592_v47  ;;  %v32589_v47 = vld [vmem:[%s41723_s1 + $0x2dc0] sm:$0xff] }
 0x5b6   :  { %20535 = vmatpush.bf16.msrb.mxu0 %v32567_v50  ;;  %v22348_v50 = vld [vmem:[%s41724_s0 + $0x6dc] sm:$0x70] }
 0x5b7   :  { %20563 = vmatpush.bf16.msrb.mxu2 %v32583_v15  ;;  %v41861_v15 = vld [vmem:[#allocation53_spill] sm:$0xff]  ;;  %v22351_v34 = vor.u32 %v30959_v14, %v22348_v50  ;;  %v41866_v14 = vld [vmem:[#allocation56_spill] sm:$0xff] }
 0x5b8   :  { %20549 = vmatpush.bf16.msrb.mxu1 %v32575_v6  ;;  %v19310_v6 = vadd.f32 %v41861_v15, %v19296_v55  ;;  %v32618_v55 = vld [vmem:[%s41723_s1 + $0x2ea8] sm:$0xff] }
 0x5b9   :  { %20577 = vmatpush.bf16.msrb.mxu3 %v32591_v13  ;;  %v22339_v13 = vor.u32 %v31086_v49, %v22338_v17  ;;  %v41863_v49 = vld [vmem:[#allocation55_spill] sm:$0xff] }
 0x5ba   :  { %20536 = vmatpush.bf16.msrb.mxu0 %v32566_v9  ;;  %v32612_v9 = vld [vmem:[%s41723_s1 + $0x2e78] sm:$0xff] }
 0x5bb   :  { %20564 = vmatpush.bf16.msrb.mxu2 %v32582_v31  ;;  %v32628_v31 = vld [vmem:[%s41723_s1 + $0x2ef8] sm:$0xff] }
 0x5bc   :  { %20550 = vmatpush.bf16.msrb.mxu1 %v32574_v25  ;;  %v39278_v25 = vpop.f32.mrf.mxu1 }
 0x5bd   :  { %20578 = vmatpush.bf16.msrb.mxu3 %v32590_v24  ;;  %v32603_v24 = vld [vmem:[%s41723_s1 + $0x2e30] sm:$0xff] }
 0x5be   :  { %20537 = vmatpush.bf16.msrb.mxu0 %v32565_v60  ;;  %v32619_v60 = vld [vmem:[%s41723_s1 + $0x2eb0] sm:$0xff]  ;;  %v20315_v27 = vpop.f32.mrf.mxu0 }
 0x5bf   :  { %20565 = vmatpush.bf16.msrb.mxu2 %v32581_v37  ;;  %v41862_v37 = vld [vmem:[#allocation54_spill] sm:$0xff]  ;;  %v20316_v15 = vadd.f32 %v20315_v27, %v39198_v28  ;;  %v32599_v27 = vld [vmem:[%s41723_s1 + $0x2e10] sm:$0xff] }
 0x5c0   :  { %20551 = vmatpush.bf16.msrb.mxu1 %v32573_v51  ;;  %v19324_v17 = vadd.f32 %v41862_v37, %v19310_v6  ;;  %v39302_v51 = vpop.f32.mrf.mxu3  ;;  %v32601_v6 = vld [vmem:[%s41723_s1 + $0x2e20] sm:$0xff] }
 0x5c1   :  { %20579 = vmatpush.bf16.msrb.mxu3 %v32589_v47  ;;  %20538 = vmatmul.bf16.vlgmr.msrb.gmra.mxu0 %v22339_v13  ;;  %41865 = vst [vmem:[#allocation3_spill] sm:$0xff] %v39302_v51  ;;  %v32610_v47 = vld [vmem:[%s41723_s1 + $0x2e68] sm:$0xff]  ;;  %v32617_v13 = vld [vmem:[%s41723_s1 + $0x2ea0] sm:$0xff] }
 0x5c2   :  { %20586 = vmatpush.bf16.msra.mxu0 %v32604_v7  ;;  %20566 = vmatmul.bf16.vlgmr.msrb.gmra.mxu2 %v22347_v53  ;;  %v32611_v7 = vld [vmem:[%s41723_s1 + $0x2e70] sm:$0xff]  ;;  %v19338_v21 = vadd.f32 %v41863_v49, %v19324_v17  ;;  %v32609_v28 = vld [vmem:[%s41723_s1 + $0x2e60] sm:$0xff]  ;;  %v32608_v49 = vld [vmem:[%s41723_s1 + $0x2e58] sm:$0xff] }
 0x5c3   :  { %20614 = vmatpush.bf16.msra.mxu2 %v32620_v43  ;;  %v32627_v43 = vld [vmem:[%s41723_s1 + $0x2ef0] sm:$0xff]  ;;  %20552 = vmatmul.bf16.vlgmr.msrb.gmra.mxu1 %v22343_v38  ;;  %v41868_v17 = vld [vmem:[#allocation58_spill] sm:$0xff] }
 0x5c4   :  { %20600 = vmatpush.bf16.msra.mxu1 %v32612_v9  ;;  %20580 = vmatmul.bf16.vlgmr.msrb.gmra.mxu3 %v22351_v34  ;;  %v19352_v50 = vadd.f32 %v41866_v14, %v19338_v21  ;;  %v20329_v53 = vpop.f32.mrf.mxu1  ;;  %v41867_v9 = vld [vmem:[#allocation57_spill] sm:$0xff]  ;;  %v32625_v34 = vld [vmem:[%s41723_s1 + $0x2ee0] sm:$0xff]  ;;  %v32615_v14 = vld [vmem:[%s41723_s1 + $0x2e90] sm:$0xff] }
 0x5c5   :  { %20628 = vmatpush.bf16.msra.mxu3 %v32628_v31  ;;  %v20330_v38 = vadd.f32 %v20329_v53, %v20316_v15  ;;  %v20343_v37 = vpop.f32.mrf.mxu2  ;;  %v32624_v21 = vld [vmem:[%s41723_s1 + $0x2ed8] sm:$0xff]  ;;  %v32623_v15 = vld [vmem:[%s41723_s1 + $0x2ed0] sm:$0xff]  ;;  %v32598_v53 = vld [vmem:[%s41723_s1 + $0x2e08] sm:$0xff] }
 0x5c6   :  { %20587 = vmatpush.bf16.msra.mxu0 %v32603_v24  ;;  %v19366_v31 = vadd.f32 %v41867_v9, %v19352_v50  ;;  %v32600_v24 = vld [vmem:[%s41723_s1 + $0x2e18] sm:$0xff]  ;;  %v32607_v50 = vld [vmem:[%s41723_s1 + $0x2e50] sm:$0xff]  ;;  %v32614_v9 = vld [vmem:[%s41723_s1 + $0x2e88] sm:$0xff] }
 0x5c7   :  { %20615 = vmatpush.bf16.msra.mxu2 %v32619_v60  ;;  %v32616_v60 = vld [vmem:[%s41723_s1 + $0x2e98] sm:$0xff] }
 0x5c8   :  { %20601 = vmatpush.bf16.msra.mxu1 %v32611_v7  ;;  %v19380_v7 = vadd.f32 %v41868_v17, %v19366_v31  ;;  %v41871_v31 = vld [vmem:[#allocation61_spill] sm:$0xff] }
 0x5c9   :  { %20629 = vmatpush.bf16.msra.mxu3 %v32627_v43  ;;  %v20344_v43 = vadd.f32 %v20343_v37, %v20330_v38  ;;  %v32636_v37 = vld [vmem:[%s41723_s1 + $0x2f38] sm:$0xff] }
 0x5ca   :  { %20588 = vmatpush.bf16.msra.mxu0 %v32602_v32  ;;  %v20357_v32 = vpop.f32.mrf.mxu3  ;;  %v32652_v17 = vld [vmem:[%s41723_s1 + $0x2fb8] sm:$0xff] }
 0x5cb   :  { %20616 = vmatpush.bf16.msra.mxu2 %v32618_v55  ;;  %v41869_v55 = vld [vmem:[#allocation59_spill] sm:$0xff] }
 0x5cc   :  { %20602 = vmatpush.bf16.msra.mxu1 %v32610_v47  ;;  %v19394_v47 = vadd.f32 %v41869_v55, %v19380_v7  ;;  %v22354_v7 = vld [vmem:[%s41724_s0 + $0x2e0] sm:$0xf]  ;;  %v39419_v23 = vpop.f32.mrf.mxu1 }
 0x5cd   :  { %20630 = vmatpush.bf16.msra.mxu3 %v32626_v40  ;;  %v39339_v40 = vadd.f32 %v20357_v32, %v20344_v43  ;;  %v31088_v43 = vld [vmem:[%s41724_s0 + $0x6e0] sm:$0x70]  ;;  %41875 = vst [vmem:[#allocation5_spill] sm:$0xff] %v39419_v23 }
 0x5ce   :  { %20589 = vmatpush.bf16.msra.mxu0 %v32601_v6  ;;  %v41870_v6 = vld [vmem:[#allocation60_spill] sm:$0xff]  ;;  %v41872_v32 = vld [vmem:[#allocation62_spill] sm:$0xff] }
 0x5cf   :  { %20617 = vmatpush.bf16.msra.mxu2 %v32617_v13  ;;  %v19408_v13 = vadd.f32 %v41870_v6, %v19394_v47  ;;  %v32605_v47 = vld [vmem:[%s41723_s1 + $0x2e40] sm:$0xff]  ;;  %v22364_v6 = vld [vmem:[%s41724_s0 + $0x6ec] sm:$0x70] }
 0x5d0   :  { %20603 = vmatpush.bf16.msra.mxu1 %v32609_v28  ;;  %v32606_v28 = vld [vmem:[%s41723_s1 + $0x2e48] sm:$0xff] }
 0x5d1   :  { %20631 = vmatpush.bf16.msra.mxu3 %v32625_v34  ;;  %v19422_v38 = vadd.f32 %v41871_v31, %v19408_v13  ;;  %v32622_v34 = vld [vmem:[%s41723_s1 + $0x2ec8] sm:$0xff] }
 0x5d2   :  { %20590 = vmatpush.bf16.msra.mxu0 %v32600_v24  ;;  %v32597_v24 = vld [vmem:[%s41723_s1 + $0x2e00] sm:$0xff]  ;;  %v41873_v13 = vld [vmem:[#allocation63_spill] sm:$0xff] }
 0x5d3   :  { %20618 = vmatpush.bf16.msra.mxu2 %v32616_v60  ;;  %v32613_v60 = vld [vmem:[%s41723_s1 + $0x2e80] sm:$0xff]  ;;  %v19436_v55 = vadd.f32 %v41872_v32, %v19422_v38  ;;  %v39411_v38 = vpop.f32.mrf.mxu0 }
 0x5d4   :  { %20604 = vmatpush.bf16.msra.mxu1 %v32608_v49  ;;  %v22362_v49 = vld [vmem:[%s41724_s0 + $0x2e8] sm:$0xf]  ;;  %41874 = vst [vmem:[#allocation4_spill] sm:$0xff] %v39411_v38 }
 0x5d5   :  { %20632 = vmatpush.bf16.msra.mxu3 %v32624_v21  ;;  %v31089_v21 = vld [vmem:[%s41724_s0 + $0x6e8] sm:$0x70] }
 0x5d6   :  { %20591 = vmatpush.bf16.msra.mxu0 %v32599_v27  ;;  %v32621_v27 = vld [vmem:[%s41723_s1 + $0x2ec0] sm:$0xff]  ;;  %v22363_v31 = vor.u32 %v31089_v21, %v22362_v49  ;;  %v41877_v49 = vld [vmem:[#allocation65_spill] sm:$0xff] }
 0x5d7   :  { %20619 = vmatpush.bf16.msra.mxu2 %v32615_v14  ;;  %v30960_v14 = vld [vmem:[%s41724_s0 + $0x2e4] sm:$0xf] }
 0x5d8   :  { %20605 = vmatpush.bf16.msra.mxu1 %v32607_v50  ;;  %v22356_v50 = vld [vmem:[%s41724_s0 + $0x6e4] sm:$0x70] }
 0x5d9   :  { %20633 = vmatpush.bf16.msra.mxu3 %v32623_v15  ;;  %v30961_v15 = vld [vmem:[%s41724_s0 + $0x2ec] sm:$0xf]  ;;  %v22359_v32 = vor.u32 %v30960_v14, %v22356_v50  ;;  %v39443_v14 = vpop.f32.mrf.mxu3 }
 0x5da   :  { %20592 = vmatpush.bf16.msra.mxu0 %v32598_v53  ;;  %v19450_v53 = vadd.f32 %v41873_v13, %v19436_v55  ;;  %v22367_v51 = vor.u32 %v30961_v15, %v22364_v6  ;;  %v39435_v55 = vpop.f32.mrf.mxu2  ;;  %41879 = vst [vmem:[#allocation7_spill] sm:$0xff] %v39443_v14  ;;  %v32658_v50 = vld [vmem:[%s41723_s1 + $0x2fe8] sm:$0xff]  ;;  %v41880_v6 = vld [vmem:[#allocation66_spill] sm:$0xff] }
 0x5db   :  { %20620 = vmatpush.bf16.msra.mxu2 %v32614_v9  ;;  %v22355_v9 = vor.u32 %v31088_v43, %v22354_v7  ;;  %v41876_v7 = vld [vmem:[#allocation64_spill] sm:$0xff]  ;;  %41878 = vst [vmem:[#allocation6_spill] sm:$0xff] %v39435_v55 }
 0x5dc   :  { %20606 = vmatpush.bf16.msra.mxu1 %v32606_v28  ;;  %v32644_v28 = vld [vmem:[%s41723_s1 + $0x2f78] sm:$0xff]  ;;  %v19464_v43 = vadd.f32 %v41876_v7, %v19450_v53 }
 0x5dd   :  { %20634 = vmatpush.bf16.msra.mxu3 %v32622_v34  ;;  %v32660_v34 = vld [vmem:[%s41723_s1 + $0x2ff8] sm:$0xff] }
 0x5de   :  { %20593 = vmatpush.bf16.msra.mxu0 %v32597_v24  ;;  %v32635_v24 = vld [vmem:[%s41723_s1 + $0x2f30] sm:$0xff]  ;;  %v19478_v21 = vadd.f32 %v41877_v49, %v19464_v43  ;;  %v20371_v15 = vpop.f32.mrf.mxu0  ;;  %v32632_v7 = vld [vmem:[%s41723_s1 + $0x2f18] sm:$0xff] }
 0x5df   :  { %20621 = vmatpush.bf16.msra.mxu2 %v32613_v60  ;;  %v32651_v60 = vld [vmem:[%s41723_s1 + $0x2fb0] sm:$0xff]  ;;  %v20372_v53 = vadd.f32 %v20371_v15, %v39339_v40  ;;  %v32641_v40 = vld [vmem:[%s41723_s1 + $0x2f60] sm:$0xff]  ;;  %v32648_v43 = vld [vmem:[%s41723_s1 + $0x2f98] sm:$0xff] }
 0x5e0   :  { %20607 = vmatpush.bf16.msra.mxu1 %v32605_v47  ;;  %v32634_v47 = vld [vmem:[%s41723_s1 + $0x2f28] sm:$0xff]  ;;  %v19492_v13 = vadd.f32 %v41880_v6, %v19478_v21 }
 0x5e1   :  { %20635 = vmatpush.bf16.msra.mxu3 %v32621_v27  ;;  %20594 = vmatmul.bf16.vlgmr.msra.gmra.mxu0 %v22355_v9  ;;  %v32650_v27 = vld [vmem:[%s41723_s1 + $0x2fa8] sm:$0xff]  ;;  %v32633_v9 = vld [vmem:[%s41723_s1 + $0x2f20] sm:$0xff] }
 0x5e2   :  { %20642 = vmatpush.bf16.msrb.mxu0 %v32636_v37  ;;  %20622 = vmatmul.bf16.vlgmr.msra.gmra.mxu2 %v22363_v31  ;;  %v32643_v37 = vld [vmem:[%s41723_s1 + $0x2f70] sm:$0xff]  ;;  %v32649_v31 = vld [vmem:[%s41723_s1 + $0x2fa0] sm:$0xff] }
 0x5e3   :  { %20670 = vmatpush.bf16.msrb.mxu2 %v32652_v17  ;;  %v32659_v17 = vld [vmem:[%s41723_s1 + $0x2ff0] sm:$0xff]  ;;  %20608 = vmatmul.bf16.vlgmr.msra.gmra.mxu1 %v22359_v32 }
 0x5e4   :  { %20656 = vmatpush.bf16.msrb.mxu1 %v32644_v28  ;;  %20636 = vmatmul.bf16.vlgmr.msra.gmra.mxu3 %v22367_v51  ;;  %v32642_v51 = vld [vmem:[%s41723_s1 + $0x2f68] sm:$0xff]  ;;  %v20385_v28 = vpop.f32.mrf.mxu1 }
 0x5e5   :  { %20684 = vmatpush.bf16.msrb.mxu3 %v32660_v34  ;;  %v41881_v34 = vld [vmem:[#allocation67_spill] sm:$0xff] }
 0x5e6   :  { %20643 = vmatpush.bf16.msrb.mxu0 %v32635_v24  ;;  %v19506_v32 = vadd.f32 %v41881_v34, %v19492_v13  ;;  %v20386_v24 = vadd.f32 %v20385_v28, %v20372_v53  ;;  %v32631_v13 = vld [vmem:[%s41723_s1 + $0x2f10] sm:$0xff]  ;;  %v41884_v28 = vld [vmem:[#allocation70_spill] sm:$0xff]  ;;  %v39552_v14 = vpop.f32.mrf.mxu0 }
 0x5e7   :  { %20671 = vmatpush.bf16.msrb.mxu2 %v32651_v60  ;;  %v32657_v60 = vld [vmem:[%s41723_s1 + $0x2fe0] sm:$0xff]  ;;  %v32647_v53 = vld [vmem:[%s41723_s1 + $0x2f90] sm:$0xff]  ;;  %41888 = vst [vmem:[#allocation8_spill] sm:$0xff] %v39552_v14 }
 0x5e8   :  { %20657 = vmatpush.bf16.msrb.mxu1 %v32643_v37  ;;  %v20399_v37 = vpop.f32.mrf.mxu2 }
 0x5e9   :  { %20685 = vmatpush.bf16.msrb.mxu3 %v32659_v17  ;;  %v41882_v17 = vld [vmem:[#allocation68_spill] sm:$0xff]  ;;  %v20400_v21 = vadd.f32 %v20399_v37, %v20386_v24  ;;  %v32646_v24 = vld [vmem:[%s41723_s1 + $0x2f88] sm:$0xff]  ;;  %v32629_v37 = vld [vmem:[%s41723_s1 + $0x2f00] sm:$0xff] }
 0x5ea   :  { %20644 = vmatpush.bf16.msrb.mxu0 %v32634_v47  ;;  %v19520_v49 = vadd.f32 %v41882_v17, %v19506_v32  ;;  %v32640_v47 = vld [vmem:[%s41723_s1 + $0x2f58] sm:$0xff]  ;;  %v32630_v32 = vld [vmem:[%s41723_s1 + $0x2f08] sm:$0xff]  ;;  %v32645_v17 = vld [vmem:[%s41723_s1 + $0x2f80] sm:$0xff] }
 0x5eb   :  { %20672 = vmatpush.bf16.msrb.mxu2 %v32650_v27  ;;  %v32656_v27 = vld [vmem:[%s41723_s1 + $0x2fd8] sm:$0xff] }
 0x5ec   :  { %20658 = vmatpush.bf16.msrb.mxu1 %v32642_v51  ;;  %v20413_v51 = vpop.f32.mrf.mxu3  ;;  %v39560_v38 = vpop.f32.mrf.mxu1 }
 0x5ed   :  { %20686 = vmatpush.bf16.msrb.mxu3 %v32658_v50  ;;  %v41883_v50 = vld [vmem:[#allocation69_spill] sm:$0xff]  ;;  %v39480_v6 = vadd.f32 %v20413_v51, %v20400_v21  ;;  %41889 = vst [vmem:[#allocation9_spill] sm:$0xff] %v39560_v38 }
 0x5ee   :  { %20645 = vmatpush.bf16.msrb.mxu0 %v32633_v9  ;;  %v19534_v15 = vadd.f32 %v41883_v50, %v19520_v49  ;;  %v32639_v9 = vld [vmem:[%s41723_s1 + $0x2f50] sm:$0xff]  ;;  %v32668_v49 = vld [vmem:[%s41723_s1 + $0x3038] sm:$0xff] }
 0x5ef   :  { %20673 = vmatpush.bf16.msrb.mxu2 %v32649_v31  ;;  %v32655_v31 = vld [vmem:[%s41723_s1 + $0x2fd0] sm:$0xff]  ;;  %v32684_v21 = vld [vmem:[%s41723_s1 + $0x30b8] sm:$0xff] }
 0x5f0   :  { %20659 = vmatpush.bf16.msrb.mxu1 %v32641_v40  ;;  %v19548_v34 = vadd.f32 %v41884_v28, %v19534_v15  ;;  %v41885_v40 = vld [vmem:[#allocation71_spill] sm:$0xff]  ;;  %v22378_v51 = vld [vmem:[%s41724_s0 + $0x2f8] sm:$0xf]  ;;  %v31091_v50 = vld [vmem:[%s41724_s0 + $0x6f8] sm:$0x70] }
 0x5f1   :  { %20687 = vmatpush.bf16.msrb.mxu3 %v32657_v60  ;;  %v41886_v15 = vld [vmem:[#allocation72_spill] sm:$0xff]  ;;  %v22372_v28 = vld [vmem:[%s41724_s0 + $0x6f4] sm:$0x70] }
 0x5f2   :  { %20646 = vmatpush.bf16.msrb.mxu0 %v32632_v7  ;;  %v19562_v60 = vadd.f32 %v41885_v40, %v19548_v34  ;;  %v32638_v7 = vld [vmem:[%s41723_s1 + $0x2f48] sm:$0xff]  ;;  %v30963_v34 = vld [vmem:[%s41724_s0 + $0x2fc] sm:$0xf] }
 0x5f3   :  { %20674 = vmatpush.bf16.msrb.mxu2 %v32648_v43  ;;  %v32654_v43 = vld [vmem:[%s41723_s1 + $0x2fc8] sm:$0xff] }
 0x5f4   :  { %20660 = vmatpush.bf16.msrb.mxu1 %v32640_v47  ;;  %v22370_v47 = vld [vmem:[%s41724_s0 + $0x2f0] sm:$0xf] }
 0x5f5   :  { %20688 = vmatpush.bf16.msrb.mxu3 %v32656_v27  ;;  %v31090_v27 = vld [vmem:[%s41724_s0 + $0x6f0] sm:$0x70] }
 0x5f6   :  { %20647 = vmatpush.bf16.msrb.mxu0 %v32631_v13  ;;  %v19576_v13 = vadd.f32 %v41886_v15, %v19562_v60  ;;  %v22371_v60 = vor.u32 %v31090_v27, %v22370_v47  ;;  %v22379_v15 = vor.u32 %v31091_v50, %v22378_v51  ;;  %v41890_v47 = vld [vmem:[#allocation74_spill] sm:$0xff]  ;;  %v41891_v51 = vld [vmem:[#allocation75_spill] sm:$0xff] }
 0x5f7   :  { %20675 = vmatpush.bf16.msrb.mxu2 %v32647_v53  ;;  %v32637_v53 = vld [vmem:[%s41723_s1 + $0x2f40] sm:$0xff] }
 0x5f8   :  { %20661 = vmatpush.bf16.msrb.mxu1 %v32639_v9  ;;  %v32653_v9 = vld [vmem:[%s41723_s1 + $0x2fc0] sm:$0xff] }
 0x5f9   :  { %20689 = vmatpush.bf16.msrb.mxu3 %v32655_v31  ;;  %v30962_v31 = vld [vmem:[%s41724_s0 + $0x2f4] sm:$0xf] }
 0x5fa   :  { %20648 = vmatpush.bf16.msrb.mxu0 %v32630_v32  ;;  %v22380_v32 = vld [vmem:[%s41724_s0 + $0x6fc] sm:$0x70]  ;;  %v22375_v55 = vor.u32 %v30962_v31, %v22372_v28  ;;  %v39584_v31 = vpop.f32.mrf.mxu3 }
 0x5fb   :  { %20676 = vmatpush.bf16.msrb.mxu2 %v32646_v24  ;;  %v41887_v24 = vld [vmem:[#allocation73_spill] sm:$0xff]  ;;  %v22383_v23 = vor.u32 %v30963_v34, %v22380_v32  ;;  %41893 = vst [vmem:[#allocation11_spill] sm:$0xff] %v39584_v31  ;;  %v41894_v34 = vld [vmem:[#allocation76_spill] sm:$0xff] }
 0x5fc   :  { %20662 = vmatpush.bf16.msrb.mxu1 %v32638_v7  ;;  %v19590_v40 = vadd.f32 %v41887_v24, %v19576_v13  ;;  %v32676_v7 = vld [vmem:[%s41723_s1 + $0x3078] sm:$0xff]  ;;  %v39576_v13 = vpop.f32.mrf.mxu2 }
 0x5fd   :  { %20690 = vmatpush.bf16.msrb.mxu3 %v32654_v43  ;;  %v32692_v43 = vld [vmem:[%s41723_s1 + $0x30f8] sm:$0xff]  ;;  %41892 = vst [vmem:[#allocation10_spill] sm:$0xff] %v39576_v13 }
 0x5fe   :  { %20649 = vmatpush.bf16.msrb.mxu0 %v32629_v37  ;;  %v32667_v37 = vld [vmem:[%s41723_s1 + $0x3030] sm:$0xff]  ;;  %v19604_v27 = vadd.f32 %v41890_v47, %v19590_v40  ;;  %v20427_v28 = vpop.f32.mrf.mxu0  ;;  %v32665_v40 = vld [vmem:[%s41723_s1 + $0x3020] sm:$0xff]  ;;  %v32664_v47 = vld [vmem:[%s41723_s1 + $0x3018] sm:$0xff] }
 0x5ff   :  { %20677 = vmatpush.bf16.msrb.mxu2 %v32645_v17  ;;  %v32683_v17 = vld [vmem:[%s41723_s1 + $0x30b0] sm:$0xff]  ;;  %v20428_v24 = vadd.f32 %v20427_v28, %v39480_v6  ;;  %v32673_v6 = vld [vmem:[%s41723_s1 + $0x3060] sm:$0xff] }
 0x600   :  { %20663 = vmatpush.bf16.msrb.mxu1 %v32637_v53  ;;  %v19618_v50 = vadd.f32 %v41891_v51, %v19604_v27  ;;  %v32666_v53 = vld [vmem:[%s41723_s1 + $0x3028] sm:$0xff]  ;;  %v32680_v27 = vld [vmem:[%s41723_s1 + $0x3098] sm:$0xff] }
 0x601   :  { %20691 = vmatpush.bf16.msrb.mxu3 %v32653_v9  ;;  %20650 = vmatmul.bf16.vlgmr.msrb.gmra.mxu0 %v22371_v60  ;;  %v32682_v9 = vld [vmem:[%s41723_s1 + $0x30a8] sm:$0xff]  ;;  %v32681_v60 = vld [vmem:[%s41723_s1 + $0x30a0] sm:$0xff] }
 0x602   :  { %20698 = vmatpush.bf16.msra.mxu0 %v32668_v49  ;;  %20678 = vmatmul.bf16.vlgmr.msrb.gmra.mxu2 %v22379_v15  ;;  %v32675_v49 = vld [vmem:[%s41723_s1 + $0x3070] sm:$0xff]  ;;  %v19632_v32 = vadd.f32 %v41894_v34, %v19618_v50  ;;  %v20441_v15 = vpop.f32.mrf.mxu1 }
 0x603   :  { %20726 = vmatpush.bf16.msra.mxu2 %v32684_v21  ;;  %v32691_v21 = vld [vmem:[%s41723_s1 + $0x30f0] sm:$0xff]  ;;  %20664 = vmatmul.bf16.vlgmr.msrb.gmra.mxu1 %v22375_v55  ;;  %v32690_v55 = vld [vmem:[%s41723_s1 + $0x30e8] sm:$0xff] }
 0x604   :  { %20712 = vmatpush.bf16.msra.mxu1 %v32676_v7  ;;  %20692 = vmatmul.bf16.vlgmr.msrb.gmra.mxu3 %v22383_v23  ;;  %v32674_v23 = vld [vmem:[%s41723_s1 + $0x3068] sm:$0xff]  ;;  %v41895_v7 = vld [vmem:[#allocation77_spill] sm:$0xff] }
 0x605   :  { %20740 = vmatpush.bf16.msra.mxu3 %v32692_v43  ;;  %v19646_v43 = vadd.f32 %v41895_v7, %v19632_v32  ;;  %v32663_v32 = vld [vmem:[%s41723_s1 + $0x3010] sm:$0xff] }
 0x606   :  { %20699 = vmatpush.bf16.msra.mxu0 %v32667_v37  ;;  %v20442_v37 = vadd.f32 %v20441_v15, %v20428_v24  ;;  %v32679_v24 = vld [vmem:[%s41723_s1 + $0x3090] sm:$0xff]  ;;  %v39693_v31 = vpop.f32.mrf.mxu0 }
 0x607   :  { %20727 = vmatpush.bf16.msra.mxu2 %v32683_v17  ;;  %v32689_v17 = vld [vmem:[%s41723_s1 + $0x30e0] sm:$0xff]  ;;  %v41898_v15 = vld [vmem:[#allocation80_spill] sm:$0xff] }
 0x608   :  { %20713 = vmatpush.bf16.msra.mxu1 %v32675_v49  ;;  %v20455_v49 = vpop.f32.mrf.mxu2 }
 0x609   :  { %20741 = vmatpush.bf16.msra.mxu3 %v32691_v21  ;;  %v41896_v21 = vld [vmem:[#allocation78_spill] sm:$0xff]  ;;  %v20456_v50 = vadd.f32 %v20455_v49, %v20442_v37  ;;  %v32678_v37 = vld [vmem:[%s41723_s1 + $0x3088] sm:$0xff] }
 0x60a   :  { %20700 = vmatpush.bf16.msra.mxu0 %v32666_v53  ;;  %v19660_v51 = vadd.f32 %v41896_v21, %v19646_v43  ;;  %v32672_v53 = vld [vmem:[%s41723_s1 + $0x3058] sm:$0xff]  ;;  %v32662_v43 = vld [vmem:[%s41723_s1 + $0x3008] sm:$0xff]  ;;  %v32661_v49 = vld [vmem:[%s41723_s1 + $0x3000] sm:$0xff]  ;;  %v39701_v14 = vpop.f32.mrf.mxu1 }
 0x60b   :  { %20728 = vmatpush.bf16.msra.mxu2 %v32682_v9  ;;  %v32688_v9 = vld [vmem:[%s41723_s1 + $0x30d8] sm:$0xff]  ;;  %v32677_v21 = vld [vmem:[%s41723_s1 + $0x3080] sm:$0xff] }
 0x60c   :  { %20714 = vmatpush.bf16.msra.mxu1 %v32674_v23  ;;  %v20469_v23 = vpop.f32.mrf.mxu3 }
 0x60d   :  { %20742 = vmatpush.bf16.msra.mxu3 %v32690_v55  ;;  %v41897_v55 = vld [vmem:[#allocation79_spill] sm:$0xff]  ;;  %v39621_v34 = vadd.f32 %v20469_v23, %v20456_v50  ;;  %v32716_v50 = vld [vmem:[%s41723_s1 + $0x31b8] sm:$0xff] }
 0x60e   :  { %20701 = vmatpush.bf16.msra.mxu0 %v32665_v40  ;;  %v19674_v28 = vadd.f32 %v41897_v55, %v19660_v51  ;;  %v32671_v40 = vld [vmem:[%s41723_s1 + $0x3050] sm:$0xff]  ;;  %v32700_v51 = vld [vmem:[%s41723_s1 + $0x3138] sm:$0xff]  ;;  %v22394_v23 = vld [vmem:[%s41724_s0 + $0x308] sm:$0xf] }
 0x60f   :  { %20729 = vmatpush.bf16.msra.mxu2 %v32681_v60  ;;  %v32687_v60 = vld [vmem:[%s41723_s1 + $0x30d0] sm:$0xff]  ;;  %v31093_v55 = vld [vmem:[%s41724_s0 + $0x708] sm:$0x70] }
 0x610   :  { %20715 = vmatpush.bf16.msra.mxu1 %v32673_v6  ;;  %v19688_v7 = vadd.f32 %v41898_v15, %v19674_v28  ;;  %v41899_v6 = vld [vmem:[#allocation81_spill] sm:$0xff]  ;;  %v41900_v28 = vld [vmem:[#allocation82_spill] sm:$0xff]  ;;  %v22388_v15 = vld [vmem:[%s41724_s0 + $0x704] sm:$0x70] }
 0x611   :  { %20743 = vmatpush.bf16.msra.mxu3 %v32689_v17 }
 0x612   :  { %20702 = vmatpush.bf16.msra.mxu0 %v32664_v47  ;;  %v19702_v17 = vadd.f32 %v41899_v6, %v19688_v7  ;;  %v32670_v47 = vld [vmem:[%s41723_s1 + $0x3048] sm:$0xff] }
 0x613   :  { %20730 = vmatpush.bf16.msra.mxu2 %v32680_v27  ;;  %v32686_v27 = vld [vmem:[%s41723_s1 + $0x30c8] sm:$0xff] }
 0x614   :  { %20716 = vmatpush.bf16.msra.mxu1 %v32672_v53  ;;  %v22386_v53 = vld [vmem:[%s41724_s0 + $0x300] sm:$0xf]  ;;  %v30965_v7 = vld [vmem:[%s41724_s0 + $0x30c] sm:$0xf] }
 0x615   :  { %20744 = vmatpush.bf16.msra.mxu3 %v32688_v9  ;;  %v31092_v9 = vld [vmem:[%s41724_s0 + $0x700] sm:$0x70] }
 0x616   :  { %20703 = vmatpush.bf16.msra.mxu0 %v32663_v32  ;;  %v19716_v32 = vadd.f32 %v41900_v28, %v19702_v17  ;;  %v22387_v17 = vor.u32 %v31092_v9, %v22386_v53  ;;  %v22395_v28 = vor.u32 %v31093_v55, %v22394_v23  ;;  %v41902_v53 = vld [vmem:[#allocation84_spill] sm:$0xff]  ;;  %v39717_v55 = vpop.f32.mrf.mxu2 }
 0x617   :  { %20731 = vmatpush.bf16.msra.mxu2 %v32679_v24  ;;  %v32669_v24 = vld [vmem:[%s41723_s1 + $0x3040] sm:$0xff] }
 0x618   :  { %20717 = vmatpush.bf16.msra.mxu1 %v32671_v40  ;;  %v32685_v40 = vld [vmem:[%s41723_s1 + $0x30c0] sm:$0xff] }
 0x619   :  { %20745 = vmatpush.bf16.msra.mxu3 %v32687_v60  ;;  %v30964_v60 = vld [vmem:[%s41724_s0 + $0x304] sm:$0xf] }
 0x61a   :  { %20704 = vmatpush.bf16.msra.mxu0 %v32662_v43  ;;  %v22396_v43 = vld [vmem:[%s41724_s0 + $0x70c] sm:$0x70]  ;;  %v22391_v13 = vor.u32 %v30964_v60, %v22388_v15 }
 0x61b   :  { %20732 = vmatpush.bf16.msra.mxu2 %v32678_v37  ;;  %v41901_v37 = vld [vmem:[#allocation83_spill] sm:$0xff]  ;;  %v22399_v38 = vor.u32 %v30965_v7, %v22396_v43  ;;  %v32697_v7 = vld [vmem:[%s41723_s1 + $0x3120] sm:$0xff] }
 0x61c   :  { %20718 = vmatpush.bf16.msra.mxu1 %v32670_v47  ;;  %v19730_v6 = vadd.f32 %v41901_v37, %v19716_v32  ;;  %v32708_v47 = vld [vmem:[%s41723_s1 + $0x3178] sm:$0xff]  ;;  %v32698_v32 = vld [vmem:[%s41723_s1 + $0x3128] sm:$0xff]  ;;  %v32713_v43 = vld [vmem:[%s41723_s1 + $0x31a0] sm:$0xff] }
 0x61d   :  { %20746 = vmatpush.bf16.msra.mxu3 %v32686_v27  ;;  %v32724_v27 = vld [vmem:[%s41723_s1 + $0x31f8] sm:$0xff] }
 0x61e   :  { %20705 = vmatpush.bf16.msra.mxu0 %v32661_v49  ;;  %v32699_v49 = vld [vmem:[%s41723_s1 + $0x3130] sm:$0xff]  ;;  %v19744_v9 = vadd.f32 %v41902_v53, %v19730_v6  ;;  %v32720_v53 = vld [vmem:[%s41723_s1 + $0x31d8] sm:$0xff] }
 0x61f   :  { %20733 = vmatpush.bf16.msra.mxu2 %v32677_v21  ;;  %v32715_v21 = vld [vmem:[%s41723_s1 + $0x31b0] sm:$0xff] }
 0x620   :  { %20719 = vmatpush.bf16.msra.mxu1 %v32669_v24  ;;  %v19758_v23 = vadd.f32 %v38001_v46, %v19744_v9  ;;  %v32714_v24 = vld [vmem:[%s41723_s1 + $0x31a8] sm:$0xff]  ;;  %v20497_v37 = vpop.f32.mrf.mxu1 }
 0x621   :  { %20747 = vmatpush.bf16.msra.mxu3 %v32685_v40  ;;  %20706 = vmatmul.bf16.vlgmr.msra.gmra.mxu0 %v22387_v17  ;;  %v39725_v40 = vpop.f32.mrf.mxu3  ;;  %v32706_v46 = vld [vmem:[%s41723_s1 + $0x3168] sm:$0xff] }
 0x622   :  { %20754 = vmatpush.bf16.msrb.mxu0 %v32700_v51  ;;  %20734 = vmatmul.bf16.vlgmr.msra.gmra.mxu2 %v22395_v28  ;;  %v32707_v51 = vld [vmem:[%s41723_s1 + $0x3170] sm:$0xff]  ;;  %v19772_v60 = vadd.f32 %v38009_v54, %v19758_v23  ;;  %v32705_v54 = vld [vmem:[%s41723_s1 + $0x3160] sm:$0xff]  ;;  %v32696_v28 = vld [vmem:[%s41723_s1 + $0x3118] sm:$0xff] }
 0x623   :  { %20782 = vmatpush.bf16.msrb.mxu2 %v32716_v50  ;;  %v32723_v50 = vld [vmem:[%s41723_s1 + $0x31f0] sm:$0xff]  ;;  %20720 = vmatmul.bf16.vlgmr.msra.gmra.mxu1 %v22391_v13  ;;  %v20483_v13 = vpop.f32.mrf.mxu0 }
 0x624   :  { %20768 = vmatpush.bf16.msrb.mxu1 %v32708_v47  ;;  %20748 = vmatmul.bf16.vlgmr.msra.gmra.mxu3 %v22399_v38  ;;  %v32722_v38 = vld [vmem:[%s41723_s1 + $0x31e8] sm:$0xff]  ;;  %v20484_v15 = vadd.f32 %v20483_v13, %v39621_v34  ;;  %v19786_v6 = vadd.f32 %v38025_v61, %v19772_v60  ;;  %v32721_v34 = vld [vmem:[%s41723_s1 + $0x31e0] sm:$0xff]  ;;  %v32712_v61 = vld [vmem:[%s41723_s1 + $0x3198] sm:$0xff] }
 0x625   :  { %20796 = vmatpush.bf16.msrb.mxu3 %v32724_v27  ;;  %v20511_v47 = vpop.f32.mrf.mxu2  ;;  %v32711_v23 = vld [vmem:[%s41723_s1 + $0x3190] sm:$0xff]  ;;  %v32702_v60 = vld [vmem:[%s41723_s1 + $0x3148] sm:$0xff] }
 0x626   :  { %20755 = vmatpush.bf16.msrb.mxu0 %v32699_v49  ;;  %v20498_v17 = vadd.f32 %v20497_v37, %v20484_v15  ;;  %v19800_v27 = vadd.f32 %v38033_v20, %v19786_v6  ;;  %v32695_v20 = vld [vmem:[%s41723_s1 + $0x3110] sm:$0xff]  ;;  %v32693_v15 = vld [vmem:[%s41723_s1 + $0x3100] sm:$0xff] }
 0x627   :  { %20783 = vmatpush.bf16.msrb.mxu2 %v32715_v21  ;;  %v32704_v21 = vld [vmem:[%s41723_s1 + $0x3158] sm:$0xff]  ;;  %v22402_v37 = vld [vmem:[%s41724_s0 + $0x310] sm:$0xf]  ;;  %v31094_v6 = vld [vmem:[%s41724_s0 + $0x710] sm:$0x70] }
 0x628   :  { %20769 = vmatpush.bf16.msrb.mxu1 %v32707_v51  ;;  %v20512_v49 = vadd.f32 %v20511_v47, %v20498_v17  ;;  %v19814_v51 = vadd.f32 %v38142_v33, %v19800_v27  ;;  %v32719_v33 = vld [vmem:[%s41723_s1 + $0x31d0] sm:$0xff]  ;;  %v22410_v17 = vld [vmem:[%s41724_s0 + $0x318] sm:$0xf] }
 0x629   :  { %20797 = vmatpush.bf16.msrb.mxu3 %v32723_v50  ;;  %v20525_v9 = vpop.f32.mrf.mxu3  ;;  %v30966_v47 = vld [vmem:[%s41724_s0 + $0x314] sm:$0xf]  ;;  %v22404_v27 = vld [vmem:[%s41724_s0 + $0x714] sm:$0x70] }
 0x62a   :  { %20756 = vmatpush.bf16.msrb.mxu0 %v32698_v32  ;;  %v39762_v50 = vadd.f32 %v20525_v9, %v20512_v49  ;;  %v32703_v32 = vld [vmem:[%s41723_s1 + $0x3150] sm:$0xff]  ;;  %v22412_v49 = vld [vmem:[%s41724_s0 + $0x71c] sm:$0x70] }
 0x62b   :  { %20784 = vmatpush.bf16.msrb.mxu2 %v32714_v24  ;;  %v19828_v24 = vadd.f32 %v38150_v5, %v19814_v51  ;;  %v32718_v5 = vld [vmem:[%s41723_s1 + $0x31c8] sm:$0xff]  ;;  %v39834_v51 = vpop.f32.mrf.mxu0 }
 0x62c   :  { %20770 = vmatpush.bf16.msrb.mxu1 %v32706_v46  ;;  %v32694_v46 = vld [vmem:[%s41723_s1 + $0x3108] sm:$0xff] }
 0x62d   :  { %20798 = vmatpush.bf16.msrb.mxu3 %v32722_v38  ;;  %v32710_v38 = vld [vmem:[%s41723_s1 + $0x3188] sm:$0xff]  ;;  %v19842_v13 = vadd.f32 %v38166_v11, %v19828_v24  ;;  %v32732_v11 = vld [vmem:[%s41723_s1 + $0x3238] sm:$0xff]  ;;  %v39842_v24 = vpop.f32.mrf.mxu1 }
 0x62e   :  { %20757 = vmatpush.bf16.msrb.mxu0 %v32697_v7  ;;  %v32709_v7 = vld [vmem:[%s41723_s1 + $0x3180] sm:$0xff] }
 0x62f   :  { %20785 = vmatpush.bf16.msrb.mxu2 %v32713_v43  ;;  %v32748_v43 = vld [vmem:[%s41723_s1 + $0x32b8] sm:$0xff] }
 0x630   :  { %20771 = vmatpush.bf16.msrb.mxu1 %v32705_v54  ;;  %v31095_v54 = vld [vmem:[%s41724_s0 + $0x718] sm:$0x70] }
 0x631   :  { %20799 = vmatpush.bf16.msrb.mxu3 %v32721_v34  ;;  %v19856_v34 = vadd.f32 %v38174_v26, %v19842_v13  ;;  %v30967_v26 = vld [vmem:[%s41724_s0 + $0x31c] sm:$0xf]  ;;  %v22411_v9 = vor.u32 %v31095_v54, %v22410_v17  ;;  %v32739_v13 = vld [vmem:[%s41723_s1 + $0x3270] sm:$0xff]  ;;  %v32729_v54 = vld [vmem:[%s41723_s1 + $0x3220] sm:$0xff] }
 0x632   :  { %20758 = vmatpush.bf16.msrb.mxu0 %v32696_v28  ;;  %v32701_v28 = vld [vmem:[%s41723_s1 + $0x3140] sm:$0xff] }
 0x633   :  { %20786 = vmatpush.bf16.msrb.mxu2 %v32712_v61  ;;  %v32717_v61 = vld [vmem:[%s41723_s1 + $0x31c0] sm:$0xff] }
 0x634   :  { %20772 = vmatpush.bf16.msrb.mxu1 %v32704_v21  ;;  %v19870_v21 = vadd.f32 %v38283_v16, %v19856_v34  ;;  %v32731_v16 = vld [vmem:[%s41723_s1 + $0x3230] sm:$0xff]  ;;  %v32745_v34 = vld [vmem:[%s41723_s1 + $0x32a0] sm:$0xff] }
 0x635   :  { %20800 = vmatpush.bf16.msrb.mxu3 %v32720_v53  ;;  %v22403_v53 = vor.u32 %v31094_v6, %v22402_v37 }
 0x636   :  { %20759 = vmatpush.bf16.msrb.mxu0 %v32695_v20  ;;  %v32740_v20 = vld [vmem:[%s41723_s1 + $0x3278] sm:$0xff] }
 0x637   :  { %20787 = vmatpush.bf16.msrb.mxu2 %v32711_v23  ;;  %v32756_v23 = vld [vmem:[%s41723_s1 + $0x32f8] sm:$0xff] }
 0x638   :  { %20773 = vmatpush.bf16.msrb.mxu1 %v32703_v32  ;;  %v22407_v32 = vor.u32 %v30966_v47, %v22404_v27  ;;  %v32728_v27 = vld [vmem:[%s41723_s1 + $0x3218] sm:$0xff] }
 0x639   :  { %20801 = vmatpush.bf16.msrb.mxu3 %v32719_v33  ;;  %v22415_v33 = vor.u32 %v30967_v26, %v22412_v49 }
 0x63a   :  { %20760 = vmatpush.bf16.msrb.mxu0 %v32694_v46  ;;  %v32747_v46 = vld [vmem:[%s41723_s1 + $0x32b0] sm:$0xff] }
 0x63b   :  { %20788 = vmatpush.bf16.msrb.mxu2 %v32710_v38  ;;  %v19884_v38 = vadd.f32 %v38291_v12, %v19870_v21  ;;  %v32730_v12 = vld [vmem:[%s41723_s1 + $0x3228] sm:$0xff] }
 0x63c   :  { %20774 = vmatpush.bf16.msrb.mxu1 %v32702_v60  ;;  %v32755_v60 = vld [vmem:[%s41723_s1 + $0x32f0] sm:$0xff] }
 0x63d   :  { %20802 = vmatpush.bf16.msrb.mxu3 %v32718_v5  ;;  %v19898_v5 = vadd.f32 %v38307_v35, %v19884_v38  ;;  %v32738_v35 = vld [vmem:[%s41723_s1 + $0x3268] sm:$0xff] }
 0x63e   :  { %20761 = vmatpush.bf16.msrb.mxu0 %v32693_v15  ;;  %v39858_v15 = vpop.f32.mrf.mxu2  ;;  %v20539_v37 = vpop.f32.mrf.mxu0  ;;  %v32726_v38 = vld [vmem:[%s41723_s1 + $0x3208] sm:$0xff] }
 0x63f   :  { %20789 = vmatpush.bf16.msrb.mxu2 %v32709_v7  ;;  %v32746_v7 = vld [vmem:[%s41723_s1 + $0x32a8] sm:$0xff]  ;;  %v19912_v6 = vadd.f32 %v38315_v30, %v19898_v5  ;;  %v20540_v17 = vadd.f32 %v20539_v37, %v39762_v50  ;;  %v32737_v30 = vld [vmem:[%s41723_s1 + $0x3260] sm:$0xff] }
 0x640   :  { %20775 = vmatpush.bf16.msrb.mxu1 %v32701_v28  ;;  %v20553_v28 = vpop.f32.mrf.mxu1  ;;  %v32753_v50 = vld [vmem:[%s41723_s1 + $0x32e0] sm:$0xff]  ;;  %v32734_v5 = vld [vmem:[%s41723_s1 + $0x3248] sm:$0xff] }
 0x641   :  { %20803 = vmatpush.bf16.msrb.mxu3 %v32717_v61  ;;  %20762 = vmatmul.bf16.vlgmr.msrb.gmra.mxu0 %v22403_v53  ;;  %v19926_v61 = vadd.f32 %v38424_v36, %v19912_v6  ;;  %v20554_v47 = vadd.f32 %v20553_v28, %v20540_v17  ;;  %v32744_v36 = vld [vmem:[%s41723_s1 + $0x3298] sm:$0xff]  ;;  %v31096_v37 = vld [vmem:[%s41724_s0 + $0x720] sm:$0x70]  ;;  %v22426_v6 = vld [vmem:[%s41724_s0 + $0x328] sm:$0xf] }
 0x642   :  { %20810 = vmatpush.bf16.msra.mxu0 %v32732_v11  ;;  %20790 = vmatmul.bf16.vlgmr.msrb.gmra.mxu2 %v22411_v9  ;;  %v39866_v11 = vpop.f32.mrf.mxu3  ;;  %v32736_v53 = vld [vmem:[%s41723_s1 + $0x3258] sm:$0xff]  ;;  %v31097_v17 = vld [vmem:[%s41724_s0 + $0x728] sm:$0x70]  ;;  %v32749_v28 = vld [vmem:[%s41723_s1 + $0x32c0] sm:$0xff] }
 0x643   :  { %20838 = vmatpush.bf16.msra.mxu2 %v32748_v43  ;;  %20776 = vmatmul.bf16.vlgmr.msrb.gmra.mxu1 %v22407_v32  ;;  %v32754_v43 = vld [vmem:[%s41723_s1 + $0x32e8] sm:$0xff]  ;;  %v19940_v49 = vadd.f32 %v38432_v18, %v19926_v61  ;;  %v32752_v9 = vld [vmem:[%s41723_s1 + $0x32d8] sm:$0xff]  ;;  %v32727_v18 = vld [vmem:[%s41723_s1 + $0x3210] sm:$0xff] }
 0x644   :  { %20824 = vmatpush.bf16.msra.mxu1 %v32740_v20  ;;  %20804 = vmatmul.bf16.vlgmr.msrb.gmra.mxu3 %v22415_v33  ;;  %v32743_v33 = vld [vmem:[%s41723_s1 + $0x3290] sm:$0xff]  ;;  %v30968_v61 = vld [vmem:[%s41724_s0 + $0x324] sm:$0xf] }
 0x645   :  { %20852 = vmatpush.bf16.msra.mxu3 %v32756_v23  ;;  %v19954_v23 = vadd.f32 %v38448_v52, %v19940_v49  ;;  %v32751_v52 = vld [vmem:[%s41723_s1 + $0x32d0] sm:$0xff]  ;;  %v32772_v49 = vld [vmem:[%s41723_s1 + $0x3378] sm:$0xff] }
 0x646   :  { %20811 = vmatpush.bf16.msra.mxu0 %v32731_v16  ;;  %v20567_v26 = vpop.f32.mrf.mxu2  ;;  %v32735_v16 = vld [vmem:[%s41723_s1 + $0x3250] sm:$0xff] }
 0x647   :  { %20839 = vmatpush.bf16.msra.mxu2 %v32747_v46  ;;  %v20568_v21 = vadd.f32 %v20567_v26, %v20554_v47  ;;  %v19968_v46 = vadd.f32 %v38456_v41, %v19954_v23  ;;  %v32750_v41 = vld [vmem:[%s41723_s1 + $0x32c8] sm:$0xff]  ;;  %v39975_v26 = vpop.f32.mrf.mxu0  ;;  %v32779_v23 = vld [vmem:[%s41723_s1 + $0x33b0] sm:$0xff] }
 0x648   :  { %20825 = vmatpush.bf16.msra.mxu1 %v32739_v13  ;;  %v32742_v13 = vld [vmem:[%s41723_s1 + $0x3288] sm:$0xff] }
 0x649   :  { %20853 = vmatpush.bf16.msra.mxu3 %v32755_v60  ;;  %v19982_v60 = vadd.f32 %v38565_v19, %v19968_v46  ;;  %v32764_v19 = vld [vmem:[%s41723_s1 + $0x3338] sm:$0xff]  ;;  %v22420_v47 = vld [vmem:[%s41724_s0 + $0x724] sm:$0x70] }
 0x64a   :  { %20812 = vmatpush.bf16.msra.mxu0 %v32730_v12  ;;  %v20581_v20 = vpop.f32.mrf.mxu3  ;;  %v32725_v12 = vld [vmem:[%s41723_s1 + $0x3200] sm:$0xff] }
 0x64b   :  { %20840 = vmatpush.bf16.msra.mxu2 %v32746_v7  ;;  %v39903_v32 = vadd.f32 %v20581_v20, %v20568_v21  ;;  %v32741_v7 = vld [vmem:[%s41723_s1 + $0x3280] sm:$0xff]  ;;  %v32788_v21 = vld [vmem:[%s41723_s1 + $0x33f8] sm:$0xff]  ;;  %v39983_v20 = vpop.f32.mrf.mxu1 }
 0x64c   :  { %20826 = vmatpush.bf16.msra.mxu1 %v32738_v35  ;;  %v32780_v35 = vld [vmem:[%s41723_s1 + $0x33b8] sm:$0xff] }
 0x64d   :  { %20854 = vmatpush.bf16.msra.mxu3 %v32754_v43  ;;  %v22418_v43 = vld [vmem:[%s41724_s0 + $0x320] sm:$0xf] }
 0x64e   :  { %20813 = vmatpush.bf16.msra.mxu0 %v32729_v54  ;;  %v19996_v54 = vadd.f32 %v38573_v0, %v19982_v60  ;;  %v30969_v0 = vld [vmem:[%s41724_s0 + $0x32c] sm:$0xf]  ;;  %v39999_v46 = vpop.f32.mrf.mxu2 }
 0x64f   :  { %20841 = vmatpush.bf16.msra.mxu2 %v32745_v34  ;;  %v32733_v34 = vld [vmem:[%s41723_s1 + $0x3240] sm:$0xff]  ;;  %v32786_v60 = vld [vmem:[%s41723_s1 + $0x33e8] sm:$0xff] }
 0x650   :  { %20827 = vmatpush.bf16.msra.mxu1 %v32737_v30  ;;  %v22428_v30 = vld [vmem:[%s41724_s0 + $0x72c] sm:$0x70] }
 0x651   :  { %20855 = vmatpush.bf16.msra.mxu3 %v32753_v50  ;;  %v20010_v50 = vadd.f32 %v38589_v58, %v19996_v54  ;;  %v32763_v58 = vld [vmem:[%s41723_s1 + $0x3330] sm:$0xff] }
 0x652   :  { %20814 = vmatpush.bf16.msra.mxu0 %v32728_v27  ;;  %v22419_v27 = vor.u32 %v31096_v37, %v22418_v43 }
 0x653   :  { %20842 = vmatpush.bf16.msra.mxu2 %v32744_v36  ;;  %v22427_v36 = vor.u32 %v31097_v17, %v22426_v6  ;;  %v32760_v6 = vld [vmem:[%s41723_s1 + $0x3318] sm:$0xff] }
 0x654   :  { %20828 = vmatpush.bf16.msra.mxu1 %v32736_v53  ;;  %v22423_v53 = vor.u32 %v30968_v61, %v22420_v47  ;;  %v32784_v61 = vld [vmem:[%s41723_s1 + $0x33d8] sm:$0xff] }
 0x655   :  { %20856 = vmatpush.bf16.msra.mxu3 %v32752_v9  ;;  %v22431_v9 = vor.u32 %v30969_v0, %v22428_v30 }
 0x656   :  { %20815 = vmatpush.bf16.msra.mxu0 %v32727_v18  ;;  %v20024_v18 = vadd.f32 %v38597_v62, %v20010_v50  ;;  %v32762_v62 = vld [vmem:[%s41723_s1 + $0x3328] sm:$0xff]  ;;  %v32775_v50 = vld [vmem:[%s41723_s1 + $0x3390] sm:$0xff] }
 0x657   :  { %20843 = vmatpush.bf16.msra.mxu2 %v32743_v33  ;;  %v32771_v33 = vld [vmem:[%s41723_s1 + $0x3370] sm:$0xff] }
 0x658   :  { %20829 = vmatpush.bf16.msra.mxu1 %v32735_v16  ;;  %v32787_v16 = vld [vmem:[%s41723_s1 + $0x33f0] sm:$0xff] }
 0x659   :  { %20857 = vmatpush.bf16.msra.mxu3 %v32751_v52  ;;  %v20038_v52 = vadd.f32 %v38706_v22, %v20024_v18  ;;  %v32770_v22 = vld [vmem:[%s41723_s1 + $0x3368] sm:$0xff]  ;;  %v32812_v18 = vld [vmem:[%s41723_s1 + $0x34b8] sm:$0xff] }
 0x65a   :  { %20816 = vmatpush.bf16.msra.mxu0 %v32726_v38  ;;  %v32778_v38 = vld [vmem:[%s41723_s1 + $0x33a8] sm:$0xff] }
 0x65b   :  { %20844 = vmatpush.bf16.msra.mxu2 %v32742_v13  ;;  %v40007_v13 = vpop.f32.mrf.mxu3 }
 0x65c   :  { %20830 = vmatpush.bf16.msra.mxu1 %v32734_v5 }
 0x65d   :  { %20858 = vmatpush.bf16.msra.mxu3 %v32750_v41  ;;  %v20052_v41 = vadd.f32 %v38714_v63, %v20038_v52  ;;  %v32769_v63 = vld [vmem:[%s41723_s1 + $0x3360] sm:$0xff]  ;;  %v22442_v52 = vld [vmem:[%s41724_s0 + $0x338] sm:$0xf] }
 0x65e   :  { %20817 = vmatpush.bf16.msra.mxu0 %v32725_v12  ;;  %v20595_v5 = vpop.f32.mrf.mxu0 }
 0x65f   :  { %20845 = vmatpush.bf16.msra.mxu2 %v32741_v7  ;;  %v20596_v12 = vadd.f32 %v20595_v5, %v39903_v32  ;;  %v32761_v7 = vld [vmem:[%s41723_s1 + $0x3320] sm:$0xff]  ;;  %v20066_v43 = vadd.f32 %v38730_v29, %v20052_v41  ;;  %v32776_v29 = vld [vmem:[%s41723_s1 + $0x3398] sm:$0xff]  ;;  %v30970_v5 = vld [vmem:[%s41724_s0 + $0x334] sm:$0xf] }
 0x660   :  { %20831 = vmatpush.bf16.msra.mxu1 %v32733_v34  ;;  %v32785_v32 = vld [vmem:[%s41723_s1 + $0x33e0] sm:$0xff]  ;;  %v22436_v41 = vld [vmem:[%s41724_s0 + $0x734] sm:$0x70] }
 0x661   :  { %20859 = vmatpush.bf16.msra.mxu3 %v32749_v28  ;;  %20818 = vmatmul.bf16.vlgmr.msra.gmra.mxu0 %v22419_v27  ;;  %v20080_v54 = vadd.f32 %v38738_v48, %v20066_v43  ;;  %v32768_v28 = vld [vmem:[%s41723_s1 + $0x3358] sm:$0xff]  ;;  %v32759_v48 = vld [vmem:[%s41723_s1 + $0x3310] sm:$0xff] }
 0x662   :  { %20866 = vmatpush.bf16.msrb.mxu0 %v32764_v19  ;;  %20846 = vmatmul.bf16.vlgmr.msra.gmra.mxu2 %v22427_v36  ;;  %v32777_v19 = vld [vmem:[%s41723_s1 + $0x33a0] sm:$0xff]  ;;  %v32767_v27 = vld [vmem:[%s41723_s1 + $0x3350] sm:$0xff] }
 0x663   :  { %20894 = vmatpush.bf16.msrb.mxu2 %v32780_v35  ;;  %20832 = vmatmul.bf16.vlgmr.msra.gmra.mxu1 %v22423_v53  ;;  %v20609_v35 = vpop.f32.mrf.mxu1  ;;  %v20094_v0 = vadd.f32 %v38847_v45, %v20080_v54  ;;  %v32783_v45 = vld [vmem:[%s41723_s1 + $0x33d0] sm:$0xff] }
 0x664   :  { %20880 = vmatpush.bf16.msrb.mxu1 %v32772_v49  ;;  %20860 = vmatmul.bf16.vlgmr.msra.gmra.mxu3 %v22431_v9  ;;  %v20610_v37 = vadd.f32 %v20609_v35, %v20596_v12  ;;  %v32758_v49 = vld [vmem:[%s41723_s1 + $0x3308] sm:$0xff]  ;;  %v22444_v12 = vld [vmem:[%s41724_s0 + $0x73c] sm:$0x70] }
 0x665   :  { %20908 = vmatpush.bf16.msrb.mxu3 %v32788_v21  ;;  %v20623_v17 = vpop.f32.mrf.mxu2  ;;  %v20108_v36 = vadd.f32 %v38855_v3, %v20094_v0  ;;  %v32774_v21 = vld [vmem:[%s41723_s1 + $0x3388] sm:$0xff] }
 0x666   :  { %20867 = vmatpush.bf16.msrb.mxu0 %v32763_v58  ;;  %v20624_v34 = vadd.f32 %v20623_v17, %v20610_v37  ;;  %v32766_v9 = vld [vmem:[%s41723_s1 + $0x3348] sm:$0xff]  ;;  %v32757_v58 = vld [vmem:[%s41723_s1 + $0x3300] sm:$0xff]  ;;  %v40116_v43 = vpop.f32.mrf.mxu0  ;;  %v32804_v37 = vld [vmem:[%s41723_s1 + $0x3478] sm:$0xff] }
 0x667   :  { %20895 = vmatpush.bf16.msrb.mxu2 %v32779_v23  ;;  %v20637_v47 = vpop.f32.mrf.mxu3  ;;  %v20122_v53 = vadd.f32 %v38871_v39, %v20108_v36  ;;  %v32782_v3 = vld [vmem:[%s41723_s1 + $0x33c8] sm:$0xff]  ;;  %v32773_v23 = vld [vmem:[%s41723_s1 + $0x3380] sm:$0xff]  ;;  %v32796_v39 = vld [vmem:[%s41723_s1 + $0x3438] sm:$0xff] }
 0x668   :  { %20881 = vmatpush.bf16.msrb.mxu1 %v32771_v33  ;;  %v40044_v30 = vadd.f32 %v20637_v47, %v20624_v34  ;;  %v22434_v33 = vld [vmem:[%s41724_s0 + $0x330] sm:$0xf]  ;;  %v32810_v0 = vld [vmem:[%s41723_s1 + $0x34a8] sm:$0xff] }
 0x669   :  { %20909 = vmatpush.bf16.msrb.mxu3 %v32787_v16  ;;  %v31098_v16 = vld [vmem:[%s41724_s0 + $0x730] sm:$0x70] }
 0x66a   :  { %20868 = vmatpush.bf16.msrb.mxu0 %v32762_v62  ;;  %v31099_v62 = vld [vmem:[%s41724_s0 + $0x738] sm:$0x70]  ;;  %v32811_v17 = vld [vmem:[%s41723_s1 + $0x34b0] sm:$0xff] }
 0x66b   :  { %20896 = vmatpush.bf16.msrb.mxu2 %v32778_v38  ;;  %v20136_v38 = vadd.f32 %v38879_v2, %v20122_v53  ;;  %v30971_v2 = vld [vmem:[%s41724_s0 + $0x33c] sm:$0xf]  ;;  %v22443_v35 = vor.u32 %v31099_v62, %v22442_v52  ;;  %v32803_v34 = vld [vmem:[%s41723_s1 + $0x3470] sm:$0xff] }
 0x66c   :  { %20882 = vmatpush.bf16.msrb.mxu1 %v32770_v22  ;;  %v32765_v22 = vld [vmem:[%s41723_s1 + $0x3340] sm:$0xff] }
 0x66d   :  { %20910 = vmatpush.bf16.msrb.mxu3 %v32786_v60  ;;  %v32781_v60 = vld [vmem:[%s41723_s1 + $0x33c0] sm:$0xff]  ;;  %v40140_v47 = vpop.f32.mrf.mxu2 }
 0x66e   :  { %20869 = vmatpush.bf16.msrb.mxu0 %v32761_v7  ;;  %v20150_v7 = vadd.f32 %v38988_v8, %v20136_v38  ;;  %v32795_v8 = vld [vmem:[%s41723_s1 + $0x3430] sm:$0xff] }
 0x66f   :  { %20897 = vmatpush.bf16.msrb.mxu2 %v32777_v19  ;;  %v22435_v19 = vor.u32 %v31098_v16, %v22434_v33  ;;  %v32800_v33 = vld [vmem:[%s41723_s1 + $0x3458] sm:$0xff] }
 0x670   :  { %20883 = vmatpush.bf16.msrb.mxu1 %v32769_v63  ;;  %v32820_v63 = vld [vmem:[%s41723_s1 + $0x34f8] sm:$0xff]  ;;  %v20164_v54 = vadd.f32 %v38996_v59, %v20150_v7  ;;  %v32794_v59 = vld [vmem:[%s41723_s1 + $0x3428] sm:$0xff] }
 0x671   :  { %20911 = vmatpush.bf16.msrb.mxu3 %v32785_v32  ;;  %v22439_v32 = vor.u32 %v30970_v5, %v22436_v41  ;;  %v32816_v16 = vld [vmem:[%s41723_s1 + $0x34d8] sm:$0xff]  ;;  %v32790_v41 = vld [vmem:[%s41723_s1 + $0x3408] sm:$0xff] }
 0x672   :  { %20870 = vmatpush.bf16.msrb.mxu0 %v32760_v6  ;;  %v22447_v6 = vor.u32 %v30971_v2, %v22444_v12  ;;  %v32806_v2 = vld [vmem:[%s41723_s1 + $0x3488] sm:$0xff] }
 0x673   :  { %20898 = vmatpush.bf16.msrb.mxu2 %v32776_v29  ;;  %v40124_v29 = vpop.f32.mrf.mxu1  ;;  %v32798_v7 = vld [vmem:[%s41723_s1 + $0x3448] sm:$0xff] }
 0x674   :  { %20884 = vmatpush.bf16.msrb.mxu1 %v32768_v28  ;;  %v32819_v28 = vld [vmem:[%s41723_s1 + $0x34f0] sm:$0xff] }
 0x675   :  { %20912 = vmatpush.bf16.msrb.mxu3 %v32784_v61  ;;  %v20178_v61 = vadd.f32 %v39012_v56, %v20164_v54  ;;  %v32802_v56 = vld [vmem:[%s41723_s1 + $0x3468] sm:$0xff]  ;;  %v32797_v54 = vld [vmem:[%s41723_s1 + $0x3440] sm:$0xff] }
 0x676   :  { %20871 = vmatpush.bf16.msrb.mxu0 %v32759_v48  ;;  %v40148_v48 = vpop.f32.mrf.mxu3 }
 0x677   :  { %20899 = vmatpush.bf16.msrb.mxu2 %v32775_v50  ;;  %v32818_v50 = vld [vmem:[%s41723_s1 + $0x34e8] sm:$0xff] }
 0x678   :  { %20885 = vmatpush.bf16.msrb.mxu1 %v32767_v27 }
 0x679   :  { %20913 = vmatpush.bf16.msrb.mxu3 %v32783_v45  ;;  %v20192_v45 = vadd.f32 %v39020_v4, %v20178_v61  ;;  %v32801_v4 = vld [vmem:[%s41723_s1 + $0x3460] sm:$0xff]  ;;  %v22452_v61 = vld [vmem:[%s41724_s0 + $0x744] sm:$0x70] }
 0x67a   :  { %20872 = vmatpush.bf16.msrb.mxu0 %v32758_v49  ;;  %v32793_v49 = vld [vmem:[%s41723_s1 + $0x3420] sm:$0xff] }
 0x67b   :  { %20900 = vmatpush.bf16.msrb.mxu2 %v32774_v21  ;;  %v32809_v21 = vld [vmem:[%s41723_s1 + $0x34a0] sm:$0xff] }
 0x67c   :  { %20886 = vmatpush.bf16.msrb.mxu1 %v32766_v9  ;;  %v20206_v9 = vadd.f32 %v39129_v1, %v20192_v45  ;;  %v32808_v1 = vld [vmem:[%s41723_s1 + $0x3498] sm:$0xff] }
 0x67d   :  { %20914 = vmatpush.bf16.msrb.mxu3 %v32782_v3 }
 0x67e   :  { %20873 = vmatpush.bf16.msrb.mxu0 %v32757_v58  ;;  %v20651_v27 = vpop.f32.mrf.mxu0  ;;  %v32792_v58 = vld [vmem:[%s41723_s1 + $0x3418] sm:$0xff] }
 0x67f   :  { %20901 = vmatpush.bf16.msrb.mxu2 %v32773_v23  ;;  %v20652_v36 = vadd.f32 %v20651_v27, %v40044_v30  ;;  %v32817_v30 = vld [vmem:[%s41723_s1 + $0x34e0] sm:$0xff] }
 0x680   :  { %20887 = vmatpush.bf16.msrb.mxu1 %v32765_v22  ;;  %v20665_v53 = vpop.f32.mrf.mxu1  ;;  %v32807_v22 = vld [vmem:[%s41723_s1 + $0x3490] sm:$0xff] }
 0x681   :  { %20915 = vmatpush.bf16.msrb.mxu3 %v32781_v60  ;;  %20874 = vmatmul.bf16.vlgmr.msrb.gmra.mxu0 %v22435_v19  ;;  %v20666_v3 = vadd.f32 %v20665_v53, %v20652_v36  ;;  %v32799_v60 = vld [vmem:[%s41723_s1 + $0x3450] sm:$0xff]  ;;  %v32789_v19 = vld [vmem:[%s41723_s1 + $0x3400] sm:$0xff]  ;;  %v32836_v36 = vld [vmem:[%s41723_s1 + $0x3578] sm:$0xff] }
 0x682   :  { %20922 = vmatpush.bf16.msra.mxu0 %v32796_v39  ;;  %20902 = vmatmul.bf16.vlgmr.msrb.gmra.mxu2 %v22443_v35  ;;  %v20220_v39 = vadd.f32 %v39137_v42, %v20206_v9  ;;  %v32791_v42 = vld [vmem:[%s41723_s1 + $0x3410] sm:$0xff]  ;;  %v32805_v35 = vld [vmem:[%s41723_s1 + $0x3480] sm:$0xff] }
 0x683   :  { %20950 = vmatpush.bf16.msra.mxu2 %v32812_v18  ;;  %20888 = vmatmul.bf16.vlgmr.msrb.gmra.mxu1 %v22439_v32  ;;  %v31100_v32 = vld [vmem:[%s41724_s0 + $0x740] sm:$0x70] }
 0x684   :  { %20936 = vmatpush.bf16.msra.mxu1 %v32804_v37  ;;  %20916 = vmatmul.bf16.vlgmr.msrb.gmra.mxu3 %v22447_v6  ;;  %v20234_v62 = vadd.f32 %v39153_v57, %v20220_v39  ;;  %v32815_v57 = vld [vmem:[%s41723_s1 + $0x34d0] sm:$0xff]  ;;  %v32844_v37 = vld [vmem:[%s41723_s1 + $0x35b8] sm:$0xff]  ;;  %v22458_v6 = vld [vmem:[%s41724_s0 + $0x348] sm:$0xf] }
 0x685   :  { %20964 = vmatpush.bf16.msra.mxu3 %v32820_v63  ;;  %v20679_v23 = vpop.f32.mrf.mxu2  ;;  %v22450_v63 = vld [vmem:[%s41724_s0 + $0x340] sm:$0xf]  ;;  %v41905_v39 = vld [vmem:[#allocation4_spill] sm:$0xff] }
 0x686   :  { %20923 = vmatpush.bf16.msra.mxu0 %v32795_v8  ;;  %v20680_v18 = vadd.f32 %v20679_v23, %v20666_v3  ;;  %v20248_v5 = vadd.f32 %v39161_v10, %v20234_v62  ;;  %v32814_v10 = vld [vmem:[%s41723_s1 + $0x34c8] sm:$0xff]  ;;  %v40257_v45 = vpop.f32.mrf.mxu0  ;;  %v32827_v3 = vld [vmem:[%s41723_s1 + $0x3530] sm:$0xff] }
 0x687   :  { %20951 = vmatpush.bf16.msra.mxu2 %v32811_v17  ;;  %v20693_v52 = vpop.f32.mrf.mxu3  ;;  %v31101_v8 = vld [vmem:[%s41724_s0 + $0x748] sm:$0x70]  ;;  %v32851_v23 = vld [vmem:[%s41723_s1 + $0x35f0] sm:$0xff] }
 0x688   :  { %20937 = vmatpush.bf16.msra.mxu1 %v32803_v34  ;;  %v40185_v38 = vadd.f32 %v20693_v52, %v20680_v18  ;;  %v20262_v12 = vadd.f32 %v39270_v44, %v20248_v5  ;;  %v32828_v44 = vld [vmem:[%s41723_s1 + $0x3538] sm:$0xff]  ;;  %v32813_v34 = vld [vmem:[%s41723_s1 + $0x34c0] sm:$0xff]  ;;  %v22459_v27 = vor.u32 %v31101_v8, %v22458_v6  ;;  %v40265_v9 = vpop.f32.mrf.mxu1  ;;  %v32842_v52 = vld [vmem:[%s41723_s1 + $0x35a8] sm:$0xff] }
 0x689   :  { %20965 = vmatpush.bf16.msra.mxu3 %v32819_v28  ;;  %v30972_v28 = vld [vmem:[%s41724_s0 + $0x344] sm:$0xf]  ;;  %v41908_v6 = vld [vmem:[#allocation7_spill] sm:$0xff] }
 0x68a   :  { %20924 = vmatpush.bf16.msra.mxu0 %v32794_v59  ;;  %v20276_v17 = vadd.f32 %v39278_v25, %v20262_v12  ;;  %v30973_v25 = vld [vmem:[%s41724_s0 + $0x34c] sm:$0xf]  ;;  %v22460_v59 = vld [vmem:[%s41724_s0 + $0x74c] sm:$0x70]  ;;  %v32841_v12 = vld [vmem:[%s41723_s1 + $0x35a0] sm:$0xff] }
 0x68b   :  { %20952 = vmatpush.bf16.msra.mxu2 %v32810_v0  ;;  %v41903_v0 = vld [vmem:[#allocation2_spill] sm:$0xff]  ;;  %v22463_v53 = vor.u32 %v30973_v25, %v22460_v59 }
 0x68c   :  { %20938 = vmatpush.bf16.msra.mxu1 %v32802_v56  ;;  %v20290_v56 = vadd.f32 %v41903_v0, %v20276_v17  ;;  %v32823_v0 = vld [vmem:[%s41723_s1 + $0x3510] sm:$0xff] }
 0x68d   :  { %20966 = vmatpush.bf16.msra.mxu3 %v32818_v50  ;;  %v22451_v50 = vor.u32 %v31100_v32, %v22450_v63  ;;  %v32840_v63 = vld [vmem:[%s41723_s1 + $0x3598] sm:$0xff] }
 0x68e   :  { %20925 = vmatpush.bf16.msra.mxu0 %v32793_v49  ;;  %v32852_v49 = vld [vmem:[%s41723_s1 + $0x35f8] sm:$0xff] }
 0x68f   :  { %20953 = vmatpush.bf16.msra.mxu2 %v32809_v21  ;;  %v22455_v21 = vor.u32 %v30972_v28, %v22452_v61  ;;  %v40289_v62 = vpop.f32.mrf.mxu3  ;;  %v41909_v61 = vld [vmem:[#allocation8_spill] sm:$0xff] }
 0x690   :  { %20939 = vmatpush.bf16.msra.mxu1 %v32801_v4  ;;  %v32843_v4 = vld [vmem:[%s41723_s1 + $0x35b0] sm:$0xff] }
 0x691   :  { %20967 = vmatpush.bf16.msra.mxu3 %v32817_v30  ;;  %v41904_v30 = vld [vmem:[#allocation3_spill] sm:$0xff] }
 0x692   :  { %20926 = vmatpush.bf16.msra.mxu0 %v32792_v58  ;;  %v20304_v58 = vadd.f32 %v41904_v30, %v20290_v56  ;;  %v32839_v56 = vld [vmem:[%s41723_s1 + $0x3590] sm:$0xff]  ;;  %v32830_v30 = vld [vmem:[%s41723_s1 + $0x3548] sm:$0xff] }
 0x693   :  { %20954 = vmatpush.bf16.msra.mxu2 %v32808_v1  ;;  %v32835_v1 = vld [vmem:[%s41723_s1 + $0x3570] sm:$0xff] }
 0x694   :  { %20940 = vmatpush.bf16.msra.mxu1 %v32800_v33  ;;  %v20318_v18 = vadd.f32 %v41905_v39, %v20304_v58  ;;  %v40281_v33 = vpop.f32.mrf.mxu2  ;;  %v32846_v58 = vld [vmem:[%s41723_s1 + $0x35c8] sm:$0xff]  ;;  %v32860_v39 = vld [vmem:[%s41723_s1 + $0x3638] sm:$0xff] }
 0x695   :  { %20968 = vmatpush.bf16.msra.mxu3 %v32816_v16  ;;  %v32826_v16 = vld [vmem:[%s41723_s1 + $0x3528] sm:$0xff] }
 0x696   :  { %20927 = vmatpush.bf16.msra.mxu0 %v32791_v42  ;;  %v32834_v42 = vld [vmem:[%s41723_s1 + $0x3568] sm:$0xff] }
 0x697   :  { %20955 = vmatpush.bf16.msra.mxu2 %v32807_v22  ;;  %v32850_v22 = vld [vmem:[%s41723_s1 + $0x35e8] sm:$0xff] }
 0x698   :  { %20941 = vmatpush.bf16.msra.mxu1 %v32799_v60 }
 0x699   :  { %20969 = vmatpush.bf16.msra.mxu3 %v32815_v57  ;;  %v41906_v57 = vld [vmem:[#allocation5_spill] sm:$0xff] }
 0x69a   :  { %20928 = vmatpush.bf16.msra.mxu0 %v32790_v41  ;;  %v20332_v5 = vadd.f32 %v41906_v57, %v20318_v18  ;;  %v32876_v18 = vld [vmem:[%s41723_s1 + $0x36b8] sm:$0xff] }
 0x69b   :  { %20956 = vmatpush.bf16.msra.mxu2 %v32806_v2  ;;  %v32825_v2 = vld [vmem:[%s41723_s1 + $0x3520] sm:$0xff] }
 0x69c   :  { %20942 = vmatpush.bf16.msra.mxu1 %v32798_v7 }
 0x69d   :  { %20970 = vmatpush.bf16.msra.mxu3 %v32814_v10  ;;  %v41907_v10 = vld [vmem:[#allocation6_spill] sm:$0xff] }
 0x69e   :  { %20929 = vmatpush.bf16.msra.mxu0 %v32789_v19  ;;  %v20707_v60 = vpop.f32.mrf.mxu0  ;;  %v20346_v19 = vadd.f32 %v41907_v10, %v20332_v5  ;;  %v32829_v5 = vld [vmem:[%s41723_s1 + $0x3540] sm:$0xff] }
 0x69f   :  { %20957 = vmatpush.bf16.msra.mxu2 %v32805_v35  ;;  %v20708_v41 = vadd.f32 %v20707_v60, %v40185_v38  ;;  %v32833_v38 = vld [vmem:[%s41723_s1 + $0x3560] sm:$0xff]  ;;  %v41912_v60 = vld [vmem:[#allocation11_spill] sm:$0xff] }
 0x6a0   :  { %20943 = vmatpush.bf16.msra.mxu1 %v32797_v54  ;;  %v20721_v7 = vpop.f32.mrf.mxu1  ;;  %v20360_v8 = vadd.f32 %v41908_v6, %v20346_v19  ;;  %v32832_v54 = vld [vmem:[%s41723_s1 + $0x3558] sm:$0xff]  ;;  %v22476_v10 = vld [vmem:[%s41724_s0 + $0x75c] sm:$0x70] }
 0x6a1   :  { %20971 = vmatpush.bf16.msra.mxu3 %v32813_v34  ;;  %20930 = vmatmul.bf16.vlgmr.msra.gmra.mxu0 %v22451_v50  ;;  %v20722_v35 = vadd.f32 %v20721_v7, %v20708_v41  ;;  %v32848_v34 = vld [vmem:[%s41723_s1 + $0x35d8] sm:$0xff]  ;;  %v32831_v50 = vld [vmem:[%s41723_s1 + $0x3550] sm:$0xff]  ;;  %v32845_v41 = vld [vmem:[%s41723_s1 + $0x35c0] sm:$0xff] }
 0x6a2   :  { %20978 = vmatpush.bf16.msrb.mxu0 %v32828_v44  ;;  %20958 = vmatmul.bf16.vlgmr.msra.gmra.mxu2 %v22459_v27  ;;  %v32849_v44 = vld [vmem:[%s41723_s1 + $0x35e0] sm:$0xff]  ;;  %v20374_v25 = vadd.f32 %v41909_v61, %v20360_v8  ;;  %v32847_v27 = vld [vmem:[%s41723_s1 + $0x35d0] sm:$0xff]  ;;  %v30975_v7 = vld [vmem:[%s41724_s0 + $0x35c] sm:$0xf] }
 0x6a3   :  { %21006 = vmatpush.bf16.msrb.mxu2 %v32844_v37  ;;  %20944 = vmatmul.bf16.vlgmr.msra.gmra.mxu1 %v22455_v21  ;;  %v32824_v37 = vld [vmem:[%s41723_s1 + $0x3518] sm:$0xff]  ;;  %v32822_v21 = vld [vmem:[%s41723_s1 + $0x3508] sm:$0xff]  ;;  %v22479_v6 = vor.u32 %v30975_v7, %v22476_v10  ;;  %v32853_v10 = vld [vmem:[%s41723_s1 + $0x3600] sm:$0xff] }
 0x6a4   :  { %20992 = vmatpush.bf16.msrb.mxu1 %v32836_v36  ;;  %20972 = vmatmul.bf16.vlgmr.msra.gmra.mxu3 %v22463_v53  ;;  %v41910_v36 = vld [vmem:[#allocation9_spill] sm:$0xff]  ;;  %v32838_v53 = vld [vmem:[%s41723_s1 + $0x3588] sm:$0xff] }
 0x6a5   :  { %21020 = vmatpush.bf16.msrb.mxu3 %v32852_v49  ;;  %v20735_v32 = vpop.f32.mrf.mxu2  ;;  %v20388_v49 = vadd.f32 %v41910_v36, %v20374_v25  ;;  %v32862_v7 = vld [vmem:[%s41723_s1 + $0x3648] sm:$0xff] }
 0x6a6   :  { %20979 = vmatpush.bf16.msrb.mxu0 %v32827_v3  ;;  %v20736_v17 = vadd.f32 %v20735_v32, %v20722_v35  ;;  %v41911_v3 = vld [vmem:[#allocation10_spill] sm:$0xff] }
 0x6a7   :  { %21007 = vmatpush.bf16.msrb.mxu2 %v32843_v4  ;;  %v20749_v28 = vpop.f32.mrf.mxu3  ;;  %v20402_v4 = vadd.f32 %v41911_v3, %v20388_v49 }
 0x6a8   :  { %20993 = vmatpush.bf16.msrb.mxu1 %v32835_v1  ;;  %v40326_v59 = vadd.f32 %v20749_v28, %v20736_v17  ;;  %v32821_v1 = vld [vmem:[%s41723_s1 + $0x3500] sm:$0xff]  ;;  %v40406_v8 = vpop.f32.mrf.mxu1  ;;  %v32875_v17 = vld [vmem:[%s41723_s1 + $0x36b0] sm:$0xff] }
 0x6a9   :  { %21021 = vmatpush.bf16.msrb.mxu3 %v32851_v23  ;;  %v32837_v23 = vld [vmem:[%s41723_s1 + $0x3580] sm:$0xff]  ;;  %v20416_v57 = vadd.f32 %v41912_v60, %v20402_v4  ;;  %v32883_v28 = vld [vmem:[%s41723_s1 + $0x36f0] sm:$0xff] }
 0x6aa   :  { %20980 = vmatpush.bf16.msrb.mxu0 %v32826_v16  ;;  %v22466_v16 = vld [vmem:[%s41724_s0 + $0x350] sm:$0xf] }
 0x6ab   :  { %21008 = vmatpush.bf16.msrb.mxu2 %v32842_v52  ;;  %v31102_v52 = vld [vmem:[%s41724_s0 + $0x750] sm:$0x70]  ;;  %v20430_v19 = vadd.f32 %v39693_v31, %v20416_v57 }
 0x6ac   :  { %20994 = vmatpush.bf16.msrb.mxu1 %v32834_v42  ;;  %v22474_v42 = vld [vmem:[%s41724_s0 + $0x358] sm:$0xf]  ;;  %v22467_v35 = vor.u32 %v31102_v52, %v22466_v16  ;;  %v32859_v31 = vld [vmem:[%s41723_s1 + $0x3630] sm:$0xff] }
 0x6ad   :  { %21022 = vmatpush.bf16.msrb.mxu3 %v32850_v22  ;;  %v31103_v22 = vld [vmem:[%s41724_s0 + $0x758] sm:$0x70]  ;;  %v40422_v25 = vpop.f32.mrf.mxu2  ;;  %v32871_v60 = vld [vmem:[%s41723_s1 + $0x3690] sm:$0xff] }
 0x6ae   :  { %20981 = vmatpush.bf16.msrb.mxu0 %v32825_v2  ;;  %v30974_v2 = vld [vmem:[%s41724_s0 + $0x354] sm:$0xf]  ;;  %v32880_v16 = vld [vmem:[%s41723_s1 + $0x36d8] sm:$0xff] }
 0x6af   :  { %21009 = vmatpush.bf16.msrb.mxu2 %v32841_v12  ;;  %v22468_v12 = vld [vmem:[%s41724_s0 + $0x754] sm:$0x70]  ;;  %v32863_v57 = vld [vmem:[%s41723_s1 + $0x3650] sm:$0xff] }
 0x6b0   :  { %20995 = vmatpush.bf16.msrb.mxu1 %v32833_v38  ;;  %v22475_v38 = vor.u32 %v31103_v22, %v22474_v42  ;;  %v22471_v32 = vor.u32 %v30974_v2, %v22468_v12  ;;  %v32870_v2 = vld [vmem:[%s41723_s1 + $0x3688] sm:$0xff] }
 0x6b1   :  { %21023 = vmatpush.bf16.msrb.mxu3 %v32849_v44  ;;  %v40398_v44 = vpop.f32.mrf.mxu0 }
 0x6b2   :  { %20982 = vmatpush.bf16.msrb.mxu0 %v32824_v37  ;;  %v32868_v37 = vld [vmem:[%s41723_s1 + $0x3678] sm:$0xff] }
 0x6b3   :  { %21010 = vmatpush.bf16.msrb.mxu2 %v32840_v63  ;;  %v32884_v63 = vld [vmem:[%s41723_s1 + $0x36f8] sm:$0xff] }
 0x6b4   :  { %20996 = vmatpush.bf16.msrb.mxu1 %v32832_v54  ;;  %v20444_v54 = vadd.f32 %v39701_v14, %v20430_v19  ;;  %v32858_v14 = vld [vmem:[%s41723_s1 + $0x3628] sm:$0xff]  ;;  %v32869_v19 = vld [vmem:[%s41723_s1 + $0x3680] sm:$0xff] }
 0x6b5   :  { %21024 = vmatpush.bf16.msrb.mxu3 %v32848_v34  ;;  %v32867_v34 = vld [vmem:[%s41723_s1 + $0x3670] sm:$0xff] }
 0x6b6   :  { %20983 = vmatpush.bf16.msrb.mxu0 %v32823_v0  ;;  %v20458_v61 = vadd.f32 %v39717_v55, %v20444_v54  ;;  %v32874_v0 = vld [vmem:[%s41723_s1 + $0x36a8] sm:$0xff]  ;;  %v30976_v54 = vld [vmem:[%s41724_s0 + $0x364] sm:$0xf] }
 0x6b7   :  { %21011 = vmatpush.bf16.msrb.mxu2 %v32839_v56  ;;  %v40430_v56 = vpop.f32.mrf.mxu3  ;;  %v32866_v55 = vld [vmem:[%s41723_s1 + $0x3668] sm:$0xff] }
 0x6b8   :  { %20997 = vmatpush.bf16.msrb.mxu1 %v32831_v50  ;;  %v32882_v50 = vld [vmem:[%s41723_s1 + $0x36e8] sm:$0xff]  ;;  %v20472_v36 = vadd.f32 %v39725_v40, %v20458_v61  ;;  %v32865_v40 = vld [vmem:[%s41723_s1 + $0x3660] sm:$0xff] }
 0x6b9   :  { %21025 = vmatpush.bf16.msrb.mxu3 %v32847_v27 }
 0x6ba   :  { %20984 = vmatpush.bf16.msrb.mxu0 %v32822_v21  ;;  %v32857_v21 = vld [vmem:[%s41723_s1 + $0x3620] sm:$0xff]  ;;  %v20486_v4 = vadd.f32 %v39834_v51, %v20472_v36  ;;  %v32872_v51 = vld [vmem:[%s41723_s1 + $0x3698] sm:$0xff] }
 0x6bb   :  { %21012 = vmatpush.bf16.msrb.mxu2 %v32838_v53  ;;  %v32873_v53 = vld [vmem:[%s41723_s1 + $0x36a0] sm:$0xff] }
 0x6bc   :  { %20998 = vmatpush.bf16.msrb.mxu1 %v32830_v30 }
 0x6bd   :  { %21026 = vmatpush.bf16.msrb.mxu3 %v32846_v58  ;;  %v32856_v58 = vld [vmem:[%s41723_s1 + $0x3618] sm:$0xff] }
 0x6be   :  { %20985 = vmatpush.bf16.msrb.mxu0 %v32821_v1  ;;  %v20763_v27 = vpop.f32.mrf.mxu0 }
 0x6bf   :  { %21013 = vmatpush.bf16.msrb.mxu2 %v32837_v23  ;;  %v20764_v49 = vadd.f32 %v20763_v27, %v40326_v59  ;;  %v32881_v59 = vld [vmem:[%s41723_s1 + $0x36e0] sm:$0xff]  ;;  %v20500_v23 = vadd.f32 %v39842_v24, %v20486_v4  ;;  %v32855_v24 = vld [vmem:[%s41723_s1 + $0x3610] sm:$0xff]  ;;  %v32916_v27 = vld [vmem:[%s41723_s1 + $0x37f8] sm:$0xff] }
 0x6c0   :  { %20999 = vmatpush.bf16.msrb.mxu1 %v32829_v5  ;;  %v20777_v3 = vpop.f32.mrf.mxu1  ;;  %v32899_v4 = vld [vmem:[%s41723_s1 + $0x3770] sm:$0xff] }
 0x6c1   :  { %21027 = vmatpush.bf16.msrb.mxu3 %v32845_v41  ;;  %20986 = vmatmul.bf16.vlgmr.msrb.gmra.mxu0 %v22467_v35  ;;  %v20778_v30 = vadd.f32 %v20777_v3, %v20764_v49  ;;  %v20514_v42 = vadd.f32 %v39858_v15, %v20500_v23  ;;  %v32879_v15 = vld [vmem:[%s41723_s1 + $0x36d0] sm:$0xff]  ;;  %v32854_v41 = vld [vmem:[%s41723_s1 + $0x3608] sm:$0xff]  ;;  %v32908_v35 = vld [vmem:[%s41723_s1 + $0x37b8] sm:$0xff] }
 0x6c2   :  { %21034 = vmatpush.bf16.msra.mxu0 %v32860_v39  ;;  %21014 = vmatmul.bf16.vlgmr.msrb.gmra.mxu2 %v22475_v38  ;;  %v22482_v38 = vld [vmem:[%s41724_s0 + $0x360] sm:$0xf] }
 0x6c3   :  { %21062 = vmatpush.bf16.msra.mxu2 %v32876_v18  ;;  %21000 = vmatmul.bf16.vlgmr.msrb.gmra.mxu1 %v22471_v32  ;;  %v32864_v18 = vld [vmem:[%s41723_s1 + $0x3658] sm:$0xff]  ;;  %v20528_v5 = vadd.f32 %v39866_v11, %v20514_v42  ;;  %v32878_v11 = vld [vmem:[%s41723_s1 + $0x36c8] sm:$0xff] }
 0x6c4   :  { %21048 = vmatpush.bf16.msra.mxu1 %v32868_v37  ;;  %21028 = vmatmul.bf16.vlgmr.msrb.gmra.mxu3 %v22479_v6  ;;  %v31104_v37 = vld [vmem:[%s41724_s0 + $0x760] sm:$0x70]  ;;  %v31105_v32 = vld [vmem:[%s41724_s0 + $0x768] sm:$0x70] }
 0x6c5   :  { %21076 = vmatpush.bf16.msra.mxu3 %v32884_v63  ;;  %v20791_v1 = vpop.f32.mrf.mxu2  ;;  %v20542_v12 = vadd.f32 %v39975_v26, %v20528_v5  ;;  %v32892_v26 = vld [vmem:[%s41723_s1 + $0x3738] sm:$0xff]  ;;  %v22490_v63 = vld [vmem:[%s41724_s0 + $0x368] sm:$0xf] }
 0x6c6   :  { %21035 = vmatpush.bf16.msra.mxu0 %v32859_v31  ;;  %v20792_v39 = vadd.f32 %v20791_v1, %v20778_v30  ;;  %v32861_v31 = vld [vmem:[%s41723_s1 + $0x3640] sm:$0xff]  ;;  %v32915_v30 = vld [vmem:[%s41723_s1 + $0x37f0] sm:$0xff]  ;;  %v32914_v1 = vld [vmem:[%s41723_s1 + $0x37e8] sm:$0xff] }
 0x6c7   :  { %21063 = vmatpush.bf16.msra.mxu2 %v32875_v17  ;;  %v20805_v52 = vpop.f32.mrf.mxu3  ;;  %v20556_v6 = vadd.f32 %v39983_v20, %v20542_v12  ;;  %v32877_v17 = vld [vmem:[%s41723_s1 + $0x36c0] sm:$0xff]  ;;  %v30977_v20 = vld [vmem:[%s41724_s0 + $0x36c] sm:$0xf]  ;;  %v32912_v12 = vld [vmem:[%s41723_s1 + $0x37d8] sm:$0xff] }
 0x6c8   :  { %21049 = vmatpush.bf16.msra.mxu1 %v32867_v34  ;;  %v40467_v22 = vadd.f32 %v20805_v52, %v20792_v39  ;;  %v22484_v34 = vld [vmem:[%s41724_s0 + $0x764] sm:$0x70]  ;;  %v32905_v52 = vld [vmem:[%s41723_s1 + $0x37a0] sm:$0xff] }
 0x6c9   :  { %21077 = vmatpush.bf16.msra.mxu3 %v32883_v28  ;;  %v22492_v28 = vld [vmem:[%s41724_s0 + $0x76c] sm:$0x70]  ;;  %v20570_v61 = vadd.f32 %v39999_v46, %v20556_v6  ;;  %v22487_v36 = vor.u32 %v30976_v54, %v22484_v34  ;;  %v32885_v6 = vld [vmem:[%s41723_s1 + $0x3700] sm:$0xff]  ;;  %v31106_v34 = vld [vmem:[%s41724_s0 + $0x770] sm:$0x70] }
 0x6ca   :  { %21036 = vmatpush.bf16.msra.mxu0 %v32858_v14  ;;  %v22483_v14 = vor.u32 %v31104_v37, %v22482_v38  ;;  %v22495_v49 = vor.u32 %v30977_v20, %v22492_v28  ;;  %v32891_v46 = vld [vmem:[%s41723_s1 + $0x3730] sm:$0xff]  ;;  %v32886_v38 = vld [vmem:[%s41723_s1 + $0x3708] sm:$0xff]  ;;  %v22506_v20 = vld [vmem:[%s41724_s0 + $0x378] sm:$0xf] }
 0x6cb   :  { %21064 = vmatpush.bf16.msra.mxu2 %v32874_v0  ;;  %v22491_v0 = vor.u32 %v31105_v32, %v22490_v63  ;;  %v20584_v3 = vadd.f32 %v40007_v13, %v20570_v61  ;;  %v32890_v13 = vld [vmem:[%s41723_s1 + $0x3728] sm:$0xff]  ;;  %v22498_v54 = vld [vmem:[%s41724_s0 + $0x370] sm:$0xf]  ;;  %v31107_v28 = vld [vmem:[%s41724_s0 + $0x778] sm:$0x70] }
 0x6cc   :  { %21050 = vmatpush.bf16.msra.mxu1 %v32866_v55  ;;  %v40539_v55 = vpop.f32.mrf.mxu0  ;;  %v32902_v37 = vld [vmem:[%s41723_s1 + $0x3788] sm:$0xff] }
 0x6cd   :  { %21078 = vmatpush.bf16.msra.mxu3 %v32882_v50  ;;  %v32900_v50 = vld [vmem:[%s41723_s1 + $0x3778] sm:$0xff]  ;;  %v32894_v32 = vld [vmem:[%s41723_s1 + $0x3748] sm:$0xff] }
 0x6ce   :  { %21037 = vmatpush.bf16.msra.mxu0 %v32857_v21  ;;  %v40547_v21 = vpop.f32.mrf.mxu1 }
 0x6cf   :  { %21065 = vmatpush.bf16.msra.mxu2 %v32873_v53  ;;  %v32907_v53 = vld [vmem:[%s41723_s1 + $0x37b0] sm:$0xff] }
 0x6d0   :  { %21051 = vmatpush.bf16.msra.mxu1 %v32865_v40  ;;  %v20598_v40 = vadd.f32 %v40116_v43, %v20584_v3  ;;  %v32898_v43 = vld [vmem:[%s41723_s1 + $0x3768] sm:$0xff] }
 0x6d1   :  { %21079 = vmatpush.bf16.msra.mxu3 %v32881_v59  ;;  %v40563_v59 = vpop.f32.mrf.mxu2 }
 0x6d2   :  { %21038 = vmatpush.bf16.msra.mxu0 %v32856_v58  ;;  %v32906_v58 = vld [vmem:[%s41723_s1 + $0x37a8] sm:$0xff]  ;;  %v20612_v39 = vadd.f32 %v40124_v29, %v20598_v40  ;;  %v32897_v29 = vld [vmem:[%s41723_s1 + $0x3760] sm:$0xff] }
 0x6d3   :  { %21066 = vmatpush.bf16.msra.mxu2 %v32872_v51  ;;  %v40571_v51 = vpop.f32.mrf.mxu3 }
 0x6d4   :  { %21052 = vmatpush.bf16.msra.mxu1 %v32864_v18 }
 0x6d5   :  { %21080 = vmatpush.bf16.msra.mxu3 %v32880_v16  ;;  %v32889_v16 = vld [vmem:[%s41723_s1 + $0x3720] sm:$0xff] }
 0x6d6   :  { %21039 = vmatpush.bf16.msra.mxu0 %v32855_v24  ;;  %v20626_v24 = vadd.f32 %v40140_v47, %v20612_v39  ;;  %v32904_v47 = vld [vmem:[%s41723_s1 + $0x3798] sm:$0xff]  ;;  %v32947_v39 = vld [vmem:[%s41723_s1 + $0x38f0] sm:$0xff] }
 0x6d7   :  { %21067 = vmatpush.bf16.msra.mxu2 %v32871_v60 }
 0x6d8   :  { %21053 = vmatpush.bf16.msra.mxu1 %v32863_v57  ;;  %v32888_v57 = vld [vmem:[%s41723_s1 + $0x3718] sm:$0xff]  ;;  %v20640_v5 = vadd.f32 %v40148_v48, %v20626_v24  ;;  %v32887_v48 = vld [vmem:[%s41723_s1 + $0x3710] sm:$0xff]  ;;  %v32946_v24 = vld [vmem:[%s41723_s1 + $0x38e8] sm:$0xff] }
 0x6d9   :  { %21081 = vmatpush.bf16.msra.mxu3 %v32879_v15 }
 0x6da   :  { %21040 = vmatpush.bf16.msra.mxu0 %v32854_v41 }
 0x6db   :  { %21068 = vmatpush.bf16.msra.mxu2 %v32870_v2  ;;  %v32896_v2 = vld [vmem:[%s41723_s1 + $0x3758] sm:$0xff] }
 0x6dc   :  { %21054 = vmatpush.bf16.msra.mxu1 %v32862_v7 }
 0x6dd   :  { %21082 = vmatpush.bf16.msra.mxu3 %v32878_v11  ;;  %v20654_v11 = vadd.f32 %v40257_v45, %v20640_v5  ;;  %v32911_v45 = vld [vmem:[%s41723_s1 + $0x37d0] sm:$0xff] }
 0x6de   :  { %21041 = vmatpush.bf16.msra.mxu0 %v32853_v10  ;;  %v20819_v23 = vpop.f32.mrf.mxu0 }
 0x6df   :  { %21069 = vmatpush.bf16.msra.mxu2 %v32869_v19  ;;  %v20820_v18 = vadd.f32 %v20819_v23, %v40467_v22  ;;  %v32913_v22 = vld [vmem:[%s41723_s1 + $0x37e0] sm:$0xff]  ;;  %v32903_v19 = vld [vmem:[%s41723_s1 + $0x3790] sm:$0xff] }
 0x6e0   :  { %21055 = vmatpush.bf16.msra.mxu1 %v32861_v31  ;;  %v20833_v42 = vpop.f32.mrf.mxu1  ;;  %v32901_v31 = vld [vmem:[%s41723_s1 + $0x3780] sm:$0xff]  ;;  %v32931_v23 = vld [vmem:[%s41723_s1 + $0x3870] sm:$0xff] }
 0x6e1   :  { %21083 = vmatpush.bf16.msra.mxu3 %v32877_v17  ;;  %21042 = vmatmul.bf16.vlgmr.msra.gmra.mxu0 %v22483_v14  ;;  %v20834_v60 = vadd.f32 %v20833_v42, %v20820_v18  ;;  %v32940_v17 = vld [vmem:[%s41723_s1 + $0x38b8] sm:$0xff]  ;;  %v32893_v14 = vld [vmem:[%s41723_s1 + $0x3740] sm:$0xff] }
 0x6e2   :  { %21090 = vmatpush.bf16.msrb.mxu0 %v32892_v26  ;;  %21070 = vmatmul.bf16.vlgmr.msra.gmra.mxu2 %v22491_v0  ;;  %v32895_v26 = vld [vmem:[%s41723_s1 + $0x3750] sm:$0xff]  ;;  %v32909_v0 = vld [vmem:[%s41723_s1 + $0x37c0] sm:$0xff] }
 0x6e3   :  { %21118 = vmatpush.bf16.msrb.mxu2 %v32908_v35  ;;  %21056 = vmatmul.bf16.vlgmr.msra.gmra.mxu1 %v22487_v36  ;;  %v20668_v35 = vadd.f32 %v40265_v9, %v20654_v11  ;;  %v32910_v9 = vld [vmem:[%s41723_s1 + $0x37c8] sm:$0xff]  ;;  %v22508_v36 = vld [vmem:[%s41724_s0 + $0x77c] sm:$0x70] }
 0x6e4   :  { %21104 = vmatpush.bf16.msrb.mxu1 %v32900_v50  ;;  %21084 = vmatmul.bf16.vlgmr.msra.gmra.mxu3 %v22495_v49  ;;  %v30978_v50 = vld [vmem:[%s41724_s0 + $0x374] sm:$0xf] }
 0x6e5   :  { %21132 = vmatpush.bf16.msrb.mxu3 %v32916_v27  ;;  %v20847_v15 = vpop.f32.mrf.mxu2  ;;  %v20682_v63 = vadd.f32 %v40281_v33, %v20668_v35  ;;  %v32924_v33 = vld [vmem:[%s41723_s1 + $0x3838] sm:$0xff] }
 0x6e6   :  { %21091 = vmatpush.bf16.msrb.mxu0 %v32891_v46  ;;  %v20848_v41 = vadd.f32 %v20847_v15, %v20834_v60  ;;  %v22500_v27 = vld [vmem:[%s41724_s0 + $0x774] sm:$0x70]  ;;  %v22499_v46 = vor.u32 %v31106_v34, %v22498_v54  ;;  %v40680_v3 = vpop.f32.mrf.mxu0 }
 0x6e7   :  { %21119 = vmatpush.bf16.msrb.mxu2 %v32907_v53  ;;  %v20861_v7 = vpop.f32.mrf.mxu3  ;;  %v20696_v61 = vadd.f32 %v40289_v62, %v20682_v63  ;;  %v30979_v62 = vld [vmem:[%s41724_s0 + $0x37c] sm:$0xf]  ;;  %v22507_v53 = vor.u32 %v31107_v28, %v22506_v20  ;;  %v22503_v40 = vor.u32 %v30978_v50, %v22500_v27  ;;  %v22514_v20 = vld [vmem:[%s41724_s0 + $0x380] sm:$0xf]  ;;  %v31108_v28 = vld [vmem:[%s41724_s0 + $0x780] sm:$0x70] }
 0x6e8   :  { %21105 = vmatpush.bf16.msrb.mxu1 %v32899_v4  ;;  %v40608_v10 = vadd.f32 %v20861_v7, %v20848_v41  ;;  %v32932_v4 = vld [vmem:[%s41723_s1 + $0x3878] sm:$0xff]  ;;  %v32925_v50 = vld [vmem:[%s41723_s1 + $0x3840] sm:$0xff] }
 0x6e9   :  { %21133 = vmatpush.bf16.msrb.mxu3 %v32915_v30  ;;  %v20710_v49 = vadd.f32 %v40398_v44, %v20696_v61  ;;  %v32948_v30 = vld [vmem:[%s41723_s1 + $0x38f8] sm:$0xff]  ;;  %v32923_v44 = vld [vmem:[%s41723_s1 + $0x3830] sm:$0xff]  ;;  %v22522_v61 = vld [vmem:[%s41724_s0 + $0x388] sm:$0xf] }
 0x6ea   :  { %21092 = vmatpush.bf16.msrb.mxu0 %v32890_v13  ;;  %v22511_v13 = vor.u32 %v30979_v62, %v22508_v36  ;;  %v32956_v54 = vld [vmem:[%s41723_s1 + $0x3938] sm:$0xff]  ;;  %v32941_v27 = vld [vmem:[%s41723_s1 + $0x38c0] sm:$0xff]  ;;  %v22516_v36 = vld [vmem:[%s41724_s0 + $0x784] sm:$0x70] }
 0x6eb   :  { %21120 = vmatpush.bf16.msrb.mxu2 %v32906_v58  ;;  %v40688_v58 = vpop.f32.mrf.mxu1  ;;  %v32972_v34 = vld [vmem:[%s41723_s1 + $0x39b8] sm:$0xff]  ;;  %v30980_v62 = vld [vmem:[%s41724_s0 + $0x384] sm:$0xf] }
 0x6ec   :  { %21106 = vmatpush.bf16.msrb.mxu1 %v32898_v43  ;;  %v32939_v43 = vld [vmem:[%s41723_s1 + $0x38b0] sm:$0xff] }
 0x6ed   :  { %21134 = vmatpush.bf16.msrb.mxu3 %v32914_v1  ;;  %v20724_v1 = vadd.f32 %v40406_v8, %v20710_v49  ;;  %v32922_v8 = vld [vmem:[%s41723_s1 + $0x3828] sm:$0xff] }
 0x6ee   :  { %21093 = vmatpush.bf16.msrb.mxu0 %v32889_v16  ;;  %v40704_v16 = vpop.f32.mrf.mxu2  ;;  %v30981_v49 = vld [vmem:[%s41724_s0 + $0x38c] sm:$0xf] }
 0x6ef   :  { %21121 = vmatpush.bf16.msrb.mxu2 %v32905_v52  ;;  %v20738_v18 = vadd.f32 %v40422_v25, %v20724_v1  ;;  %v32938_v52 = vld [vmem:[%s41723_s1 + $0x38a8] sm:$0xff]  ;;  %v40712_v42 = vpop.f32.mrf.mxu3  ;;  %v32955_v1 = vld [vmem:[%s41723_s1 + $0x3930] sm:$0xff] }
 0x6f0   :  { %21107 = vmatpush.bf16.msrb.mxu1 %v32897_v29  ;;  %v32930_v25 = vld [vmem:[%s41723_s1 + $0x3868] sm:$0xff] }
 0x6f1   :  { %21135 = vmatpush.bf16.msrb.mxu3 %v32913_v22  ;;  %v20752_v29 = vadd.f32 %v40430_v56, %v20738_v18  ;;  %v32929_v56 = vld [vmem:[%s41723_s1 + $0x3860] sm:$0xff]  ;;  %v32963_v18 = vld [vmem:[%s41723_s1 + $0x3970] sm:$0xff] }
 0x6f2   :  { %21094 = vmatpush.bf16.msrb.mxu0 %v32888_v57  ;;  %v32921_v57 = vld [vmem:[%s41723_s1 + $0x3820] sm:$0xff] }
 0x6f3   :  { %21122 = vmatpush.bf16.msrb.mxu2 %v32904_v47  ;;  %v32937_v47 = vld [vmem:[%s41723_s1 + $0x38a0] sm:$0xff]  ;;  %v20766_v5 = vadd.f32 %v40539_v55, %v20752_v29  ;;  %v32936_v55 = vld [vmem:[%s41723_s1 + $0x3898] sm:$0xff]  ;;  %v32978_v29 = vld [vmem:[%s41723_s1 + $0x39e8] sm:$0xff] }
 0x6f4   :  { %21108 = vmatpush.bf16.msrb.mxu1 %v32896_v2  ;;  %v32945_v2 = vld [vmem:[%s41723_s1 + $0x38e0] sm:$0xff] }
 0x6f5   :  { %21136 = vmatpush.bf16.msrb.mxu3 %v32912_v12  ;;  %v32920_v12 = vld [vmem:[%s41723_s1 + $0x3818] sm:$0xff]  ;;  %v20780_v11 = vadd.f32 %v40547_v21, %v20766_v5  ;;  %v32919_v21 = vld [vmem:[%s41723_s1 + $0x3810] sm:$0xff]  ;;  %v32969_v5 = vld [vmem:[%s41723_s1 + $0x39a0] sm:$0xff] }
 0x6f6   :  { %21095 = vmatpush.bf16.msrb.mxu0 %v32887_v48  ;;  %v32928_v48 = vld [vmem:[%s41723_s1 + $0x3858] sm:$0xff] }
 0x6f7   :  { %21123 = vmatpush.bf16.msrb.mxu2 %v32903_v19  ;;  %v32944_v19 = vld [vmem:[%s41723_s1 + $0x38d8] sm:$0xff] }
 0x6f8   :  { %21109 = vmatpush.bf16.msrb.mxu1 %v32895_v26 }
 0x6f9   :  { %21137 = vmatpush.bf16.msrb.mxu3 %v32911_v45  ;;  %v20794_v45 = vadd.f32 %v40563_v59, %v20780_v11  ;;  %v32943_v59 = vld [vmem:[%s41723_s1 + $0x38d0] sm:$0xff]  ;;  %v32968_v11 = vld [vmem:[%s41723_s1 + $0x3998] sm:$0xff] }
 0x6fa   :  { %21096 = vmatpush.bf16.msrb.mxu0 %v32886_v38  ;;  %v32935_v38 = vld [vmem:[%s41723_s1 + $0x3890] sm:$0xff] }
 0x6fb   :  { %21124 = vmatpush.bf16.msrb.mxu2 %v32902_v37  ;;  %v32927_v37 = vld [vmem:[%s41723_s1 + $0x3850] sm:$0xff]  ;;  %v20808_v63 = vadd.f32 %v40571_v51, %v20794_v45  ;;  %v32942_v51 = vld [vmem:[%s41723_s1 + $0x38c8] sm:$0xff]  ;;  %v32976_v45 = vld [vmem:[%s41723_s1 + $0x39d8] sm:$0xff] }
 0x6fc   :  { %21110 = vmatpush.bf16.msrb.mxu1 %v32894_v32  ;;  %v32918_v32 = vld [vmem:[%s41723_s1 + $0x3808] sm:$0xff] }
 0x6fd   :  { %21138 = vmatpush.bf16.msrb.mxu3 %v32910_v9  ;;  %v32934_v9 = vld [vmem:[%s41723_s1 + $0x3888] sm:$0xff] }
 0x6fe   :  { %21097 = vmatpush.bf16.msrb.mxu0 %v32885_v6  ;;  %v20875_v60 = vpop.f32.mrf.mxu0  ;;  %v20822_v6 = vadd.f32 %v40680_v3, %v20808_v63  ;;  %v22515_v3 = vor.u32 %v31108_v28, %v22514_v20  ;;  %v32967_v63 = vld [vmem:[%s41723_s1 + $0x3990] sm:$0xff]  ;;  %v32974_v20 = vld [vmem:[%s41723_s1 + $0x39c8] sm:$0xff] }
 0x6ff   :  { %21125 = vmatpush.bf16.msrb.mxu2 %v32901_v31  ;;  %v20876_v22 = vadd.f32 %v20875_v60, %v40608_v10  ;;  %v32926_v31 = vld [vmem:[%s41723_s1 + $0x3848] sm:$0xff] }
 0x700   :  { %21111 = vmatpush.bf16.msrb.mxu1 %v32893_v14  ;;  %v20889_v15 = vpop.f32.mrf.mxu1  ;;  %v31109_v14 = vld [vmem:[%s41724_s0 + $0x788] sm:$0x70] }
 0x701   :  { %21139 = vmatpush.bf16.msrb.mxu3 %v32909_v0  ;;  %21098 = vmatmul.bf16.vlgmr.msrb.gmra.mxu0 %v22499_v46  ;;  %v20890_v41 = vadd.f32 %v20889_v15, %v20876_v22  ;;  %v20836_v0 = vadd.f32 %v40688_v58, %v20822_v6  ;;  %v22524_v46 = vld [vmem:[%s41724_s0 + $0x78c] sm:$0x70]  ;;  %v22519_v58 = vor.u32 %v30980_v62, %v22516_v36  ;;  %v32962_v60 = vld [vmem:[%s41723_s1 + $0x3968] sm:$0xff]  ;;  %v32953_v15 = vld [vmem:[%s41723_s1 + $0x3920] sm:$0xff] }
 0x702   :  { %21146 = vmatpush.bf16.msra.mxu0 %v32924_v33  ;;  %21126 = vmatmul.bf16.vlgmr.msrb.gmra.mxu2 %v22507_v53  ;;  %v32917_v33 = vld [vmem:[%s41723_s1 + $0x3800] sm:$0xff]  ;;  %v32975_v6 = vld [vmem:[%s41723_s1 + $0x39d0] sm:$0xff] }
 0x703   :  { %21174 = vmatpush.bf16.msra.mxu2 %v32940_v17  ;;  %21112 = vmatmul.bf16.vlgmr.msrb.gmra.mxu1 %v22503_v40  ;;  %v32933_v17 = vld [vmem:[%s41723_s1 + $0x3880] sm:$0xff]  ;;  %v20850_v53 = vadd.f32 %v40704_v16, %v20836_v0  ;;  %v32964_v40 = vld [vmem:[%s41723_s1 + $0x3978] sm:$0xff]  ;;  %v32979_v16 = vld [vmem:[%s41723_s1 + $0x39f0] sm:$0xff] }
 0x704   :  { %21160 = vmatpush.bf16.msra.mxu1 %v32932_v4  ;;  %21140 = vmatmul.bf16.vlgmr.msrb.gmra.mxu3 %v22511_v13  ;;  %v22523_v4 = vor.u32 %v31109_v14, %v22522_v61  ;;  %v32980_v13 = vld [vmem:[%s41723_s1 + $0x39f8] sm:$0xff]  ;;  %v32949_v61 = vld [vmem:[%s41723_s1 + $0x3900] sm:$0xff]  ;;  %v22530_v62 = vld [vmem:[%s41724_s0 + $0x390] sm:$0xf] }
 0x705   :  { %21188 = vmatpush.bf16.msra.mxu3 %v32948_v30  ;;  %v20903_v7 = vpop.f32.mrf.mxu2  ;;  %v32965_v14 = vld [vmem:[%s41723_s1 + $0x3980] sm:$0xff]  ;;  %v31110_v36 = vld [vmem:[%s41724_s0 + $0x790] sm:$0x70] }
 0x706   :  { %21147 = vmatpush.bf16.msra.mxu0 %v32923_v44  ;;  %v20904_v10 = vadd.f32 %v20903_v7, %v20890_v41  ;;  %v20877_v30 = vpop.f32.mrf.mxu0  ;;  %v22527_v44 = vor.u32 %v30981_v49, %v22524_v46  ;;  %v32952_v7 = vld [vmem:[%s41723_s1 + $0x3918] sm:$0xff] }
 0x707   :  { %21175 = vmatpush.bf16.msra.mxu2 %v32939_v43  ;;  %v20917_v26 = vpop.f32.mrf.mxu3  ;;  %v22538_v49 = vld [vmem:[%s41724_s0 + $0x398] sm:$0xf]  ;;  %v31111_v46 = vld [vmem:[%s41724_s0 + $0x798] sm:$0x70] }
 0x708   :  { %21161 = vmatpush.bf16.msra.mxu1 %v32931_v23  ;;  %v40749_v35 = vadd.f32 %v20917_v26, %v20904_v10  ;;  %v20891_v43 = vpop.f32.mrf.mxu1  ;;  %v32971_v23 = vld [vmem:[%s41723_s1 + $0x39b0] sm:$0xff]  ;;  %v32960_v26 = vld [vmem:[%s41723_s1 + $0x3958] sm:$0xff] }
 0x709   :  { %21189 = vmatpush.bf16.msra.mxu3 %v32947_v39  ;;  %v20864_v39 = vadd.f32 %v40712_v42, %v20850_v53  ;;  %v32954_v42 = vld [vmem:[%s41723_s1 + $0x3928] sm:$0xff]  ;;  %v32957_v53 = vld [vmem:[%s41723_s1 + $0x3940] sm:$0xff] }
 0x70a   :  { %21148 = vmatpush.bf16.msra.mxu0 %v32922_v8 }
 0x70b   :  { %21176 = vmatpush.bf16.msra.mxu2 %v32938_v52  ;;  %v20878_v8 = vadd.f32 %v20877_v30, %v20864_v39  ;;  %v22532_v30 = vld [vmem:[%s41724_s0 + $0x794] sm:$0x70] }
 0x70c   :  { %21162 = vmatpush.bf16.msra.mxu1 %v32930_v25  ;;  %v32970_v25 = vld [vmem:[%s41723_s1 + $0x39a8] sm:$0xff] }
 0x70d   :  { %21190 = vmatpush.bf16.msra.mxu3 %v32946_v24  ;;  %v20905_v52 = vpop.f32.mrf.mxu2 }
 0x70e   :  { %21149 = vmatpush.bf16.msra.mxu0 %v32921_v57  ;;  %v20892_v57 = vadd.f32 %v20891_v43, %v20878_v8  ;;  %v32996_v43 = vld [vmem:[%s41723_s1 + $0x3a78] sm:$0xff]  ;;  %v32995_v8 = vld [vmem:[%s41723_s1 + $0x3a70] sm:$0xff] }
 0x70f   :  { %21177 = vmatpush.bf16.msra.mxu2 %v32937_v47  ;;  %v20919_v24 = vpop.f32.mrf.mxu3 }
 0x710   :  { %21163 = vmatpush.bf16.msra.mxu1 %v32929_v56  ;;  %v20906_v56 = vadd.f32 %v20905_v52, %v20892_v57  ;;  %v33011_v52 = vld [vmem:[%s41723_s1 + $0x3af0] sm:$0xff]  ;;  %v32985_v57 = vld [vmem:[%s41723_s1 + $0x3a20] sm:$0xff] }
 0x711   :  { %21191 = vmatpush.bf16.msra.mxu3 %v32945_v2 }
 0x712   :  { %21150 = vmatpush.bf16.msra.mxu0 %v32920_v12  ;;  %v32961_v12 = vld [vmem:[%s41723_s1 + $0x3960] sm:$0xff] }
 0x713   :  { %21178 = vmatpush.bf16.msra.mxu2 %v32936_v55  ;;  %v32977_v55 = vld [vmem:[%s41723_s1 + $0x39e0] sm:$0xff] }
 0x714   :  { %21164 = vmatpush.bf16.msra.mxu1 %v32928_v48  ;;  %v20920_v48 = vadd.f32 %v20919_v24, %v20906_v56  ;;  %v32994_v24 = vld [vmem:[%s41723_s1 + $0x3a68] sm:$0xff]  ;;  %v33009_v56 = vld [vmem:[%s41723_s1 + $0x3ae0] sm:$0xff] }
 0x715   :  { %21192 = vmatpush.bf16.msra.mxu3 %v32944_v19 }
 0x716   :  { %21151 = vmatpush.bf16.msra.mxu0 %v32919_v21 }
 0x717   :  { %21179 = vmatpush.bf16.msra.mxu2 %v32935_v38 }
 0x718   :  { %21165 = vmatpush.bf16.msra.mxu1 %v32927_v37 }
 0x719   :  { %21193 = vmatpush.bf16.msra.mxu3 %v32943_v59  ;;  %v32951_v59 = vld [vmem:[%s41723_s1 + $0x3910] sm:$0xff] }
 0x71a   :  { %21152 = vmatpush.bf16.msra.mxu0 %v32918_v32 }
 0x71b   :  { %21180 = vmatpush.bf16.msra.mxu2 %v32934_v9  ;;  %v32959_v9 = vld [vmem:[%s41723_s1 + $0x3950] sm:$0xff] }
 0x71c   :  { %21166 = vmatpush.bf16.msra.mxu1 %v32926_v31 }
 0x71d   :  { %21194 = vmatpush.bf16.msra.mxu3 %v32942_v51  ;;  %v32950_v51 = vld [vmem:[%s41723_s1 + $0x3908] sm:$0xff] }
 0x71e   :  { %21153 = vmatpush.bf16.msra.mxu0 %v32917_v33  ;;  %v20931_v22 = vpop.f32.mrf.mxu0  ;;  %v32966_v33 = vld [vmem:[%s41723_s1 + $0x3988] sm:$0xff] }
 0x71f   :  { %21181 = vmatpush.bf16.msra.mxu2 %v32933_v17  ;;  %v20932_v47 = vadd.f32 %v20931_v22, %v40749_v35 }
 0x720   :  { %21167 = vmatpush.bf16.msra.mxu1 %v32925_v50  ;;  %v20945_v41 = vpop.f32.mrf.mxu1  ;;  %v32988_v50 = vld [vmem:[%s41723_s1 + $0x3a38] sm:$0xff] }
 0x721   :  { %21195 = vmatpush.bf16.msra.mxu3 %v32941_v27  ;;  %21154 = vmatmul.bf16.vlgmr.msra.gmra.mxu0 %v22515_v3  ;;  %v20946_v2 = vadd.f32 %v20945_v41, %v20932_v47  ;;  %v33004_v27 = vld [vmem:[%s41723_s1 + $0x3ab8] sm:$0xff]  ;;  %v32973_v3 = vld [vmem:[%s41723_s1 + $0x39c0] sm:$0xff] }
 0x722   :  { %21202 = vmatpush.bf16.msrb.mxu0 %v32956_v54  ;;  %21182 = vmatmul.bf16.vlgmr.msra.gmra.mxu2 %v22523_v4  ;;  %v30982_v4 = vld [vmem:[%s41724_s0 + $0x394] sm:$0xf]  ;;  %v33001_v47 = vld [vmem:[%s41723_s1 + $0x3aa0] sm:$0xff] }
 0x723   :  { %21230 = vmatpush.bf16.msrb.mxu2 %v32972_v34  ;;  %21168 = vmatmul.bf16.vlgmr.msra.gmra.mxu1 %v22519_v58  ;;  %v32958_v34 = vld [vmem:[%s41723_s1 + $0x3948] sm:$0xff]  ;;  %v22531_v58 = vor.u32 %v31110_v36, %v22530_v62  ;;  %v32993_v41 = vld [vmem:[%s41723_s1 + $0x3a60] sm:$0xff] }
 0x724   :  { %21216 = vmatpush.bf16.msrb.mxu1 %v32964_v40  ;;  %21196 = vmatmul.bf16.vlgmr.msra.gmra.mxu3 %v22527_v44  ;;  %v30983_v40 = vld [vmem:[%s41724_s0 + $0x39c] sm:$0xf]  ;;  %v22539_v44 = vor.u32 %v31111_v46, %v22538_v49  ;;  %v32989_v62 = vld [vmem:[%s41723_s1 + $0x3a40] sm:$0xff]  ;;  %v22548_v46 = vld [vmem:[%s41724_s0 + $0x7a4] sm:$0x70] }
 0x725   :  { %21244 = vmatpush.bf16.msrb.mxu3 %v32980_v13  ;;  %v20959_v10 = vpop.f32.mrf.mxu2  ;;  %v22540_v13 = vld [vmem:[%s41724_s0 + $0x79c] sm:$0x70]  ;;  %v30984_v49 = vld [vmem:[%s41724_s0 + $0x3a4] sm:$0xf] }
 0x726   :  { %21203 = vmatpush.bf16.msrb.mxu0 %v32955_v1  ;;  %v20960_v19 = vadd.f32 %v20959_v10, %v20946_v2  ;;  %v20933_v35 = vpop.f32.mrf.mxu0  ;;  %v33012_v1 = vld [vmem:[%s41723_s1 + $0x3af8] sm:$0xff]  ;;  %v22543_v39 = vor.u32 %v30983_v40, %v22540_v13  ;;  %v33005_v36 = vld [vmem:[%s41723_s1 + $0x3ac0] sm:$0xff] }
 0x727   :  { %21231 = vmatpush.bf16.msrb.mxu2 %v32971_v23  ;;  %v20973_v21 = vpop.f32.mrf.mxu3  ;;  %v20934_v38 = vadd.f32 %v20933_v35, %v20920_v48  ;;  %v22535_v23 = vor.u32 %v30982_v4, %v22532_v30  ;;  %v32984_v2 = vld [vmem:[%s41723_s1 + $0x3a18] sm:$0xff]  ;;  %v32983_v35 = vld [vmem:[%s41723_s1 + $0x3a10] sm:$0xff] }
 0x728   :  { %21217 = vmatpush.bf16.msrb.mxu1 %v32963_v18  ;;  %v40877_v37 = vadd.f32 %v20973_v21, %v20960_v19  ;;  %v20947_v32 = vpop.f32.mrf.mxu1  ;;  %v32987_v18 = vld [vmem:[%s41723_s1 + $0x3a30] sm:$0xff]  ;;  %v33008_v10 = vld [vmem:[%s41723_s1 + $0x3ad8] sm:$0xff] }
 0x729   :  { %21245 = vmatpush.bf16.msrb.mxu3 %v32979_v16  ;;  %v20948_v31 = vadd.f32 %v20947_v32, %v20934_v38  ;;  %v33003_v16 = vld [vmem:[%s41723_s1 + $0x3ab0] sm:$0xff]  ;;  %v32982_v32 = vld [vmem:[%s41723_s1 + $0x3a08] sm:$0xff]  ;;  %v33028_v40 = vld [vmem:[%s41723_s1 + $0x3b78] sm:$0xff] }
 0x72a   :  { %21204 = vmatpush.bf16.msrb.mxu0 %v32954_v42  ;;  %v32986_v42 = vld [vmem:[%s41723_s1 + $0x3a28] sm:$0xff]  ;;  %v32999_v21 = vld [vmem:[%s41723_s1 + $0x3a90] sm:$0xff]  ;;  %v33044_v13 = vld [vmem:[%s41723_s1 + $0x3bf8] sm:$0xff] }
 0x72b   :  { %21232 = vmatpush.bf16.msrb.mxu2 %v32970_v25  ;;  %v33002_v25 = vld [vmem:[%s41723_s1 + $0x3aa8] sm:$0xff] }
 0x72c   :  { %21218 = vmatpush.bf16.msrb.mxu1 %v32962_v60  ;;  %v33010_v60 = vld [vmem:[%s41723_s1 + $0x3ae8] sm:$0xff] }
 0x72d   :  { %21246 = vmatpush.bf16.msrb.mxu3 %v32978_v29  ;;  %v20961_v17 = vpop.f32.mrf.mxu2 }
 0x72e   :  { %21205 = vmatpush.bf16.msrb.mxu0 %v32953_v15  ;;  %v20962_v54 = vadd.f32 %v20961_v17, %v20948_v31 }
 0x72f   :  { %21233 = vmatpush.bf16.msrb.mxu2 %v32969_v5  ;;  %v20975_v28 = vpop.f32.mrf.mxu3 }
 0x730   :  { %21219 = vmatpush.bf16.msrb.mxu1 %v32961_v12  ;;  %v40909_v0 = vadd.f32 %v20975_v28, %v20962_v54  ;;  %v33000_v12 = vld [vmem:[%s41723_s1 + $0x3a98] sm:$0xff]  ;;  %v32981_v54 = vld [vmem:[%s41723_s1 + $0x3a00] sm:$0xff] }
 0x731   :  { %21247 = vmatpush.bf16.msrb.mxu3 %v32977_v55  ;;  %v33020_v28 = vld [vmem:[%s41723_s1 + $0x3b38] sm:$0xff] }
 0x732   :  { %21206 = vmatpush.bf16.msrb.mxu0 %v32952_v7 }
 0x733   :  { %21234 = vmatpush.bf16.msrb.mxu2 %v32968_v11  ;;  %v32992_v11 = vld [vmem:[%s41723_s1 + $0x3a58] sm:$0xff] }
 0x734   :  { %21220 = vmatpush.bf16.msrb.mxu1 %v32960_v26 }
 0x735   :  { %21248 = vmatpush.bf16.msrb.mxu3 %v32976_v45 }
 0x736   :  { %21207 = vmatpush.bf16.msrb.mxu0 %v32951_v59  ;;  %v32991_v59 = vld [vmem:[%s41723_s1 + $0x3a50] sm:$0xff] }
 0x737   :  { %21235 = vmatpush.bf16.msrb.mxu2 %v32967_v63  ;;  %v33007_v63 = vld [vmem:[%s41723_s1 + $0x3ad0] sm:$0xff] }
 0x738   :  { %21221 = vmatpush.bf16.msrb.mxu1 %v32959_v9  ;;  %v32998_v9 = vld [vmem:[%s41723_s1 + $0x3a88] sm:$0xff] }
 0x739   :  { %21249 = vmatpush.bf16.msrb.mxu3 %v32975_v6 }
 0x73a   :  { %21208 = vmatpush.bf16.msrb.mxu0 %v32950_v51  ;;  %v32990_v51 = vld [vmem:[%s41723_s1 + $0x3a48] sm:$0xff] }
 0x73b   :  { %21236 = vmatpush.bf16.msrb.mxu2 %v32966_v33  ;;  %v33006_v33 = vld [vmem:[%s41723_s1 + $0x3ac8] sm:$0xff] }
 0x73c   :  { %21222 = vmatpush.bf16.msrb.mxu1 %v32958_v34  ;;  %v32997_v34 = vld [vmem:[%s41723_s1 + $0x3a80] sm:$0xff] }
 0x73d   :  { %21250 = vmatpush.bf16.msrb.mxu3 %v32974_v20 }
 0x73e   :  { %21209 = vmatpush.bf16.msrb.mxu0 %v32949_v61  ;;  %v20987_v29 = vpop.f32.mrf.mxu0  ;;  %v33036_v61 = vld [vmem:[%s41723_s1 + $0x3bb8] sm:$0xff] }
 0x73f   :  { %21237 = vmatpush.bf16.msrb.mxu2 %v32965_v14  ;;  %v20988_v22 = vadd.f32 %v20987_v29, %v40877_v37  ;;  %v22546_v14 = vld [vmem:[%s41724_s0 + $0x3a0] sm:$0xf] }
 0x740   :  { %21223 = vmatpush.bf16.msrb.mxu1 %v32957_v53  ;;  %v21001_v15 = vpop.f32.mrf.mxu1  ;;  %v30985_v53 = vld [vmem:[%s41724_s0 + $0x3ac] sm:$0xf] }
 0x741   :  { %21251 = vmatpush.bf16.msrb.mxu3 %v32973_v3  ;;  %21210 = vmatmul.bf16.vlgmr.msrb.gmra.mxu0 %v22531_v58  ;;  %v21002_v5 = vadd.f32 %v21001_v15, %v20988_v22  ;;  %v22556_v3 = vld [vmem:[%s41724_s0 + $0x7ac] sm:$0x70]  ;;  %v22551_v58 = vor.u32 %v30984_v49, %v22548_v46  ;;  %v33016_v15 = vld [vmem:[%s41723_s1 + $0x3b18] sm:$0xff] }
 0x742   :  { %21258 = vmatpush.bf16.msra.mxu0 %v32988_v50  ;;  %21238 = vmatmul.bf16.vlgmr.msrb.gmra.mxu2 %v22539_v44  ;;  %v22554_v50 = vld [vmem:[%s41724_s0 + $0x3a8] sm:$0xf]  ;;  %v22559_v44 = vor.u32 %v30985_v53, %v22556_v3  ;;  %v33060_v53 = vld [vmem:[%s41723_s1 + $0x3c78] sm:$0xff] }
 0x743   :  { %21286 = vmatpush.bf16.msra.mxu2 %v33004_v27  ;;  %21224 = vmatmul.bf16.vlgmr.msrb.gmra.mxu1 %v22535_v23  ;;  %v31113_v27 = vld [vmem:[%s41724_s0 + $0x7a8] sm:$0x70]  ;;  %v33027_v23 = vld [vmem:[%s41723_s1 + $0x3b70] sm:$0xff]  ;;  %v33076_v3 = vld [vmem:[%s41723_s1 + $0x3cf8] sm:$0xff] }
 0x744   :  { %21272 = vmatpush.bf16.msra.mxu1 %v32996_v43  ;;  %21252 = vmatmul.bf16.vlgmr.msrb.gmra.mxu3 %v22543_v39  ;;  %v22555_v30 = vor.u32 %v31113_v27, %v22554_v50  ;;  %v33019_v43 = vld [vmem:[%s41723_s1 + $0x3b30] sm:$0xff]  ;;  %v22564_v27 = vld [vmem:[%s41724_s0 + $0x7b4] sm:$0x70] }
 0x745   :  { %21300 = vmatpush.bf16.msra.mxu3 %v33012_v1  ;;  %v21015_v55 = vpop.f32.mrf.mxu2  ;;  %v33035_v1 = vld [vmem:[%s41723_s1 + $0x3bb0] sm:$0xff] }
 0x746   :  { %21259 = vmatpush.bf16.msra.mxu0 %v32987_v18  ;;  %v21016_v7 = vadd.f32 %v21015_v55, %v21002_v5  ;;  %v20989_v48 = vpop.f32.mrf.mxu0  ;;  %v33043_v39 = vld [vmem:[%s41723_s1 + $0x3bf0] sm:$0xff]  ;;  %v33018_v18 = vld [vmem:[%s41723_s1 + $0x3b28] sm:$0xff]  ;;  %v33032_v5 = vld [vmem:[%s41723_s1 + $0x3b98] sm:$0xff] }
 0x747   :  { %21287 = vmatpush.bf16.msra.mxu2 %v33003_v16  ;;  %v21029_v19 = vpop.f32.mrf.mxu3  ;;  %v20990_v26 = vadd.f32 %v20989_v48, %v40909_v0  ;;  %v31112_v0 = vld [vmem:[%s41724_s0 + $0x7a0] sm:$0x70]  ;;  %v33034_v16 = vld [vmem:[%s41723_s1 + $0x3ba8] sm:$0xff]  ;;  %v33015_v48 = vld [vmem:[%s41723_s1 + $0x3b10] sm:$0xff] }
 0x748   :  { %21273 = vmatpush.bf16.msra.mxu1 %v32995_v8  ;;  %v41003_v45 = vadd.f32 %v21029_v19, %v21016_v7  ;;  %v21003_v38 = vpop.f32.mrf.mxu1  ;;  %v22547_v4 = vor.u32 %v31112_v0, %v22546_v14  ;;  %v33026_v8 = vld [vmem:[%s41723_s1 + $0x3b68] sm:$0xff]  ;;  %v33031_v19 = vld [vmem:[%s41723_s1 + $0x3b90] sm:$0xff]  ;;  %v33021_v14 = vld [vmem:[%s41723_s1 + $0x3b40] sm:$0xff] }
 0x749   :  { %21301 = vmatpush.bf16.msra.mxu3 %v33011_v52  ;;  %v21004_v37 = vadd.f32 %v21003_v38, %v20990_v26  ;;  %v33042_v52 = vld [vmem:[%s41723_s1 + $0x3be8] sm:$0xff]  ;;  %v33037_v0 = vld [vmem:[%s41723_s1 + $0x3bc0] sm:$0xff]  ;;  %v30986_v50 = vld [vmem:[%s41724_s0 + $0x3b4] sm:$0xf] }
 0x74a   :  { %21260 = vmatpush.bf16.msra.mxu0 %v32986_v42  ;;  %v33014_v38 = vld [vmem:[%s41723_s1 + $0x3b08] sm:$0xff] }
 0x74b   :  { %21288 = vmatpush.bf16.msra.mxu2 %v33002_v25 }
 0x74c   :  { %21274 = vmatpush.bf16.msra.mxu1 %v32994_v24  ;;  %v33017_v24 = vld [vmem:[%s41723_s1 + $0x3b20] sm:$0xff] }
 0x74d   :  { %21302 = vmatpush.bf16.msra.mxu3 %v33010_v60  ;;  %v21017_v6 = vpop.f32.mrf.mxu2  ;;  %v33033_v60 = vld [vmem:[%s41723_s1 + $0x3ba0] sm:$0xff] }
 0x74e   :  { %21261 = vmatpush.bf16.msra.mxu0 %v32985_v57  ;;  %v21018_v31 = vadd.f32 %v21017_v6, %v21004_v37  ;;  %v33025_v57 = vld [vmem:[%s41723_s1 + $0x3b60] sm:$0xff]  ;;  %v33030_v37 = vld [vmem:[%s41723_s1 + $0x3b88] sm:$0xff] }
 0x74f   :  { %21289 = vmatpush.bf16.msra.mxu2 %v33001_v47  ;;  %v21031_v17 = vpop.f32.mrf.mxu3  ;;  %v33041_v47 = vld [vmem:[%s41723_s1 + $0x3be0] sm:$0xff] }
 0x750   :  { %21275 = vmatpush.bf16.msra.mxu1 %v32993_v41  ;;  %v41035_v20 = vadd.f32 %v21031_v17, %v21018_v31  ;;  %v33013_v31 = vld [vmem:[%s41723_s1 + $0x3b00] sm:$0xff]  ;;  %v33052_v17 = vld [vmem:[%s41723_s1 + $0x3c38] sm:$0xff] }
 0x751   :  { %21303 = vmatpush.bf16.msra.mxu3 %v33009_v56 }
 0x752   :  { %21262 = vmatpush.bf16.msra.mxu0 %v32984_v2  ;;  %v33024_v2 = vld [vmem:[%s41723_s1 + $0x3b58] sm:$0xff] }
 0x753   :  { %21290 = vmatpush.bf16.msra.mxu2 %v33000_v12  ;;  %v33040_v12 = vld [vmem:[%s41723_s1 + $0x3bd8] sm:$0xff] }
 0x754   :  { %21276 = vmatpush.bf16.msra.mxu1 %v32992_v11 }
 0x755   :  { %21304 = vmatpush.bf16.msra.mxu3 %v33008_v10 }
 0x756   :  { %21263 = vmatpush.bf16.msra.mxu0 %v32983_v35  ;;  %v33023_v35 = vld [vmem:[%s41723_s1 + $0x3b50] sm:$0xff] }
 0x757   :  { %21291 = vmatpush.bf16.msra.mxu2 %v32999_v21  ;;  %v33039_v21 = vld [vmem:[%s41723_s1 + $0x3bd0] sm:$0xff] }
 0x758   :  { %21277 = vmatpush.bf16.msra.mxu1 %v32991_v59 }
 0x759   :  { %21305 = vmatpush.bf16.msra.mxu3 %v33007_v63 }
 0x75a   :  { %21264 = vmatpush.bf16.msra.mxu0 %v32982_v32  ;;  %v33022_v32 = vld [vmem:[%s41723_s1 + $0x3b48] sm:$0xff] }
 0x75b   :  { %21292 = vmatpush.bf16.msra.mxu2 %v32998_v9  ;;  %v33038_v9 = vld [vmem:[%s41723_s1 + $0x3bc8] sm:$0xff] }
 0x75c   :  { %21278 = vmatpush.bf16.msra.mxu1 %v32990_v51  ;;  %v33029_v51 = vld [vmem:[%s41723_s1 + $0x3b80] sm:$0xff] }
 0x75d   :  { %21306 = vmatpush.bf16.msra.mxu3 %v33006_v33 }
 0x75e   :  { %21265 = vmatpush.bf16.msra.mxu0 %v32981_v54  ;;  %v21043_v42 = vpop.f32.mrf.mxu0  ;;  %v33068_v54 = vld [vmem:[%s41723_s1 + $0x3cb8] sm:$0xff] }
 0x75f   :  { %21293 = vmatpush.bf16.msra.mxu2 %v32997_v34  ;;  %v21044_v25 = vadd.f32 %v21043_v42, %v41003_v45  ;;  %v22562_v34 = vld [vmem:[%s41724_s0 + $0x3b0] sm:$0xf] }
 0x760   :  { %21279 = vmatpush.bf16.msra.mxu1 %v32989_v62  ;;  %v21057_v29 = vpop.f32.mrf.mxu1  ;;  %v30987_v62 = vld [vmem:[%s41724_s0 + $0x3bc] sm:$0xf] }
 0x761   :  { %21307 = vmatpush.bf16.msra.mxu3 %v33005_v36  ;;  %21266 = vmatmul.bf16.vlgmr.msra.gmra.mxu0 %v22547_v4  ;;  %v21058_v22 = vadd.f32 %v21057_v29, %v21044_v25  ;;  %v22572_v36 = vld [vmem:[%s41724_s0 + $0x7bc] sm:$0x70]  ;;  %v22567_v4 = vor.u32 %v30986_v50, %v22564_v27  ;;  %v33048_v29 = vld [vmem:[%s41723_s1 + $0x3c18] sm:$0xff] }
 0x762   :  { %21314 = vmatpush.bf16.msrb.mxu0 %v33020_v28  ;;  %21294 = vmatmul.bf16.vlgmr.msra.gmra.mxu2 %v22555_v30  ;;  %v22570_v28 = vld [vmem:[%s41724_s0 + $0x3b8] sm:$0xf]  ;;  %v22575_v30 = vor.u32 %v30987_v62, %v22572_v36 }
 0x763   :  { %21342 = vmatpush.bf16.msrb.mxu2 %v33036_v61  ;;  %21280 = vmatmul.bf16.vlgmr.msra.gmra.mxu1 %v22551_v58  ;;  %v31115_v61 = vld [vmem:[%s41724_s0 + $0x7b8] sm:$0x70]  ;;  %v33059_v58 = vld [vmem:[%s41723_s1 + $0x3c70] sm:$0xff] }
 0x764   :  { %21328 = vmatpush.bf16.msrb.mxu1 %v33028_v40  ;;  %21308 = vmatmul.bf16.vlgmr.msra.gmra.mxu3 %v22559_v44  ;;  %v22571_v46 = vor.u32 %v31115_v61, %v22570_v28  ;;  %v33051_v40 = vld [vmem:[%s41723_s1 + $0x3c30] sm:$0xff]  ;;  %v30988_v28 = vld [vmem:[%s41724_s0 + $0x3c4] sm:$0xf]  ;;  %v22580_v61 = vld [vmem:[%s41724_s0 + $0x7c4] sm:$0x70] }
 0x765   :  { %21356 = vmatpush.bf16.msrb.mxu3 %v33044_v13  ;;  %v21071_v41 = vpop.f32.mrf.mxu2  ;;  %v33067_v13 = vld [vmem:[%s41723_s1 + $0x3cb0] sm:$0xff]  ;;  %v33092_v62 = vld [vmem:[%s41723_s1 + $0x3d78] sm:$0xff] }
 0x766   :  { %21315 = vmatpush.bf16.msrb.mxu0 %v33019_v43  ;;  %v21072_v56 = vadd.f32 %v21071_v41, %v21058_v22  ;;  %v21045_v55 = vpop.f32.mrf.mxu0  ;;  %v33075_v44 = vld [vmem:[%s41723_s1 + $0x3cf0] sm:$0xff]  ;;  %v33050_v43 = vld [vmem:[%s41723_s1 + $0x3c28] sm:$0xff]  ;;  %v33064_v22 = vld [vmem:[%s41723_s1 + $0x3c98] sm:$0xff] }
 0x767   :  { %21343 = vmatpush.bf16.msrb.mxu2 %v33035_v1  ;;  %v21085_v7 = vpop.f32.mrf.mxu3  ;;  %v21046_v11 = vadd.f32 %v21045_v55, %v41035_v20  ;;  %v31114_v20 = vld [vmem:[%s41724_s0 + $0x7b0] sm:$0x70]  ;;  %v33066_v1 = vld [vmem:[%s41723_s1 + $0x3ca8] sm:$0xff]  ;;  %v33108_v36 = vld [vmem:[%s41723_s1 + $0x3df8] sm:$0xff] }
 0x768   :  { %21329 = vmatpush.bf16.msrb.mxu1 %v33027_v23  ;;  %v41129_v10 = vadd.f32 %v21085_v7, %v21072_v56  ;;  %v21059_v26 = vpop.f32.mrf.mxu1  ;;  %v22563_v49 = vor.u32 %v31114_v20, %v22562_v34  ;;  %v33058_v23 = vld [vmem:[%s41723_s1 + $0x3c68] sm:$0xff]  ;;  %v33047_v55 = vld [vmem:[%s41723_s1 + $0x3c10] sm:$0xff]  ;;  %v33053_v34 = vld [vmem:[%s41723_s1 + $0x3c40] sm:$0xff] }
 0x769   :  { %21357 = vmatpush.bf16.msrb.mxu3 %v33043_v39  ;;  %v21060_v45 = vadd.f32 %v21059_v26, %v21046_v11  ;;  %v33074_v39 = vld [vmem:[%s41723_s1 + $0x3ce8] sm:$0xff]  ;;  %v33063_v7 = vld [vmem:[%s41723_s1 + $0x3c90] sm:$0xff]  ;;  %v33069_v20 = vld [vmem:[%s41723_s1 + $0x3cc0] sm:$0xff] }
 0x76a   :  { %21316 = vmatpush.bf16.msrb.mxu0 %v33018_v18  ;;  %v33046_v26 = vld [vmem:[%s41723_s1 + $0x3c08] sm:$0xff] }
 0x76b   :  { %21344 = vmatpush.bf16.msrb.mxu2 %v33034_v16 }
 0x76c   :  { %21330 = vmatpush.bf16.msrb.mxu1 %v33026_v8  ;;  %v33049_v8 = vld [vmem:[%s41723_s1 + $0x3c20] sm:$0xff] }
 0x76d   :  { %21358 = vmatpush.bf16.msrb.mxu3 %v33042_v52  ;;  %v21073_v59 = vpop.f32.mrf.mxu2  ;;  %v33065_v52 = vld [vmem:[%s41723_s1 + $0x3ca0] sm:$0xff] }
 0x76e   :  { %21317 = vmatpush.bf16.msrb.mxu0 %v33017_v24  ;;  %v21074_v63 = vadd.f32 %v21073_v59, %v21060_v45  ;;  %v33057_v24 = vld [vmem:[%s41723_s1 + $0x3c60] sm:$0xff]  ;;  %v33062_v45 = vld [vmem:[%s41723_s1 + $0x3c88] sm:$0xff] }
 0x76f   :  { %21345 = vmatpush.bf16.msrb.mxu2 %v33033_v60  ;;  %v21087_v6 = vpop.f32.mrf.mxu3  ;;  %v33073_v60 = vld [vmem:[%s41723_s1 + $0x3ce0] sm:$0xff] }
 0x770   :  { %21331 = vmatpush.bf16.msrb.mxu1 %v33025_v57  ;;  %v41161_v33 = vadd.f32 %v21087_v6, %v21074_v63  ;;  %v33045_v63 = vld [vmem:[%s41723_s1 + $0x3c00] sm:$0xff]  ;;  %v33084_v6 = vld [vmem:[%s41723_s1 + $0x3d38] sm:$0xff] }
 0x771   :  { %21359 = vmatpush.bf16.msrb.mxu3 %v33041_v47 }
 0x772   :  { %21318 = vmatpush.bf16.msrb.mxu0 %v33016_v15  ;;  %v33056_v15 = vld [vmem:[%s41723_s1 + $0x3c58] sm:$0xff] }
 0x773   :  { %21346 = vmatpush.bf16.msrb.mxu2 %v33032_v5  ;;  %v33072_v5 = vld [vmem:[%s41723_s1 + $0x3cd8] sm:$0xff] }
 0x774   :  { %21332 = vmatpush.bf16.msrb.mxu1 %v33024_v2 }
 0x775   :  { %21360 = vmatpush.bf16.msrb.mxu3 %v33040_v12 }
 0x776   :  { %21319 = vmatpush.bf16.msrb.mxu0 %v33015_v48  ;;  %v33055_v48 = vld [vmem:[%s41723_s1 + $0x3c50] sm:$0xff] }
 0x777   :  { %21347 = vmatpush.bf16.msrb.mxu2 %v33031_v19  ;;  %v33071_v19 = vld [vmem:[%s41723_s1 + $0x3cd0] sm:$0xff] }
 0x778   :  { %21333 = vmatpush.bf16.msrb.mxu1 %v33023_v35 }
 0x779   :  { %21361 = vmatpush.bf16.msrb.mxu3 %v33039_v21 }
 0x77a   :  { %21320 = vmatpush.bf16.msrb.mxu0 %v33014_v38  ;;  %v33054_v38 = vld [vmem:[%s41723_s1 + $0x3c48] sm:$0xff] }
 0x77b   :  { %21348 = vmatpush.bf16.msrb.mxu2 %v33030_v37  ;;  %v33070_v37 = vld [vmem:[%s41723_s1 + $0x3cc8] sm:$0xff] }
 0x77c   :  { %21334 = vmatpush.bf16.msrb.mxu1 %v33022_v32  ;;  %v33061_v32 = vld [vmem:[%s41723_s1 + $0x3c80] sm:$0xff] }
 0x77d   :  { %21362 = vmatpush.bf16.msrb.mxu3 %v33038_v9 }
 0x77e   :  { %21321 = vmatpush.bf16.msrb.mxu0 %v33013_v31  ;;  %v21099_v18 = vpop.f32.mrf.mxu0  ;;  %v33100_v31 = vld [vmem:[%s41723_s1 + $0x3db8] sm:$0xff] }
 0x77f   :  { %21349 = vmatpush.bf16.msrb.mxu2 %v33029_v51  ;;  %v21100_v16 = vadd.f32 %v21099_v18, %v41129_v10  ;;  %v22578_v51 = vld [vmem:[%s41724_s0 + $0x3c0] sm:$0xf] }
 0x780   :  { %21335 = vmatpush.bf16.msrb.mxu1 %v33021_v14  ;;  %v21113_v42 = vpop.f32.mrf.mxu1  ;;  %v30989_v14 = vld [vmem:[%s41724_s0 + $0x3cc] sm:$0xf]  ;;  %v33089_v18 = vld [vmem:[%s41723_s1 + $0x3d60] sm:$0xff] }
 0x781   :  { %21363 = vmatpush.bf16.msrb.mxu3 %v33037_v0  ;;  %21322 = vmatmul.bf16.vlgmr.msrb.gmra.mxu0 %v22563_v49  ;;  %v21114_v25 = vadd.f32 %v21113_v42, %v21100_v16  ;;  %v22588_v0 = vld [vmem:[%s41724_s0 + $0x7cc] sm:$0x70]  ;;  %v22583_v49 = vor.u32 %v30988_v28, %v22580_v61  ;;  %v33105_v16 = vld [vmem:[%s41723_s1 + $0x3de0] sm:$0xff]  ;;  %v33088_v42 = vld [vmem:[%s41723_s1 + $0x3d58] sm:$0xff] }
 0x782   :  { %21370 = vmatpush.bf16.msra.mxu0 %v33052_v17  ;;  %21350 = vmatmul.bf16.vlgmr.msrb.gmra.mxu2 %v22571_v46  ;;  %v22586_v17 = vld [vmem:[%s41724_s0 + $0x3c8] sm:$0xf]  ;;  %v22591_v46 = vor.u32 %v30989_v14, %v22588_v0  ;;  %v33113_v14 = vld [vmem:[%s41723_s1 + $0x3e20] sm:$0xff] }
 0x783   :  { %21398 = vmatpush.bf16.msra.mxu2 %v33068_v54  ;;  %21336 = vmatmul.bf16.vlgmr.msrb.gmra.mxu1 %v22567_v4  ;;  %v31117_v54 = vld [vmem:[%s41724_s0 + $0x7c8] sm:$0x70]  ;;  %v33091_v4 = vld [vmem:[%s41723_s1 + $0x3d70] sm:$0xff]  ;;  %v33129_v0 = vld [vmem:[%s41723_s1 + $0x3ea0] sm:$0xff] }
 0x784   :  { %21384 = vmatpush.bf16.msra.mxu1 %v33060_v53  ;;  %21364 = vmatmul.bf16.vlgmr.msrb.gmra.mxu3 %v22575_v30  ;;  %v22587_v27 = vor.u32 %v31117_v54, %v22586_v17  ;;  %v33083_v53 = vld [vmem:[%s41723_s1 + $0x3d30] sm:$0xff]  ;;  %v33122_v28 = vld [vmem:[%s41723_s1 + $0x3e68] sm:$0xff] }
 0x785   :  { %21412 = vmatpush.bf16.msra.mxu3 %v33076_v3  ;;  %v21127_v57 = vpop.f32.mrf.mxu2  ;;  %v33099_v3 = vld [vmem:[%s41723_s1 + $0x3db0] sm:$0xff]  ;;  %v33138_v61 = vld [vmem:[%s41723_s1 + $0x3ee8] sm:$0xff] }
 0x786   :  { %21371 = vmatpush.bf16.msra.mxu0 %v33051_v40  ;;  %v21128_v47 = vadd.f32 %v21127_v57, %v21114_v25  ;;  %v21101_v41 = vpop.f32.mrf.mxu0  ;;  %v33107_v30 = vld [vmem:[%s41723_s1 + $0x3df0] sm:$0xff]  ;;  %v33082_v40 = vld [vmem:[%s41723_s1 + $0x3d28] sm:$0xff]  ;;  %v33104_v25 = vld [vmem:[%s41723_s1 + $0x3dd8] sm:$0xff] }
 0x787   :  { %21399 = vmatpush.bf16.msra.mxu2 %v33067_v13  ;;  %v21141_v56 = vpop.f32.mrf.mxu3  ;;  %v21102_v2 = vadd.f32 %v21101_v41, %v41161_v33  ;;  %v31116_v33 = vld [vmem:[%s41724_s0 + $0x7c0] sm:$0x70]  ;;  %v33098_v13 = vld [vmem:[%s41723_s1 + $0x3da8] sm:$0xff]  ;;  %v33087_v57 = vld [vmem:[%s41723_s1 + $0x3d50] sm:$0xff] }
 0x788   :  { %21385 = vmatpush.bf16.msra.mxu1 %v33059_v58  ;;  %v41255_v12 = vadd.f32 %v21141_v56, %v21128_v47  ;;  %v21115_v11 = vpop.f32.mrf.mxu1  ;;  %v22579_v50 = vor.u32 %v31116_v33, %v22578_v51  ;;  %v33090_v58 = vld [vmem:[%s41723_s1 + $0x3d68] sm:$0xff]  ;;  %v33103_v47 = vld [vmem:[%s41723_s1 + $0x3dd0] sm:$0xff] }
 0x789   :  { %21413 = vmatpush.bf16.msra.mxu3 %v33075_v44  ;;  %v21116_v10 = vadd.f32 %v21115_v11, %v21102_v2  ;;  %v33106_v44 = vld [vmem:[%s41723_s1 + $0x3de8] sm:$0xff]  ;;  %v33077_v2 = vld [vmem:[%s41723_s1 + $0x3d00] sm:$0xff]  ;;  %v22594_v11 = vld [vmem:[%s41724_s0 + $0x3d0] sm:$0xf] }
 0x78a   :  { %21372 = vmatpush.bf16.msra.mxu0 %v33050_v43  ;;  %v33086_v41 = vld [vmem:[%s41723_s1 + $0x3d48] sm:$0xff]  ;;  %v33115_v51 = vld [vmem:[%s41723_s1 + $0x3e30] sm:$0xff] }
 0x78b   :  { %21400 = vmatpush.bf16.msra.mxu2 %v33066_v1  ;;  %v33102_v56 = vld [vmem:[%s41723_s1 + $0x3dc8] sm:$0xff]  ;;  %v33131_v33 = vld [vmem:[%s41723_s1 + $0x3eb0] sm:$0xff] }
 0x78c   :  { %21386 = vmatpush.bf16.msra.mxu1 %v33058_v23  ;;  %v33081_v23 = vld [vmem:[%s41723_s1 + $0x3d20] sm:$0xff]  ;;  %v33123_v17 = vld [vmem:[%s41723_s1 + $0x3e70] sm:$0xff] }
 0x78d   :  { %21414 = vmatpush.bf16.msra.mxu3 %v33074_v39  ;;  %v21129_v35 = vpop.f32.mrf.mxu2  ;;  %v33097_v39 = vld [vmem:[%s41723_s1 + $0x3da0] sm:$0xff]  ;;  %v33139_v54 = vld [vmem:[%s41723_s1 + $0x3ef0] sm:$0xff] }
 0x78e   :  { %21373 = vmatpush.bf16.msra.mxu0 %v33049_v8  ;;  %v21130_v21 = vadd.f32 %v21129_v35, %v21116_v10  ;;  %v33080_v8 = vld [vmem:[%s41723_s1 + $0x3d18] sm:$0xff]  ;;  %v31118_v10 = vld [vmem:[%s41724_s0 + $0x7d0] sm:$0x70] }
 0x78f   :  { %21401 = vmatpush.bf16.msra.mxu2 %v33065_v52  ;;  %v21143_v59 = vpop.f32.mrf.mxu3  ;;  %v33096_v52 = vld [vmem:[%s41723_s1 + $0x3d98] sm:$0xff]  ;;  %v30990_v35 = vld [vmem:[%s41724_s0 + $0x3d4] sm:$0xf] }
 0x790   :  { %21387 = vmatpush.bf16.msra.mxu1 %v33057_v24  ;;  %v41287_v9 = vadd.f32 %v21143_v59, %v21130_v21  ;;  %v22596_v21 = vld [vmem:[%s41724_s0 + $0x7d4] sm:$0x70]  ;;  %v22595_v59 = vor.u32 %v31118_v10, %v22594_v11  ;;  %v33155_v11 = vld [vmem:[%s41723_s1 + $0x3f70] sm:$0xff] }
 0x791   :  { %21415 = vmatpush.bf16.msra.mxu3 %v33073_v60  ;;  %v33171_v10 = vld [vmem:[%s41723_s1 + $0x3ff0] sm:$0xff] }
 0x792   :  { %21374 = vmatpush.bf16.msra.mxu0 %v33048_v29  ;;  %v33079_v29 = vld [vmem:[%s41723_s1 + $0x3d10] sm:$0xff] }
 0x793   :  { %21402 = vmatpush.bf16.msra.mxu2 %v33064_v22  ;;  %v33095_v22 = vld [vmem:[%s41723_s1 + $0x3d90] sm:$0xff] }
 0x794   :  { %21388 = vmatpush.bf16.msra.mxu1 %v33056_v15  ;;  %v33078_v15 = vld [vmem:[%s41723_s1 + $0x3d08] sm:$0xff] }
 0x795   :  { %21416 = vmatpush.bf16.msra.mxu3 %v33072_v5  ;;  %v33094_v5 = vld [vmem:[%s41723_s1 + $0x3d88] sm:$0xff] }
 0x796   :  { %21375 = vmatpush.bf16.msra.mxu0 %v33047_v55  ;;  %v33116_v55 = vld [vmem:[%s41723_s1 + $0x3e38] sm:$0xff] }
 0x797   :  { %21403 = vmatpush.bf16.msra.mxu2 %v33063_v7  ;;  %v33132_v7 = vld [vmem:[%s41723_s1 + $0x3eb8] sm:$0xff] }
 0x798   :  { %21389 = vmatpush.bf16.msra.mxu1 %v33055_v48  ;;  %v22602_v48 = vld [vmem:[%s41724_s0 + $0x3d8] sm:$0xf] }
 0x799   :  { %21417 = vmatpush.bf16.msra.mxu3 %v33071_v19  ;;  %v31119_v19 = vld [vmem:[%s41724_s0 + $0x7d8] sm:$0x70] }
 0x79a   :  { %21376 = vmatpush.bf16.msra.mxu0 %v33046_v26  ;;  %v33085_v26 = vld [vmem:[%s41723_s1 + $0x3d40] sm:$0xff] }
 0x79b   :  { %21404 = vmatpush.bf16.msra.mxu2 %v33062_v45  ;;  %v33101_v45 = vld [vmem:[%s41723_s1 + $0x3dc0] sm:$0xff] }
 0x79c   :  { %21390 = vmatpush.bf16.msra.mxu1 %v33054_v38  ;;  %v30991_v38 = vld [vmem:[%s41724_s0 + $0x3dc] sm:$0xf] }
 0x79d   :  { %21418 = vmatpush.bf16.msra.mxu3 %v33070_v37  ;;  %v22604_v37 = vld [vmem:[%s41724_s0 + $0x7dc] sm:$0x70] }
 0x79e   :  { %21377 = vmatpush.bf16.msra.mxu0 %v33045_v63  ;;  %v21155_v43 = vpop.f32.mrf.mxu0  ;;  %v22603_v63 = vor.u32 %v31119_v19, %v22602_v48  ;;  %v33146_v48 = vld [vmem:[%s41723_s1 + $0x3f28] sm:$0xff] }
 0x79f   :  { %21405 = vmatpush.bf16.msra.mxu2 %v33061_v32  ;;  %v41356_v1 = vadd.f32 %v21155_v43, %v41255_v12  ;;  %v33093_v12 = vld [vmem:[%s41723_s1 + $0x3d80] sm:$0xff]  ;;  %v33124_v32 = vld [vmem:[%s41723_s1 + $0x3e78] sm:$0xff]  ;;  %v33162_v19 = vld [vmem:[%s41723_s1 + $0x3fa8] sm:$0xff] }
 0x7a0   :  { %21391 = vmatpush.bf16.msra.mxu1 %v33053_v34  ;;  %v33114_v34 = vld [vmem:[%s41723_s1 + $0x3e28] sm:$0xff]  ;;  %v33109_v43 = vld [vmem:[%s41723_s1 + $0x3e00] sm:$0xff] }
 0x7a1   :  { %21419 = vmatpush.bf16.msra.mxu3 %v33069_v20  ;;  %21378 = vmatmul.bf16.vlgmr.msra.gmra.mxu0 %v22579_v50  ;;  %v33130_v20 = vld [vmem:[%s41723_s1 + $0x3ea8] sm:$0xff]  ;;  %v33121_v50 = vld [vmem:[%s41723_s1 + $0x3e60] sm:$0xff] }
 0x7a2   :  { %21426 = vmatpush.bf16.msrb.mxu0 %v33084_v6  ;;  %21406 = vmatmul.bf16.vlgmr.msra.gmra.mxu2 %v22587_v27  ;;  %v22599_v6 = vor.u32 %v30990_v35, %v22596_v21  ;;  %v33137_v27 = vld [vmem:[%s41723_s1 + $0x3ee0] sm:$0xff] }
 0x7a3   :  { %21454 = vmatpush.bf16.msrb.mxu2 %v33100_v31  ;;  %21392 = vmatmul.bf16.vlgmr.msra.gmra.mxu1 %v22583_v49  ;;  %v22607_v31 = vor.u32 %v30991_v38, %v22604_v37  ;;  %v33120_v49 = vld [vmem:[%s41723_s1 + $0x3e58] sm:$0xff]  ;;  %v33145_v35 = vld [vmem:[%s41723_s1 + $0x3f20] sm:$0xff] }
 0x7a4   :  { %21440 = vmatpush.bf16.msrb.mxu1 %v33092_v62  ;;  %21420 = vmatmul.bf16.vlgmr.msra.gmra.mxu3 %v22591_v46  ;;  %v33112_v62 = vld [vmem:[%s41723_s1 + $0x3e18] sm:$0xff]  ;;  %v33161_v21 = vld [vmem:[%s41723_s1 + $0x3fa0] sm:$0xff] }
 0x7a5   :  { %21468 = vmatpush.bf16.msrb.mxu3 %v33108_v36  ;;  %v33128_v36 = vld [vmem:[%s41723_s1 + $0x3e98] sm:$0xff]  ;;  %v33153_v38 = vld [vmem:[%s41723_s1 + $0x3f60] sm:$0xff] }
 0x7a6   :  { %21427 = vmatpush.bf16.msrb.mxu0 %v33083_v53  ;;  %v21157_v24 = vpop.f32.mrf.mxu0  ;;  %v33136_v46 = vld [vmem:[%s41723_s1 + $0x3ed8] sm:$0xff]  ;;  %v33111_v53 = vld [vmem:[%s41723_s1 + $0x3e10] sm:$0xff]  ;;  %v33169_v37 = vld [vmem:[%s41723_s1 + $0x3fe0] sm:$0xff] }
 0x7a7   :  { %21455 = vmatpush.bf16.msrb.mxu2 %v33099_v3  ;;  %v41383_v60 = vadd.f32 %v21157_v24, %v41287_v9  ;;  %v33140_v9 = vld [vmem:[%s41723_s1 + $0x3ef8] sm:$0xff]  ;;  %v33127_v3 = vld [vmem:[%s41723_s1 + $0x3e90] sm:$0xff]  ;;  %v33133_v24 = vld [vmem:[%s41723_s1 + $0x3ec0] sm:$0xff] }
 0x7a8   :  { %21441 = vmatpush.bf16.msrb.mxu1 %v33091_v4  ;;  %v33119_v4 = vld [vmem:[%s41723_s1 + $0x3e50] sm:$0xff] }
 0x7a9   :  { %21469 = vmatpush.bf16.msrb.mxu3 %v33107_v30  ;;  %v33135_v30 = vld [vmem:[%s41723_s1 + $0x3ed0] sm:$0xff] }
 0x7aa   :  { %21428 = vmatpush.bf16.msrb.mxu0 %v33082_v40  ;;  %v33110_v40 = vld [vmem:[%s41723_s1 + $0x3e08] sm:$0xff] }
 0x7ab   :  { %21456 = vmatpush.bf16.msrb.mxu2 %v33098_v13  ;;  %v33126_v13 = vld [vmem:[%s41723_s1 + $0x3e88] sm:$0xff] }
 0x7ac   :  { %21442 = vmatpush.bf16.msrb.mxu1 %v33090_v58  ;;  %v33118_v58 = vld [vmem:[%s41723_s1 + $0x3e48] sm:$0xff] }
 0x7ad   :  { %21470 = vmatpush.bf16.msrb.mxu3 %v33106_v44  ;;  %v33134_v44 = vld [vmem:[%s41723_s1 + $0x3ec8] sm:$0xff] }
 0x7ae   :  { %21429 = vmatpush.bf16.msrb.mxu0 %v33081_v23  ;;  %v33125_v23 = vld [vmem:[%s41723_s1 + $0x3e80] sm:$0xff] }
 0x7af   :  { %21457 = vmatpush.bf16.msrb.mxu2 %v33097_v39  ;;  %v33148_v39 = vld [vmem:[%s41723_s1 + $0x3f38] sm:$0xff] }
 0x7b0   :  { %21443 = vmatpush.bf16.msrb.mxu1 %v33089_v18  ;;  %v33164_v18 = vld [vmem:[%s41723_s1 + $0x3fb8] sm:$0xff] }
 0x7b1   :  { %21471 = vmatpush.bf16.msrb.mxu3 %v33105_v16  ;;  %v22610_v16 = vld [vmem:[%s41724_s0 + $0x3e0] sm:$0xf] }
 0x7b2   :  { %21430 = vmatpush.bf16.msrb.mxu0 %v33080_v8  ;;  %v31120_v8 = vld [vmem:[%s41724_s0 + $0x7e0] sm:$0x70] }
 0x7b3   :  { %21458 = vmatpush.bf16.msrb.mxu2 %v33096_v52  ;;  %v22618_v52 = vld [vmem:[%s41724_s0 + $0x3e8] sm:$0xf] }
 0x7b4   :  { %21444 = vmatpush.bf16.msrb.mxu1 %v33088_v42  ;;  %v31121_v42 = vld [vmem:[%s41724_s0 + $0x7e8] sm:$0x70] }
 0x7b5   :  { %21472 = vmatpush.bf16.msrb.mxu3 %v33104_v25  ;;  %v33117_v25 = vld [vmem:[%s41723_s1 + $0x3e40] sm:$0xff] }
 0x7b6   :  { %21431 = vmatpush.bf16.msrb.mxu0 %v33079_v29  ;;  %v30992_v29 = vld [vmem:[%s41724_s0 + $0x3e4] sm:$0xf] }
 0x7b7   :  { %21459 = vmatpush.bf16.msrb.mxu2 %v33095_v22  ;;  %v22612_v22 = vld [vmem:[%s41724_s0 + $0x7e4] sm:$0x70] }
 0x7b8   :  { %21445 = vmatpush.bf16.msrb.mxu1 %v33087_v57  ;;  %v30993_v57 = vld [vmem:[%s41724_s0 + $0x3ec] sm:$0xf] }
 0x7b9   :  { %21473 = vmatpush.bf16.msrb.mxu3 %v33103_v47  ;;  %v22620_v47 = vld [vmem:[%s41724_s0 + $0x7ec] sm:$0x70] }
 0x7ba   :  { %21432 = vmatpush.bf16.msrb.mxu0 %v33078_v15  ;;  %v22611_v15 = vor.u32 %v31120_v8, %v22610_v16  ;;  %v21169_v16 = vpop.f32.mrf.mxu1  ;;  %v21183_v8 = vpop.f32.mrf.mxu2 }
 0x7bb   :  { %21460 = vmatpush.bf16.msrb.mxu2 %v33094_v5  ;;  %v22619_v5 = vor.u32 %v31121_v42, %v22618_v52  ;;  %v33174_v52 = vld [vmem:[%s41723_s1 + $0x4008] sm:$0xff]  ;;  %v21197_v42 = vpop.f32.mrf.mxu3 }
 0x7bc   :  { %21446 = vmatpush.bf16.msrb.mxu1 %v33086_v41  ;;  %v33156_v41 = vld [vmem:[%s41723_s1 + $0x3f78] sm:$0xff] }
 0x7bd   :  { %21474 = vmatpush.bf16.msrb.mxu3 %v33102_v56  ;;  %v33172_v56 = vld [vmem:[%s41723_s1 + $0x3ff8] sm:$0xff] }
 0x7be   :  { %21433 = vmatpush.bf16.msrb.mxu0 %v33077_v2  ;;  %v22615_v2 = vor.u32 %v30992_v29, %v22612_v22  ;;  %v31124_v29 = vld [vmem:[%s41724_s0 + $0x800] sm:$0x70] }
 0x7bf   :  { %21461 = vmatpush.bf16.msrb.mxu2 %v33093_v12  ;;  %v22623_v12 = vor.u32 %v30993_v57, %v22620_v47 }
 0x7c0   :  { %21447 = vmatpush.bf16.msrb.mxu1 %v33085_v26  ;;  %v33154_v26 = vld [vmem:[%s41723_s1 + $0x3f68] sm:$0xff] }
 0x7c1   :  { %21475 = vmatpush.bf16.msrb.mxu3 %v33101_v45  ;;  %21434 = vmatmul.bf16.vlgmr.msrb.gmra.mxu0 %v22595_v59  ;;  %v33170_v45 = vld [vmem:[%s41723_s1 + $0x3fe8] sm:$0xff]  ;;  %v33144_v59 = vld [vmem:[%s41723_s1 + $0x3f18] sm:$0xff] }
 0x7c2   :  { %21482 = vmatpush.bf16.msra.mxu0 %v33116_v55  ;;  %21462 = vmatmul.bf16.vlgmr.msrb.gmra.mxu2 %v22603_v63  ;;  %v33147_v55 = vld [vmem:[%s41723_s1 + $0x3f30] sm:$0xff]  ;;  %v33160_v63 = vld [vmem:[%s41723_s1 + $0x3f98] sm:$0xff]  ;;  %v21171_v57 = vpop.f32.mrf.mxu1  ;;  %v21185_v47 = vpop.f32.mrf.mxu2 }
 0x7c3   :  { %21510 = vmatpush.bf16.msra.mxu2 %v33132_v7  ;;  %21448 = vmatmul.bf16.vlgmr.msrb.gmra.mxu1 %v22599_v6  ;;  %v33163_v7 = vld [vmem:[%s41723_s1 + $0x3fb0] sm:$0xff] }
 0x7c4   :  { %21496 = vmatpush.bf16.msra.mxu1 %v33124_v32  ;;  %21476 = vmatmul.bf16.vlgmr.msrb.gmra.mxu3 %v22607_v31  ;;  %v33152_v32 = vld [vmem:[%s41723_s1 + $0x3f58] sm:$0xff]  ;;  %v33143_v6 = vld [vmem:[%s41723_s1 + $0x3f10] sm:$0xff] }
 0x7c5   :  { %21524 = vmatpush.bf16.msra.mxu3 %v33140_v9  ;;  %v33168_v9 = vld [vmem:[%s41723_s1 + $0x3fd8] sm:$0xff]  ;;  %v33159_v31 = vld [vmem:[%s41723_s1 + $0x3f90] sm:$0xff] }
 0x7c6   :  { %21483 = vmatpush.bf16.msra.mxu0 %v33115_v51  ;;  %v33151_v51 = vld [vmem:[%s41723_s1 + $0x3f50] sm:$0xff] }
 0x7c7   :  { %21511 = vmatpush.bf16.msra.mxu2 %v33131_v33  ;;  %v33167_v33 = vld [vmem:[%s41723_s1 + $0x3fd0] sm:$0xff] }
 0x7c8   :  { %21497 = vmatpush.bf16.msra.mxu1 %v33123_v17  ;;  %v33142_v17 = vld [vmem:[%s41723_s1 + $0x3f08] sm:$0xff] }
 0x7c9   :  { %21525 = vmatpush.bf16.msra.mxu3 %v33139_v54  ;;  %v33158_v54 = vld [vmem:[%s41723_s1 + $0x3f88] sm:$0xff] }
 0x7ca   :  { %21484 = vmatpush.bf16.msra.mxu0 %v33114_v34  ;;  %v33150_v34 = vld [vmem:[%s41723_s1 + $0x3f48] sm:$0xff] }
 0x7cb   :  { %21512 = vmatpush.bf16.msra.mxu2 %v33130_v20  ;;  %v33166_v20 = vld [vmem:[%s41723_s1 + $0x3fc8] sm:$0xff] }
 0x7cc   :  { %21498 = vmatpush.bf16.msra.mxu1 %v33122_v28  ;;  %v33141_v28 = vld [vmem:[%s41723_s1 + $0x3f00] sm:$0xff] }
 0x7cd   :  { %21526 = vmatpush.bf16.msra.mxu3 %v33138_v61  ;;  %v33157_v61 = vld [vmem:[%s41723_s1 + $0x3f80] sm:$0xff] }
 0x7ce   :  { %21485 = vmatpush.bf16.msra.mxu0 %v33113_v14  ;;  %v33180_v14 = vld [vmem:[%s41723_s1 + $0x4038] sm:$0xff] }
 0x7cf   :  { %21513 = vmatpush.bf16.msra.mxu2 %v33129_v0  ;;  %v22626_v0 = vld [vmem:[%s41724_s0 + $0x3f0] sm:$0xf] }
 0x7d0   :  { %21499 = vmatpush.bf16.msra.mxu1 %v33121_v50  ;;  %v31122_v50 = vld [vmem:[%s41724_s0 + $0x7f0] sm:$0x70] }
 0x7d1   :  { %21527 = vmatpush.bf16.msra.mxu3 %v33137_v27  ;;  %v22634_v27 = vld [vmem:[%s41724_s0 + $0x3f8] sm:$0xf] }
 0x7d2   :  { %21486 = vmatpush.bf16.msra.mxu0 %v33112_v62  ;;  %v31123_v62 = vld [vmem:[%s41724_s0 + $0x7f8] sm:$0x70] }
 0x7d3   :  { %21514 = vmatpush.bf16.msra.mxu2 %v33128_v36  ;;  %v33149_v36 = vld [vmem:[%s41723_s1 + $0x3f40] sm:$0xff] }
 0x7d4   :  { %21500 = vmatpush.bf16.msra.mxu1 %v33120_v49  ;;  %v33165_v49 = vld [vmem:[%s41723_s1 + $0x3fc0] sm:$0xff] }
 0x7d5   :  { %21528 = vmatpush.bf16.msra.mxu3 %v33136_v46  ;;  %v30994_v46 = vld [vmem:[%s41724_s0 + $0x3f4] sm:$0xf] }
 0x7d6   :  { %21487 = vmatpush.bf16.msra.mxu0 %v33111_v53  ;;  %v22628_v53 = vld [vmem:[%s41724_s0 + $0x7f4] sm:$0x70] }
 0x7d7   :  { %21515 = vmatpush.bf16.msra.mxu2 %v33127_v3  ;;  %v30995_v3 = vld [vmem:[%s41724_s0 + $0x3fc] sm:$0xf] }
 0x7d8   :  { %21501 = vmatpush.bf16.msra.mxu1 %v33119_v4  ;;  %v22636_v4 = vld [vmem:[%s41724_s0 + $0x7fc] sm:$0x70] }
 0x7d9   :  { %21529 = vmatpush.bf16.msra.mxu3 %v33135_v30  ;;  %v22627_v30 = vor.u32 %v31122_v50, %v22626_v0 }
 0x7da   :  { %21488 = vmatpush.bf16.msra.mxu0 %v33110_v40  ;;  %v22635_v40 = vor.u32 %v31123_v62, %v22634_v27 }
 0x7db   :  { %21516 = vmatpush.bf16.msra.mxu2 %v33126_v13  ;;  %v22631_v13 = vor.u32 %v30994_v46, %v22628_v53 }
 0x7dc   :  { %21502 = vmatpush.bf16.msra.mxu1 %v33118_v58  ;;  %v22639_v58 = vor.u32 %v30995_v3, %v22636_v4 }
 0x7dd   :  { %21530 = vmatpush.bf16.msra.mxu3 %v33134_v44  ;;  %v33179_v44 = vld [vmem:[%s41723_s1 + $0x4030] sm:$0xff] }
 0x7de   :  { %21489 = vmatpush.bf16.msra.mxu0 %v33109_v43  ;;  %v33178_v43 = vld [vmem:[%s41723_s1 + $0x4028] sm:$0xff] }
 0x7df   :  { %21517 = vmatpush.bf16.msra.mxu2 %v33125_v23  ;;  %v33177_v23 = vld [vmem:[%s41723_s1 + $0x4020] sm:$0xff] }
 0x7e0   :  { %21503 = vmatpush.bf16.msra.mxu1 %v33117_v25  ;;  %v33173_v25 = vld [vmem:[%s41723_s1 + $0x4000] sm:$0xff] }
 0x7e1   :  { %21531 = vmatpush.bf16.msra.mxu3 %v33133_v24  ;;  %21490 = vmatmul.bf16.vlgmr.msra.gmra.mxu0 %v22611_v15  ;;  %v22642_v24 = vld [vmem:[%s41724_s0 + $0x400] sm:$0xf]  ;;  %v21211_v15 = vpop.f32.mrf.mxu0 }
 0x7e2   :  { %21538 = vmatpush.bf16.msrb.mxu0 %v33148_v39  ;;  %21518 = vmatmul.bf16.vlgmr.msra.gmra.mxu2 %v22619_v5  ;;  %v33176_v39 = vld [vmem:[%s41723_s1 + $0x4018] sm:$0xff]  ;;  %v22643_v22 = vor.u32 %v31124_v29, %v22642_v24  ;;  %v21199_v5 = vpop.f32.mrf.mxu3 }
 0x7e3   :  { %21566 = vmatpush.bf16.msrb.mxu2 %v33164_v18  ;;  %21504 = vmatmul.bf16.vlgmr.msra.gmra.mxu1 %v22615_v2  ;;  %v33175_v18 = vld [vmem:[%s41723_s1 + $0x4010] sm:$0xff] }
 0x7e4   :  { %21552 = vmatpush.bf16.msrb.mxu1 %v33156_v41  ;;  %21532 = vmatmul.bf16.vlgmr.msra.gmra.mxu3 %v22623_v12  ;;  %v21225_v41 = vpop.f32.mrf.mxu1 }
 0x7e5   :  { %21580 = vmatpush.bf16.msrb.mxu3 %v33172_v56  ;;  %v21239_v56 = vpop.f32.mrf.mxu2 }
 0x7e6   :  { %21539 = vmatpush.bf16.msrb.mxu0 %v33147_v55 }
 0x7e7   :  { %21567 = vmatpush.bf16.msrb.mxu2 %v33163_v7 }
 0x7e8   :  { %21553 = vmatpush.bf16.msrb.mxu1 %v33155_v11 }
 0x7e9   :  { %21581 = vmatpush.bf16.msrb.mxu3 %v33171_v10  ;;  %v21213_v2 = vpop.f32.mrf.mxu0 }
 0x7ea   :  { %21540 = vmatpush.bf16.msrb.mxu0 %v33146_v48  ;;  %v21253_v12 = vpop.f32.mrf.mxu3 }
 0x7eb   :  { %21568 = vmatpush.bf16.msrb.mxu2 %v33162_v19 }
 0x7ec   :  { %21554 = vmatpush.bf16.msrb.mxu1 %v33154_v26  ;;  %v21227_v55 = vpop.f32.mrf.mxu1 }
 0x7ed   :  { %21582 = vmatpush.bf16.msrb.mxu3 %v33170_v45  ;;  %v21241_v7 = vpop.f32.mrf.mxu2 }
 0x7ee   :  { %21541 = vmatpush.bf16.msrb.mxu0 %v33145_v35 }
 0x7ef   :  { %21569 = vmatpush.bf16.msrb.mxu2 %v33161_v21  ;;  %v21170_v21 = vadd.f32 %v21169_v16, %v41356_v1 }
 0x7f0   :  { %21555 = vmatpush.bf16.msrb.mxu1 %v33153_v38 }
 0x7f1   :  { %21583 = vmatpush.bf16.msrb.mxu3 %v33169_v37  ;;  %v21267_v11 = vpop.f32.mrf.mxu0 }
 0x7f2   :  { %21542 = vmatpush.bf16.msrb.mxu0 %v33144_v59  ;;  %v21255_v10 = vpop.f32.mrf.mxu3  ;;  %v21184_v59 = vadd.f32 %v21183_v8, %v21170_v21 }
 0x7f3   :  { %21570 = vmatpush.bf16.msrb.mxu2 %v33160_v63 }
 0x7f4   :  { %21556 = vmatpush.bf16.msrb.mxu1 %v33152_v32  ;;  %v21281_v48 = vpop.f32.mrf.mxu1  ;;  %v21198_v32 = vadd.f32 %v21197_v42, %v21184_v59 }
 0x7f5   :  { %21584 = vmatpush.bf16.msrb.mxu3 %v33168_v9  ;;  %v21295_v19 = vpop.f32.mrf.mxu2 }
 0x7f6   :  { %21543 = vmatpush.bf16.msrb.mxu0 %v33143_v6  ;;  %v21172_v6 = vadd.f32 %v21171_v57, %v41383_v60 }
 0x7f7   :  { %21571 = vmatpush.bf16.msrb.mxu2 %v33159_v31  ;;  %v21212_v31 = vadd.f32 %v21211_v15, %v21198_v32 }
 0x7f8   :  { %21557 = vmatpush.bf16.msrb.mxu1 %v33151_v51 }
 0x7f9   :  { %21585 = vmatpush.bf16.msrb.mxu3 %v33167_v33  ;;  %v21269_v26 = vpop.f32.mrf.mxu0  ;;  %v21186_v33 = vadd.f32 %v21185_v47, %v21172_v6 }
 0x7fa   :  { %21544 = vmatpush.bf16.msrb.mxu0 %v33142_v17  ;;  %v21309_v45 = vpop.f32.mrf.mxu3 }
 0x7fb   :  { %21572 = vmatpush.bf16.msrb.mxu2 %v33158_v54  ;;  %v21226_v54 = vadd.f32 %v21225_v41, %v21212_v31 }
 0x7fc   :  { %21558 = vmatpush.bf16.msrb.mxu1 %v33150_v34  ;;  %v21283_v35 = vpop.f32.mrf.mxu1 }
 0x7fd   :  { %21586 = vmatpush.bf16.msrb.mxu3 %v33166_v20  ;;  %v21297_v38 = vpop.f32.mrf.mxu2  ;;  %v21200_v20 = vadd.f32 %v21199_v5, %v21186_v33 }
 0x7fe   :  { %21545 = vmatpush.bf16.msrb.mxu0 %v33141_v28  ;;  %v21240_v28 = vadd.f32 %v21239_v56, %v21226_v54 }
 0x7ff   :  { %21573 = vmatpush.bf16.msrb.mxu2 %v33157_v61  ;;  %v21214_v61 = vadd.f32 %v21213_v2, %v21200_v20 }
 0x800   :  { %21559 = vmatpush.bf16.msrb.mxu1 %v33149_v36  ;;  %v21254_v0 = vadd.f32 %v21253_v12, %v21240_v28 }
 0x801   :  { %21587 = vmatpush.bf16.msrb.mxu3 %v33165_v49  ;;  %21546 = vmatmul.bf16.vlgmr.msrb.gmra.mxu0 %v22627_v30  ;;  %v21323_v37 = vpop.f32.mrf.mxu0  ;;  %v21228_v27 = vadd.f32 %v21227_v55, %v21214_v61 }
 0x802   :  { %21594 = vmatpush.bf16.msra.mxu0 %v33180_v14  ;;  %21574 = vmatmul.bf16.vlgmr.msrb.gmra.mxu2 %v22635_v40  ;;  %v21311_v63 = vpop.f32.mrf.mxu3  ;;  %v21268_v62 = vadd.f32 %v21267_v11, %v21254_v0 }
 0x803   :  { %21560 = vmatmul.bf16.vlgmr.msrb.gmra.mxu1 %v22631_v13  ;;  %v21242_v36 = vadd.f32 %v21241_v7, %v21228_v27 }
 0x804   :  { %21588 = vmatmul.bf16.vlgmr.msrb.gmra.mxu3 %v22639_v58  ;;  %v21337_v9 = vpop.f32.mrf.mxu1  ;;  %v21282_v46 = vadd.f32 %v21281_v48, %v21268_v62 }
 0x805   :  { %v21351_v51 = vpop.f32.mrf.mxu2  ;;  %v21256_v60 = vadd.f32 %v21255_v10, %v21242_v36 }
 0x806   :  { %21595 = vmatpush.bf16.msra.mxu0 %v33179_v44  ;;  %v21296_v3 = vadd.f32 %v21295_v19, %v21282_v46 }
 0x807   :  { %v21270_v30 = vadd.f32 %v21269_v26, %v21256_v60 }
 0x808   :  { %v21310_v13 = vadd.f32 %v21309_v45, %v21296_v3 }
 0x809   :  { %v21325_v17 = vpop.f32.mrf.mxu0  ;;  %v21284_v44 = vadd.f32 %v21283_v35, %v21270_v30 }
 0x80a   :  { %21596 = vmatpush.bf16.msra.mxu0 %v33178_v43  ;;  %v21365_v34 = vpop.f32.mrf.mxu3  ;;  %v21324_v43 = vadd.f32 %v21323_v37, %v21310_v13 }
 0x80c   :  { %v21339_v14 = vpop.f32.mrf.mxu1 }
 0x80d   :  { %v21353_v1 = vpop.f32.mrf.mxu2 }
 0x80e   :  { %21597 = vmatpush.bf16.msra.mxu0 %v33177_v23  ;;  %v21298_v23 = vadd.f32 %v21297_v38, %v21284_v44 }
 0x812   :  { %21598 = vmatpush.bf16.msra.mxu0 %v33176_v39  ;;  %v21367_v49 = vpop.f32.mrf.mxu3 }
 0x816   :  { %21599 = vmatpush.bf16.msra.mxu0 %v33175_v18  ;;  %v21338_v18 = vadd.f32 %v21337_v9, %v21324_v43 }
 0x818   :  { %v21352_v42 = vadd.f32 %v21351_v51, %v21338_v18 }
 0x81a   :  { %21600 = vmatpush.bf16.msra.mxu0 %v33174_v52  ;;  %v21312_v52 = vadd.f32 %v21311_v63, %v21298_v23  ;;  %v21366_v29 = vadd.f32 %v21365_v34, %v21352_v42 }
 0x81e   :  { %21601 = vmatpush.bf16.msra.mxu0 %v33173_v25  ;;  %v21379_v50 = vpop.f32.mrf.mxu0  ;;  %v21326_v25 = vadd.f32 %v21325_v17, %v21312_v52 }
 0x81f   :  { %v21380_v47 = vadd.f32 %v21379_v50, %v21366_v29 }
 0x820   :  { %v21393_v53 = vpop.f32.mrf.mxu1  ;;  %v21340_v57 = vadd.f32 %v21339_v14, %v21326_v25 }
 0x821   :  { %21602 = vmatmul.bf16.vlgmr.msra.gmra.mxu0 %v22643_v22  ;;  %v21394_v56 = vadd.f32 %v21393_v53, %v21380_v47 }
 0x822   :  { %v21354_v5 = vadd.f32 %v21353_v1, %v21340_v57 }
 0x824   :  { %v21368_v12 = vadd.f32 %v21367_v49, %v21354_v5 }
 0x825   :  { %v21407_v4 = vpop.f32.mrf.mxu2 }
 0x826   :  { %v21381_v40 = vpop.f32.mrf.mxu0  ;;  %v21408_v55 = vadd.f32 %v21407_v4, %v21394_v56 }
 0x827   :  { %v21421_v58 = vpop.f32.mrf.mxu3  ;;  %v21382_v7 = vadd.f32 %v21381_v40, %v21368_v12 }
 0x828   :  { %v21395_v39 = vpop.f32.mrf.mxu1  ;;  %v21422_v10 = vadd.f32 %v21421_v58, %v21408_v55 }
 0x829   :  { %v21396_v26 = vadd.f32 %v21395_v39, %v21382_v7 }
 0x82d   :  { %v21409_v16 = vpop.f32.mrf.mxu2 }
 0x82e   :  { %v21410_v35 = vadd.f32 %v21409_v16, %v21396_v26 }
 0x82f   :  { %v21423_v24 = vpop.f32.mrf.mxu3 }
 0x830   :  { %v21424_v59 = vadd.f32 %v21423_v24, %v21410_v35 }
 0x83e   :  { %v21435_v8 = vpop.f32.mrf.mxu0 }
 0x83f   :  { %v21436_v45 = vadd.f32 %v21435_v8, %v21422_v10 }
 0x840   :  { %v21449_v22 = vpop.f32.mrf.mxu1 }
 0x841   :  { %v21450_v38 = vadd.f32 %v21449_v22, %v21436_v45 }
 0x845   :  { %v21463_v15 = vpop.f32.mrf.mxu2 }
 0x846   :  { %v21437_v41 = vpop.f32.mrf.mxu0  ;;  %v21464_v63 = vadd.f32 %v21463_v15, %v21450_v38 }
 0x847   :  { %v21477_v2 = vpop.f32.mrf.mxu3  ;;  %v21438_v9 = vadd.f32 %v21437_v41, %v21424_v59 }
 0x848   :  { %v21451_v11 = vpop.f32.mrf.mxu1  ;;  %v21478_v31 = vadd.f32 %v21477_v2, %v21464_v63 }
 0x849   :  { %v21452_v33 = vadd.f32 %v21451_v11, %v21438_v9 }
 0x84d   :  { %v21465_v48 = vpop.f32.mrf.mxu2 }
 0x84e   :  { %v21466_v54 = vadd.f32 %v21465_v48, %v21452_v33 }
 0x84f   :  { %v21479_v21 = vpop.f32.mrf.mxu3 }
 0x850   :  { %v21480_v14 = vadd.f32 %v21479_v21, %v21466_v54 }
 0x85e   :  { %v21491_v19 = vpop.f32.mrf.mxu0 }
 0x85f   :  { %v21492_v17 = vadd.f32 %v21491_v19, %v21478_v31 }
 0x860   :  { %v21505_v37 = vpop.f32.mrf.mxu1 }
 0x861   :  { %v21506_v20 = vadd.f32 %v21505_v37, %v21492_v17 }
 0x865   :  { %v21519_v32 = vpop.f32.mrf.mxu2 }
 0x866   :  { %v21493_v6 = vpop.f32.mrf.mxu0  ;;  %v21520_v0 = vadd.f32 %v21519_v32, %v21506_v20 }
 0x867   :  { %v21533_v51 = vpop.f32.mrf.mxu3  ;;  %v21494_v1 = vadd.f32 %v21493_v6, %v21480_v14 }
 0x868   :  { %v21507_v34 = vpop.f32.mrf.mxu1  ;;  %v21534_v27 = vadd.f32 %v21533_v51, %v21520_v0 }
 0x869   :  { %v21508_v36 = vadd.f32 %v21507_v34, %v21494_v1 }
 0x86d   :  { %v21521_v28 = vpop.f32.mrf.mxu2 }
 0x86e   :  { %v21522_v53 = vadd.f32 %v21521_v28, %v21508_v36 }
 0x86f   :  { %v21535_v50 = vpop.f32.mrf.mxu3 }
 0x870   :  { %v21536_v30 = vadd.f32 %v21535_v50, %v21522_v53 }
 0x87e   :  { %v21547_v61 = vpop.f32.mrf.mxu0 }
 0x87f   :  { %v21548_v49 = vadd.f32 %v21547_v61, %v21534_v27 }
 0x880   :  { %v21561_v62 = vpop.f32.mrf.mxu1 }
 0x881   :  { %v21562_v3 = vadd.f32 %v21561_v62, %v21548_v49 }
 0x885   :  { %v21575_v46 = vpop.f32.mrf.mxu2 }
 0x886   :  { %v21549_v60 = vpop.f32.mrf.mxu0  ;;  %v21576_v40 = vadd.f32 %v21575_v46, %v21562_v3 }
 0x887   :  { %v21589_v4 = vpop.f32.mrf.mxu3  ;;  %v21550_v13 = vadd.f32 %v21549_v60, %v21536_v30 }
 0x888   :  { %v21563_v58 = vpop.f32.mrf.mxu1  ;;  %v21590_v44 = vadd.f32 %v21589_v4, %v21576_v40 }
 0x889   :  { %v21564_v39 = vadd.f32 %v21563_v58, %v21550_v13 }
 0x88d   :  { %v21577_v43 = vpop.f32.mrf.mxu2 }
 0x88e   :  { %v21578_v16 = vadd.f32 %v21577_v43, %v21564_v39 }
 0x88f   :  { %v21591_v8 = vpop.f32.mrf.mxu3 }
 0x890   :  { %v21592_v52 = vadd.f32 %v21591_v8, %v21578_v16 }
 0x89e   :  { %v21603_v23 = vpop.f32.mrf.mxu0 }
 0x89f   :  { %v21604_v18 = vadd.f32 %v21603_v23, %v21590_v44 }
 0x8a1   :  { %21609 = vst.msk [vmem:[%s41726_s3] sm:$0xff] %vm21608_vm0, %v21604_v18 }
 0x8a6   :  { %v21605_v42 = vpop.f32.mrf.mxu0 }
 0x8a7   :  { %v21606_v25 = vadd.f32 %v21605_v42, %v21592_v52 }
 0x8a9   :  { %21611 = vst.msk [vmem:[%s41726_s3 + $0x8] sm:$0x3f] %vm21610_vm1, %v21606_v25 }

</bundles_post_ra>
